<compile_context>
chip_gen: v7x
topology: tpu7x:2x2x1
jax: 0.10.0
libtpu: 0.0.40
codegen_flags: <defaults>
</compile_context>

<pallas_src>
import jax
import jax.numpy as jnp
from jax import lax
from jax.experimental import pallas as pl
from jax.experimental.pallas import tpu as pltpu

# ---- hyperparams taken from MyNeuralNetwork.__init__ ----
SOM_H, SOM_W, SOM_C, SOM_KH, SOM_KW = 16, 16, 3, 3, 3
N_CELLS = SOM_H * SOM_W                  # 256
PATCH = SOM_C * SOM_KH * SOM_KW          # 27 (flatten order = (C, KH, KW), like torch)
K_PAD = 32                               # patch dim padded to 32 (bf16 sublane friendly)
LANE_CHUNK = 128                         # in-kernel column chunk: (256,128) f32 score = 32 vregs

FC_DIMS = [2 * 30 * 30, 1000, 500, 200, 10]     # logical torch dims
PAD_DIMS = [1920, 1024, 512, 256, 10]            # lane-padded dims used on-device
K1_PAD, H1, H2, H3, NOUT = PAD_DIMS
TK = 384                                 # fc1 K-chunk used only for large batches


# ---------------------------------------------------------------------------
# Kernel 1: SOM winner search.
# torch ranks cells by sqrt(mean((p - s)^2)); argmin is unchanged by sqrt/mean/||p||^2, so we
# rank by score = p.s - 0.5*||s||^2 and take the FIRST maximum (== torch first-minimum rule).
# score is computed transposed, (256 cells, columns = patches), so the winner index per patch
# comes out as a lane-dense (1, tm) int32 row.
# ---------------------------------------------------------------------------
def som_argmax_kernel(pT_ref, som_ref, sq_ref, idx_ref):
    som_t = som_ref[...]                                             # (256, 32) bf16, resident
    half_sq = sq_ref[...]                                            # (256, 1)  f32,  resident
    ids = lax.broadcasted_iota(jnp.int32, (N_CELLS, LANE_CHUNK), 0)  # cell id = m*16 + n
    n_chunks = pT_ref.shape[1] // LANE_CHUNK
    for c in range(n_chunks):                                        # vreg-resident chunks
        lo = c * LANE_CHUNK
        score = jnp.dot(som_t, pT_ref[:, lo:lo + LANE_CHUNK],
                        preferred_element_type=jnp.float32) - half_sq    # (256, 128) f32
        best = jnp.max(score, axis=0, keepdims=True)                     # (1, 128)
        idx_ref[:, lo:lo + LANE_CHUNK] = jnp.min(                        # first arg-best
            jnp.where(score == best, ids, N_CELLS), axis=0, keepdims=True)


def som_winner_indices(x, som, *, max_tm=2048):
    """Winner cell index per 3x3 patch. x: (B, C, H, W) NCHW. Returns (B, OJ, OK) int32."""
    B, C, H, W = x.shape
    oj, ok = H - SOM_KH + 1, W - SOM_KW + 1                          # 30, 30
    n_rows = B * oj * ok

    # TODO(synk): the transposed im2col below is an XLA pre-pass that materializes ~9x the image
    # bytes in HBM; it could be fused into the kernel (per-batch image DMA) for very large B.
    xb = x.astype(jnp.bfloat16)                                      # halves pre-pass + DMA bytes
    slabs = [xb[:, c, j:j + oj, k:k + ok]                            # row t = c*9 + jj*3 + kk
             for c in range(SOM_C) for j in range(SOM_KH) for k in range(SOM_KW)]
    pT = jnp.stack(slabs, axis=0).reshape(PATCH, n_rows)             # (27, B*900), column = b*900+r*30+s

    # Tile so the "parallel" grid has >= 4 tiles (v7x megacore + pipelining), lane aligned, capped.
    tm = max(2 * LANE_CHUNK,
             min(max_tm, pl.cdiv(pl.cdiv(n_rows, 4), LANE_CHUNK) * LANE_CHUNK))
    n_pad = pl.cdiv(n_rows, tm) * tm
    pT = jnp.pad(pT, ((0, K_PAD - PATCH), (0, n_pad - n_rows)))      # (32, n_pad) bf16

    som_flat = som.reshape(N_CELLS, PATCH)                           # row = m*16 + n (f32)
    som_bf = jnp.pad(som_flat.astype(jnp.bfloat16), ((0, 0), (0, K_PAD - PATCH)))   # (256, 32)
    half_sq = 0.5 * jnp.sum(som_flat * som_flat, axis=1, keepdims=True)             # (256, 1) f32

    idx = pl.pallas_call(
        som_argmax_kernel,
        out_shape=jax.ShapeDtypeStruct((1, n_pad), jnp.int32),
        grid_spec=pltpu.PrefetchScalarGridSpec(
            num_scalar_prefetch=0,
            grid=(n_pad // tm,),
            in_specs=[pl.BlockSpec((K_PAD, tm), lambda i: (0, i)),        # streamed bf16 patches
                      pl.BlockSpec((N_CELLS, K_PAD), lambda i: (0, 0)),   # resident bf16 SOM table
                      pl.BlockSpec((N_CELLS, 1), lambda i: (0, 0))],      # resident f32 0.5*||s||^2
            out_specs=pl.BlockSpec((1, tm), lambda i: (0, i))),           # lane-dense indices
        compiler_params=pltpu.CompilerParams(
            dimension_semantics=("parallel",),                            # tiles independent (megacore)
            vmem_limit_bytes=32 << 20),
    )(pT, som_bf, half_sq)

    return idx[0, :n_rows].reshape(B, oj, ok)


# ---------------------------------------------------------------------------
# Kernel 2: fc1..fc4 + ReLU + log_softmax on a (batch-tile, fc1-K) grid.
# fc1 partial sums accumulate into a VMEM f32 scratch; fc2..fc4 + log_softmax run in the last
# K step. Weights are bf16 (lane-padded), accumulation/elementwise in f32. Dropout = identity.
# ---------------------------------------------------------------------------
def mlp_kernel(x_ref, w1_ref, b1_ref, w2_ref, b2_ref, w3_ref, b3_ref,
               w4_ref, b4_ref, out_ref, acc_ref):
    k = pl.program_id(1)

    @pl.when(k == 0)
    def _():
        acc_ref[...] = jnp.zeros_like(acc_ref)

    acc_ref[...] += jnp.dot(x_ref[...], w1_ref[...],
                            preferred_element_type=jnp.float32)          # fc1 partial sum

    @pl.when(k == pl.num_programs(1) - 1)
    def _():
        def dense(h, w_ref, b_ref):
            return jnp.dot(h.astype(w_ref.dtype), w_ref[...],
                           preferred_element_type=jnp.float32) + b_ref[...]

        h = jnp.maximum(acc_ref[...] + b1_ref[...], 0.0)                 # fc1 + relu (+dropout=id)
        h = jnp.maximum(dense(h, w2_ref, b2_ref), 0.0)                   # fc2 + relu
        h = jnp.maximum(dense(h, w3_ref, b3_ref), 0.0)                   # fc3 + relu
        logits = dense(h, w4_ref, b4_ref)                                # fc4 -> (tb, 10)
        z = logits - jnp.max(logits, axis=-1, keepdims=True)
        out_ref[...] = z - jnp.log(jnp.sum(jnp.exp(z), axis=-1, keepdims=True))  # log_softmax


def _padded(a, rows, cols, dtype=None):
    if dtype is not None and a.dtype != dtype:
        a = a.astype(dtype)
    pr, pc = rows - a.shape[0], cols - a.shape[1]
    if pr or pc:
        a = jnp.pad(a, ((0, pr), (0, pc)))
    return a


def mlp_forward(feats, params):
    B = feats.shape[0]
    (w1, b1), (w2, b2), (w3, b3), (w4, b4) = params

    # Lane-pad weights/biases (zeros are inert through matmul + bias + ReLU).
    w1 = _padded(w1, K1_PAD, H1, jnp.bfloat16); b1 = _padded(b1, 1, H1)
    w2 = _padded(w2, H1, H2, jnp.bfloat16);     b2 = _padded(b2, 1, H2)
    w3 = _padded(w3, H2, H3, jnp.bfloat16);     b3 = _padded(b3, 1, H3)
    w4 = _padded(w4, H3, NOUT, jnp.bfloat16);   b4 = _padded(b4, 1, NOUT)

    x = feats.astype(jnp.bfloat16)                   # r/c features are multiples of 1/16 -> exact
    if x.shape[1] != K1_PAD:
        x = jnp.pad(x, ((0, 0), (0, K1_PAD - x.shape[1])))

    # Batch tiling: one tile for small B; 256-row "parallel" tiles for large B (v7x megacore).
    if B <= 256:
        tb, nb = B, 1
    else:
        tb = 256
        nb = pl.cdiv(B, tb)
    B_pad = tb * nb
    if B_pad != B:
        x = jnp.pad(x, ((0, B_pad - B), (0, 0)))     # padded rows sliced off after the call

    # fc1 K tiling: single step for small B (chunk DMA would not be covered by MXU work);
    # stream 384-wide chunks only when the per-chunk compute is large enough to overlap.
    tk = K1_PAD if B <= 256 else TK
    nk = K1_PAD // tk

    out = pl.pallas_call(
        mlp_kernel,
        out_shape=jax.ShapeDtypeStruct((B_pad, NOUT), jnp.float32),
        grid_spec=pltpu.PrefetchScalarGridSpec(
            num_scalar_prefetch=0,
            grid=(nb, nk),
            in_specs=[pl.BlockSpec((tb, tk), lambda b, k: (b, k)),        # feats tile
                      pl.BlockSpec((tk, H1), lambda b, k: (k, 0)),        # fc1 weight (streamed)
                      pl.BlockSpec((1, H1), lambda b, k: (0, 0)),         # b1
                      pl.BlockSpec((H1, H2), lambda b, k: (0, 0)),        # fc2 (resident)
                      pl.BlockSpec((1, H2), lambda b, k: (0, 0)),
                      pl.BlockSpec((H2, H3), lambda b, k: (0, 0)),        # fc3 (resident)
                      pl.BlockSpec((1, H3), lambda b, k: (0, 0)),
                      pl.BlockSpec((H3, NOUT), lambda b, k: (0, 0)),      # fc4 (resident)
                      pl.BlockSpec((1, NOUT), lambda b, k: (0, 0))],
            out_specs=pl.BlockSpec((tb, NOUT), lambda b, k: (b, 0)),
            scratch_shapes=[pltpu.VMEM((tb, H1), jnp.float32)]),
        compiler_params=pltpu.CompilerParams(
            dimension_semantics=("parallel", "arbitrary"),   # batch tiles independent, K is a reduction
            vmem_limit_bytes=32 << 20),                      # valid on v5e/v6e/v7x
    )(x, w1, b1, w2, b2, w3, b3, w4, b4)

    return out[:B] if B_pad != B else out


# ---------------------------------------------------------------------------
# Full forward pass of MyNeuralNetwork
# ---------------------------------------------------------------------------
@jax.jit
def my_neural_network_forward(x, som, params):
    B = x.shape[0]
    idx = som_winner_indices(x, som)                         # som1(x, stride=1) winner indices
    r = (idx // SOM_W).astype(jnp.float32) * (1.0 / SOM_H)   # winner_r / som.shape[0]
    c = (idx % SOM_W).astype(jnp.float32) * (1.0 / SOM_W)    # winner_c / som.shape[1]
    feats = jnp.stack([r, c], axis=1)                        # (B, 2, 30, 30)
    feats = feats.reshape(B, -1)                             # x.view(batchsize, -1) -> (B, 1800)
    return mlp_forward(feats, params)                        # (B, 10) log-probabilities


def init_params(key):
    """Deterministic nn.Linear-style init; weights stored lane-padded (in, out) bf16, biases f32."""
    params = []
    for li in range(4):
        din, dout = FC_DIMS[li], FC_DIMS[li + 1]
        dinp, doutp = PAD_DIMS[li], PAD_DIMS[li + 1]
        key, kw, kb = jax.random.split(key, 3)
        bound = 1.0 / float(din) ** 0.5
        w = jax.random.uniform(kw, (din, dout), jnp.float32, -bound, bound).astype(jnp.bfloat16)
        b = jax.random.uniform(kb, (1, dout), jnp.float32, -bound, bound)
        w = jnp.pad(w, ((0, dinp - din), (0, doutp - dout)))
        b = jnp.pad(b, ((0, 0), (0, doutp - dout)))
        params.append((w, b))
    return params


if __name__ == "__main__":
    key = jax.random.PRNGKey(0)
    kx, kp = jax.random.split(key)

    # fc1 = Linear(2*30*30, 1000) with 3x3 windows, stride 1  =>  input is (B, 3, 32, 32)
    x = jax.random.uniform(kx, (2, 3, 32, 32), dtype=jnp.float32)
    # SOMLayer.__init__: som = ones((16,16,3,3,3)) * 0.5  (all-equal cells -> winner idx 0)
    som = jnp.full((SOM_H, SOM_W, SOM_C, SOM_KH, SOM_KW), 0.5, dtype=jnp.float32)
    params = init_params(kp)

    out = my_neural_network_forward(x, som, params)
    out = jax.block_until_ready(out)
    assert out.shape == (2, 10) and out.dtype == jnp.float32
    # TODO(synk): nn.Dropout(p=0.3) is implemented as eval-mode identity (no RNG mask).
    print("KERNEL_OK")
</pallas_src>

<mosaic_0001>
module attributes {stable_mosaic.version = 11 : i64} {
  func.func @som_argmax_kernel(%arg0: i32, %arg1: memref<32x512xbf16, #tpu.memory_space<vmem>>, %arg2: memref<256x32xbf16, #tpu.memory_space<vmem>>, %arg3: memref<256x1xf32, #tpu.memory_space<vmem>>, %arg4: memref<1x512xi32, #tpu.memory_space<vmem>>) attributes {dimension_semantics = [#tpu.dimension_semantics<parallel>], iteration_bounds = array<i64: 4>, scalar_prefetch = 0 : i64, scratch_operands = 0 : i64, tpu.core_type = #tpu.core_type<tc>, window_params = [{transform_indices = @transform_0, window_bounds = array<i64: 32, 512>}, {pipeline_mode = #tpu.pipeline_mode<synchronous>, transform_indices = @transform_1, window_bounds = array<i64: 256, 32>}, {pipeline_mode = #tpu.pipeline_mode<synchronous>, transform_indices = @transform_2, window_bounds = array<i64: 256, 1>}, {transform_indices = @transform_3, window_bounds = array<i64: 1, 512>}]} {
    %c0 = arith.constant 0 : index
    %c0_0 = arith.constant 0 : index
    %0 = vector.load %arg2[%c0, %c0_0] : memref<256x32xbf16, #tpu.memory_space<vmem>>, vector<256x32xbf16>
    %c0_1 = arith.constant 0 : index
    %c0_2 = arith.constant 0 : index
    %1 = vector.load %arg3[%c0_1, %c0_2] : memref<256x1xf32, #tpu.memory_space<vmem>>, vector<256x1xf32>
    %2 = tpu.iota {dimensions = array<i32: 0>} : vector<256x128xi32>
    %c0_3 = arith.constant 0 : index
    %c0_4 = arith.constant 0 : index
    %3 = vector.load %arg1[%c0_3, %c0_4] : memref<32x512xbf16, #tpu.memory_space<vmem>>, vector<32x128xbf16>
    %cst = arith.constant dense<0.000000e+00> : vector<256x128xf32>
    %4 = tpu.matmul %0, %3, %cst {dimension_numbers = #tpu.dot_dimension_numbers<[1], [0], [0], [1], [0, 0, 1, 1], [], []>} : vector<256x32xbf16>, vector<32x128xbf16>, vector<256x128xf32> -> vector<256x128xf32>
    %5 = vector.broadcast %1 : vector<256x1xf32> to vector<256x128xf32>
    %6 = arith.subf %4, %5 : vector<256x128xf32>
    %cst_5 = arith.constant dense<0xFF800000> : vector<128xf32>
    %7 = vector.multi_reduction <maximumf>, %6, %cst_5 [0] : vector<256x128xf32> to vector<128xf32>
    %8 = vector.shape_cast %7 : vector<128xf32> to vector<1x128xf32>
    %9 = vector.broadcast %8 : vector<1x128xf32> to vector<256x128xf32>
    %10 = arith.cmpf oeq, %6, %9 : vector<256x128xf32>
    %c256_i32 = arith.constant 256 : i32
    %11 = vector.broadcast %c256_i32 : i32 to vector<256x128xi32>
    %12 = arith.select %10, %2, %11 : vector<256x128xi1>, vector<256x128xi32>
    %cst_6 = arith.constant dense<2147483647> : vector<128xi32>
    %13 = vector.multi_reduction <minsi>, %12, %cst_6 [0] : vector<256x128xi32> to vector<128xi32>
    %14 = vector.shape_cast %13 : vector<128xi32> to vector<1x128xi32>
    %c0_7 = arith.constant 0 : index
    %c0_8 = arith.constant 0 : index
    %15 = vector.load %arg4[%c0_7, %c0_8] : memref<1x512xi32, #tpu.memory_space<vmem>>, vector<1x128xi32>
    tpu.vector_store %arg4[%c0_7, %c0_8], %14 {strides = array<i32>} : memref<1x512xi32, #tpu.memory_space<vmem>>, vector<1x128xi32>,
    %c0_9 = arith.constant 0 : index
    %c128 = arith.constant 128 : index
    %16 = vector.load %arg1[%c0_9, %c128] : memref<32x512xbf16, #tpu.memory_space<vmem>>, vector<32x128xbf16>
    %cst_10 = arith.constant dense<0.000000e+00> : vector<256x128xf32>
    %17 = tpu.matmul %0, %16, %cst_10 {dimension_numbers = #tpu.dot_dimension_numbers<[1], [0], [0], [1], [0, 0, 1, 1], [], []>} : vector<256x32xbf16>, vector<32x128xbf16>, vector<256x128xf32> -> vector<256x128xf32>
    %18 = vector.broadcast %1 : vector<256x1xf32> to vector<256x128xf32>
    %19 = arith.subf %17, %18 : vector<256x128xf32>
    %cst_11 = arith.constant dense<0xFF800000> : vector<128xf32>
    %20 = vector.multi_reduction <maximumf>, %19, %cst_11 [0] : vector<256x128xf32> to vector<128xf32>
    %21 = vector.shape_cast %20 : vector<128xf32> to vector<1x128xf32>
    %22 = vector.broadcast %21 : vector<1x128xf32> to vector<256x128xf32>
    %23 = arith.cmpf oeq, %19, %22 : vector<256x128xf32>
    %c256_i32_12 = arith.constant 256 : i32
    %24 = vector.broadcast %c256_i32_12 : i32 to vector<256x128xi32>
    %25 = arith.select %23, %2, %24 : vector<256x128xi1>, vector<256x128xi32>
    %cst_13 = arith.constant dense<2147483647> : vector<128xi32>
    %26 = vector.multi_reduction <minsi>, %25, %cst_13 [0] : vector<256x128xi32> to vector<128xi32>
    %27 = vector.shape_cast %26 : vector<128xi32> to vector<1x128xi32>
    %c0_14 = arith.constant 0 : index
    %c128_15 = arith.constant 128 : index
    %28 = vector.load %arg4[%c0_14, %c128_15] : memref<1x512xi32, #tpu.memory_space<vmem>>, vector<1x128xi32>
    tpu.vector_store %arg4[%c0_14, %c128_15], %27 {strides = array<i32>} : memref<1x512xi32, #tpu.memory_space<vmem>>, vector<1x128xi32>,
    %c0_16 = arith.constant 0 : index
    %c256 = arith.constant 256 : index
    %29 = vector.load %arg1[%c0_16, %c256] : memref<32x512xbf16, #tpu.memory_space<vmem>>, vector<32x128xbf16>
    %cst_17 = arith.constant dense<0.000000e+00> : vector<256x128xf32>
    %30 = tpu.matmul %0, %29, %cst_17 {dimension_numbers = #tpu.dot_dimension_numbers<[1], [0], [0], [1], [0, 0, 1, 1], [], []>} : vector<256x32xbf16>, vector<32x128xbf16>, vector<256x128xf32> -> vector<256x128xf32>
    %31 = vector.broadcast %1 : vector<256x1xf32> to vector<256x128xf32>
    %32 = arith.subf %30, %31 : vector<256x128xf32>
    %cst_18 = arith.constant dense<0xFF800000> : vector<128xf32>
    %33 = vector.multi_reduction <maximumf>, %32, %cst_18 [0] : vector<256x128xf32> to vector<128xf32>
    %34 = vector.shape_cast %33 : vector<128xf32> to vector<1x128xf32>
    %35 = vector.broadcast %34 : vector<1x128xf32> to vector<256x128xf32>
    %36 = arith.cmpf oeq, %32, %35 : vector<256x128xf32>
    %c256_i32_19 = arith.constant 256 : i32
    %37 = vector.broadcast %c256_i32_19 : i32 to vector<256x128xi32>
    %38 = arith.select %36, %2, %37 : vector<256x128xi1>, vector<256x128xi32>
    %cst_20 = arith.constant dense<2147483647> : vector<128xi32>
    %39 = vector.multi_reduction <minsi>, %38, %cst_20 [0] : vector<256x128xi32> to vector<128xi32>
    %40 = vector.shape_cast %39 : vector<128xi32> to vector<1x128xi32>
    %c0_21 = arith.constant 0 : index
    %c256_22 = arith.constant 256 : index
    %41 = vector.load %arg4[%c0_21, %c256_22] : memref<1x512xi32, #tpu.memory_space<vmem>>, vector<1x128xi32>
    tpu.vector_store %arg4[%c0_21, %c256_22], %40 {strides = array<i32>} : memref<1x512xi32, #tpu.memory_space<vmem>>, vector<1x128xi32>,
    %c0_23 = arith.constant 0 : index
    %c384 = arith.constant 384 : index
    %42 = vector.load %arg1[%c0_23, %c384] : memref<32x512xbf16, #tpu.memory_space<vmem>>, vector<32x128xbf16>
    %cst_24 = arith.constant dense<0.000000e+00> : vector<256x128xf32>
    %43 = tpu.matmul %0, %42, %cst_24 {dimension_numbers = #tpu.dot_dimension_numbers<[1], [0], [0], [1], [0, 0, 1, 1], [], []>} : vector<256x32xbf16>, vector<32x128xbf16>, vector<256x128xf32> -> vector<256x128xf32>
    %44 = vector.broadcast %1 : vector<256x1xf32> to vector<256x128xf32>
    %45 = arith.subf %43, %44 : vector<256x128xf32>
    %cst_25 = arith.constant dense<0xFF800000> : vector<128xf32>
    %46 = vector.multi_reduction <maximumf>, %45, %cst_25 [0] : vector<256x128xf32> to vector<128xf32>
    %47 = vector.shape_cast %46 : vector<128xf32> to vector<1x128xf32>
    %48 = vector.broadcast %47 : vector<1x128xf32> to vector<256x128xf32>
    %49 = arith.cmpf oeq, %45, %48 : vector<256x128xf32>
    %c256_i32_26 = arith.constant 256 : i32
    %50 = vector.broadcast %c256_i32_26 : i32 to vector<256x128xi32>
    %51 = arith.select %49, %2, %50 : vector<256x128xi1>, vector<256x128xi32>
    %cst_27 = arith.constant dense<2147483647> : vector<128xi32>
    %52 = vector.multi_reduction <minsi>, %51, %cst_27 [0] : vector<256x128xi32> to vector<128xi32>
    %53 = vector.shape_cast %52 : vector<128xi32> to vector<1x128xi32>
    %c0_28 = arith.constant 0 : index
    %c384_29 = arith.constant 384 : index
    %54 = vector.load %arg4[%c0_28, %c384_29] : memref<1x512xi32, #tpu.memory_space<vmem>>, vector<1x128xi32>
    tpu.vector_store %arg4[%c0_28, %c384_29], %53 {strides = array<i32>} : memref<1x512xi32, #tpu.memory_space<vmem>>, vector<1x128xi32>,
    return
  }
  func.func @transform_0(%arg0: i32) -> (i32, i32) {
    %c0_i32 = arith.constant 0 : i32
    %c0_i32_0 = arith.constant 0 : i32
    return %c0_i32, %arg0 : i32, i32
  }
  func.func @transform_1(%arg0: i32) -> (i32, i32) {
    %c0_i32 = arith.constant 0 : i32
    %c0_i32_0 = arith.constant 0 : i32
    %c0_i32_1 = arith.constant 0 : i32
    return %c0_i32, %c0_i32_0 : i32, i32
  }
  func.func @transform_2(%arg0: i32) -> (i32, i32) {
    %c0_i32 = arith.constant 0 : i32
    %c0_i32_0 = arith.constant 0 : i32
    %c0_i32_1 = arith.constant 0 : i32
    return %c0_i32, %c0_i32_0 : i32, i32
  }
  func.func @transform_3(%arg0: i32) -> (i32, i32) {
    %c0_i32 = arith.constant 0 : i32
    %c0_i32_0 = arith.constant 0 : i32
    return %c0_i32, %arg0 : i32, i32
  }
}

module attributes {stable_mosaic.version = 11 : i64} {
  func.func @mlp_kernel(%arg0: i32, %arg1: i32, %arg2: memref<2x1920xbf16, #tpu.memory_space<vmem>>, %arg3: memref<1920x1024xbf16, #tpu.memory_space<vmem>>, %arg4: memref<1x1024xf32, #tpu.memory_space<vmem>>, %arg5: memref<1024x512xbf16, #tpu.memory_space<vmem>>, %arg6: memref<1x512xf32, #tpu.memory_space<vmem>>, %arg7: memref<512x256xbf16, #tpu.memory_space<vmem>>, %arg8: memref<1x256xf32, #tpu.memory_space<vmem>>, %arg9: memref<256x10xbf16, #tpu.memory_space<vmem>>, %arg10: memref<1x10xf32, #tpu.memory_space<vmem>>, %arg11: memref<2x10xf32, #tpu.memory_space<vmem>>, %arg12: memref<2x1024xf32, #tpu.memory_space<vmem>>) attributes {dimension_semantics = [#tpu.dimension_semantics<parallel>, #tpu.dimension_semantics<arbitrary>], iteration_bounds = array<i64: 1, 1>, scalar_prefetch = 0 : i64, scratch_operands = 1 : i64, tpu.core_type = #tpu.core_type<tc>, window_params = [{transform_indices = @transform_0, window_bounds = array<i64: 2, 1920>}, {transform_indices = @transform_1, window_bounds = array<i64: 1920, 1024>}, {pipeline_mode = #tpu.pipeline_mode<synchronous>, transform_indices = @transform_2, window_bounds = array<i64: 1, 1024>}, {pipeline_mode = #tpu.pipeline_mode<synchronous>, transform_indices = @transform_3, window_bounds = array<i64: 1024, 512>}, {pipeline_mode = #tpu.pipeline_mode<synchronous>, transform_indices = @transform_4, window_bounds = array<i64: 1, 512>}, {pipeline_mode = #tpu.pipeline_mode<synchronous>, transform_indices = @transform_5, window_bounds = array<i64: 512, 256>}, {pipeline_mode = #tpu.pipeline_mode<synchronous>, transform_indices = @transform_6, window_bounds = array<i64: 1, 256>}, {pipeline_mode = #tpu.pipeline_mode<synchronous>, transform_indices = @transform_7, window_bounds = array<i64: 256, 10>}, {pipeline_mode = #tpu.pipeline_mode<synchronous>, transform_indices = @transform_8, window_bounds = array<i64: 1, 10>}, {transform_indices = @transform_9, window_bounds = array<i64: 2, 10>}]} {
    %c0_i32 = arith.constant 0 : i32
    %0 = arith.cmpi eq, %arg1, %c0_i32 : i32
    %1 = arith.extui %0 : i1 to i32
    %c0_i32_0 = arith.constant 0 : i32
    %2 = arith.cmpi ne, %1, %c0_i32_0 : i32
    scf.if %2 {
      %cst_10 = arith.constant 0.000000e+00 : f32
      %12 = vector.broadcast %cst_10 : f32 to vector<2x1024xf32>
      %c0_11 = arith.constant 0 : index
      %c0_12 = arith.constant 0 : index
      %13 = vector.load %arg12[%c0_11, %c0_12] : memref<2x1024xf32, #tpu.memory_space<vmem>>, vector<2x1024xf32>
      tpu.vector_store %arg12[%c0_11, %c0_12], %12 {strides = array<i32>} : memref<2x1024xf32, #tpu.memory_space<vmem>>, vector<2x1024xf32>,
    } else {
    }
    %c0 = arith.constant 0 : index
    %c0_1 = arith.constant 0 : index
    %3 = vector.load %arg12[%c0, %c0_1] : memref<2x1024xf32, #tpu.memory_space<vmem>>, vector<2x1024xf32>
    %c0_2 = arith.constant 0 : index
    %c0_3 = arith.constant 0 : index
    %4 = vector.load %arg2[%c0_2, %c0_3] : memref<2x1920xbf16, #tpu.memory_space<vmem>>, vector<2x1920xbf16>
    %c0_4 = arith.constant 0 : index
    %c0_5 = arith.constant 0 : index
    %5 = vector.load %arg3[%c0_4, %c0_5] : memref<1920x1024xbf16, #tpu.memory_space<vmem>>, vector<1920x1024xbf16>
    %cst = arith.constant dense<0.000000e+00> : vector<2x1024xf32>
    %6 = tpu.matmul %4, %5, %cst {dimension_numbers = #tpu.dot_dimension_numbers<[1], [0], [0], [1], [0, 0, 1, 1], [], []>} : vector<2x1920xbf16>, vector<1920x1024xbf16>, vector<2x1024xf32> -> vector<2x1024xf32>
    %7 = arith.addf %3, %6 : vector<2x1024xf32>
    %c0_6 = arith.constant 0 : index
    %c0_7 = arith.constant 0 : index
    %8 = vector.load %arg12[%c0_6, %c0_7] : memref<2x1024xf32, #tpu.memory_space<vmem>>, vector<2x1024xf32>
    tpu.vector_store %arg12[%c0_6, %c0_7], %7 {strides = array<i32>} : memref<2x1024xf32, #tpu.memory_space<vmem>>, vector<2x1024xf32>,
    %c0_i32_8 = arith.constant 0 : i32
    %9 = arith.cmpi eq, %arg1, %c0_i32_8 : i32
    %10 = arith.extui %9 : i1 to i32
    %c0_i32_9 = arith.constant 0 : i32
    %11 = arith.cmpi ne, %10, %c0_i32_9 : i32
    scf.if %11 {
      %c0_10 = arith.constant 0 : index
      %c0_11 = arith.constant 0 : index
      %12 = vector.load %arg12[%c0_10, %c0_11] : memref<2x1024xf32, #tpu.memory_space<vmem>>, vector<2x1024xf32>
      %c0_12 = arith.constant 0 : index
      %c0_13 = arith.constant 0 : index
      %13 = vector.load %arg4[%c0_12, %c0_13] : memref<1x1024xf32, #tpu.memory_space<vmem>>, vector<1x1024xf32>
      %14 = vector.broadcast %13 : vector<1x1024xf32> to vector<2x1024xf32>
      %15 = arith.addf %12, %14 : vector<2x1024xf32>
      %cst_14 = arith.constant 0.000000e+00 : f32
      %16 = vector.broadcast %cst_14 : f32 to vector<2x1024xf32>
      %17 = arith.maximumf %15, %16 : vector<2x1024xf32>
      %18 = arith.truncf %17 : vector<2x1024xf32> to vector<2x1024xbf16>
      %c0_15 = arith.constant 0 : index
      %c0_16 = arith.constant 0 : index
      %19 = vector.load %arg5[%c0_15, %c0_16] : memref<1024x512xbf16, #tpu.memory_space<vmem>>, vector<1024x512xbf16>
      %cst_17 = arith.constant dense<0.000000e+00> : vector<2x512xf32>
      %20 = tpu.matmul %18, %19, %cst_17 {dimension_numbers = #tpu.dot_dimension_numbers<[1], [0], [0], [1], [0, 0, 1, 1], [], []>} : vector<2x1024xbf16>, vector<1024x512xbf16>, vector<2x512xf32> -> vector<2x512xf32>
      %c0_18 = arith.constant 0 : index
      %c0_19 = arith.constant 0 : index
      %21 = vector.load %arg6[%c0_18, %c0_19] : memref<1x512xf32, #tpu.memory_space<vmem>>, vector<1x512xf32>
      %22 = vector.broadcast %21 : vector<1x512xf32> to vector<2x512xf32>
      %23 = arith.addf %20, %22 : vector<2x512xf32>
      %cst_20 = arith.constant 0.000000e+00 : f32
      %24 = vector.broadcast %cst_20 : f32 to vector<2x512xf32>
      %25 = arith.maximumf %23, %24 : vector<2x512xf32>
      %26 = arith.truncf %25 : vector<2x512xf32> to vector<2x512xbf16>
      %c0_21 = arith.constant 0 : index
      %c0_22 = arith.constant 0 : index
      %27 = vector.load %arg7[%c0_21, %c0_22] : memref<512x256xbf16, #tpu.memory_space<vmem>>, vector<512x256xbf16>
      %cst_23 = arith.constant dense<0.000000e+00> : vector<2x256xf32>
      %28 = tpu.matmul %26, %27, %cst_23 {dimension_numbers = #tpu.dot_dimension_numbers<[1], [0], [0], [1], [0, 0, 1, 1], [], []>} : vector<2x512xbf16>, vector<512x256xbf16>, vector<2x256xf32> -> vector<2x256xf32>
      %c0_24 = arith.constant 0 : index
      %c0_25 = arith.constant 0 : index
      %29 = vector.load %arg8[%c0_24, %c0_25] : memref<1x256xf32, #tpu.memory_space<vmem>>, vector<1x256xf32>
      %30 = vector.broadcast %29 : vector<1x256xf32> to vector<2x256xf32>
      %31 = arith.addf %28, %30 : vector<2x256xf32>
      %cst_26 = arith.constant 0.000000e+00 : f32
      %32 = vector.broadcast %cst_26 : f32 to vector<2x256xf32>
      %33 = arith.maximumf %31, %32 : vector<2x256xf32>
      %34 = arith.truncf %33 : vector<2x256xf32> to vector<2x256xbf16>
      %c0_27 = arith.constant 0 : index
      %c0_28 = arith.constant 0 : index
      %35 = vector.load %arg9[%c0_27, %c0_28] : memref<256x10xbf16, #tpu.memory_space<vmem>>, vector<256x10xbf16>
      %cst_29 = arith.constant dense<0.000000e+00> : vector<2x10xf32>
      %36 = tpu.matmul %34, %35, %cst_29 {dimension_numbers = #tpu.dot_dimension_numbers<[1], [0], [0], [1], [0, 0, 1, 1], [], []>} : vector<2x256xbf16>, vector<256x10xbf16>, vector<2x10xf32> -> vector<2x10xf32>
      %c0_30 = arith.constant 0 : index
      %c0_31 = arith.constant 0 : index
      %37 = vector.load %arg10[%c0_30, %c0_31] : memref<1x10xf32, #tpu.memory_space<vmem>>, vector<1x10xf32>
      %38 = vector.broadcast %37 : vector<1x10xf32> to vector<2x10xf32>
      %39 = arith.addf %36, %38 : vector<2x10xf32>
      %cst_32 = arith.constant dense<0xFF800000> : vector<2xf32>
      %40 = vector.multi_reduction <maximumf>, %39, %cst_32 [1] : vector<2x10xf32> to vector<2xf32>
      %41 = vector.shape_cast %40 : vector<2xf32> to vector<2x1xf32>
      %42 = vector.broadcast %41 : vector<2x1xf32> to vector<2x10xf32>
      %43 = arith.subf %39, %42 : vector<2x10xf32>
      %44 = math.exp %43 : vector<2x10xf32>
      %cst_33 = arith.constant dense<0.000000e+00> : vector<2xf32>
      %45 = vector.multi_reduction <add>, %44, %cst_33 [1] : vector<2x10xf32> to vector<2xf32>
      %46 = vector.shape_cast %45 : vector<2xf32> to vector<2x1xf32>
      %47 = math.log %46 : vector<2x1xf32>
      %48 = vector.broadcast %47 : vector<2x1xf32> to vector<2x10xf32>
      %49 = arith.subf %43, %48 : vector<2x10xf32>
      %c0_34 = arith.constant 0 : index
      %c0_35 = arith.constant 0 : index
      %50 = vector.load %arg11[%c0_34, %c0_35] : memref<2x10xf32, #tpu.memory_space<vmem>>, vector<2x10xf32>
      tpu.vector_store %arg11[%c0_34, %c0_35], %49 {strides = array<i32>} : memref<2x10xf32, #tpu.memory_space<vmem>>, vector<2x10xf32>,
    } else {
    }
    return
  }
  func.func @transform_0(%arg0: i32, %arg1: i32) -> (i32, i32) {
    %c0_i32 = arith.constant 0 : i32
    return %arg0, %arg1 : i32, i32
  }
  func.func @transform_1(%arg0: i32, %arg1: i32) -> (i32, i32) {
    %c0_i32 = arith.constant 0 : i32
    %c0_i32_0 = arith.constant 0 : i32
    return %arg1, %c0_i32 : i32, i32
  }
  func.func @transform_2(%arg0: i32, %arg1: i32) -> (i32, i32) {
    %c0_i32 = arith.constant 0 : i32
    %c0_i32_0 = arith.constant 0 : i32
    %c0_i32_1 = arith.constant 0 : i32
    return %c0_i32, %c0_i32_0 : i32, i32
  }
  func.func @transform_3(%arg0: i32, %arg1: i32) -> (i32, i32) {
    %c0_i32 = arith.constant 0 : i32
    %c0_i32_0 = arith.constant 0 : i32
    %c0_i32_1 = arith.constant 0 : i32
    return %c0_i32, %c0_i32_0 : i32, i32
  }
  func.func @transform_4(%arg0: i32, %arg1: i32) -> (i32, i32) {
    %c0_i32 = arith.constant 0 : i32
    %c0_i32_0 = arith.constant 0 : i32
    %c0_i32_1 = arith.constant 0 : i32
    return %c0_i32, %c0_i32_0 : i32, i32
  }
  func.func @transform_5(%arg0: i32, %arg1: i32) -> (i32, i32) {
    %c0_i32 = arith.constant 0 : i32
    %c0_i32_0 = arith.constant 0 : i32
    %c0_i32_1 = arith.constant 0 : i32
    return %c0_i32, %c0_i32_0 : i32, i32
  }
  func.func @transform_6(%arg0: i32, %arg1: i32) -> (i32, i32) {
    %c0_i32 = arith.constant 0 : i32
    %c0_i32_0 = arith.constant 0 : i32
    %c0_i32_1 = arith.constant 0 : i32
    return %c0_i32, %c0_i32_0 : i32, i32
  }
  func.func @transform_7(%arg0: i32, %arg1: i32) -> (i32, i32) {
    %c0_i32 = arith.constant 0 : i32
    %c0_i32_0 = arith.constant 0 : i32
    %c0_i32_1 = arith.constant 0 : i32
    return %c0_i32, %c0_i32_0 : i32, i32
  }
  func.func @transform_8(%arg0: i32, %arg1: i32) -> (i32, i32) {
    %c0_i32 = arith.constant 0 : i32
    %c0_i32_0 = arith.constant 0 : i32
    %c0_i32_1 = arith.constant 0 : i32
    return %c0_i32, %c0_i32_0 : i32, i32
  }
  func.func @transform_9(%arg0: i32, %arg1: i32) -> (i32, i32) {
    %c0_i32 = arith.constant 0 : i32
    %c0_i32_0 = arith.constant 0 : i32
    return %arg0, %c0_i32 : i32, i32
  }
}

</mosaic_0001>

<bundles_post_ra>
// kernel: my_neural_network_forward.2
= control target key start
LH: loop header
LB: loop body
LE: loop exit
PB: predicated region body
PF: predicated region fallthrough
CT: control target
= control target key end

     0   :  { %s2593_s12 = smov 0   ;;  %s2595_s13 = smov 0   ;;  %s4623_s0 = inlined_call_operand.vmem [shape: bf16[32,2048], index: 0, kind: input, shape index: {}]   ;;  %s4624_s1 = inlined_call_operand.vmem [shape: bf16[256,32], index: 1, kind: input, shape index: {}]   ;;  %s4625_s2 = inlined_call_operand.vmem [shape: f32[256,1], index: 2, kind: input, shape index: {}]   ;;  %s4626_s3 = inlined_call_operand.vmem [shape: s32[1,2048], index: 3, kind: output, shape index: {}]  }
   0x1   :  { %s2597_s14 = smov 0  }
   0x2 LB: > { %s2180_s15 = sadd.s32 4294967295, %s2570_s14   ;;  %s2610_s16 = sadd.s32 1, %s2570_s14   ;;  %s2570_s14 = sphi %s2597_s14, %s5336_s14   ;;  %s2566_s13 = sphi %s2595_s13, %s5335_s13   ;;  %s2562_s12 = sphi %s2593_s12, %s5334_s12  }
   0x3   : > { %s17_s17 = ssub.s32 %s2570_s14, %s2610_s16  ;;  %s20_s18 = sadd.s32 1, %s2566_s13 }
   0x4   : > { %p18_p0 = scmp.eq.s32.totalorder %s17_s17, 0  ;;  %p27_p1 = scmp.ne.s32.totalorder %s2566_s13, %s2562_s12 }
   0x5   : > { %p28_p2 = scmp.eq.s32.totalorder %s2570_s14, 0  ;;  %p2183_p4 = scmp.ge.s32.totalorder %s2570_s14, 4 }
   0x6   : > { %s2619_s19 = scalar_select %p18_p0, %s2566_s13, %s20_s18  }
   0x7   : > { %p29_p3 = por %p28_p2, %p27_p1  ;;  %127 = sbr.rel (%p2183_p4) target bundleno = 22 (0x16), region = 24 }
   0xe   : > { %130 = sbr.rel (!%p29_p3) target bundleno = 22 (0x16), region = 28  ;;  %s132_s20 = sand.u32 (%p29_p3), 1, %s2566_s13  }
   0xf   : > { %s2280_s21 = sshll.u32 (%p29_p3), %s2570_s14, 4  ;;  %s2184_s22 = sshll.u32 (%p29_p3), %s132_s20, 6 }
  0x10   : > { %s137_s25 = scalar_lea.vmem (%p29_p3), %s4623_s0, %s2280_s21  ;;  %s134_s26 = scalar_lea.vmem (%p29_p3), [#allocation2], %s2184_s22 }
  0x11   : > { %v150_v0 = vld [vmem:[%s137_s25] sm:$0xff] (%p29_p3)  ;;  %v152_v1 = vld [vmem:[%s137_s25 + $0x8] sm:$0xff] (%p29_p3) }
  0x12   : > { %v154_v2 = vld [vmem:[%s137_s25 + $0x40] sm:$0xff] (%p29_p3)  ;;  %151 = vst [vmem:[%s134_s26] sm:$0xff] (%p29_p3), %v150_v0  ;;  %153 = vst [vmem:[%s134_s26 + $0x8] sm:$0xff] (%p29_p3), %v152_v1  ;;  %v156_v3 = vld [vmem:[%s137_s25 + $0x48] sm:$0xff] (%p29_p3) }
  0x13   : > { %155 = vst [vmem:[%s134_s26 + $0x10] sm:$0xff] (%p29_p3), %v154_v2  ;;  %v158_v4 = vld [vmem:[%s137_s25 + $0x80] sm:$0xff] (%p29_p3)  ;;  %v160_v5 = vld [vmem:[%s137_s25 + $0x88] sm:$0xff] (%p29_p3)  ;;  %157 = vst [vmem:[%s134_s26 + $0x18] sm:$0xff] (%p29_p3), %v156_v3 }
  0x14   : > { %159 = vst [vmem:[%s134_s26 + $0x20] sm:$0xff] (%p29_p3), %v158_v4  ;;  %161 = vst [vmem:[%s134_s26 + $0x28] sm:$0xff] (%p29_p3), %v160_v5  ;;  %v162_v6 = vld [vmem:[%s137_s25 + $0xc0] sm:$0xff] (%p29_p3)  ;;  %v164_v7 = vld [vmem:[%s137_s25 + $0xc8] sm:$0xff] (%p29_p3) }
  0x15   : > { %163 = vst [vmem:[%s134_s26 + $0x30] sm:$0xff] %v162_v6  ;;  %165 = vst [vmem:[%s134_s26 + $0x38] sm:$0xff] %v164_v7 }
  0x16 PF: > { %p2187_p5 = scmp.ge.s32.totalorder %s2570_s14, 1  ;;  %p170_p6 = scmp.lt.s32.totalorder %s2570_s14, 5 }
  0x18   : > { %p171_p7 = pnand %p2187_p5, %p170_p6 }
  0x1a   : > { %174 = sbr.rel (%p171_p7) target bundleno = 533 (0x215), region = 51 }
  0x21   : > { %s177_s27 = sand.u32 1, %s2562_s12   ;;  %v2633_v8 = vld [vmem:[%s4624_s1] sm:$0xff]   ;;  %vm399_vm0 = vcmask 261120   ;;  %v2650_v15 = vld [vmem:[%s4624_s1 + $0x8] sm:$0xff]   ;;  %v2572_v16 = vmov 0   ;;  %v2655_v17 = vld [vmem:[%s4624_s1 + $0x10] sm:$0xff]  }
  0x22   : > { %s2188_s30 = sshll.u32 %s177_s27, 6  ;;  %2357 = vmatprep.mubr.msk.bf16.mxu0 %vm399_vm0, %v2633_v8  ;;  %2393 = vmatprep.mubr.msk.bf16.mxu1 %vm399_vm0, %v2633_v8  ;;  %v2666_v18 = vld [vmem:[%s4624_s1 + $0x18] sm:$0xff]   ;;  %v2673_v19 = vld [vmem:[%s4624_s1 + $0x20] sm:$0xff]   ;;  %v240_v23 = vld [vmem:[%s4625_s2 + $0x10] sm:$0xff]  ;;  %s3718_s11 = sshll.u32 %s2180_s15, 2 }
  0x23   : > { %s2639_s4 = scalar_lea.vmem [#allocation2], %s2188_s30  ;;  %2522 = vset.pattern.permute.xlu0 %v2572_v16  ;;  %2523 = vset.pattern.permute.xlu1 %v2572_v16  ;;  %v238_v22 = vld [vmem:[%s4625_s2] sm:$0xff]  ;;  %v2694_v24 = vld [vmem:[%s4624_s1 + $0x28] sm:$0xff]   ;;  %v2699_v25 = vld [vmem:[%s4624_s1 + $0x30] sm:$0xff]   ;;  %p201_p8 = scmp.lt.s32.totalorder %s3718_s11, 15 }
  0x24   : > { %v2524_v9 = vld [vmem:[%s2639_s4] ss:$16 sps:$4 sm:$0xff]   ;;  %v2525_v10 = vld [vmem:[%s2639_s4 + $0x4] ss:$16 sps:$4 sm:$0xff]   ;;  %v2530_v13 = vld [vmem:[%s2639_s4 + $0x8] ss:$16 sps:$4 sm:$0xff]   ;;  %611 = vperm.xlu0 %2522, %v238_v22   ;;  %621 = vperm.xlu1 %2523, %v240_v23  }
  0x25   : > { %2353 = vmatprep.subr.bf16.mxu0 %v2524_v9  ;;  %v2526_v11 = vld [vmem:[%s2639_s4 + $0x20] ss:$16 sps:$4 sm:$0xff]   ;;  %2389 = vmatprep.subr.bf16.mxu1 %v2525_v10  ;;  %v2527_v12 = vld [vmem:[%s2639_s4 + $0x24] ss:$16 sps:$4 sm:$0xff]   ;;  %v2531_v14 = vld [vmem:[%s2639_s4 + $0xc] ss:$16 sps:$4 sm:$0xff]  }
  0x26   : > { %2354 = vmatpush3.bf16.msra.mxu0 %v2524_v9  ;;  %2390 = vmatpush3.bf16.msra.mxu1 %v2525_v10  ;;  %v2540_v20 = vld [vmem:[%s2639_s4 + $0x28] ss:$16 sps:$4 sm:$0xff]   ;;  %v2541_v21 = vld [vmem:[%s2639_s4 + $0x2c] ss:$16 sps:$4 sm:$0xff]   ;;  %v242_v28 = vld [vmem:[%s4625_s2 + $0x20] sm:$0xff]  ;;  %s5338_s11 = smov (!%p201_p8, %s3718_s11), 15 }
  0x27   : > { %2355 = vmatprep.subr.bf16.mxu0 %v2526_v11  ;;  %2391 = vmatprep.subr.bf16.mxu1 %v2527_v12  ;;  %v239_v26 = vld [vmem:[%s4625_s2 + $0x8] sm:$0xff]  ;;  %v241_v27 = vld [vmem:[%s4625_s2 + $0x18] sm:$0xff]  ;;  %v2729_v31 = vld [vmem:[%s4624_s1 + $0x40] sm:$0xff]   ;;  %s3842_s12 = scalar_lea.vmem %s4626_s3, %s5338_s11 }
  0x28   : > { %616 = vperm.xlu0 %2522, %v239_v26   ;;  %626 = vperm.xlu1 %2523, %v241_v27   ;;  %v243_v29 = vld [vmem:[%s4625_s2 + $0x28] sm:$0xff]  ;;  %v2724_v30 = vld [vmem:[%s4624_s1 + $0x38] sm:$0xff]   ;;  %v244_v32 = vld [vmem:[%s4625_s2 + $0x30] sm:$0xff] }
  0x29   : > { %v245_v33 = vld [vmem:[%s4625_s2 + $0x38] sm:$0xff]  ;;  %v246_v34 = vld [vmem:[%s4625_s2 + $0x40] sm:$0xff]  ;;  %v247_v35 = vld [vmem:[%s4625_s2 + $0x48] sm:$0xff] }
  0x2a   : > { %2356 = vmatpush3.bf16.msra.mxu0 %v2526_v11  ;;  %2392 = vmatpush3.bf16.msra.mxu1 %v2527_v12  ;;  %v2754_v36 = vld [vmem:[%s4624_s1 + $0x48] sm:$0xff]   ;;  %v2759_v37 = vld [vmem:[%s4624_s1 + $0x50] sm:$0xff]   ;;  %v249_v39 = vld [vmem:[%s4625_s2 + $0x58] sm:$0xff] }
  0x2b   : > { %2425 = vmatprep.subr.bf16.mxu0 %v2530_v13  ;;  %2461 = vmatprep.subr.bf16.mxu1 %v2531_v14  ;;  %v248_v38 = vld [vmem:[%s4625_s2 + $0x50] sm:$0xff]  ;;  %v250_v40 = vld [vmem:[%s4625_s2 + $0x60] sm:$0xff]  ;;  %v251_v41 = vld [vmem:[%s4625_s2 + $0x68] sm:$0xff] }
  0x2c   : > { %631 = vperm.xlu0 %2522, %v242_v28   ;;  %636 = vperm.xlu1 %2523, %v243_v29   ;;  %v2784_v42 = vld [vmem:[%s4624_s1 + $0x58] sm:$0xff]   ;;  %v2789_v43 = vld [vmem:[%s4624_s1 + $0x60] sm:$0xff]   ;;  %v252_v44 = vld [vmem:[%s4625_s2 + $0x70] sm:$0xff] }
  0x2d   : > { %2358 = vmatmul.mubr.msk.bf16.vlgmr.msra.gmra.mrb[0].mxu0 %vm399_vm0, %v2650_v15  ;;  %2394 = vmatmul.mubr.msk.bf16.vlgmr.msra.gmra.mrb[0].mxu1 %vm399_vm0, %v2650_v15  ;;  %v253_v45 = vld [vmem:[%s4625_s2 + $0x78] sm:$0xff]  ;;  %v254_v46 = vld [vmem:[%s4625_s2 + $0x80] sm:$0xff]  ;;  %v255_v47 = vld [vmem:[%s4625_s2 + $0x88] sm:$0xff] }
  0x2e   : > { %2426 = vmatpush3.bf16.msra.mxu0 %v2530_v13  ;;  %2462 = vmatpush3.bf16.msra.mxu1 %v2531_v14  ;;  %v2814_v48 = vld [vmem:[%s4624_s1 + $0x68] sm:$0xff]   ;;  %v2819_v49 = vld [vmem:[%s4624_s1 + $0x70] sm:$0xff]   ;;  %v257_v51 = vld [vmem:[%s4625_s2 + $0x98] sm:$0xff] }
  0x2f   : > { %2361 = vmatprep.mubr.msk.bf16.mxu0 %vm399_vm0, %v2655_v17  ;;  %2397 = vmatprep.mubr.msk.bf16.mxu1 %vm399_vm0, %v2655_v17  ;;  %v256_v50 = vld [vmem:[%s4625_s2 + $0x90] sm:$0xff]  ;;  %v258_v52 = vld [vmem:[%s4625_s2 + $0xa0] sm:$0xff]  ;;  %v259_v53 = vld [vmem:[%s4625_s2 + $0xa8] sm:$0xff] }
  0x30   : > { %2427 = vmatprep.subr.bf16.mxu0 %v2540_v20  ;;  %2463 = vmatprep.subr.bf16.mxu1 %v2541_v21  ;;  %v2547_v54 = vld [vmem:[%s4624_s1 + $0x78] sm:$0xff]   ;;  %v260_v55 = vld [vmem:[%s4625_s2 + $0xb0] sm:$0xff]  ;;  %v262_v57 = vld [vmem:[%s4625_s2 + $0xc0] sm:$0xff] }
  0x31   : > { %641 = vperm.xlu0 %2522, %v244_v32   ;;  %646 = vperm.xlu1 %2523, %v245_v33   ;;  %v261_v56 = vld [vmem:[%s4625_s2 + $0xb8] sm:$0xff]  ;;  %v263_v58 = vld [vmem:[%s4625_s2 + $0xc8] sm:$0xff]  ;;  %v264_v59 = vld [vmem:[%s4625_s2 + $0xd0] sm:$0xff] }
  0x32   : > { %2428 = vmatpush3.bf16.msra.mxu0 %v2540_v20  ;;  %2464 = vmatpush3.bf16.msra.mxu1 %v2541_v21  ;;  %v265_v60 = vld [vmem:[%s4625_s2 + $0xd8] sm:$0xff]  ;;  %v266_v61 = vld [vmem:[%s4625_s2 + $0xe0] sm:$0xff]  ;;  %v267_v62 = vld [vmem:[%s4625_s2 + $0xe8] sm:$0xff] }
  0x33   : > { %v268_v63 = vld [vmem:[%s4625_s2 + $0xf0] sm:$0xff]  ;;  %v269_v0 = vld [vmem:[%s4625_s2 + $0xf8] sm:$0xff] }
  0x35   : > { %2362 = vmatmul.mubr.msk.bf16.gmra.mrb[4].mxu0 %vm399_vm0, %v2666_v18  ;;  %2398 = vmatmul.mubr.msk.bf16.gmra.mrb[4].mxu1 %vm399_vm0, %v2666_v18 }
  0x36   : > { %2365 = vmatprep.mubr.msk.bf16.mxu0 %vm399_vm0, %v2673_v19  ;;  %2401 = vmatprep.mubr.msk.bf16.mxu1 %vm399_vm0, %v2673_v19 }
  0x37   : > { %651 = vperm.xlu0 %2522, %v246_v34   ;;  %656 = vperm.xlu1 %2523, %v247_v35  }
  0x3b   : > { %661 = vperm.xlu0 %2522, %v248_v38   ;;  %666 = vperm.xlu1 %2523, %v249_v39  }
  0x3d   : > { %2366 = vmatmul.mubr.msk.bf16.gmra.mrb[8].mxu0 %vm399_vm0, %v2694_v24  ;;  %2402 = vmatmul.mubr.msk.bf16.gmra.mrb[8].mxu1 %vm399_vm0, %v2694_v24 }
  0x3e   : > { %2369 = vmatprep.mubr.msk.bf16.mxu0 %vm399_vm0, %v2699_v25  ;;  %2405 = vmatprep.mubr.msk.bf16.mxu1 %vm399_vm0, %v2699_v25 }
  0x3f   : > { %671 = vperm.xlu0 %2522, %v250_v40   ;;  %676 = vperm.xlu1 %2523, %v251_v41  }
  0x43   : > { %681 = vperm.xlu0 %2522, %v252_v44   ;;  %686 = vperm.xlu1 %2523, %v253_v45  }
  0x45   : > { %2370 = vmatmul.mubr.msk.bf16.gmra.mrb[12].mxu0 %vm399_vm0, %v2724_v30  ;;  %2406 = vmatmul.mubr.msk.bf16.gmra.mrb[12].mxu1 %vm399_vm0, %v2724_v30 }
  0x46   : > { %2373 = vmatprep.mubr.msk.bf16.mxu0 %vm399_vm0, %v2729_v31  ;;  %2409 = vmatprep.mubr.msk.bf16.mxu1 %vm399_vm0, %v2729_v31 }
  0x47   : > { %691 = vperm.xlu0 %2522, %v254_v46   ;;  %696 = vperm.xlu1 %2523, %v255_v47  }
  0x4b   : > { %701 = vperm.xlu0 %2522, %v256_v50   ;;  %706 = vperm.xlu1 %2523, %v257_v51  }
  0x4d   : > { %2374 = vmatmul.mubr.msk.bf16.gmra.mrb[16].mxu0 %vm399_vm0, %v2754_v36  ;;  %2410 = vmatmul.mubr.msk.bf16.gmra.mrb[16].mxu1 %vm399_vm0, %v2754_v36 }
  0x4e   : > { %2377 = vmatprep.mubr.msk.bf16.mxu0 %vm399_vm0, %v2759_v37  ;;  %2413 = vmatprep.mubr.msk.bf16.mxu1 %vm399_vm0, %v2759_v37 }
  0x4f   : > { %711 = vperm.xlu0 %2522, %v258_v52   ;;  %716 = vperm.xlu1 %2523, %v259_v53  }
  0x53   : > { %721 = vperm.xlu0 %2522, %v260_v55   ;;  %726 = vperm.xlu1 %2523, %v261_v56  }
  0x55   : > { %2378 = vmatmul.mubr.msk.bf16.gmra.mrb[20].mxu0 %vm399_vm0, %v2784_v42  ;;  %2414 = vmatmul.mubr.msk.bf16.gmra.mrb[20].mxu1 %vm399_vm0, %v2784_v42 }
  0x56   : > { %2381 = vmatprep.mubr.msk.bf16.mxu0 %vm399_vm0, %v2789_v43  ;;  %2417 = vmatprep.mubr.msk.bf16.mxu1 %vm399_vm0, %v2789_v43 }
  0x57   : > { %731 = vperm.xlu0 %2522, %v262_v57   ;;  %736 = vperm.xlu1 %2523, %v263_v58  }
  0x5b   : > { %741 = vperm.xlu0 %2522, %v264_v59   ;;  %746 = vperm.xlu1 %2523, %v265_v60  }
  0x5d   : > { %2382 = vmatmul.mubr.msk.bf16.gmra.mrb[24].mxu0 %vm399_vm0, %v2814_v48  ;;  %2418 = vmatmul.mubr.msk.bf16.gmra.mrb[24].mxu1 %vm399_vm0, %v2814_v48 }
  0x5e   : > { %2385 = vmatprep.mubr.msk.bf16.mxu0 %vm399_vm0, %v2819_v49  ;;  %2421 = vmatprep.mubr.msk.bf16.mxu1 %vm399_vm0, %v2819_v49 }
  0x5f   : > { %751 = vperm.xlu0 %2522, %v266_v61   ;;  %756 = vperm.xlu1 %2523, %v267_v62  }
  0x63   : > { %761 = vperm.xlu0 %2522, %v268_v63   ;;  %766 = vperm.xlu1 %2523, %v269_v0  }
  0x65   : > { %2386 = vmatmul.mubr.msk.bf16.gmra.mrb[28].mxu0 %vm399_vm0, %v2547_v54  ;;  %2422 = vmatmul.mubr.msk.bf16.gmra.mrb[28].mxu1 %vm399_vm0, %v2547_v54 }
  0x66   : > { %2429 = vmatprep.mubr.msk.bf16.mxu0 %vm399_vm0, %v2633_v8  ;;  %2465 = vmatprep.mubr.msk.bf16.mxu1 %vm399_vm0, %v2633_v8 }
  0x6d   : > { %2430 = vmatmul.mubr.msk.bf16.vlgmr.msra.gmra.mrb[32].mxu0 %vm399_vm0, %v2650_v15  ;;  %2466 = vmatmul.mubr.msk.bf16.vlgmr.msra.gmra.mrb[32].mxu1 %vm399_vm0, %v2650_v15 }
  0x6e   : > { %2433 = vmatprep.mubr.msk.bf16.mxu0 %vm399_vm0, %v2655_v17  ;;  %2469 = vmatprep.mubr.msk.bf16.mxu1 %vm399_vm0, %v2655_v17 }
  0x75   : > { %2434 = vmatmul.mubr.msk.bf16.gmra.mrb[36].mxu0 %vm399_vm0, %v2666_v18  ;;  %2470 = vmatmul.mubr.msk.bf16.gmra.mrb[36].mxu1 %vm399_vm0, %v2666_v18 }
  0x76   : > { %2437 = vmatprep.mubr.msk.bf16.mxu0 %vm399_vm0, %v2673_v19  ;;  %2473 = vmatprep.mubr.msk.bf16.mxu1 %vm399_vm0, %v2673_v19 }
  0x7d   : > { %2438 = vmatmul.mubr.msk.bf16.gmra.mrb[40].mxu0 %vm399_vm0, %v2694_v24  ;;  %2474 = vmatmul.mubr.msk.bf16.gmra.mrb[40].mxu1 %vm399_vm0, %v2694_v24 }
  0x7e   : > { %2441 = vmatprep.mubr.msk.bf16.mxu0 %vm399_vm0, %v2699_v25  ;;  %2477 = vmatprep.mubr.msk.bf16.mxu1 %vm399_vm0, %v2699_v25 }
  0x85   : > { %2442 = vmatmul.mubr.msk.bf16.gmra.mrb[44].mxu0 %vm399_vm0, %v2724_v30  ;;  %2478 = vmatmul.mubr.msk.bf16.gmra.mrb[44].mxu1 %vm399_vm0, %v2724_v30 }
  0x86   : > { %2445 = vmatprep.mubr.msk.bf16.mxu0 %vm399_vm0, %v2729_v31  ;;  %2481 = vmatprep.mubr.msk.bf16.mxu1 %vm399_vm0, %v2729_v31 }
  0x8d   : > { %2446 = vmatmul.mubr.msk.bf16.gmra.mrb[48].mxu0 %vm399_vm0, %v2754_v36  ;;  %2482 = vmatmul.mubr.msk.bf16.gmra.mrb[48].mxu1 %vm399_vm0, %v2754_v36 }
  0x8e   : > { %2449 = vmatprep.mubr.msk.bf16.mxu0 %vm399_vm0, %v2759_v37  ;;  %2485 = vmatprep.mubr.msk.bf16.mxu1 %vm399_vm0, %v2759_v37 }
  0x95   : > { %2450 = vmatmul.mubr.msk.bf16.gmra.mrb[52].mxu0 %vm399_vm0, %v2784_v42  ;;  %2486 = vmatmul.mubr.msk.bf16.gmra.mrb[52].mxu1 %vm399_vm0, %v2784_v42 }
  0x96   : > { %2453 = vmatprep.mubr.msk.bf16.mxu0 %vm399_vm0, %v2789_v43  ;;  %2489 = vmatprep.mubr.msk.bf16.mxu1 %vm399_vm0, %v2789_v43 }
  0x9d   : > { %2454 = vmatmul.mubr.msk.bf16.gmra.mrb[56].mxu0 %vm399_vm0, %v2814_v48  ;;  %2490 = vmatmul.mubr.msk.bf16.gmra.mrb[56].mxu1 %vm399_vm0, %v2814_v48 }
  0x9e   : > { %2457 = vmatprep.mubr.msk.bf16.mxu0 %vm399_vm0, %v2819_v49  ;;  %2493 = vmatprep.mubr.msk.bf16.mxu1 %vm399_vm0, %v2819_v49 }
  0xa3   : > { %v2938_v1 = vpop.permute.xlu0 %611  ;;  %v2940_v2 = vpop.permute.xlu1 %621 }
  0xa5   : > { %2458 = vmatmul.mubr.msk.bf16.gmra.mrb[60].mxu0 %vm399_vm0, %v2547_v54  ;;  %2494 = vmatmul.mubr.msk.bf16.gmra.mrb[60].mxu1 %vm399_vm0, %v2547_v54 }
  0xa7   : > { %v2942_v3 = vpop.permute.xlu0 %616  ;;  %v2944_v4 = vpop.permute.xlu1 %626 }
  0xab   : > { %v2946_v5 = vpop.permute.xlu0 %631  ;;  %v2948_v6 = vpop.permute.xlu1 %636 }
  0xb0   : > { %v2950_v7 = vpop.permute.xlu0 %641  ;;  %v2952_v8 = vpop.permute.xlu1 %646 }
  0xb6   : > { %v2954_v9 = vpop.permute.xlu0 %651  ;;  %v2956_v10 = vpop.permute.xlu1 %656 }
  0xb7   : > { %4866 = vst [vmem:[#allocation3_spill] sm:$0xff] %v2954_v9  ;;  %4867 = vst [vmem:[#allocation4_spill] sm:$0xff] %v2956_v10 }
  0xba   : > { %v2958_v11 = vpop.permute.xlu0 %661  ;;  %v2960_v12 = vpop.permute.xlu1 %666 }
  0xbb   : > { %4868 = vst [vmem:[#allocation5_spill] sm:$0xff] %v2958_v11  ;;  %4869 = vst [vmem:[#allocation6_spill] sm:$0xff] %v2960_v12 }
  0xbe   : > { %v2962_v13 = vpop.permute.xlu0 %671  ;;  %v2964_v14 = vpop.permute.xlu1 %676 }
  0xbf   : > { %4870 = vst [vmem:[#allocation7_spill] sm:$0xff] %v2962_v13  ;;  %4871 = vst [vmem:[#allocation8_spill] sm:$0xff] %v2964_v14 }
  0xc2   : > { %v2966_v15 = vpop.permute.xlu0 %681  ;;  %v2968_v16 = vpop.permute.xlu1 %686 }
  0xc3   : > { %4872 = vst [vmem:[#allocation9_spill] sm:$0xff] %v2966_v15  ;;  %4873 = vst [vmem:[#allocation10_spill] sm:$0xff] %v2968_v16 }
  0xc6   : > { %v2970_v17 = vpop.permute.xlu0 %691  ;;  %v2972_v19 = vpop.permute.xlu1 %696 }
  0xc7   : > { %4874 = vst [vmem:[#allocation11_spill] sm:$0xff] %v2970_v17  ;;  %4875 = vst [vmem:[#allocation12_spill] sm:$0xff] %v2972_v19 }
  0xca   : > { %v2974_v27 = vpop.permute.xlu0 %701  ;;  %v2979_v30 = vpop.permute.xlu1 %706 }
  0xcb   : > { %4876 = vst [vmem:[#allocation13_spill] sm:$0xff] %v2974_v27  ;;  %4877 = vst [vmem:[#allocation14_spill] sm:$0xff] %v2979_v30 }
  0xce   : > { %v3042_v61 = vpop.permute.xlu0 %711  ;;  %v3044_v63 = vpop.permute.xlu1 %716 }
  0xcf   : > { %4886 = vst [vmem:[#allocation23_spill] sm:$0xff] %v3042_v61  ;;  %4887 = vst [vmem:[#allocation24_spill] sm:$0xff] %v3044_v63 }
 0x100   : > { %v2359_v18 = vpop.f32.mrb[0].mxu0  ;;  %v2395_v20 = vpop.f32.mrb[0].mxu1 }
 0x101   : > { %v482_v21 = vpop.f32.mrb[1].mxu0  ;;  %v1028_v22 = vpop.f32.mrb[1].mxu1  ;;  %v2977_v28 = vsub.f32 %v2359_v18, %v2940_v2  ;;  %v2982_v31 = vsub.f32 %v2395_v20, %v2940_v2 }
 0x102   : > { %v2360_v23 = vpop.f32.mrb[2].mxu0  ;;  %v2396_v24 = vpop.f32.mrb[2].mxu1  ;;  %v2985_v32 = vsub.f32 %v482_v21, %v2938_v1  ;;  %v2988_v33 = vsub.f32 %v1028_v22, %v2938_v1 }
 0x103   : > { %v485_v25 = vpop.f32.mrb[3].mxu0  ;;  %v1031_v26 = vpop.f32.mrb[3].mxu1  ;;  %4878 = vst [vmem:[#allocation15_spill] sm:$0xff] %v2982_v31  ;;  %v2994_v37 = vsub.f32 %v2360_v23, %v2944_v4  ;;  %v2997_v38 = vsub.f32 %v2396_v24, %v2944_v4 }
 0x104   : > { %4879 = vst [vmem:[#allocation16_spill] sm:$0xff] %v2988_v33  ;;  %v3006_v43 = vsub.f32 %v485_v25, %v2942_v3  ;;  %v3027_v54 = vsub.f32 %v1031_v26, %v2942_v3 }
 0x105   : > { %4880 = vst [vmem:[#allocation17_spill] sm:$0xff] %v2997_v38 }
 0x106   : > { %4884 = vst [vmem:[#allocation21_spill] sm:$0xff] %v3027_v54 }
 0x108   : > { %v2363_v29 = vpop.f32.mrb[4].mxu0  ;;  %v2399_v35 = vpop.f32.mrb[4].mxu1 }
 0x109   : > { %v2991_v34 = vsub.f32 %v2363_v29, %v2950_v7  ;;  %v498_v36 = vpop.f32.mrb[5].mxu0  ;;  %v3000_v39 = vsub.f32 %v2399_v35, %v2950_v7  ;;  %v1044_v41 = vpop.f32.mrb[5].mxu1 }
 0x10a   : > { %v3003_v40 = vsub.f32 %v498_v36, %v2946_v5  ;;  %v2364_v42 = vpop.f32.mrb[6].mxu0  ;;  %v3011_v45 = vsub.f32 %v1044_v41, %v2946_v5  ;;  %v2400_v47 = vpop.f32.mrb[6].mxu1 }
 0x10b   : > { %4881 = vst [vmem:[#allocation18_spill] sm:$0xff] %v3000_v39  ;;  %v803_v44 = vmax.f32 %v2977_v28, %v2991_v34  ;;  %v3014_v46 = vsub.f32 %v2364_v42, %v2952_v8  ;;  %v501_v48 = vpop.f32.mrb[7].mxu0  ;;  %v1189_v49 = vmax.f32 %v2982_v31, %v3000_v39  ;;  %v3021_v51 = vsub.f32 %v2400_v47, %v2952_v8  ;;  %v1047_v53 = vpop.f32.mrb[7].mxu1 }
 0x10c   : > { %4882 = vst [vmem:[#allocation19_spill] sm:$0xff] %v3011_v45  ;;  %v801_v50 = vmax.f32 %v2985_v32, %v3003_v40  ;;  %v3024_v52 = vsub.f32 %v501_v48, %v2948_v6  ;;  %v1187_v55 = vmax.f32 %v2988_v33, %v3011_v45  ;;  %v3034_v57 = vsub.f32 %v1047_v53, %v2948_v6 }
 0x10d   : > { %4883 = vst [vmem:[#allocation20_spill] sm:$0xff] %v3021_v51  ;;  %v804_v56 = vmax.f32 %v2994_v37, %v3014_v46  ;;  %v1190_v58 = vmax.f32 %v2997_v38, %v3021_v51 }
 0x10e   : > { %4885 = vst [vmem:[#allocation22_spill] sm:$0xff] %v3034_v57  ;;  %v802_v59 = vmax.f32 %v3006_v43, %v3024_v52  ;;  %v1188_v60 = vmax.f32 %v3027_v54, %v3034_v57 }
 0x110   : > { %v2367_v62 = vpop.f32.mrb[8].mxu0  ;;  %v2403_v18 = vpop.f32.mrb[8].mxu1 }
 0x111   : > { %v3047_v0 = vsub.f32 %v2367_v62, %v2958_v11  ;;  %v514_v20 = vpop.f32.mrb[9].mxu0  ;;  %v3050_v21 = vsub.f32 %v2403_v18, %v2958_v11  ;;  %v1060_v23 = vpop.f32.mrb[9].mxu1 }
 0x112   : > { %v3053_v22 = vsub.f32 %v514_v20, %v2954_v9  ;;  %v2368_v24 = vpop.f32.mrb[10].mxu0  ;;  %v3057_v26 = vsub.f32 %v1060_v23, %v2954_v9  ;;  %v2404_v35 = vpop.f32.mrb[10].mxu1 }
 0x113   : > { %4888 = vst [vmem:[#allocation25_spill] sm:$0xff] %v3050_v21  ;;  %v807_v25 = vmax.f32 %v803_v44, %v3047_v0  ;;  %v3060_v29 = vsub.f32 %v2368_v24, %v2960_v12  ;;  %v517_v36 = vpop.f32.mrb[11].mxu0  ;;  %v1193_v41 = vmax.f32 %v1189_v49, %v3050_v21  ;;  %v3065_v47 = vsub.f32 %v2404_v35, %v2960_v12  ;;  %v1063_v53 = vpop.f32.mrb[11].mxu1 }
 0x114   : > { %4889 = vst [vmem:[#allocation26_spill] sm:$0xff] %v3057_v26  ;;  %v805_v42 = vmax.f32 %v801_v50, %v3053_v22  ;;  %v3068_v48 = vsub.f32 %v517_v36, %v2956_v10  ;;  %v1191_v44 = vmax.f32 %v1187_v55, %v3057_v26  ;;  %v3073_v18 = vsub.f32 %v1063_v53, %v2956_v10  ;;  %v3078_v23 = vpop.permute.xlu0 %721  ;;  %v3080_v35 = vpop.permute.xlu1 %726 }
 0x115   : > { %4890 = vst [vmem:[#allocation27_spill] sm:$0xff] %v3065_v47  ;;  %v808_v62 = vmax.f32 %v804_v56, %v3060_v29  ;;  %v1194_v20 = vmax.f32 %v1190_v58, %v3065_v47  ;;  %4892 = vst [vmem:[#allocation29_spill] sm:$0xff] %v3078_v23 }
 0x116   : > { %4891 = vst [vmem:[#allocation28_spill] sm:$0xff] %v3073_v18  ;;  %v806_v49 = vmax.f32 %v802_v59, %v3068_v48  ;;  %v1192_v50 = vmax.f32 %v1188_v60, %v3073_v18  ;;  %4893 = vst [vmem:[#allocation30_spill] sm:$0xff] %v3080_v35 }
 0x118   : > { %v2371_v24 = vpop.f32.mrb[12].mxu0  ;;  %v2407_v55 = vpop.f32.mrb[12].mxu1 }
 0x119   : > { %v3083_v36 = vsub.f32 %v2371_v24, %v2966_v15  ;;  %v530_v12 = vpop.f32.mrb[13].mxu0  ;;  %v3086_v56 = vsub.f32 %v2407_v55, %v2966_v15  ;;  %v1076_v58 = vpop.f32.mrb[13].mxu1 }
 0x11a   : > { %v3089_v53 = vsub.f32 %v530_v12, %v2962_v13  ;;  %v2372_v59 = vpop.f32.mrb[14].mxu0  ;;  %v3093_v10 = vsub.f32 %v1076_v58, %v2962_v13  ;;  %v2408_v24 = vpop.f32.mrb[14].mxu1 }
 0x11b   : > { %4894 = vst [vmem:[#allocation31_spill] sm:$0xff] %v3086_v56  ;;  %v811_v60 = vmax.f32 %v807_v25, %v3083_v36  ;;  %v3096_v9 = vsub.f32 %v2372_v59, %v2968_v16  ;;  %v533_v11 = vpop.f32.mrb[15].mxu0  ;;  %v1197_v47 = vmax.f32 %v1193_v41, %v3086_v56  ;;  %v3101_v15 = vsub.f32 %v2408_v24, %v2968_v16  ;;  %v1079_v21 = vpop.f32.mrb[15].mxu1 }
 0x11c   : > { %4895 = vst [vmem:[#allocation32_spill] sm:$0xff] %v3093_v10  ;;  %v809_v55 = vmax.f32 %v805_v42, %v3089_v53  ;;  %v3104_v12 = vsub.f32 %v533_v11, %v2964_v14  ;;  %v1195_v25 = vmax.f32 %v1191_v44, %v3093_v10  ;;  %v3109_v59 = vsub.f32 %v1079_v21, %v2964_v14  ;;  %v3114_v56 = vpop.permute.xlu0 %731  ;;  %v3116_v16 = vpop.permute.xlu1 %736 }
 0x11d   : > { %4896 = vst [vmem:[#allocation33_spill] sm:$0xff] %v3101_v15  ;;  %v812_v58 = vmax.f32 %v808_v62, %v3096_v9  ;;  %v1198_v13 = vmax.f32 %v1194_v20, %v3101_v15  ;;  %4898 = vst [vmem:[#allocation35_spill] sm:$0xff] %v3114_v56 }
 0x11e   : > { %4897 = vst [vmem:[#allocation34_spill] sm:$0xff] %v3109_v59  ;;  %v810_v41 = vmax.f32 %v806_v49, %v3104_v12  ;;  %v1196_v42 = vmax.f32 %v1192_v50, %v3109_v59  ;;  %4899 = vst [vmem:[#allocation36_spill] sm:$0xff] %v3116_v16 }
 0x120   : > { %v2375_v24 = vpop.f32.mrb[16].mxu0  ;;  %v2411_v44 = vpop.f32.mrb[16].mxu1 }
 0x121   : > { %v3119_v11 = vsub.f32 %v2375_v24, %v2974_v27  ;;  %v546_v10 = vpop.f32.mrb[17].mxu0  ;;  %v3122_v62 = vsub.f32 %v2411_v44, %v2974_v27  ;;  %v1092_v20 = vpop.f32.mrb[17].mxu1 }
 0x122   : > { %v3125_v21 = vsub.f32 %v546_v10, %v2970_v17  ;;  %v2376_v49 = vpop.f32.mrb[18].mxu0  ;;  %v3129_v14 = vsub.f32 %v1092_v20, %v2970_v17  ;;  %v2412_v24 = vpop.f32.mrb[18].mxu1 }
 0x123   : > { %4900 = vst [vmem:[#allocation37_spill] sm:$0xff] %v3122_v62  ;;  %v815_v50 = vmax.f32 %v811_v60, %v3119_v11  ;;  %v3132_v15 = vsub.f32 %v2376_v49, %v2979_v30  ;;  %v549_v59 = vpop.f32.mrb[19].mxu0  ;;  %v1201_v18 = vmax.f32 %v1197_v47, %v3122_v62  ;;  %v3137_v27 = vsub.f32 %v2412_v24, %v2979_v30  ;;  %v1095_v26 = vpop.f32.mrb[19].mxu1 }
 0x124   : > { %4901 = vst [vmem:[#allocation38_spill] sm:$0xff] %v3129_v14  ;;  %v813_v44 = vmax.f32 %v809_v55, %v3125_v21  ;;  %v3140_v10 = vsub.f32 %v549_v59, %v2972_v19  ;;  %v1199_v60 = vmax.f32 %v1195_v25, %v3129_v14  ;;  %v3145_v49 = vsub.f32 %v1095_v26, %v2972_v19  ;;  %v3150_v62 = vpop.permute.xlu0 %741  ;;  %v3152_v30 = vpop.permute.xlu1 %746 }
 0x125   : > { %4902 = vst [vmem:[#allocation39_spill] sm:$0xff] %v3137_v27  ;;  %v816_v20 = vmax.f32 %v812_v58, %v3132_v15  ;;  %v1202_v17 = vmax.f32 %v1198_v13, %v3137_v27  ;;  %4904 = vst [vmem:[#allocation41_spill] sm:$0xff] %v3150_v62 }
 0x126   : > { %4903 = vst [vmem:[#allocation40_spill] sm:$0xff] %v3145_v49  ;;  %v814_v47 = vmax.f32 %v810_v41, %v3140_v10  ;;  %v1200_v55 = vmax.f32 %v1196_v42, %v3145_v49  ;;  %4905 = vst [vmem:[#allocation42_spill] sm:$0xff] %v3152_v30 }
 0x128   : > { %v2379_v24 = vpop.f32.mrb[20].mxu0  ;;  %v2415_v25 = vpop.f32.mrb[20].mxu1 }
 0x129   : > { %v3155_v59 = vsub.f32 %v2379_v24, %v3078_v23  ;;  %v562_v14 = vpop.f32.mrb[21].mxu0  ;;  %v3158_v58 = vsub.f32 %v2415_v25, %v3078_v23  ;;  %v1108_v13 = vpop.f32.mrb[21].mxu1 }
 0x12a   : > { %v3161_v26 = vsub.f32 %v562_v14, %v3042_v61  ;;  %v2380_v41 = vpop.f32.mrb[22].mxu0  ;;  %v3165_v19 = vsub.f32 %v1108_v13, %v3042_v61  ;;  %v2416_v24 = vpop.f32.mrb[22].mxu1 }
 0x12b   : > { %4906 = vst [vmem:[#allocation43_spill] sm:$0xff] %v3158_v58  ;;  %v819_v42 = vmax.f32 %v815_v50, %v3155_v59  ;;  %v3168_v27 = vsub.f32 %v2380_v41, %v3080_v35  ;;  %v565_v49 = vpop.f32.mrb[23].mxu0  ;;  %v1205_v51 = vmax.f32 %v1201_v18, %v3158_v58  ;;  %v3173_v23 = vsub.f32 %v2416_v24, %v3080_v35  ;;  %v1111_v39 = vpop.f32.mrb[23].mxu1 }
 0x12c   : > { %4907 = vst [vmem:[#allocation44_spill] sm:$0xff] %v3165_v19  ;;  %v817_v25 = vmax.f32 %v813_v44, %v3161_v26  ;;  %v3176_v14 = vsub.f32 %v565_v49, %v3044_v63  ;;  %v1203_v50 = vmax.f32 %v1199_v60, %v3165_v19  ;;  %v3181_v41 = vsub.f32 %v1111_v39, %v3044_v63  ;;  %v3186_v58 = vpop.permute.xlu0 %751  ;;  %v3188_v35 = vpop.permute.xlu1 %756 }
 0x12d   : > { %4908 = vst [vmem:[#allocation45_spill] sm:$0xff] %v3173_v23  ;;  %v820_v13 = vmax.f32 %v816_v20, %v3168_v27  ;;  %v1206_v61 = vmax.f32 %v1202_v17, %v3173_v23  ;;  %4910 = vst [vmem:[#allocation47_spill] sm:$0xff] %v3186_v58 }
 0x12e   : > { %4909 = vst [vmem:[#allocation46_spill] sm:$0xff] %v3181_v41  ;;  %v818_v18 = vmax.f32 %v814_v47, %v3176_v14  ;;  %v1204_v44 = vmax.f32 %v1200_v55, %v3181_v41  ;;  %4911 = vst [vmem:[#allocation48_spill] sm:$0xff] %v3188_v35 }
 0x130   : > { %v2383_v24 = vpop.f32.mrb[24].mxu0  ;;  %v2419_v60 = vpop.f32.mrb[24].mxu1 }
 0x131   : > { %v3191_v49 = vsub.f32 %v2383_v24, %v3150_v62  ;;  %v578_v19 = vpop.f32.mrb[25].mxu0  ;;  %v3194_v20 = vsub.f32 %v2419_v60, %v3150_v62  ;;  %v1124_v17 = vpop.f32.mrb[25].mxu1 }
 0x132   : > { %v3197_v39 = vsub.f32 %v578_v19, %v3114_v56  ;;  %v2384_v47 = vpop.f32.mrb[26].mxu0  ;;  %v3201_v23 = vsub.f32 %v1124_v17, %v3114_v56  ;;  %v2420_v24 = vpop.f32.mrb[26].mxu1 }
 0x133   : > { %4912 = vst [vmem:[#allocation49_spill] sm:$0xff] %v3194_v20  ;;  %v823_v55 = vmax.f32 %v819_v42, %v3191_v49  ;;  %v3204_v41 = vsub.f32 %v2384_v47, %v3152_v30  ;;  %v581_v57 = vpop.f32.mrb[27].mxu0  ;;  %v1209_v45 = vmax.f32 %v1205_v51, %v3194_v20  ;;  %v3209_v19 = vsub.f32 %v2420_v24, %v3152_v30  ;;  %v1127_v63 = vpop.f32.mrb[27].mxu1 }
 0x134   : > { %4913 = vst [vmem:[#allocation50_spill] sm:$0xff] %v3201_v23  ;;  %v821_v60 = vmax.f32 %v817_v25, %v3197_v39  ;;  %v3212_v62 = vsub.f32 %v581_v57, %v3116_v16  ;;  %v1207_v42 = vmax.f32 %v1203_v50, %v3201_v23  ;;  %v3217_v47 = vsub.f32 %v1127_v63, %v3116_v16  ;;  %v3221_v20 = vpop.permute.xlu0 %761  ;;  %v3227_v38 = vpop.permute.xlu1 %766 }
 0x135   : > { %4914 = vst [vmem:[#allocation51_spill] sm:$0xff] %v3209_v19  ;;  %v824_v17 = vmax.f32 %v820_v13, %v3204_v41  ;;  %v1210_v56 = vmax.f32 %v1206_v61, %v3209_v19  ;;  %4916 = vst [vmem:[#allocation53_spill] sm:$0xff] %v3221_v20  ;;  %v4917_v25 = vlaneseq }
 0x136   : > { %4915 = vst [vmem:[#allocation52_spill] sm:$0xff] %v3217_v47  ;;  %v822_v51 = vmax.f32 %v818_v18, %v3212_v62  ;;  %v1208_v57 = vmax.f32 %v1204_v44, %v3217_v47  ;;  %4919 = vst [vmem:[#allocation55_spill] sm:$0xff] %v3227_v38 }
 0x137   : > { %v3224_v24 = vshrl.u32 %v4917_v25, 7 }
 0x138   : > { %v2387_v30 = vpop.f32.mrb[28].mxu0  ;;  %v2423_v13 = vpop.f32.mrb[28].mxu1 }
 0x139   : > { %4918 = vst [vmem:[#allocation54_spill] sm:$0xff] %v3224_v24  ;;  %v3230_v50 = vsub.f32 %v2387_v30, %v3221_v20  ;;  %v594_v63 = vpop.f32.mrb[29].mxu0  ;;  %v3233_v16 = vsub.f32 %v2423_v13, %v3221_v20  ;;  %v1140_v18 = vpop.f32.mrb[29].mxu1  ;;  %v3239_v23 = vadd.s32 8, %v3224_v24  ;;  %v3249_v13 = vadd.s32 16, %v3224_v24 }
 0x13a   : > { %v3236_v61 = vsub.f32 %v594_v63, %v3186_v58  ;;  %v2388_v19 = vpop.f32.mrb[30].mxu0  ;;  %v3243_v47 = vsub.f32 %v1140_v18, %v3186_v58  ;;  %v2424_v25 = vpop.f32.mrb[30].mxu1  ;;  %v3262_v33 = vadd.s32 24, %v3224_v24 }
 0x13b   : > { %4920 = vst [vmem:[#allocation56_spill] sm:$0xff] %v3233_v16  ;;  %v827_v44 = vmax.f32 %v823_v55, %v3230_v50  ;;  %v3246_v30 = vsub.f32 %v2388_v19, %v3227_v38  ;;  %4922 = vst [vmem:[#allocation58_spill] sm:$0xff] %v3249_v13  ;;  %v597_v20 = vpop.f32.mrb[31].mxu0  ;;  %v1213_v63 = vmax.f32 %v1209_v45, %v3233_v16  ;;  %v1143_v18 = vpop.f32.mrb[31].mxu1 }
 0x13c   : > { %4921 = vst [vmem:[#allocation57_spill] sm:$0xff] %v3243_v47  ;;  %v825_v31 = vmax.f32 %v821_v60, %v3236_v61  ;;  %v3254_v54 = vsub.f32 %v2424_v25, %v3227_v38  ;;  %v3257_v55 = vsub.f32 %v597_v20, %v3188_v35  ;;  %v1211_v58 = vmax.f32 %v1207_v42, %v3243_v47 }
 0x13d   : > { %v828_v19 = vmax.f32 %v824_v17, %v3246_v30  ;;  %4924 = vst [vmem:[#allocation60_spill] sm:$0xff] %v3262_v33  ;;  %v3265_v13 = vsub.f32 %v1143_v18, %v3188_v35  ;;  %v3269_v60 = vadd.s32 32, %v3224_v24  ;;  %v3272_v25 = vadd.s32 40, %v3224_v24 }
 0x13e   : > { %4923 = vst [vmem:[#allocation59_spill] sm:$0xff] %v3254_v54  ;;  %v1214_v45 = vmax.f32 %v1210_v56, %v3254_v54  ;;  %v826_v20 = vmax.f32 %v822_v51, %v3257_v55  ;;  %v3276_v42 = vadd.s32 48, %v3224_v24  ;;  %v3279_v17 = vadd.s32 56, %v3224_v24 }
 0x13f   : > { %4925 = vst [vmem:[#allocation61_spill] sm:$0xff] %v3265_v13  ;;  %4926 = vst [vmem:[#allocation62_spill] sm:$0xff] %v3269_v60  ;;  %v830_v38 = vmax.f32 %v827_v44, %v828_v19  ;;  %v1212_v18 = vmax.f32 %v1208_v57, %v3265_v13  ;;  %v3283_v56 = vadd.s32 64, %v3224_v24  ;;  %v3286_v54 = vadd.s32 72, %v3224_v24 }
 0x140   : > { %4927 = vst [vmem:[#allocation63_spill] sm:$0xff] %v3272_v25  ;;  %4928 = vst [vmem:[#allocation64_spill] sm:$0xff] %v3276_v42  ;;  %v1216_v35 = vmax.f32 %v1213_v63, %v1214_v45  ;;  %v829_v16 = vmax.f32 %v825_v31, %v826_v20  ;;  %v2431_v47 = vpop.f32.mrb[32].mxu0  ;;  %v3289_v51 = vadd.s32 80, %v3224_v24  ;;  %v3292_v44 = vadd.s32 88, %v3224_v24  ;;  %v2467_v57 = vpop.f32.mrb[32].mxu1 }
 0x141   : > { %4929 = vst [vmem:[#allocation65_spill] sm:$0xff] %v3279_v17  ;;  %4930 = vst [vmem:[#allocation66_spill] sm:$0xff] %v3283_v56  ;;  %v3295_v19 = vadd.s32 96, %v3224_v24  ;;  %v1215_v17 = vmax.f32 %v1211_v58, %v1212_v18  ;;  %v1410_v63 = vpop.f32.mrb[33].mxu0  ;;  %v3298_v45 = vadd.s32 104, %v3224_v24  ;;  %v3301_v13 = vadd.s32 112, %v3224_v24 }
 0x142   : > { %4931 = vst [vmem:[#allocation67_spill] sm:$0xff] %v3286_v54  ;;  %4932 = vst [vmem:[#allocation68_spill] sm:$0xff] %v3289_v51  ;;  %v3304_v31 = vadd.s32 120, %v3224_v24  ;;  %v831_v20 = vmax.f32 %v829_v16, %v830_v38  ;;  %v1792_v51 = vpop.f32.mrb[33].mxu1  ;;  %v2432_v54 = vpop.f32.mrb[34].mxu0  ;;  %v3313_v58 = vadd.s32 144, %v3224_v24 }
 0x143   : > { %4933 = vst [vmem:[#allocation69_spill] sm:$0xff] %v3292_v44  ;;  %4934 = vst [vmem:[#allocation70_spill] sm:$0xff] %v3295_v19  ;;  %v3307_v44 = vadd.s32 128, %v3224_v24  ;;  %v3310_v19 = vadd.s32 136, %v3224_v24  ;;  %v1217_v18 = vmax.f32 %v1215_v17, %v1216_v35  ;;  %v1413_v56 = vpop.f32.mrb[35].mxu0  ;;  %v3322_v16 = vadd.s32 168, %v3224_v24 }
 0x144   : > { %4935 = vst [vmem:[#allocation71_spill] sm:$0xff] %v3298_v45  ;;  %4936 = vst [vmem:[#allocation72_spill] sm:$0xff] %v3301_v13  ;;  %v2468_v45 = vpop.f32.mrb[34].mxu1  ;;  %v3316_v13 = vadd.s32 152, %v3224_v24  ;;  %v832_v38 = vrot.slane %v831_v20, 4  ;;  %v3325_v42 = vadd.s32 176, %v3224_v24 }
 0x145   : > { %4937 = vst [vmem:[#allocation73_spill] sm:$0xff] %v3304_v31  ;;  %4938 = vst [vmem:[#allocation74_spill] sm:$0xff] %v3307_v44  ;;  %v3319_v31 = vadd.s32 160, %v3224_v24  ;;  %v1795_v44 = vpop.f32.mrb[35].mxu1  ;;  %v3331_v35 = vadd.s32 192, %v3224_v24  ;;  %v1218_v17 = vrot.slane %v1217_v18, 4 }
 0x146   : > { %4939 = vst [vmem:[#allocation75_spill] sm:$0xff] %v3310_v19  ;;  %4940 = vst [vmem:[#allocation76_spill] sm:$0xff] %v3313_v58  ;;  %v3328_v19 = vadd.s32 184, %v3224_v24  ;;  %v833_v58 = vmax.f32 %v831_v20, %v832_v38  ;;  %v3343_v25 = vadd.s32 224, %v3224_v24 }
 0x147   : > { %4941 = vst [vmem:[#allocation77_spill] sm:$0xff] %v3316_v13  ;;  %4942 = vst [vmem:[#allocation78_spill] sm:$0xff] %v3319_v31  ;;  %v3334_v13 = vadd.s32 200, %v3224_v24  ;;  %v3337_v31 = vadd.s32 208, %v3224_v24 }
 0x148   : > { %4943 = vst [vmem:[#allocation79_spill] sm:$0xff] %v3322_v16  ;;  %4944 = vst [vmem:[#allocation80_spill] sm:$0xff] %v3325_v42  ;;  %v3340_v16 = vadd.s32 216, %v3224_v24  ;;  %v3346_v42 = vadd.s32 232, %v3224_v24  ;;  %v834_v60 = vrot.slane %v833_v58, 2  ;;  %v2435_v20 = vpop.f32.mrb[36].mxu0 }
 0x149   : > { %4945 = vst [vmem:[#allocation81_spill] sm:$0xff] %v3328_v19  ;;  %4946 = vst [vmem:[#allocation82_spill] sm:$0xff] %v3331_v35  ;;  %v1219_v19 = vmax.f32 %v1217_v18, %v1218_v17  ;;  %v3349_v35 = vsub.f32 %v2431_v47, %v2940_v2  ;;  %v3364_v18 = vsub.f32 %v2468_v45, %v2944_v4  ;;  %v2471_v17 = vpop.f32.mrb[36].mxu1 }
 0x14a   : > { %4947 = vst [vmem:[#allocation83_spill] sm:$0xff] %v3334_v13  ;;  %4948 = vst [vmem:[#allocation84_spill] sm:$0xff] %v3337_v31  ;;  %v3352_v13 = vsub.f32 %v2467_v57, %v2940_v2  ;;  %v3355_v31 = vsub.f32 %v1410_v63, %v2938_v1  ;;  %v3367_v47 = vsub.f32 %v2435_v20, %v2950_v7  ;;  %v1426_v2 = vpop.f32.mrb[37].mxu0 }
 0x14b   : > { %4949 = vst [vmem:[#allocation85_spill] sm:$0xff] %v3340_v16  ;;  %4950 = vst [vmem:[#allocation86_spill] sm:$0xff] %v3343_v25  ;;  %v3358_v16 = vsub.f32 %v1792_v51, %v2938_v1  ;;  %v1220_v38 = vrot.slane %v1219_v19, 2  ;;  %v3361_v25 = vsub.f32 %v2432_v54, %v2944_v4  ;;  %v835_v57 = vmax.f32 %v833_v58, %v834_v60  ;;  %v1808_v54 = vpop.f32.mrb[37].mxu1 }
 0x14c   : > { %4951 = vst [vmem:[#allocation87_spill] sm:$0xff] %v3346_v42  ;;  %4952 = vst [vmem:[#allocation88_spill] sm:$0xff] %v3349_v35  ;;  %v3370_v63 = vsub.f32 %v1413_v56, %v2942_v3  ;;  %v3373_v1 = vsub.f32 %v2471_v17, %v2950_v7  ;;  %v3376_v51 = vsub.f32 %v1426_v2, %v2946_v5  ;;  %v2436_v42 = vpop.f32.mrb[38].mxu0  ;;  %v2472_v56 = vpop.f32.mrb[38].mxu1  ;;  %v3401_v4 = vadd.s32 240, %v3224_v24 }
 0x14d   : > { %4953 = vst [vmem:[#allocation89_spill] sm:$0xff] %v3352_v13  ;;  %4954 = vst [vmem:[#allocation90_spill] sm:$0xff] %v3355_v31  ;;  %v1221_v33 = vmax.f32 %v1219_v19, %v1220_v38  ;;  %v3381_v45 = vsub.f32 %v1808_v54, %v2946_v5  ;;  %v3384_v60 = vsub.f32 %v2436_v42, %v2952_v8  ;;  %v1429_v58 = vpop.f32.mrb[39].mxu0  ;;  %v836_v20 = vrot.slane %v835_v57, 1  ;;  %v1811_v38 = vpop.f32.mrb[39].mxu1  ;;  %v4992_v31 = vld [vmem:[#allocation69_spill] sm:$0xff] }
 0x14e   : > { %4955 = vst [vmem:[#allocation91_spill] sm:$0xff] %v3358_v16  ;;  %4956 = vst [vmem:[#allocation92_spill] sm:$0xff] %v3361_v25  ;;  %v3391_v19 = vsub.f32 %v2472_v56, %v2952_v8  ;;  %v3398_v54 = vsub.f32 %v1429_v58, %v2948_v6  ;;  %v3404_v7 = vadd.s32 248, %v3224_v24  ;;  %v3413_v5 = vsub.f32 %v1795_v44, %v2942_v3  ;;  %v4983_v25 = vld [vmem:[#allocation64_spill] sm:$0xff]  ;;  %v4988_v16 = vld [vmem:[#allocation67_spill] sm:$0xff] }
 0x14f   : > { %4957 = vst [vmem:[#allocation93_spill] sm:$0xff] %v3364_v18  ;;  %4958 = vst [vmem:[#allocation94_spill] sm:$0xff] %v3367_v47  ;;  %v1222_v2 = vrot.slane %v1221_v33, 1  ;;  %v3406_v17 = vmax.f32 %v835_v57, %v836_v20  ;;  %v3418_v42 = vsub.f32 %v1811_v38, %v2948_v6  ;;  %v5000_v13 = vld [vmem:[#allocation72_spill] sm:$0xff]  ;;  %v5002_v47 = vld [vmem:[#allocation73_spill] sm:$0xff] }
 0x150   : > { %4959 = vst [vmem:[#allocation95_spill] sm:$0xff] %v3370_v63  ;;  %4960 = vst [vmem:[#allocation96_spill] sm:$0xff] %v3373_v1  ;;  %v3428_v3 = vpop.f32.mrb[40].mxu0  ;;  %v3438_v6 = vpop.f32.mrb[40].mxu1  ;;  %v4998_v1 = vld [vmem:[#allocation71_spill] sm:$0xff] }
 0x151   : > { %4961 = vst [vmem:[#allocation97_spill] sm:$0xff] %v3376_v51  ;;  %4962 = vst [vmem:[#allocation98_spill] sm:$0xff] %v3381_v45  ;;  %v3410_v56 = vmax.f32 %v1221_v33, %v1222_v2  ;;  %vm838_vm1 = vcmp.eq.f32.partialorder %v2985_v32, %v3406_v17  ;;  %vm839_vm2 = vcmp.eq.f32.partialorder %v3006_v43, %v3406_v17  ;;  %v3440_v33 = vpop.f32.mrb[41].mxu0  ;;  %v3450_v44 = vpop.f32.mrb[41].mxu1  ;;  %v4990_v51 = vld [vmem:[#allocation68_spill] sm:$0xff] }
 0x152   : > { %4963 = vst [vmem:[#allocation99_spill] sm:$0xff] %v3384_v60  ;;  %4964 = vst [vmem:[#allocation100_spill] sm:$0xff] %v3391_v19  ;;  %vm840_vm3 = vcmp.eq.f32.partialorder %v2977_v28, %v3406_v17  ;;  %vm841_vm4 = vcmp.eq.f32.partialorder %v2994_v37, %v3406_v17  ;;  %vm842_vm5 = vcmp.eq.f32.partialorder %v3003_v40, %v3406_v17  ;;  %v3452_v57 = vpop.f32.mrb[42].mxu0  ;;  %v3462_v20 = vpop.f32.mrb[42].mxu1  ;;  %v870_v58 = vsel %vm838_vm1, %v3224_v24, 256  ;;  %v4979_v19 = vld [vmem:[#allocation60_spill] sm:$0xff] }
 0x153   : > { %4965 = vst [vmem:[#allocation101_spill] sm:$0xff] %v3398_v54  ;;  %4966 = vst [vmem:[#allocation102_spill] sm:$0xff] %v3401_v4  ;;  %vm843_vm6 = vcmp.eq.f32.partialorder %v3024_v52, %v3406_v17  ;;  %vm844_vm7 = vcmp.eq.f32.partialorder %v2991_v34, %v3406_v17  ;;  %vm845_vm8 = vcmp.eq.f32.partialorder %v3014_v46, %v3406_v17  ;;  %v3464_v38 = vpop.f32.mrb[43].mxu0  ;;  %v3474_v2 = vpop.f32.mrb[43].mxu1  ;;  %v871_v8 = vsel %vm839_vm2, %v3239_v23, 256  ;;  %v4978_v54 = vld [vmem:[#allocation58_spill] sm:$0xff] }
 0x154   : > { %4967 = vst [vmem:[#allocation103_spill] sm:$0xff] %v3404_v7  ;;  %4968 = vst [vmem:[#allocation104_spill] sm:$0xff] %v3413_v5  ;;  %vm846_vm9 = vcmp.eq.f32.partialorder %v3053_v22, %v3406_v17  ;;  %vm863_vm14 = vcmp.eq.f32.partialorder %v3212_v62, %v3406_v17  ;;  %vm864_vm10 = vcmp.eq.f32.partialorder %v3191_v49, %v3406_v17  ;;  %v872_v63 = vsel %vm840_vm3, %v4978_v54, 256  ;;  %v4982_v60 = vld [vmem:[#allocation63_spill] sm:$0xff]  ;;  %v4987_v40 = vld [vmem:[#allocation66_spill] sm:$0xff] }
 0x155   : > { %4969 = vst [vmem:[#allocation105_spill] sm:$0xff] %v3418_v42  ;;  %4970 = vst [vmem:[#allocation106_spill] sm:$0xff] %v3428_v3  ;;  %vm865_vm0 = vcmp.eq.f32.partialorder %v3204_v41, %v3406_v17  ;;  %vm866_vm15 = vcmp.eq.f32.partialorder %v3236_v61, %v3406_v17  ;;  %vm867_vm12 = vcmp.eq.f32.partialorder %v3257_v55, %v3406_v17  ;;  %v873_v18 = vsel %vm841_vm4, %v4979_v19, 256  ;;  %v4996_v22 = vld [vmem:[#allocation70_spill] sm:$0xff]  ;;  %v5017_v5 = vld [vmem:[#allocation79_spill] sm:$0xff] }
 0x156   : > { %4971 = vst [vmem:[#allocation107_spill] sm:$0xff] %v3438_v6  ;;  %4972 = vst [vmem:[#allocation108_spill] sm:$0xff] %v3440_v33  ;;  %vm868_vm11 = vcmp.eq.f32.partialorder %v3230_v50, %v3406_v17  ;;  %vm869_vm13 = vcmp.eq.f32.partialorder %v3246_v30, %v3406_v17  ;;  %v875_v43 = vsel %vm843_vm6, %v4982_v60, 256  ;;  %v876_v28 = vsel %vm844_vm7, %v4983_v25, 256  ;;  %v5010_v33 = vld [vmem:[#allocation76_spill] sm:$0xff]  ;;  %v5012_v6 = vld [vmem:[#allocation77_spill] sm:$0xff] }
 0x157   : > { %4973 = vst [vmem:[#allocation109_spill] sm:$0xff] %v3450_v44  ;;  %4974 = vst [vmem:[#allocation110_spill] sm:$0xff] %v3452_v57  ;;  %v878_v52 = vsel %vm846_vm9, %v4987_v40, 256  ;;  %vm4989_vm1 = vcmp.eq.f32.partialorder %v3068_v48, %v3406_v17  ;;  %vm4991_vm2 = vcmp.eq.f32.partialorder %v3047_v0, %v3406_v17  ;;  %vm4993_vm3 = vcmp.eq.f32.partialorder %v3060_v29, %v3406_v17  ;;  %v5008_v44 = vld [vmem:[#allocation75_spill] sm:$0xff]  ;;  %v5015_v3 = vld [vmem:[#allocation78_spill] sm:$0xff] }
 0x158   : > { %4975 = vst [vmem:[#allocation111_spill] sm:$0xff] %v3462_v20  ;;  %4976 = vst [vmem:[#allocation112_spill] sm:$0xff] %v3464_v38  ;;  %v4981_v38 = vld [vmem:[#allocation62_spill] sm:$0xff]  ;;  %v4984_v20 = vld [vmem:[#allocation65_spill] sm:$0xff]  ;;  %v879_v34 = vsel %vm4989_vm1, %v4988_v16, 256  ;;  %v880_v46 = vsel %vm4991_vm2, %v4990_v51, 256  ;;  %vm4997_vm4 = vcmp.eq.f32.partialorder %v3089_v53, %v3406_v17  ;;  %vm5001_vm6 = vcmp.eq.f32.partialorder %v3083_v36, %v3406_v17 }
 0x159   : > { %4977 = vst [vmem:[#allocation113_spill] sm:$0xff] %v3474_v2  ;;  %v3516_v2 = vpop.f32.mrb[44].mxu0  ;;  %v874_v32 = vsel %vm842_vm5, %v4981_v38, 256  ;;  %v877_v37 = vsel %vm845_vm8, %v4984_v20, 256  ;;  %v882_v48 = vsel %vm4997_vm4, %v4996_v22, 256  ;;  %vm4999_vm5 = vcmp.eq.f32.partialorder %v3104_v12, %v3406_v17  ;;  %v5006_v53 = vld [vmem:[#allocation74_spill] sm:$0xff] }
 0x15a   : > { %4980 = vst [vmem:[#allocation58_spill] sm:$0xff] %v3516_v2  ;;  %v3534_v2 = vpop.f32.mrb[44].mxu1  ;;  %v3536_v45 = vpop.f32.mrb[45].mxu0  ;;  %v883_v0 = vsel %vm4999_vm5, %v4998_v1, 256  ;;  %v884_v29 = vsel %vm5001_vm6, %v5000_v13, 256  ;;  %vm5003_vm7 = vcmp.eq.f32.partialorder %v3096_v9, %v3406_v17  ;;  %vm5007_vm8 = vcmp.eq.f32.partialorder %v3125_v21, %v3406_v17  ;;  %v5019_v42 = vld [vmem:[#allocation80_spill] sm:$0xff] }
 0x15b   : > { %4985 = vst [vmem:[#allocation62_spill] sm:$0xff] %v3534_v2  ;;  %4986 = vst [vmem:[#allocation65_spill] sm:$0xff] %v3536_v45  ;;  %v881_v45 = vsel %vm4993_vm3, %v4992_v31, 256  ;;  %v3554_v2 = vpop.f32.mrb[45].mxu1  ;;  %v3556_v57 = vpop.f32.mrb[46].mxu0  ;;  %v886_v12 = vsel %vm5007_vm8, %v5006_v53, 256  ;;  %vm5009_vm9 = vcmp.eq.f32.partialorder %v3140_v10, %v3406_v17  ;;  %vm5011_vm1 = vcmp.eq.f32.partialorder %v3119_v11, %v3406_v17 }
 0x15c   : > { %4994 = vst [vmem:[#allocation114_spill] sm:$0xff] %v3554_v2  ;;  %4995 = vst [vmem:[#allocation115_spill] sm:$0xff] %v3556_v57  ;;  %v885_v57 = vsel %vm5003_vm7, %v5002_v47, 256  ;;  %v3574_v2 = vpop.f32.mrb[46].mxu1  ;;  %v3576_v35 = vpop.f32.mrb[47].mxu0  ;;  %v887_v36 = vsel %vm5009_vm9, %v5008_v44, 256  ;;  %vm5013_vm2 = vcmp.eq.f32.partialorder %v3132_v15, %v3406_v17  ;;  %vm5016_vm3 = vcmp.eq.f32.partialorder %v3161_v26, %v3406_v17 }
 0x15d   : > { %5004 = vst [vmem:[#allocation116_spill] sm:$0xff] %v3574_v2  ;;  %5005 = vst [vmem:[#allocation117_spill] sm:$0xff] %v3576_v35  ;;  %v888_v9 = vsel %vm5011_vm1, %v5010_v33, 256  ;;  %v889_v35 = vsel %vm5013_vm2, %v5012_v6, 256  ;;  %v3594_v2 = vpop.f32.mrb[47].mxu1  ;;  %v890_v21 = vsel %vm5016_vm3, %v5015_v3, 256  ;;  %vm5018_vm4 = vcmp.eq.f32.partialorder %v3176_v14, %v3406_v17 }
 0x15e   : > { %5014 = vst [vmem:[#allocation118_spill] sm:$0xff] %v3594_v2  ;;  %v891_v10 = vsel %vm5018_vm4, %v5017_v5, 256  ;;  %vm5020_vm5 = vcmp.eq.f32.partialorder %v3155_v59, %v3406_v17  ;;  %v5021_v33 = vld [vmem:[#allocation81_spill] sm:$0xff]  ;;  %vm5022_vm6 = vcmp.eq.f32.partialorder %v3168_v27, %v3406_v17  ;;  %v5023_v2 = vld [vmem:[#allocation82_spill] sm:$0xff]  ;;  %vm5024_vm7 = vcmp.eq.f32.partialorder %v3197_v39, %v3406_v17  ;;  %v5025_v3 = vld [vmem:[#allocation83_spill] sm:$0xff] }
 0x15f   : > { %v892_v11 = vsel %vm5020_vm5, %v5019_v42, 256  ;;  %v893_v15 = vsel %vm5022_vm6, %v5021_v33, 256  ;;  %v3616_v26 = vsel %vm5024_vm7, %v5023_v2, 256  ;;  %v3622_v14 = vsel %vm863_vm14, %v5025_v3, 256  ;;  %v5026_v5 = vld [vmem:[#allocation84_spill] sm:$0xff]  ;;  %v5027_v27 = vld [vmem:[#allocation85_spill] sm:$0xff] }
 0x160   : > { %v3628_v59 = vsel %vm864_vm10, %v5026_v5, 256  ;;  %v3634_v33 = vsel %vm865_vm0, %v5027_v27, 256  ;;  %v5028_v39 = vld [vmem:[#allocation86_spill] sm:$0xff]  ;;  %v5029_v62 = vld [vmem:[#allocation87_spill] sm:$0xff]  ;;  %v3652_v49 = vsel %vm868_vm11, %v3401_v4, 256  ;;  %v3658_v41 = vsel %vm869_vm13, %v3404_v7, 256 }
 0x161   : > { %v3640_v2 = vsel %vm866_vm15, %v5028_v39, 256  ;;  %v3646_v3 = vsel %vm867_vm12, %v5029_v62, 256  ;;  %vm902_vm10 = vcmp.lt.s32.totalorder %v870_v58, %v874_v32  ;;  %vm904_vm14 = vcmp.lt.s32.totalorder %v871_v8, %v875_v43  ;;  %v3660_v61 = vpop.f32.mrb[48].mxu0  ;;  %v3662_v5 = vpop.f32.mrb[48].mxu1 }
 0x162   : > { %vm906_vm15 = vcmp.lt.s32.totalorder %v872_v63, %v876_v28  ;;  %vm908_vm0 = vcmp.lt.s32.totalorder %v873_v18, %v877_v37  ;;  %5030 = vst [vmem:[#allocation119_spill] sm:$0xff] %v3660_v61  ;;  %v903_v55 = vsel %vm902_vm10, %v870_v58, %v874_v32  ;;  %v905_v62 = vsel %vm904_vm14, %v871_v8, %v875_v43  ;;  %v3664_v50 = vpop.f32.mrb[49].mxu0  ;;  %v3666_v30 = vpop.f32.mrb[49].mxu1 }
 0x163   : > { %v907_v39 = vsel %vm906_vm15, %v872_v63, %v876_v28  ;;  %v909_v27 = vsel %vm908_vm0, %v873_v18, %v877_v37  ;;  %vm910_vm11 = vcmp.lt.s32.totalorder %v903_v55, %v878_v52  ;;  %vm912_vm12 = vcmp.lt.s32.totalorder %v905_v62, %v879_v34  ;;  %v3668_v17 = vpop.f32.mrb[50].mxu0  ;;  %v3670_v58 = vpop.f32.mrb[50].mxu1 }
 0x164   : > { %vm914_vm8 = vcmp.lt.s32.totalorder %v907_v39, %v880_v46  ;;  %vm916_vm9 = vcmp.lt.s32.totalorder %v909_v27, %v881_v45  ;;  %5031 = vst [vmem:[#allocation120_spill] sm:$0xff] %v3668_v17  ;;  %v911_v7 = vsel %vm910_vm11, %v903_v55, %v878_v52  ;;  %v913_v4 = vsel %vm912_vm12, %v905_v62, %v879_v34  ;;  %v3672_v63 = vpop.f32.mrb[51].mxu0  ;;  %v3674_v18 = vpop.f32.mrb[51].mxu1  ;;  %v5045_v55 = vld [vmem:[#allocation15_spill] sm:$0xff] }
 0x165   : > { %v915_v42 = vsel %vm914_vm8, %v907_v39, %v880_v46  ;;  %v917_v61 = vsel %vm916_vm9, %v909_v27, %v881_v45  ;;  %5032 = vst [vmem:[#allocation121_spill] sm:$0xff] %v3670_v58  ;;  %5033 = vst [vmem:[#allocation122_spill] sm:$0xff] %v3672_v63  ;;  %vm918_vm13 = vcmp.lt.s32.totalorder %v911_v7, %v882_v48 }
 0x166   : > { %vm920_vm1 = vcmp.lt.s32.totalorder %v913_v4, %v883_v0  ;;  %vm922_vm2 = vcmp.lt.s32.totalorder %v915_v42, %v884_v29  ;;  %vm924_vm3 = vcmp.lt.s32.totalorder %v917_v61, %v885_v57  ;;  %5034 = vst [vmem:[#allocation123_spill] sm:$0xff] %v3674_v18  ;;  %v919_v8 = vsel %vm918_vm13, %v911_v7, %v882_v48 }
 0x167   : > { %v921_v32 = vsel %vm920_vm1, %v913_v4, %v883_v0  ;;  %v923_v43 = vsel %vm922_vm2, %v915_v42, %v884_v29  ;;  %v925_v28 = vsel %vm924_vm3, %v917_v61, %v885_v57  ;;  %vm926_vm4 = vcmp.lt.s32.totalorder %v919_v8, %v886_v12 }
 0x168   : > { %vm928_vm5 = vcmp.lt.s32.totalorder %v921_v32, %v887_v36  ;;  %vm930_vm6 = vcmp.lt.s32.totalorder %v923_v43, %v888_v9  ;;  %vm932_vm7 = vcmp.lt.s32.totalorder %v925_v28, %v889_v35  ;;  %v927_v37 = vsel %vm926_vm4, %v919_v8, %v886_v12  ;;  %v3676_v46 = vpop.f32.mrb[52].mxu0  ;;  %v3678_v42 = vpop.f32.mrb[52].mxu1 }
 0x169   : > { %v929_v45 = vsel %vm928_vm5, %v921_v32, %v887_v36  ;;  %v931_v52 = vsel %vm930_vm6, %v923_v43, %v888_v9  ;;  %v933_v34 = vsel %vm932_vm7, %v925_v28, %v889_v35  ;;  %vm934_vm10 = vcmp.lt.s32.totalorder %v927_v37, %v890_v21  ;;  %5035 = vst [vmem:[#allocation124_spill] sm:$0xff] %v3676_v46  ;;  %v3680_v57 = vpop.f32.mrb[53].mxu0  ;;  %v3686_v35 = vpop.f32.mrb[53].mxu1  ;;  %v5051_v43 = vld [vmem:[#allocation20_spill] sm:$0xff]  ;;  %v5052_v28 = vld [vmem:[#allocation26_spill] sm:$0xff] }
 0x16a   : > { %vm936_vm14 = vcmp.lt.s32.totalorder %v929_v45, %v891_v10  ;;  %vm938_vm15 = vcmp.lt.s32.totalorder %v931_v52, %v892_v11  ;;  %vm940_vm0 = vcmp.lt.s32.totalorder %v933_v34, %v893_v15  ;;  %v935_v27 = vsel %vm934_vm10, %v927_v37, %v890_v21  ;;  %5036 = vst [vmem:[#allocation125_spill] sm:$0xff] %v3678_v42  ;;  %v3688_v48 = vpop.f32.mrb[54].mxu0  ;;  %v3694_v9 = vpop.f32.mrb[54].mxu1  ;;  %v5053_v37 = vld [vmem:[#allocation28_spill] sm:$0xff] }
 0x16b   : > { %v937_v39 = vsel %vm936_vm14, %v929_v45, %v891_v10  ;;  %v939_v7 = vsel %vm938_vm15, %v931_v52, %v892_v11  ;;  %v941_v4 = vsel %vm940_vm0, %v933_v34, %v893_v15  ;;  %5037 = vst [vmem:[#allocation126_spill] sm:$0xff] %v3680_v57  ;;  %vm942_vm11 = vcmp.lt.s32.totalorder %v935_v27, %v3616_v26  ;;  %v3696_v21 = vpop.f32.mrb[55].mxu0  ;;  %v3702_v10 = vpop.f32.mrb[55].mxu1  ;;  %v5086_v57 = vld [vmem:[#allocation59_spill] sm:$0xff] }
 0x16c   : > { %vm944_vm12 = vcmp.lt.s32.totalorder %v937_v39, %v3622_v14  ;;  %vm946_vm8 = vcmp.lt.s32.totalorder %v939_v7, %v3628_v59  ;;  %vm948_vm9 = vcmp.lt.s32.totalorder %v941_v4, %v3634_v33  ;;  %5038 = vst [vmem:[#allocation127_spill] sm:$0xff] %v3686_v35  ;;  %5039 = vst [vmem:[#allocation128_spill] sm:$0xff] %v3688_v48  ;;  %v5084_v48 = vld [vmem:[#allocation61_spill] sm:$0xff]  ;;  %v5085_v35 = vld [vmem:[#allocation56_spill] sm:$0xff] }
 0x16d   : > { %v943_v0 = vsel %vm942_vm11, %v935_v27, %v3616_v26  ;;  %v945_v29 = vsel %vm944_vm12, %v937_v39, %v3622_v14  ;;  %v947_v12 = vsel %vm946_vm8, %v939_v7, %v3628_v59  ;;  %v949_v36 = vsel %vm948_vm9, %v941_v4, %v3634_v33  ;;  %5040 = vst [vmem:[#allocation129_spill] sm:$0xff] %v3694_v9  ;;  %v5043_v14 = vld [vmem:[#allocation16_spill] sm:$0xff]  ;;  %v5044_v59 = vld [vmem:[#allocation21_spill] sm:$0xff]  ;;  %v5057_v39 = vld [vmem:[#allocation27_spill] sm:$0xff] }
 0x16e   : > { %5041 = vst [vmem:[#allocation130_spill] sm:$0xff] %v3696_v21  ;;  %vm950_vm13 = vcmp.lt.s32.totalorder %v943_v0, %v3640_v2  ;;  %vm952_vm1 = vcmp.lt.s32.totalorder %v945_v29, %v3646_v3  ;;  %vm954_vm2 = vcmp.lt.s32.totalorder %v947_v12, %v3652_v49  ;;  %vm956_vm3 = vcmp.lt.s32.totalorder %v949_v36, %v3658_v41  ;;  %v5056_v27 = vld [vmem:[#allocation25_spill] sm:$0xff]  ;;  %v5058_v7 = vld [vmem:[#allocation32_spill] sm:$0xff]  ;;  %v5079_v21 = vld [vmem:[#allocation50_spill] sm:$0xff] }
 0x16f   : > { %5042 = vst [vmem:[#allocation131_spill] sm:$0xff] %v3702_v10  ;;  %v951_v11 = vsel %vm950_vm13, %v943_v0, %v3640_v2  ;;  %v953_v15 = vsel %vm952_vm1, %v945_v29, %v3646_v3  ;;  %v955_v33 = vsel %vm954_vm2, %v947_v12, %v3652_v49  ;;  %v957_v26 = vsel %vm956_vm3, %v949_v36, %v3658_v41  ;;  %v5046_v2 = vld [vmem:[#allocation17_spill] sm:$0xff]  ;;  %v5047_v3 = vld [vmem:[#allocation19_spill] sm:$0xff]  ;;  %v5048_v49 = vld [vmem:[#allocation22_spill] sm:$0xff] }
 0x170   : > { %vm958_vm4 = vcmp.lt.s32.totalorder %v951_v11, %v953_v15  ;;  %vm960_vm5 = vcmp.lt.s32.totalorder %v955_v33, %v957_v26  ;;  %vm1224_vm6 = vcmp.eq.f32.partialorder %v5043_v14, %v3410_v56  ;;  %vm1225_vm7 = vcmp.eq.f32.partialorder %v5044_v59, %v3410_v56  ;;  %v5049_v41 = vld [vmem:[#allocation18_spill] sm:$0xff]  ;;  %v3726_v8 = vpop.f32.mrb[56].mxu0  ;;  %v3734_v45 = vpop.f32.mrb[56].mxu1  ;;  %v5078_v10 = vld [vmem:[#allocation45_spill] sm:$0xff]  ;;  %v5080_v9 = vld [vmem:[#allocation52_spill] sm:$0xff] }
 0x171   : > { %v959_v62 = vsel %vm958_vm4, %v951_v11, %v953_v15  ;;  %v961_v61 = vsel %vm960_vm5, %v955_v33, %v957_v26  ;;  %vm1226_vm10 = vcmp.eq.f32.partialorder %v5045_v55, %v3410_v56  ;;  %vm1227_vm14 = vcmp.eq.f32.partialorder %v5046_v2, %v3410_v56  ;;  %5050 = vst [vmem:[#allocation16_spill] sm:$0xff] %v3726_v8  ;;  %v3736_v52 = vpop.f32.mrb[57].mxu0  ;;  %v3744_v4 = vpop.f32.mrb[57].mxu1  ;;  %v5065_v36 = vld [vmem:[#allocation34_spill] sm:$0xff]  ;;  %v5066_v11 = vld [vmem:[#allocation31_spill] sm:$0xff]  ;;  %v5067_v15 = vld [vmem:[#allocation33_spill] sm:$0xff] }
 0x172   : > { %vm962_vm15 = vcmp.lt.s32.totalorder %v959_v62, %v961_v61  ;;  %vm1228_vm0 = vcmp.eq.f32.partialorder %v5047_v3, %v3410_v56  ;;  %vm1229_vm11 = vcmp.eq.f32.partialorder %v5048_v49, %v3410_v56  ;;  %vm1230_vm12 = vcmp.eq.f32.partialorder %v5049_v41, %v3410_v56  ;;  %5054 = vst [vmem:[#allocation21_spill] sm:$0xff] %v3734_v45  ;;  %v3746_v0 = vpop.f32.mrb[58].mxu0  ;;  %v5068_v33 = vld [vmem:[#allocation38_spill] sm:$0xff]  ;;  %v3762_v26 = vpop.f32.mrb[58].mxu1  ;;  %v5075_v45 = vld [vmem:[#allocation44_spill] sm:$0xff] }
 0x173   : > { %v963_v32 = vsel %vm962_vm15, %v959_v62, %v961_v61  ;;  %vm1231_vm8 = vcmp.eq.f32.partialorder %v5051_v43, %v3410_v56  ;;  %5055 = vst [vmem:[#allocation15_spill] sm:$0xff] %v3736_v52  ;;  %5059 = vst [vmem:[#allocation17_spill] sm:$0xff] %v3744_v4  ;;  %v5061_v29 = vlaneseq  ;;  %v5062_v12 = vmov 0  ;;  %v3764_v62 = vpop.f32.mrb[59].mxu0  ;;  %v5071_v61 = vld [vmem:[#allocation40_spill] sm:$0xff]  ;;  %v3772_v4 = vpop.f32.mrb[59].mxu1 }
 0x174   : > { %v964_v34 = vrot.slane %v963_v32, 4  ;;  %5060 = vst [vmem:[#allocation19_spill] sm:$0xff] %v3746_v0  ;;  %5069 = vst [vmem:[#allocation18_spill] sm:$0xff] %v3762_v26  ;;  %v5073_v0 = vld [vmem:[#allocation39_spill] sm:$0xff]  ;;  %v5076_v26 = vld [vmem:[#allocation46_spill] sm:$0xff]  ;;  %vm1253_vm13 = vcmp.eq.f32.partialorder %v5084_v48, %v3410_v56  ;;  %vm1254_vm5 = vcmp.eq.f32.partialorder %v5085_v35, %v3410_v56  ;;  %vm1255_vm15 = vcmp.eq.f32.partialorder %v5086_v57, %v3410_v56 }
 0x175   : > { %vm3750_vm4 = vcmp.lt.s32.totalorder %v5061_v29, 128  ;;  %5070 = vst [vmem:[#allocation20_spill] sm:$0xff] %v3764_v62  ;;  %v5072_v29 = vld [vmem:[#allocation37_spill] sm:$0xff]  ;;  %5074 = vst [vmem:[#allocation26_spill] sm:$0xff] %v3772_v4  ;;  %v5077_v62 = vld [vmem:[#allocation43_spill] sm:$0xff]  ;;  %v1256_v42 = vsel %vm1224_vm6, %v3224_v24, 256  ;;  %vm5087_vm6 = vcmp.eq.f32.partialorder %v5052_v28, %v3410_v56 }
 0x176   : > { %v5063_v12 = vsel %vm3750_vm4, 4294967295, %v5062_v12  ;;  %vm965_vm1 = vcmp.lt.s32.totalorder %v963_v32, %v964_v34  ;;  %v5083_v4 = vld [vmem:[#allocation57_spill] sm:$0xff]  ;;  %v1257_v63 = vsel %vm1225_vm7, %v3239_v23, 256  ;;  %v1258_v58 = vsel %vm1226_vm10, %v4978_v54, 256 }
 0x177   : > { %5064 = vst [vmem:[#allocation22_spill] sm:$0xff] %v5063_v12  ;;  %v966_v52 = vsel %vm965_vm1, %v963_v32, %v964_v34  ;;  %v5081_v32 = vld [vmem:[#allocation49_spill] sm:$0xff]  ;;  %v5082_v34 = vld [vmem:[#allocation51_spill] sm:$0xff]  ;;  %vm1252_vm9 = vcmp.eq.f32.partialorder %v5083_v4, %v3410_v56  ;;  %v1259_v17 = vsel %vm1227_vm14, %v4979_v19, 256  ;;  %v1260_v59 = vsel %vm1228_vm0, %v4981_v38, 256 }
 0x178   : > { %v967_v8 = vrot.slane %v966_v52, 2  ;;  %vm1250_vm1 = vcmp.eq.f32.partialorder %v5081_v32, %v3410_v56  ;;  %vm1251_vm2 = vcmp.eq.f32.partialorder %v5082_v34, %v3410_v56  ;;  %v3805_v46 = vpop.f32.mrb[60].mxu0  ;;  %v3819_v14 = vpop.f32.mrb[60].mxu1  ;;  %v1261_v55 = vsel %vm1229_vm11, %v4982_v60, 256 }
 0x179   : > { %v3821_v24 = vpop.f32.mrb[61].mxu0  ;;  %v1262_v2 = vsel %vm1230_vm12, %v4983_v25, 256  ;;  %v1263_v3 = vsel %vm1231_vm8, %v4984_v20, 256  ;;  %v1264_v49 = vsel %vm5087_vm6, %v4987_v40, 256  ;;  %vm5088_vm7 = vcmp.eq.f32.partialorder %v5053_v37, %v3410_v56 }
 0x17a   : > { %vm968_vm3 = vcmp.lt.s32.totalorder %v966_v52, %v967_v8  ;;  %v3837_v19 = vpop.f32.mrb[62].mxu0  ;;  %v1265_v41 = vsel %vm5088_vm7, %v4988_v16, 256  ;;  %vm5089_vm10 = vcmp.eq.f32.partialorder %v5056_v27, %v3410_v56  ;;  %vm5090_vm0 = vcmp.eq.f32.partialorder %v5057_v39, %v3410_v56 }
 0x17b   : > { %v969_v18 = vsel %vm968_vm3, %v966_v52, %v967_v8  ;;  %v3835_v52 = vpop.f32.mrb[61].mxu1  ;;  %v1266_v25 = vsel %vm5089_vm10, %v4990_v51, 256  ;;  %v3862_v43 = vpop.f32.mrb[63].mxu0  ;;  %v1267_v28 = vsel %vm5090_vm0, %v4992_v31, 256  ;;  %vm5091_vm11 = vcmp.eq.f32.partialorder %v5058_v7, %v3410_v56 }
 0x17c   : > { %v970_v8 = vrot.slane %v969_v18, 1  ;;  %v3860_v60 = vpop.f32.mrb[62].mxu1  ;;  %v1268_v37 = vsel %vm5091_vm11, %v4996_v22, 256  ;;  %vm5092_vm12 = vcmp.eq.f32.partialorder %v5065_v36, %v3410_v56  ;;  %vm5093_vm8 = vcmp.eq.f32.partialorder %v5066_v11, %v3410_v56  ;;  %v5097_v36 = vld [vmem:[#allocation76_spill] sm:$0xff] }
 0x17d   : > { %v1269_v27 = vsel %vm5092_vm12, %v4998_v1, 256  ;;  %v3876_v51 = vpop.f32.mrb[63].mxu1  ;;  %v1270_v40 = vsel %vm5093_vm8, %v5000_v13, 256  ;;  %vm5094_vm3 = vcmp.eq.f32.partialorder %v5067_v15, %v3410_v56  ;;  %vm5095_vm6 = vcmp.eq.f32.partialorder %v5068_v33, %v3410_v56  ;;  %v5100_v33 = vld [vmem:[#allocation78_spill] sm:$0xff] }
 0x17e   : > { %vm971_vm14 = vcmp.lt.s32.totalorder %v969_v18, %v970_v8  ;;  %v1271_v39 = vsel %vm5094_vm3, %v5002_v47, 256  ;;  %v1272_v7 = vsel %vm5095_vm6, %v5006_v53, 256  ;;  %vm5096_vm7 = vcmp.eq.f32.partialorder %v5071_v61, %v3410_v56 }
 0x17f   : > { %v972_v16 = vsel %vm971_vm14, %v969_v18, %v970_v8  ;;  %v1273_v18 = vsel %vm5096_vm7, %v5008_v44, 256  ;;  %vm5098_vm10 = vcmp.eq.f32.partialorder %v5072_v29, %v3410_v56  ;;  %vm5099_vm14 = vcmp.eq.f32.partialorder %v5073_v0, %v3410_v56  ;;  %v5102_v8 = vld [vmem:[#allocation79_spill] sm:$0xff]  ;;  %v5104_v44 = vld [vmem:[#allocation80_spill] sm:$0xff] }
 0x180   : > { %977 = vst.msk [vmem:[%s3842_s12] sm:$0x1] %vm3750_vm4, %v972_v16  ;;  %v1274_v11 = vsel %vm5098_vm10, %v5097_v36, 256  ;;  %v1275_v15 = vsel %vm5099_vm14, %v5012_v6, 256  ;;  %vm5101_vm0 = vcmp.eq.f32.partialorder %v5075_v45, %v3410_v56  ;;  %vm5103_vm11 = vcmp.eq.f32.partialorder %v5076_v26, %v3410_v56  ;;  %v5106_v36 = vld [vmem:[#allocation81_spill] sm:$0xff]  ;;  %v5108_v6 = vld [vmem:[#allocation82_spill] sm:$0xff] }
 0x181   : > { %v1276_v16 = vsel %vm5101_vm0, %v5100_v33, 256  ;;  %v1277_v61 = vsel %vm5103_vm11, %v5102_v8, 256  ;;  %vm5105_vm12 = vcmp.eq.f32.partialorder %v5077_v62, %v3410_v56  ;;  %vm5107_vm8 = vcmp.eq.f32.partialorder %v5078_v10, %v3410_v56  ;;  %v5110_v33 = vld [vmem:[#allocation83_spill] sm:$0xff]  ;;  %v5112_v8 = vld [vmem:[#allocation84_spill] sm:$0xff] }
 0x182   : > { %v1278_v29 = vsel %vm5105_vm12, %v5104_v44, 256  ;;  %v1279_v0 = vsel %vm5107_vm8, %v5106_v36, 256  ;;  %vm5109_vm3 = vcmp.eq.f32.partialorder %v5079_v21, %v3410_v56  ;;  %vm5111_vm6 = vcmp.eq.f32.partialorder %v5080_v9, %v3410_v56  ;;  %v5113_v44 = vld [vmem:[#allocation85_spill] sm:$0xff]  ;;  %v5114_v36 = vld [vmem:[#allocation86_spill] sm:$0xff] }
 0x183   : > { %v1280_v45 = vsel %vm5109_vm3, %v5108_v6, 256  ;;  %v1281_v26 = vsel %vm5111_vm6, %v5110_v33, 256  ;;  %v1282_v62 = vsel %vm1250_vm1, %v5112_v8, 256  ;;  %v1283_v10 = vsel %vm1251_vm2, %v5113_v44, 256  ;;  %v5115_v6 = vld [vmem:[#allocation87_spill] sm:$0xff]  ;;  %v5116_v33 = vld [vmem:[#allocation102_spill] sm:$0xff] }
 0x184   : > { %v1284_v21 = vsel %vm1252_vm9, %v5114_v36, 256  ;;  %v1285_v9 = vsel %vm1253_vm13, %v5115_v6, 256  ;;  %v1286_v32 = vsel %vm1254_vm5, %v5116_v33, 256  ;;  %v5117_v8 = vld [vmem:[#allocation103_spill] sm:$0xff]  ;;  %vm1288_vm2 = vcmp.lt.s32.totalorder %v1256_v42, %v1260_v59 }
 0x185   : > { %v1287_v34 = vsel %vm1255_vm15, %v5117_v8, 256  ;;  %v1289_v44 = vsel %vm1288_vm2, %v1256_v42, %v1260_v59  ;;  %vm1290_vm1 = vcmp.lt.s32.totalorder %v1257_v63, %v1261_v55  ;;  %vm1292_vm7 = vcmp.lt.s32.totalorder %v1258_v58, %v1262_v2  ;;  %v5207_v8 = vld [vmem:[#allocation15_spill] sm:$0xff] }
 0x186   : > { %vm1294_vm9 = vcmp.lt.s32.totalorder %v1259_v17, %v1263_v3  ;;  %v1291_v4 = vsel %vm1290_vm1, %v1257_v63, %v1261_v55  ;;  %v1293_v36 = vsel %vm1292_vm7, %v1258_v58, %v1262_v2  ;;  %vm1296_vm10 = vcmp.lt.s32.totalorder %v1289_v44, %v1264_v49 }
 0x187   : > { %v1295_v53 = vsel %vm1294_vm9, %v1259_v17, %v1263_v3  ;;  %v1297_v48 = vsel %vm1296_vm10, %v1289_v44, %v1264_v49  ;;  %vm1298_vm13 = vcmp.lt.s32.totalorder %v1291_v4, %v1265_v41  ;;  %vm1300_vm14 = vcmp.lt.s32.totalorder %v1293_v36, %v1266_v25 }
 0x188   : > { %vm1302_vm0 = vcmp.lt.s32.totalorder %v1295_v53, %v1267_v28  ;;  %v1299_v35 = vsel %vm1298_vm13, %v1291_v4, %v1265_v41  ;;  %v1301_v33 = vsel %vm1300_vm14, %v1293_v36, %v1266_v25  ;;  %vm1304_vm5 = vcmp.lt.s32.totalorder %v1297_v48, %v1268_v37 }
 0x189   : > { %v1303_v6 = vsel %vm1302_vm0, %v1295_v53, %v1267_v28  ;;  %v1305_v47 = vsel %vm1304_vm5, %v1297_v48, %v1268_v37  ;;  %vm1306_vm11 = vcmp.lt.s32.totalorder %v1299_v35, %v1269_v27  ;;  %vm1308_vm15 = vcmp.lt.s32.totalorder %v1301_v33, %v1270_v40  ;;  %v5118_v37 = vld [vmem:[#allocation105_spill] sm:$0xff] }
 0x18a   : > { %vm1310_vm12 = vcmp.lt.s32.totalorder %v1303_v6, %v1271_v39  ;;  %v1307_v56 = vsel %vm1306_vm11, %v1299_v35, %v1269_v27  ;;  %v1309_v42 = vsel %vm1308_vm15, %v1301_v33, %v1270_v40  ;;  %vm1312_vm8 = vcmp.lt.s32.totalorder %v1305_v47, %v1272_v7  ;;  %v5119_v27 = vld [vmem:[#allocation104_spill] sm:$0xff]  ;;  %v5134_v35 = vld [vmem:[#allocation6_spill] sm:$0xff] }
 0x18b   : > { %v1311_v57 = vsel %vm1310_vm12, %v1303_v6, %v1271_v39  ;;  %v1313_v63 = vsel %vm1312_vm8, %v1305_v47, %v1272_v7  ;;  %vm1314_vm3 = vcmp.lt.s32.totalorder %v1307_v56, %v1273_v18  ;;  %vm1316_vm6 = vcmp.lt.s32.totalorder %v1309_v42, %v1274_v11  ;;  %v5120_v7 = vld [vmem:[#allocation5_spill] sm:$0xff] }
 0x18c   : > { %vm1318_vm2 = vcmp.lt.s32.totalorder %v1311_v57, %v1275_v15  ;;  %v1315_v44 = vsel %vm1314_vm3, %v1307_v56, %v1273_v18  ;;  %v1317_v17 = vsel %vm1316_vm6, %v1309_v42, %v1274_v11  ;;  %vm1320_vm1 = vcmp.lt.s32.totalorder %v1313_v63, %v1276_v16  ;;  %v5121_v18 = vld [vmem:[#allocation106_spill] sm:$0xff]  ;;  %v5122_v11 = vld [vmem:[#allocation107_spill] sm:$0xff] }
 0x18d   : > { %v1319_v58 = vsel %vm1318_vm2, %v1311_v57, %v1275_v15  ;;  %v1321_v59 = vsel %vm1320_vm1, %v1313_v63, %v1276_v16  ;;  %vm1322_vm7 = vcmp.lt.s32.totalorder %v1315_v44, %v1277_v61  ;;  %vm1324_vm9 = vcmp.lt.s32.totalorder %v1317_v17, %v1278_v29  ;;  %v5135_v56 = vld [vmem:[#allocation110_spill] sm:$0xff] }
 0x18e   : > { %vm1326_vm10 = vcmp.lt.s32.totalorder %v1319_v58, %v1279_v0  ;;  %v1323_v25 = vsel %vm1322_vm7, %v1315_v44, %v1277_v61  ;;  %v1325_v53 = vsel %vm1324_vm9, %v1317_v17, %v1278_v29  ;;  %vm1328_vm13 = vcmp.lt.s32.totalorder %v1321_v59, %v1280_v45  ;;  %v5124_v61 = vld [vmem:[#allocation3_spill] sm:$0xff]  ;;  %v5125_v29 = vld [vmem:[#allocation108_spill] sm:$0xff]  ;;  %v5136_v63 = vld [vmem:[#allocation90_spill] sm:$0xff] }
 0x18f   : > { %v1327_v55 = vsel %vm1326_vm10, %v1319_v58, %v1279_v0  ;;  %v1329_v2 = vsel %vm1328_vm13, %v1321_v59, %v1280_v45  ;;  %vm1330_vm14 = vcmp.lt.s32.totalorder %v1323_v25, %v1281_v26  ;;  %vm1332_vm0 = vcmp.lt.s32.totalorder %v1325_v53, %v1282_v62  ;;  %v5126_v45 = vld [vmem:[#allocation109_spill] sm:$0xff]  ;;  %v5139_v59 = vld [vmem:[#allocation91_spill] sm:$0xff] }
 0x190   : > { %vm1334_vm5 = vcmp.lt.s32.totalorder %v1327_v55, %v1283_v10  ;;  %v1331_v47 = vsel %vm1330_vm14, %v1323_v25, %v1281_v26  ;;  %v1333_v6 = vsel %vm1332_vm0, %v1325_v53, %v1282_v62  ;;  %vm1336_vm11 = vcmp.lt.s32.totalorder %v1329_v2, %v1284_v21  ;;  %v5128_v62 = vld [vmem:[#allocation88_spill] sm:$0xff]  ;;  %v5137_v44 = vld [vmem:[#allocation97_spill] sm:$0xff]  ;;  %v5140_v25 = vld [vmem:[#allocation98_spill] sm:$0xff] }
 0x191   : > { %v1335_v40 = vsel %vm1334_vm5, %v1327_v55, %v1283_v10  ;;  %v1337_v3 = vsel %vm1336_vm11, %v1329_v2, %v1284_v21  ;;  %vm1338_vm15 = vcmp.lt.s32.totalorder %v1331_v47, %v1285_v9  ;;  %vm1340_vm12 = vcmp.lt.s32.totalorder %v1333_v6, %v1286_v32  ;;  %v5129_v10 = vld [vmem:[#allocation94_spill] sm:$0xff]  ;;  %v5142_v2 = vld [vmem:[#allocation111_spill] sm:$0xff] }
 0x192   : > { %vm1342_vm8 = vcmp.lt.s32.totalorder %v1335_v40, %v1287_v34  ;;  %v1339_v49 = vsel %vm1338_vm15, %v1331_v47, %v1285_v9  ;;  %v1341_v41 = vsel %vm1340_vm12, %v1333_v6, %v1286_v32  ;;  %v1952_v39 = vmax.f32 %v5119_v27, %v5118_v37  ;;  %v5131_v32 = vld [vmem:[#allocation89_spill] sm:$0xff]  ;;  %v5165_v37 = vld [vmem:[#allocation10_spill] sm:$0xff] }
 0x193   : > { %v1343_v28 = vsel %vm1342_vm8, %v1335_v40, %v1287_v34  ;;  %vm1344_vm3 = vcmp.lt.s32.totalorder %v1337_v3, %v1339_v49  ;;  %v3957_v36 = vsub.f32 %v5121_v18, %v5120_v7  ;;  %v3961_v15 = vsub.f32 %v5122_v11, %v5120_v7  ;;  %v5132_v34 = vld [vmem:[#allocation96_spill] sm:$0xff]  ;;  %v5149_v11 = vld [vmem:[#allocation113_spill] sm:$0xff] }
 0x194   : > { %vm1346_vm6 = vcmp.lt.s32.totalorder %v1341_v41, %v1343_v28  ;;  %v1345_v33 = vsel %vm1344_vm3, %v1337_v3, %v1339_v49  ;;  %v3965_v0 = vsub.f32 %v5125_v29, %v5124_v61  ;;  %v3969_v26 = vsub.f32 %v5126_v45, %v5124_v61  ;;  %v5144_v40 = vld [vmem:[#allocation92_spill] sm:$0xff]  ;;  %v5145_v3 = vld [vmem:[#allocation99_spill] sm:$0xff] }
 0x195   : > { %5123 = vst [vmem:[#allocation28_spill] sm:$0xff] %v3961_v15  ;;  %v1347_v16 = vsel %vm1346_vm6, %v1341_v41, %v1343_v28  ;;  %v5130_v21 = vmax.f32 %v5128_v62, %v5129_v10  ;;  %v5133_v4 = vmax.f32 %v5131_v32, %v5132_v34  ;;  %v3981_v42 = vsub.f32 %v5135_v56, %v5134_v35  ;;  %v5147_v28 = vld [vmem:[#allocation4_spill] sm:$0xff]  ;;  %v5156_v56 = vld [vmem:[#allocation62_spill] sm:$0xff] }
 0x196   : > { %5127 = vst [vmem:[#allocation25_spill] sm:$0xff] %v3969_v26  ;;  %vm1348_vm2 = vcmp.lt.s32.totalorder %v1345_v33, %v1347_v16  ;;  %v5138_v17 = vmax.f32 %v5136_v63, %v5137_v44  ;;  %v5141_v53 = vmax.f32 %v5139_v59, %v5140_v25  ;;  %v3993_v47 = vsub.f32 %v5142_v2, %v5134_v35  ;;  %v5148_v7 = vld [vmem:[#allocation112_spill] sm:$0xff]  ;;  %v5159_v2 = vld [vmem:[#allocation65_spill] sm:$0xff]  ;;  %v5166_v25 = vld [vmem:[#allocation115_spill] sm:$0xff] }
 0x197   : > { %v1575_v9 = vmax.f32 %v5130_v21, %v3957_v36  ;;  %v1957_v48 = vmax.f32 %v5133_v4, %v3961_v15  ;;  %v1349_v57 = vsel %vm1348_vm2, %v1345_v33, %v1347_v16  ;;  %v5146_v49 = vmax.f32 %v5144_v40, %v5145_v3  ;;  %v5151_v16 = vld [vmem:[#allocation93_spill] sm:$0xff]  ;;  %v5152_v61 = vld [vmem:[#allocation100_spill] sm:$0xff]  ;;  %v5155_v4 = vld [vmem:[#allocation58_spill] sm:$0xff] }
 0x198   : > { %v1573_v58 = vmax.f32 %v5138_v17, %v3965_v0  ;;  %v1955_v55 = vmax.f32 %v5141_v53, %v3969_v26  ;;  %5143 = vst [vmem:[#allocation27_spill] sm:$0xff] %v3993_v47  ;;  %v1350_v6 = vrot.slane %v1349_v57, 4  ;;  %v4001_v18 = vsub.f32 %v5148_v7, %v5147_v28  ;;  %v5154_v21 = vld [vmem:[#allocation9_spill] sm:$0xff]  ;;  %v5158_v53 = vld [vmem:[#allocation7_spill] sm:$0xff] }
 0x199   : > { %v1576_v41 = vmax.f32 %v5146_v49, %v3981_v42  ;;  %v4005_v33 = vsub.f32 %v5149_v11, %v5147_v28  ;;  %v5153_v29 = vmax.f32 %v5151_v16, %v5152_v61  ;;  %v4013_v35 = vsub.f32 %v5155_v4, %v5154_v21  ;;  %v5160_v28 = vld [vmem:[#allocation95_spill] sm:$0xff]  ;;  %v5161_v7 = vld [vmem:[#allocation101_spill] sm:$0xff] }
 0x19a   : > { %v4017_v17 = vsub.f32 %v5156_v56, %v5154_v21  ;;  %v4021_v49 = vsub.f32 %v5159_v2, %v5158_v53  ;;  %vm1351_vm1 = vcmp.lt.s32.totalorder %v1349_v57, %v1350_v6  ;;  %v5162_v11 = vmax.f32 %v5160_v28, %v5161_v7 }
 0x19b   : > { %5150 = vst [vmem:[#allocation32_spill] sm:$0xff] %v4005_v33  ;;  %v1958_v45 = vmax.f32 %v5153_v29, %v3993_v47  ;;  %v1956_v29 = vmax.f32 %v1952_v39, %v4005_v33  ;;  %v5163_v47 = vld [vmem:[#allocation114_spill] sm:$0xff]  ;;  %v1352_v26 = vsel %vm1351_vm1, %v1349_v57, %v1350_v6  ;;  %v1579_v21 = vmax.f32 %v1575_v9, %v4013_v35  ;;  %v5167_v39 = vld [vmem:[#allocation116_spill] sm:$0xff]  ;;  %v5174_v6 = vld [vmem:[#allocation119_spill] sm:$0xff] }
 0x19c   : > { %5157 = vst [vmem:[#allocation34_spill] sm:$0xff] %v4017_v17  ;;  %v1574_v15 = vmax.f32 %v5162_v11, %v4001_v18  ;;  %v4030_v4 = vsub.f32 %v5163_v47, %v5158_v53  ;;  %v1961_v56 = vmax.f32 %v1957_v48, %v4017_v17  ;;  %v1577_v2 = vmax.f32 %v1573_v58, %v4021_v49  ;;  %v5169_v47 = vld [vmem:[#allocation8_spill] sm:$0xff]  ;;  %v5170_v53 = vld [vmem:[#allocation117_spill] sm:$0xff]  ;;  %v5171_v9 = vld [vmem:[#allocation118_spill] sm:$0xff] }
 0x19d   : > { %v1353_v61 = vrot.slane %v1352_v26, 2  ;;  %v4038_v16 = vsub.f32 %v5166_v25, %v5165_v37  ;;  %v4042_v11 = vsub.f32 %v5167_v39, %v5165_v37  ;;  %v4046_v57 = vsub.f32 %v5170_v53, %v5169_v47  ;;  %v5173_v58 = vld [vmem:[#allocation13_spill] sm:$0xff]  ;;  %v5176_v39 = vld [vmem:[#allocation11_spill] sm:$0xff] }
 0x19e   : > { %5164 = vst [vmem:[#allocation31_spill] sm:$0xff] %v4030_v4  ;;  %v1959_v34 = vmax.f32 %v1955_v55, %v4030_v4  ;;  %v4050_v48 = vsub.f32 %v5171_v9, %v5169_v47  ;;  %v4054_v17 = vsub.f32 %v5174_v6, %v5173_v58  ;;  %v4058_v25 = vsub.f32 %v3662_v5, %v5173_v58 }
 0x19f   : > { %5168 = vst [vmem:[#allocation33_spill] sm:$0xff] %v4042_v11  ;;  %vm1354_vm7 = vcmp.lt.s32.totalorder %v1352_v26, %v1353_v61  ;;  %v1580_v37 = vmax.f32 %v1576_v41, %v4038_v16  ;;  %v1962_v55 = vmax.f32 %v1958_v45, %v4042_v11  ;;  %v4064_v53 = vsub.f32 %v3664_v50, %v5176_v39  ;;  %v5178_v45 = vld [vmem:[#allocation14_spill] sm:$0xff]  ;;  %v5179_v50 = vld [vmem:[#allocation120_spill] sm:$0xff] }
 0x1a0   : > { %5172 = vst [vmem:[#allocation38_spill] sm:$0xff] %v4050_v48  ;;  %5175 = vst [vmem:[#allocation40_spill] sm:$0xff] %v4058_v25  ;;  %v1355_v4 = vsel %vm1354_vm7, %v1352_v26, %v1353_v61  ;;  %v1578_v47 = vmax.f32 %v1574_v15, %v4046_v57  ;;  %v1960_v9 = vmax.f32 %v1956_v29, %v4050_v48  ;;  %v5180_v15 = vld [vmem:[#allocation121_spill] sm:$0xff]  ;;  %v5182_v61 = vld [vmem:[#allocation12_spill] sm:$0xff] }
 0x1a1   : > { %v1583_v6 = vmax.f32 %v1579_v21, %v4054_v17  ;;  %v1356_v33 = vrot.slane %v1355_v4, 1  ;;  %v1965_v5 = vmax.f32 %v1961_v56, %v4058_v25  ;;  %v1581_v58 = vmax.f32 %v1577_v2, %v4064_v53  ;;  %v5183_v29 = vld [vmem:[#allocation122_spill] sm:$0xff]  ;;  %v5184_v56 = vld [vmem:[#allocation123_spill] sm:$0xff]  ;;  %v5186_v2 = vld [vmem:[#allocation29_spill] sm:$0xff] }
 0x1a2   : > { %v4073_v41 = vsub.f32 %v3666_v30, %v5176_v39  ;;  %v4077_v11 = vsub.f32 %v5179_v50, %v5178_v45  ;;  %v4081_v26 = vsub.f32 %v5180_v15, %v5178_v45  ;;  %v4085_v21 = vsub.f32 %v5183_v29, %v5182_v61  ;;  %v5187_v39 = vld [vmem:[#allocation124_spill] sm:$0xff]  ;;  %v5188_v50 = vld [vmem:[#allocation125_spill] sm:$0xff] }
 0x1a3   : > { %v4089_v25 = vsub.f32 %v5184_v56, %v5182_v61  ;;  %vm1357_vm9 = vcmp.lt.s32.totalorder %v1355_v4, %v1356_v33  ;;  %v4094_v48 = vsub.f32 %v5187_v39, %v5186_v2  ;;  %v4098_v32 = vsub.f32 %v5188_v50, %v5186_v2  ;;  %v5190_v39 = vld [vmem:[#allocation23_spill] sm:$0xff]  ;;  %v5196_v50 = vld [vmem:[#allocation129_spill] sm:$0xff] }
 0x1a4   : > { %5177 = vst [vmem:[#allocation37_spill] sm:$0xff] %v4073_v41  ;;  %5181 = vst [vmem:[#allocation39_spill] sm:$0xff] %v4081_v26  ;;  %v1963_v30 = vmax.f32 %v1959_v34, %v4073_v41  ;;  %v1358_v45 = vsel %vm1357_vm9, %v1355_v4, %v1356_v33  ;;  %v1584_v15 = vmax.f32 %v1580_v37, %v4077_v11  ;;  %v5191_v41 = vld [vmem:[#allocation126_spill] sm:$0xff]  ;;  %v5192_v33 = vld [vmem:[#allocation127_spill] sm:$0xff] }
 0x1a5   : > { %5185 = vst [vmem:[#allocation44_spill] sm:$0xff] %v4089_v25  ;;  %5189 = vst [vmem:[#allocation46_spill] sm:$0xff] %v4098_v32  ;;  %v1966_v29 = vmax.f32 %v1962_v55, %v4081_v26  ;;  %v1582_v27 = vmax.f32 %v1578_v47, %v4085_v21  ;;  %v1964_v34 = vmax.f32 %v1960_v9, %v4089_v25  ;;  %v5194_v37 = vld [vmem:[#allocation30_spill] sm:$0xff]  ;;  %v5195_v55 = vld [vmem:[#allocation128_spill] sm:$0xff] }
 0x1a6   : > { %1359 = vst.msk [vmem:[%s3842_s12 + $0x1] sm:$0x1] %vm3750_vm4, %v1358_v45  ;;  %v1587_v61 = vmax.f32 %v1583_v6, %v4094_v48  ;;  %v1969_v56 = vmax.f32 %v1965_v5, %v4098_v32  ;;  %v4111_v2 = vsub.f32 %v5191_v41, %v5190_v39  ;;  %v4115_v4 = vsub.f32 %v5192_v33, %v5190_v39  ;;  %v5198_v9 = vld [vmem:[#allocation24_spill] sm:$0xff]  ;;  %v5199_v6 = vld [vmem:[#allocation130_spill] sm:$0xff]  ;;  %v5200_v41 = vld [vmem:[#allocation131_spill] sm:$0xff] }
 0x1a7   : > { %v4119_v47 = vsub.f32 %v5195_v55, %v5194_v37  ;;  %v4123_v45 = vsub.f32 %v5196_v50, %v5194_v37  ;;  %v4127_v12 = vsub.f32 %v5199_v6, %v5198_v9  ;;  %v4132_v32 = vsub.f32 %v5200_v41, %v5198_v9  ;;  %v5202_v39 = vld [vmem:[#allocation41_spill] sm:$0xff]  ;;  %v5203_v33 = vld [vmem:[#allocation16_spill] sm:$0xff] }
 0x1a8   : > { %5193 = vst [vmem:[#allocation43_spill] sm:$0xff] %v4115_v4  ;;  %v1585_v5 = vmax.f32 %v1581_v58, %v4111_v2  ;;  %v4136_v26 = vsub.f32 %v5203_v33, %v5202_v39  ;;  %v5204_v55 = vld [vmem:[#allocation21_spill] sm:$0xff]  ;;  %v1967_v37 = vmax.f32 %v1963_v30, %v4115_v4  ;;  %v5206_v33 = vld [vmem:[#allocation35_spill] sm:$0xff]  ;;  %v5210_v30 = vld [vmem:[#allocation42_spill] sm:$0xff] }
 0x1a9   : > { %5197 = vst [vmem:[#allocation45_spill] sm:$0xff] %v4123_v45  ;;  %5201 = vst [vmem:[#allocation50_spill] sm:$0xff] %v4132_v32  ;;  %v4140_v25 = vsub.f32 %v5204_v55, %v5202_v39  ;;  %v1588_v50 = vmax.f32 %v1584_v15, %v4119_v47  ;;  %v1970_v6 = vmax.f32 %v1966_v29, %v4123_v45  ;;  %v5208_v39 = vld [vmem:[#allocation17_spill] sm:$0xff]  ;;  %v5211_v15 = vld [vmem:[#allocation19_spill] sm:$0xff] }
 0x1aa   : > { %v1586_v58 = vmax.f32 %v1582_v27, %v4127_v12  ;;  %v1968_v59 = vmax.f32 %v1964_v34, %v4132_v32  ;;  %v1591_v9 = vmax.f32 %v1587_v61, %v4136_v26  ;;  %v4151_v13 = vsub.f32 %v5207_v8, %v5206_v33  ;;  %v5212_v27 = vld [vmem:[#allocation18_spill] sm:$0xff]  ;;  %v5214_v34 = vld [vmem:[#allocation36_spill] sm:$0xff] }
 0x1ab   : > { %5205 = vst [vmem:[#allocation52_spill] sm:$0xff] %v4140_v25  ;;  %v1973_v41 = vmax.f32 %v1969_v56, %v4140_v25  ;;  %v4155_v55 = vsub.f32 %v5208_v39, %v5206_v33  ;;  %v4159_v4 = vsub.f32 %v5211_v15, %v5210_v30  ;;  %v4163_v29 = vsub.f32 %v5212_v27, %v5210_v30  ;;  %v5215_v61 = vld [vmem:[#allocation20_spill] sm:$0xff]  ;;  %v5216_v8 = vld [vmem:[#allocation26_spill] sm:$0xff]  ;;  %v5218_v33 = vld [vmem:[#allocation53_spill] sm:$0xff] }
 0x1ac   : > { %v4167_v45 = vsub.f32 %v5215_v61, %v5214_v34  ;;  %v1589_v56 = vmax.f32 %v1585_v5, %v4151_v13  ;;  %v4172_v25 = vsub.f32 %v5216_v8, %v5214_v34  ;;  %v4176_v39 = vsub.f32 %v3805_v46, %v5218_v33  ;;  %v5220_v46 = vld [vmem:[#allocation47_spill] sm:$0xff] }
 0x1ad   : > { %5209 = vst [vmem:[#allocation49_spill] sm:$0xff] %v4155_v55  ;;  %5213 = vst [vmem:[#allocation51_spill] sm:$0xff] %v4163_v29  ;;  %v4180_v15 = vsub.f32 %v3819_v14, %v5218_v33  ;;  %v1971_v30 = vmax.f32 %v1967_v37, %v4155_v55  ;;  %v1592_v27 = vmax.f32 %v1588_v50, %v4159_v4  ;;  %v5222_v37 = vld [vmem:[#allocation55_spill] sm:$0xff] }
 0x1ae   : > { %5217 = vst [vmem:[#allocation57_spill] sm:$0xff] %v4172_v25  ;;  %v1974_v61 = vmax.f32 %v1970_v6, %v4163_v29  ;;  %v1590_v5 = vmax.f32 %v1586_v58, %v4167_v45  ;;  %v1972_v32 = vmax.f32 %v1968_v59, %v4172_v25  ;;  %v1595_v34 = vmax.f32 %v1591_v9, %v4176_v39  ;;  %v5224_v59 = vld [vmem:[#allocation48_spill] sm:$0xff] }
 0x1af   : > { %5219 = vst [vmem:[#allocation61_spill] sm:$0xff] %v4180_v15  ;;  %v1977_v8 = vmax.f32 %v1973_v41, %v4180_v15  ;;  %v4191_v1 = vsub.f32 %v3821_v24, %v5220_v46  ;;  %v4195_v14 = vsub.f32 %v3835_v52, %v5220_v46  ;;  %v4199_v50 = vsub.f32 %v3837_v19, %v5222_v37 }
 0x1b0   : > { %v4203_v6 = vsub.f32 %v3860_v60, %v5222_v37  ;;  %v4207_v58 = vsub.f32 %v3862_v43, %v5224_v59  ;;  %v4212_v24 = vsub.f32 %v3876_v51, %v5224_v59 }
 0x1b1   : > { %5221 = vst [vmem:[#allocation56_spill] sm:$0xff] %v4195_v14  ;;  %v1593_v9 = vmax.f32 %v1589_v56, %v4191_v1  ;;  %v1975_v52 = vmax.f32 %v1971_v30, %v4195_v14  ;;  %v1596_v41 = vmax.f32 %v1592_v27, %v4199_v50 }
 0x1b2   : > { %5223 = vst [vmem:[#allocation59_spill] sm:$0xff] %v4203_v6  ;;  %v1978_v19 = vmax.f32 %v1974_v61, %v4203_v6  ;;  %v1594_v33 = vmax.f32 %v1590_v5, %v4207_v58  ;;  %v1976_v60 = vmax.f32 %v1972_v32, %v4212_v24 }
 0x1b3   : > { %v1598_v46 = vmax.f32 %v1595_v34, %v1596_v41  ;;  %v5228_v34 = vld [vmem:[#allocation64_spill] sm:$0xff]  ;;  %v5237_v41 = vld [vmem:[#allocation70_spill] sm:$0xff] }
 0x1b4   : > { %v1980_v37 = vmax.f32 %v1977_v8, %v1978_v19  ;;  %v1597_v43 = vmax.f32 %v1593_v9, %v1594_v33  ;;  %v1979_v15 = vmax.f32 %v1975_v52, %v1976_v60  ;;  %v5229_v8 = vld [vmem:[#allocation66_spill] sm:$0xff]  ;;  %v5233_v9 = vld [vmem:[#allocation68_spill] sm:$0xff]  ;;  %v5235_v52 = vld [vmem:[#allocation69_spill] sm:$0xff] }
 0x1b5   : > { %v5239_v19 = vld [vmem:[#allocation71_spill] sm:$0xff]  ;;  %v5241_v33 = vld [vmem:[#allocation72_spill] sm:$0xff]  ;;  %v5243_v60 = vld [vmem:[#allocation73_spill] sm:$0xff] }
 0x1b6   : > { %v1599_v29 = vmax.f32 %v1597_v43, %v1598_v46  ;;  %v1981_v56 = vmax.f32 %v1979_v15, %v1980_v37  ;;  %v5227_v15 = vld [vmem:[#allocation63_spill] sm:$0xff]  ;;  %v5245_v46 = vld [vmem:[#allocation74_spill] sm:$0xff]  ;;  %v5249_v43 = vld [vmem:[#allocation76_spill] sm:$0xff] }
 0x1b7   : > { %v5247_v37 = vld [vmem:[#allocation75_spill] sm:$0xff] }
 0x1b8   : > { %v1600_v25 = vrot.slane %v1599_v29, 4  ;;  %v1982_v55 = vrot.slane %v1981_v56, 4 }
 0x1ba   : > { %v1601_v51 = vmax.f32 %v1599_v29, %v1600_v25  ;;  %v1983_v59 = vmax.f32 %v1981_v56, %v1982_v55  ;;  %v5226_v55 = vld [vmem:[#allocation60_spill] sm:$0xff]  ;;  %v5251_v56 = vld [vmem:[#allocation77_spill] sm:$0xff] }
 0x1bc   : > { %v1602_v22 = vrot.slane %v1601_v51, 2  ;;  %v1984_v30 = vrot.slane %v1983_v59, 2 }
 0x1be   : > { %v1603_v14 = vmax.f32 %v1601_v51, %v1602_v22  ;;  %v1985_v27 = vmax.f32 %v1983_v59, %v1984_v30  ;;  %v5253_v51 = vld [vmem:[#allocation78_spill] sm:$0xff]  ;;  %v5255_v59 = vld [vmem:[#allocation79_spill] sm:$0xff]  ;;  %v5257_v30 = vld [vmem:[#allocation80_spill] sm:$0xff] }
 0x1c0   : > { %v1604_v31 = vrot.slane %v1603_v14, 1  ;;  %v1986_v61 = vrot.slane %v1985_v27, 1 }
 0x1c2   : > { %v4219_v6 = vmax.f32 %v1603_v14, %v1604_v31  ;;  %v4221_v5 = vmax.f32 %v1985_v27, %v1986_v61  ;;  %v5225_v31 = vld [vmem:[#allocation54_spill] sm:$0xff]  ;;  %v5231_v14 = vld [vmem:[#allocation67_spill] sm:$0xff]  ;;  %v5259_v27 = vld [vmem:[#allocation81_spill] sm:$0xff] }
 0x1c3   : > { %v5261_v61 = vld [vmem:[#allocation82_spill] sm:$0xff] }
 0x1c4   : > { %vm1606_vm10 = vcmp.eq.f32.partialorder %v5136_v63, %v4219_v6  ;;  %vm1607_vm13 = vcmp.eq.f32.partialorder %v5160_v28, %v4219_v6  ;;  %vm1608_vm14 = vcmp.eq.f32.partialorder %v5128_v62, %v4219_v6  ;;  %vm1609_vm0 = vcmp.eq.f32.partialorder %v5144_v40, %v4219_v6 }
 0x1c5   : > { %vm1610_vm5 = vcmp.eq.f32.partialorder %v5137_v44, %v4219_v6  ;;  %vm1611_vm11 = vcmp.eq.f32.partialorder %v5161_v7, %v4219_v6  ;;  %vm1612_vm15 = vcmp.eq.f32.partialorder %v5129_v10, %v4219_v6  ;;  %vm1613_vm12 = vcmp.eq.f32.partialorder %v5145_v3, %v4219_v6 }
 0x1c6   : > { %vm1631_vm2 = vcmp.eq.f32.partialorder %v4167_v45, %v4219_v6  ;;  %vm1632_vm1 = vcmp.eq.f32.partialorder %v4136_v26, %v4219_v6  ;;  %vm1633_vm7 = vcmp.eq.f32.partialorder %v4159_v4, %v4219_v6  ;;  %vm1634_vm9 = vcmp.eq.f32.partialorder %v4191_v1, %v4219_v6 }
 0x1c7   : > { %vm1635_vm8 = vcmp.eq.f32.partialorder %v4207_v58, %v4219_v6  ;;  %vm1636_vm3 = vcmp.eq.f32.partialorder %v4176_v39, %v4219_v6  ;;  %vm1637_vm6 = vcmp.eq.f32.partialorder %v4199_v50, %v4219_v6  ;;  %v1638_v22 = vsel %vm1606_vm10, %v5225_v31, 256 }
 0x1c8   : > { %v1639_v32 = vsel %vm1607_vm13, %v3239_v23, 256  ;;  %v1640_v25 = vsel %vm1608_vm14, %v4978_v54, 256  ;;  %v1641_v29 = vsel %vm1609_vm0, %v5226_v55, 256  ;;  %v1642_v63 = vsel %vm1610_vm5, %v4981_v38, 256 }
 0x1c9   : > { %v1643_v28 = vsel %vm1611_vm11, %v5227_v15, 256  ;;  %v1644_v62 = vsel %vm1612_vm15, %v5228_v34, 256  ;;  %v1645_v40 = vsel %vm1613_vm12, %v4984_v20, 256  ;;  %vm5230_vm10 = vcmp.eq.f32.partialorder %v3965_v0, %v4219_v6 }
 0x1ca   : > { %v1646_v44 = vsel %vm5230_vm10, %v5229_v8, 256  ;;  %vm5232_vm13 = vcmp.eq.f32.partialorder %v4001_v18, %v4219_v6  ;;  %vm5234_vm14 = vcmp.eq.f32.partialorder %v3957_v36, %v4219_v6  ;;  %vm5236_vm0 = vcmp.eq.f32.partialorder %v3981_v42, %v4219_v6 }
 0x1cb   : > { %v1647_v7 = vsel %vm5232_vm13, %v5231_v14, 256  ;;  %v1648_v10 = vsel %vm5234_vm14, %v5233_v9, 256  ;;  %v1649_v3 = vsel %vm5236_vm0, %v5235_v52, 256  ;;  %vm5238_vm5 = vcmp.eq.f32.partialorder %v4021_v49, %v4219_v6 }
 0x1cc   : > { %v1650_v0 = vsel %vm5238_vm5, %v5237_v41, 256  ;;  %vm5240_vm11 = vcmp.eq.f32.partialorder %v4046_v57, %v4219_v6  ;;  %vm5242_vm15 = vcmp.eq.f32.partialorder %v4013_v35, %v4219_v6  ;;  %vm5244_vm12 = vcmp.eq.f32.partialorder %v4038_v16, %v4219_v6 }
 0x1cd   : > { %v1651_v18 = vsel %vm5240_vm11, %v5239_v19, 256  ;;  %v1652_v36 = vsel %vm5242_vm15, %v5241_v33, 256  ;;  %v1653_v42 = vsel %vm5244_vm12, %v5243_v60, 256  ;;  %vm5246_vm10 = vcmp.eq.f32.partialorder %v4064_v53, %v4219_v6 }
 0x1ce   : > { %v1654_v49 = vsel %vm5246_vm10, %v5245_v46, 256  ;;  %vm5248_vm13 = vcmp.eq.f32.partialorder %v4085_v21, %v4219_v6  ;;  %vm5250_vm14 = vcmp.eq.f32.partialorder %v4054_v17, %v4219_v6  ;;  %vm5252_vm0 = vcmp.eq.f32.partialorder %v4077_v11, %v4219_v6 }
 0x1cf   : > { %v1655_v57 = vsel %vm5248_vm13, %v5247_v37, 256  ;;  %v1656_v35 = vsel %vm5250_vm14, %v5249_v43, 256  ;;  %v1657_v16 = vsel %vm5252_vm0, %v5251_v56, 256  ;;  %vm5254_vm5 = vcmp.eq.f32.partialorder %v4111_v2, %v4219_v6 }
 0x1d0   : > { %v1658_v53 = vsel %vm5254_vm5, %v5253_v51, 256  ;;  %vm5256_vm11 = vcmp.eq.f32.partialorder %v4127_v12, %v4219_v6  ;;  %vm5258_vm15 = vcmp.eq.f32.partialorder %v4094_v48, %v4219_v6  ;;  %vm5260_vm12 = vcmp.eq.f32.partialorder %v4119_v47, %v4219_v6  ;;  %v5263_v51 = vld [vmem:[#allocation83_spill] sm:$0xff] }
 0x1d1   : > { %v1659_v21 = vsel %vm5256_vm11, %v5255_v59, 256  ;;  %v1660_v17 = vsel %vm5258_vm15, %v5257_v30, 256  ;;  %v1661_v11 = vsel %vm5260_vm12, %v5259_v27, 256  ;;  %vm5262_vm10 = vcmp.eq.f32.partialorder %v4151_v13, %v4219_v6  ;;  %v5264_v59 = vld [vmem:[#allocation84_spill] sm:$0xff]  ;;  %v5265_v30 = vld [vmem:[#allocation85_spill] sm:$0xff]  ;;  %v5266_v27 = vld [vmem:[#allocation86_spill] sm:$0xff] }
 0x1d2   : > { %v1662_v2 = vsel %vm5262_vm10, %v5261_v61, 256  ;;  %v1663_v12 = vsel %vm1631_vm2, %v5263_v51, 256  ;;  %v1664_v48 = vsel %vm1632_vm1, %v5264_v59, 256  ;;  %v1665_v47 = vsel %vm1633_vm7, %v5265_v30, 256  ;;  %v5267_v61 = vld [vmem:[#allocation87_spill] sm:$0xff]  ;;  %v5268_v51 = vld [vmem:[#allocation102_spill] sm:$0xff] }
 0x1d3   : > { %v1666_v13 = vsel %vm1634_vm9, %v5266_v27, 256  ;;  %v1667_v45 = vsel %vm1635_vm8, %v5267_v61, 256  ;;  %v1668_v26 = vsel %vm1636_vm3, %v5268_v51, 256  ;;  %v5269_v59 = vld [vmem:[#allocation103_spill] sm:$0xff]  ;;  %vm1670_vm2 = vcmp.lt.s32.totalorder %v1638_v22, %v1642_v63 }
 0x1d4   : > { %v1669_v4 = vsel %vm1637_vm6, %v5269_v59, 256  ;;  %vm1672_vm1 = vcmp.lt.s32.totalorder %v1639_v32, %v1643_v28  ;;  %vm1674_vm7 = vcmp.lt.s32.totalorder %v1640_v25, %v1644_v62  ;;  %vm1676_vm13 = vcmp.lt.s32.totalorder %v1641_v29, %v1645_v40 }
 0x1d5   : > { %v1671_v1 = vsel %vm1670_vm2, %v1638_v22, %v1642_v63  ;;  %v1673_v27 = vsel %vm1672_vm1, %v1639_v32, %v1643_v28  ;;  %v1675_v30 = vsel %vm1674_vm7, %v1640_v25, %v1644_v62  ;;  %v1677_v56 = vsel %vm1676_vm13, %v1641_v29, %v1645_v40 }
 0x1d6   : > { %vm1678_vm9 = vcmp.lt.s32.totalorder %v1671_v1, %v1646_v44  ;;  %vm1680_vm8 = vcmp.lt.s32.totalorder %v1673_v27, %v1647_v7  ;;  %vm1682_vm14 = vcmp.lt.s32.totalorder %v1675_v30, %v1648_v10  ;;  %vm1684_vm0 = vcmp.lt.s32.totalorder %v1677_v56, %v1649_v3 }
 0x1d7   : > { %v1679_v58 = vsel %vm1678_vm9, %v1671_v1, %v1646_v44  ;;  %v1681_v39 = vsel %vm1680_vm8, %v1673_v27, %v1647_v7  ;;  %v1683_v51 = vsel %vm1682_vm14, %v1675_v30, %v1648_v10  ;;  %v1685_v61 = vsel %vm1684_vm0, %v1677_v56, %v1649_v3  ;;  %v5272_v56 = vld [vmem:[#allocation89_spill] sm:$0xff]  ;;  %v5277_v30 = vld [vmem:[#allocation100_spill] sm:$0xff]  ;;  %v5289_v1 = vld [vmem:[#allocation39_spill] sm:$0xff] }
 0x1d8   : > { %vm1686_vm3 = vcmp.lt.s32.totalorder %v1679_v58, %v1650_v0  ;;  %vm1688_vm5 = vcmp.lt.s32.totalorder %v1681_v39, %v1651_v18  ;;  %vm1690_vm11 = vcmp.lt.s32.totalorder %v1683_v51, %v1652_v36  ;;  %vm1692_vm6 = vcmp.lt.s32.totalorder %v1685_v61, %v1653_v42  ;;  %v5279_v27 = vld [vmem:[#allocation32_spill] sm:$0xff] }
 0x1d9   : > { %v1687_v50 = vsel %vm1686_vm3, %v1679_v58, %v1650_v0  ;;  %v1689_v6 = vsel %vm1688_vm5, %v1681_v39, %v1651_v18  ;;  %v1691_v59 = vsel %vm1690_vm11, %v1683_v51, %v1652_v36  ;;  %v1693_v43 = vsel %vm1692_vm6, %v1685_v61, %v1653_v42  ;;  %v5274_v51 = vld [vmem:[#allocation98_spill] sm:$0xff]  ;;  %v5280_v61 = vld [vmem:[#allocation28_spill] sm:$0xff]  ;;  %v5290_v39 = vld [vmem:[#allocation43_spill] sm:$0xff] }
 0x1da   : > { %vm1694_vm15 = vcmp.lt.s32.totalorder %v1687_v50, %v1654_v49  ;;  %vm1696_vm12 = vcmp.lt.s32.totalorder %v1689_v6, %v1655_v57  ;;  %vm1698_vm10 = vcmp.lt.s32.totalorder %v1691_v59, %v1656_v35  ;;  %vm1700_vm2 = vcmp.lt.s32.totalorder %v1693_v43, %v1657_v16 }
 0x1db   : > { %v1695_v22 = vsel %vm1694_vm15, %v1687_v50, %v1654_v49  ;;  %v1697_v32 = vsel %vm1696_vm12, %v1689_v6, %v1655_v57  ;;  %v1699_v25 = vsel %vm1698_vm10, %v1691_v59, %v1656_v35  ;;  %v1701_v29 = vsel %vm1700_vm2, %v1693_v43, %v1657_v16  ;;  %v5270_v49 = vld [vmem:[#allocation91_spill] sm:$0xff]  ;;  %v5271_v57 = vld [vmem:[#allocation104_spill] sm:$0xff]  ;;  %v5273_v16 = vld [vmem:[#allocation93_spill] sm:$0xff] }
 0x1dc   : > { %vm1702_vm1 = vcmp.lt.s32.totalorder %v1695_v22, %v1658_v53  ;;  %vm1704_vm7 = vcmp.lt.s32.totalorder %v1697_v32, %v1659_v21  ;;  %vm1706_vm13 = vcmp.lt.s32.totalorder %v1699_v25, %v1660_v17  ;;  %vm1708_vm9 = vcmp.lt.s32.totalorder %v1701_v29, %v1661_v11  ;;  %v5276_v59 = vld [vmem:[#allocation96_spill] sm:$0xff]  ;;  %v5291_v50 = vld [vmem:[#allocation50_spill] sm:$0xff] }
 0x1dd   : > { %v1703_v63 = vsel %vm1702_vm1, %v1695_v22, %v1658_v53  ;;  %v1705_v28 = vsel %vm1704_vm7, %v1697_v32, %v1659_v21  ;;  %v1707_v62 = vsel %vm1706_vm13, %v1699_v25, %v1660_v17  ;;  %v1709_v40 = vsel %vm1708_vm9, %v1701_v29, %v1661_v11  ;;  %v5275_v53 = vld [vmem:[#allocation105_spill] sm:$0xff]  ;;  %v5292_v6 = vld [vmem:[#allocation46_spill] sm:$0xff] }
 0x1de   : > { %vm1710_vm8 = vcmp.lt.s32.totalorder %v1703_v63, %v1662_v2  ;;  %vm1712_vm14 = vcmp.lt.s32.totalorder %v1705_v28, %v1663_v12  ;;  %vm1714_vm0 = vcmp.lt.s32.totalorder %v1707_v62, %v1664_v48  ;;  %vm1716_vm3 = vcmp.lt.s32.totalorder %v1709_v40, %v1665_v47  ;;  %v5278_v17 = vld [vmem:[#allocation25_spill] sm:$0xff] }
 0x1df   : > { %v1711_v44 = vsel %vm1710_vm8, %v1703_v63, %v1662_v2  ;;  %v1713_v7 = vsel %vm1712_vm14, %v1705_v28, %v1663_v12  ;;  %v1715_v10 = vsel %vm1714_vm0, %v1707_v62, %v1664_v48  ;;  %v1717_v3 = vsel %vm1716_vm3, %v1709_v40, %v1665_v47  ;;  %v5281_v2 = vld [vmem:[#allocation27_spill] sm:$0xff]  ;;  %v5283_v48 = vld [vmem:[#allocation38_spill] sm:$0xff]  ;;  %v5293_v32 = vld [vmem:[#allocation45_spill] sm:$0xff] }
 0x1e0   : > { %vm1718_vm5 = vcmp.lt.s32.totalorder %v1711_v44, %v1666_v13  ;;  %vm1720_vm11 = vcmp.lt.s32.totalorder %v1713_v7, %v1667_v45  ;;  %vm1722_vm6 = vcmp.lt.s32.totalorder %v1715_v10, %v1668_v26  ;;  %vm1724_vm15 = vcmp.lt.s32.totalorder %v1717_v3, %v1669_v4  ;;  %v5282_v12 = vld [vmem:[#allocation31_spill] sm:$0xff]  ;;  %v5284_v47 = vld [vmem:[#allocation34_spill] sm:$0xff]  ;;  %v5294_v25 = vld [vmem:[#allocation49_spill] sm:$0xff] }
 0x1e1   : > { %v1719_v0 = vsel %vm1718_vm5, %v1711_v44, %v1666_v13  ;;  %v1721_v18 = vsel %vm1720_vm11, %v1713_v7, %v1667_v45  ;;  %v1723_v36 = vsel %vm1722_vm6, %v1715_v10, %v1668_v26  ;;  %v1725_v42 = vsel %vm1724_vm15, %v1717_v3, %v1669_v4  ;;  %v5285_v13 = vld [vmem:[#allocation33_spill] sm:$0xff]  ;;  %v5287_v26 = vld [vmem:[#allocation44_spill] sm:$0xff]  ;;  %v5297_v28 = vld [vmem:[#allocation51_spill] sm:$0xff] }
 0x1e2   : > { %vm1726_vm12 = vcmp.lt.s32.totalorder %v1719_v0, %v1721_v18  ;;  %vm1728_vm10 = vcmp.lt.s32.totalorder %v1723_v36, %v1725_v42  ;;  %vm1988_vm2 = vcmp.eq.f32.partialorder %v5270_v49, %v4221_v5  ;;  %vm1989_vm1 = vcmp.eq.f32.partialorder %v5271_v57, %v4221_v5  ;;  %v5286_v45 = vld [vmem:[#allocation37_spill] sm:$0xff]  ;;  %v5288_v4 = vld [vmem:[#allocation40_spill] sm:$0xff]  ;;  %v5300_v44 = vld [vmem:[#allocation59_spill] sm:$0xff] }
 0x1e3   : > { %v1727_v43 = vsel %vm1726_vm12, %v1719_v0, %v1721_v18  ;;  %v1729_v35 = vsel %vm1728_vm10, %v1723_v36, %v1725_v42  ;;  %vm1990_vm7 = vcmp.eq.f32.partialorder %v5272_v56, %v4221_v5  ;;  %vm1991_vm13 = vcmp.eq.f32.partialorder %v5273_v16, %v4221_v5  ;;  %v5295_v29 = vld [vmem:[#allocation57_spill] sm:$0xff]  ;;  %v5296_v63 = vld [vmem:[#allocation52_spill] sm:$0xff]  ;;  %v5319_v56 = vld [vmem:[#allocation79_spill] sm:$0xff] }
 0x1e4   : > { %vm1730_vm9 = vcmp.lt.s32.totalorder %v1727_v43, %v1729_v35  ;;  %vm1992_vm8 = vcmp.eq.f32.partialorder %v5274_v51, %v4221_v5  ;;  %vm1993_vm14 = vcmp.eq.f32.partialorder %v5275_v53, %v4221_v5  ;;  %vm1994_vm0 = vcmp.eq.f32.partialorder %v5276_v59, %v4221_v5  ;;  %v5298_v62 = vld [vmem:[#allocation56_spill] sm:$0xff]  ;;  %v5299_v40 = vld [vmem:[#allocation61_spill] sm:$0xff] }
 0x1e5   : > { %v1731_v21 = vsel %vm1730_vm9, %v1727_v43, %v1729_v35  ;;  %vm2013_vm12 = vcmp.eq.f32.partialorder %v5295_v29, %v4221_v5  ;;  %vm2015_vm9 = vcmp.eq.f32.partialorder %v5297_v28, %v4221_v5  ;;  %vm2016_vm5 = vcmp.eq.f32.partialorder %v5298_v62, %v4221_v5  ;;  %v5313_v57 = vld [vmem:[#allocation76_spill] sm:$0xff]  ;;  %v5315_v43 = vld [vmem:[#allocation77_spill] sm:$0xff]  ;;  %v5317_v35 = vld [vmem:[#allocation78_spill] sm:$0xff] }
 0x1e6   : > { %v1732_v11 = vrot.slane %v1731_v21, 4  ;;  %vm2017_vm11 = vcmp.eq.f32.partialorder %v4212_v24, %v4221_v5  ;;  %vm2018_vm6 = vcmp.eq.f32.partialorder %v5299_v40, %v4221_v5  ;;  %vm2019_vm15 = vcmp.eq.f32.partialorder %v5300_v44, %v4221_v5  ;;  %v5321_v16 = vld [vmem:[#allocation80_spill] sm:$0xff]  ;;  %v5323_v53 = vld [vmem:[#allocation81_spill] sm:$0xff] }
 0x1e7   : > { %v2020_v7 = vsel %vm1988_vm2, %v5225_v31, 256  ;;  %v2021_v3 = vsel %vm1989_vm1, %v3239_v23, 256  ;;  %v2022_v0 = vsel %vm1990_vm7, %v4978_v54, 256  ;;  %v2023_v18 = vsel %vm1991_vm13, %v5226_v55, 256 }
 0x1e8   : > { %vm1733_vm3 = vcmp.lt.s32.totalorder %v1731_v21, %v1732_v11  ;;  %v2024_v31 = vsel %vm1992_vm8, %v4981_v38, 256  ;;  %v2025_v23 = vsel %vm1993_vm14, %v5227_v15, 256  ;;  %v2026_v54 = vsel %vm1994_vm0, %v5228_v34, 256 }
 0x1e9   : > { %v1734_v58 = vsel %vm1733_vm3, %v1731_v21, %v1732_v11  ;;  %vm2014_vm3 = vcmp.eq.f32.partialorder %v5296_v63, %v4221_v5  ;;  %vm5301_vm2 = vcmp.eq.f32.partialorder %v5277_v30, %v4221_v5  ;;  %vm5302_vm1 = vcmp.eq.f32.partialorder %v5278_v17, %v4221_v5  ;;  %v5325_v21 = vld [vmem:[#allocation82_spill] sm:$0xff]  ;;  %v5327_v17 = vld [vmem:[#allocation83_spill] sm:$0xff]  ;;  %v5328_v11 = vld [vmem:[#allocation84_spill] sm:$0xff] }
 0x1ea   : > { %v1735_v22 = vrot.slane %v1734_v58, 2  ;;  %v2027_v55 = vsel %vm5301_vm2, %v4984_v20, 256  ;;  %v2028_v38 = vsel %vm5302_vm1, %v5229_v8, 256  ;;  %vm5303_vm7 = vcmp.eq.f32.partialorder %v5279_v27, %v4221_v5 }
 0x1eb   : > { %v2029_v15 = vsel %vm5303_vm7, %v5231_v14, 256  ;;  %vm5304_vm13 = vcmp.eq.f32.partialorder %v5280_v61, %v4221_v5  ;;  %vm5305_vm14 = vcmp.eq.f32.partialorder %v5281_v2, %v4221_v5  ;;  %vm5306_vm0 = vcmp.eq.f32.partialorder %v5282_v12, %v4221_v5  ;;  %v5329_v2 = vld [vmem:[#allocation85_spill] sm:$0xff] }
 0x1ec   : > { %vm1736_vm10 = vcmp.lt.s32.totalorder %v1734_v58, %v1735_v22  ;;  %v2030_v34 = vsel %vm5304_vm13, %v5233_v9, 256  ;;  %v2031_v20 = vsel %vm5305_vm14, %v5235_v52, 256  ;;  %v2032_v8 = vsel %vm5306_vm0, %v5237_v41, 256 }
 0x1ed   : > { %v1737_v10 = vsel %vm1736_vm10, %v1734_v58, %v1735_v22  ;;  %vm5307_vm10 = vcmp.eq.f32.partialorder %v5283_v48, %v4221_v5  ;;  %vm5308_vm2 = vcmp.eq.f32.partialorder %v5284_v47, %v4221_v5  ;;  %vm5309_vm1 = vcmp.eq.f32.partialorder %v5285_v13, %v4221_v5  ;;  %v5330_v48 = vld [vmem:[#allocation86_spill] sm:$0xff]  ;;  %v5331_v13 = vld [vmem:[#allocation87_spill] sm:$0xff] }
 0x1ee   : > { %v1738_v36 = vrot.slane %v1737_v10, 1  ;;  %v2033_v14 = vsel %vm5307_vm10, %v5239_v19, 256  ;;  %v2034_v9 = vsel %vm5308_vm2, %v5241_v33, 256  ;;  %v2035_v52 = vsel %vm5309_vm1, %v5243_v60, 256 }
 0x1ef   : > { %vm5310_vm7 = vcmp.eq.f32.partialorder %v5286_v45, %v4221_v5  ;;  %vm5312_vm13 = vcmp.eq.f32.partialorder %v5287_v26, %v4221_v5  ;;  %vm5316_vm14 = vcmp.eq.f32.partialorder %v5289_v1, %v4221_v5  ;;  %vm5318_vm0 = vcmp.eq.f32.partialorder %v5290_v39, %v4221_v5  ;;  %v5332_v26 = vld [vmem:[#allocation102_spill] sm:$0xff]  ;;  %v5333_v1 = vld [vmem:[#allocation103_spill] sm:$0xff] }
 0x1f0   : > { %vm1739_vm8 = vcmp.lt.s32.totalorder %v1737_v10, %v1738_v36  ;;  %v2036_v41 = vsel %vm5310_vm7, %v5245_v46, 256  ;;  %v2037_v19 = vsel %vm5312_vm13, %v5247_v37, 256  ;;  %v2039_v60 = vsel %vm5316_vm14, %v5315_v43, 256 }
 0x1f1   : > { %v1740_v42 = vsel %vm1739_vm8, %v1737_v10, %v1738_v36  ;;  %vm5314_vm8 = vcmp.eq.f32.partialorder %v5288_v4, %v4221_v5  ;;  %v2040_v46 = vsel %vm5318_vm0, %v5317_v35, 256  ;;  %vm5320_vm10 = vcmp.eq.f32.partialorder %v5291_v50, %v4221_v5 }
 0x1f2   : > { %1741 = vst.msk [vmem:[%s3842_s12 + $0x2] sm:$0x1] %vm3750_vm4, %v1740_v42  ;;  %v2038_v33 = vsel %vm5314_vm8, %v5313_v57, 256  ;;  %v2041_v37 = vsel %vm5320_vm10, %v5319_v56, 256  ;;  %vm5322_vm2 = vcmp.eq.f32.partialorder %v5292_v6, %v4221_v5  ;;  %vm5324_vm1 = vcmp.eq.f32.partialorder %v5293_v32, %v4221_v5 }
 0x1f3   : > { %v2042_v51 = vsel %vm5322_vm2, %v5321_v16, 256  ;;  %v2043_v59 = vsel %vm5324_vm1, %v5323_v53, 256  ;;  %vm5326_vm7 = vcmp.eq.f32.partialorder %v5294_v25, %v4221_v5  ;;  %v2045_v27 = vsel %vm2013_vm12, %v5327_v17, 256 }
 0x1f4   : > { %v2044_v30 = vsel %vm5326_vm7, %v5325_v21, 256  ;;  %v2046_v61 = vsel %vm2014_vm3, %v5328_v11, 256  ;;  %v2047_v12 = vsel %vm2015_vm9, %v5329_v2, 256  ;;  %v2048_v47 = vsel %vm2016_vm5, %v5330_v48, 256 }
 0x1f5   : > { %v2049_v45 = vsel %vm2017_vm11, %v5331_v13, 256  ;;  %v2050_v4 = vsel %vm2018_vm6, %v5332_v26, 256  ;;  %v2051_v58 = vsel %vm2019_vm15, %v5333_v1, 256  ;;  %vm2052_vm12 = vcmp.lt.s32.totalorder %v2020_v7, %v2024_v31 }
 0x1f6   : > { %v2053_v39 = vsel %vm2052_vm12, %v2020_v7, %v2024_v31  ;;  %vm2054_vm9 = vcmp.lt.s32.totalorder %v2021_v3, %v2025_v23  ;;  %vm2056_vm3 = vcmp.lt.s32.totalorder %v2022_v0, %v2026_v54  ;;  %vm2058_vm5 = vcmp.lt.s32.totalorder %v2023_v18, %v2027_v55 }
 0x1f7   : > { %v2055_v50 = vsel %vm2054_vm9, %v2021_v3, %v2025_v23  ;;  %v2057_v6 = vsel %vm2056_vm3, %v2022_v0, %v2026_v54  ;;  %v2059_v22 = vsel %vm2058_vm5, %v2023_v18, %v2027_v55  ;;  %vm2060_vm13 = vcmp.lt.s32.totalorder %v2053_v39, %v2028_v38 }
 0x1f8   : > { %v2061_v24 = vsel %vm2060_vm13, %v2053_v39, %v2028_v38  ;;  %vm2062_vm11 = vcmp.lt.s32.totalorder %v2055_v50, %v2029_v15  ;;  %vm2064_vm8 = vcmp.lt.s32.totalorder %v2057_v6, %v2030_v34  ;;  %vm2066_vm14 = vcmp.lt.s32.totalorder %v2059_v22, %v2031_v20 }
 0x1f9   : > { %v2063_v32 = vsel %vm2062_vm11, %v2055_v50, %v2029_v15  ;;  %v2065_v25 = vsel %vm2064_vm8, %v2057_v6, %v2030_v34  ;;  %v2067_v29 = vsel %vm2066_vm14, %v2059_v22, %v2031_v20  ;;  %vm2068_vm6 = vcmp.lt.s32.totalorder %v2061_v24, %v2032_v8 }
 0x1fa   : > { %v2069_v63 = vsel %vm2068_vm6, %v2061_v24, %v2032_v8  ;;  %vm2070_vm0 = vcmp.lt.s32.totalorder %v2063_v32, %v2033_v14  ;;  %vm2072_vm15 = vcmp.lt.s32.totalorder %v2065_v25, %v2034_v9  ;;  %vm2074_vm10 = vcmp.lt.s32.totalorder %v2067_v29, %v2035_v52 }
 0x1fb   : > { %v2071_v5 = vsel %vm2070_vm0, %v2063_v32, %v2033_v14  ;;  %v2073_v28 = vsel %vm2072_vm15, %v2065_v25, %v2034_v9  ;;  %v2075_v62 = vsel %vm2074_vm10, %v2067_v29, %v2035_v52  ;;  %vm2076_vm2 = vcmp.lt.s32.totalorder %v2069_v63, %v2036_v41 }
 0x1fc   : > { %v2077_v40 = vsel %vm2076_vm2, %v2069_v63, %v2036_v41  ;;  %vm2078_vm1 = vcmp.lt.s32.totalorder %v2071_v5, %v2037_v19  ;;  %vm2080_vm7 = vcmp.lt.s32.totalorder %v2073_v28, %v2038_v33  ;;  %vm2082_vm12 = vcmp.lt.s32.totalorder %v2075_v62, %v2039_v60 }
 0x1fd   : > { %v2079_v44 = vsel %vm2078_vm1, %v2071_v5, %v2037_v19  ;;  %v2081_v7 = vsel %vm2080_vm7, %v2073_v28, %v2038_v33  ;;  %v2083_v10 = vsel %vm2082_vm12, %v2075_v62, %v2039_v60  ;;  %vm2084_vm9 = vcmp.lt.s32.totalorder %v2077_v40, %v2040_v46 }
 0x1fe   : > { %v2085_v3 = vsel %vm2084_vm9, %v2077_v40, %v2040_v46  ;;  %vm2086_vm3 = vcmp.lt.s32.totalorder %v2079_v44, %v2041_v37  ;;  %vm2088_vm5 = vcmp.lt.s32.totalorder %v2081_v7, %v2042_v51  ;;  %vm2090_vm13 = vcmp.lt.s32.totalorder %v2083_v10, %v2043_v59 }
 0x1ff   : > { %v2087_v0 = vsel %vm2086_vm3, %v2079_v44, %v2041_v37  ;;  %v2089_v18 = vsel %vm2088_vm5, %v2081_v7, %v2042_v51  ;;  %v2091_v36 = vsel %vm2090_vm13, %v2083_v10, %v2043_v59  ;;  %vm2092_vm11 = vcmp.lt.s32.totalorder %v2085_v3, %v2044_v30 }
 0x200   : > { %v2093_v31 = vsel %vm2092_vm11, %v2085_v3, %v2044_v30  ;;  %vm2094_vm8 = vcmp.lt.s32.totalorder %v2087_v0, %v2045_v27  ;;  %vm2096_vm14 = vcmp.lt.s32.totalorder %v2089_v18, %v2046_v61  ;;  %vm2098_vm6 = vcmp.lt.s32.totalorder %v2091_v36, %v2047_v12 }
 0x201   : > { %v2095_v23 = vsel %vm2094_vm8, %v2087_v0, %v2045_v27  ;;  %v2097_v54 = vsel %vm2096_vm14, %v2089_v18, %v2046_v61  ;;  %v2099_v55 = vsel %vm2098_vm6, %v2091_v36, %v2047_v12  ;;  %vm2100_vm0 = vcmp.lt.s32.totalorder %v2093_v31, %v2048_v47 }
 0x202   : > { %v2101_v38 = vsel %vm2100_vm0, %v2093_v31, %v2048_v47  ;;  %vm2102_vm15 = vcmp.lt.s32.totalorder %v2095_v23, %v2049_v45  ;;  %vm2104_vm10 = vcmp.lt.s32.totalorder %v2097_v54, %v2050_v4  ;;  %vm2106_vm2 = vcmp.lt.s32.totalorder %v2099_v55, %v2051_v58 }
 0x203   : > { %v2103_v15 = vsel %vm2102_vm15, %v2095_v23, %v2049_v45  ;;  %v2105_v34 = vsel %vm2104_vm10, %v2097_v54, %v2050_v4  ;;  %v2107_v20 = vsel %vm2106_vm2, %v2099_v55, %v2051_v58 }
 0x204   : > { %vm2108_vm1 = vcmp.lt.s32.totalorder %v2101_v38, %v2103_v15  ;;  %vm2110_vm7 = vcmp.lt.s32.totalorder %v2105_v34, %v2107_v20 }
 0x205   : > { %v2109_v8 = vsel %vm2108_vm1, %v2101_v38, %v2103_v15  ;;  %v2111_v14 = vsel %vm2110_vm7, %v2105_v34, %v2107_v20 }
 0x206   : > { %vm2112_vm12 = vcmp.lt.s32.totalorder %v2109_v8, %v2111_v14 }
 0x207   : > { %v2113_v42 = vsel %vm2112_vm12, %v2109_v8, %v2111_v14 }
 0x208   : > { %v2114_v9 = vrot.slane %v2113_v42, 4 }
 0x20a   : > { %vm2115_vm9 = vcmp.lt.s32.totalorder %v2113_v42, %v2114_v9 }
 0x20b   : > { %v2116_v52 = vsel %vm2115_vm9, %v2113_v42, %v2114_v9 }
 0x20c   : > { %v2117_v41 = vrot.slane %v2116_v52, 2 }
 0x20e   : > { %vm2118_vm3 = vcmp.lt.s32.totalorder %v2116_v52, %v2117_v41 }
 0x20f   : > { %v2119_v19 = vsel %vm2118_vm3, %v2116_v52, %v2117_v41 }
 0x210   : > { %v2120_v57 = vrot.slane %v2119_v19, 1 }
 0x212   : > { %vm2121_vm5 = vcmp.lt.s32.totalorder %v2119_v19, %v2120_v57 }
 0x213   : > { %v2122_v33 = vsel %vm2121_vm5, %v2119_v19, %v2120_v57 }
 0x214   : > { %2123 = vst.msk [vmem:[%s3842_s12 + $0x3] sm:$0x1] %vm3750_vm4, %v2122_v33 }
 0x215 PF: > { %p10_p9 = scmp.ge.s32.totalorder %s2610_s16, 6   ;;  %s5334_s12 = smov %s2566_s13 }
 0x216   : > { %s5335_s13 = smov %s2619_s19  ;;  %s5336_s14 = smov %s2610_s16 }
 0x217   :  { %12 = sbr.rel (!%p10_p9) target bundleno = 2 (0x2), region = 90 }

// kernel: my_neural_network_forward.3
= control target key start
LH: loop header
LB: loop body
LE: loop exit
PB: predicated region body
PF: predicated region fallthrough
CT: control target
= control target key end

     0   :  { %14 = vsyncpa [#allocation4], 0  ;;  %s13594_s0 = inlined_call_operand.vmem [shape: bf16[2,1920], index: 0, kind: input, shape index: {}]   ;;  %s13595_s1 = inlined_call_operand.hbm [shape: bf16[1920,1024], index: 1, kind: input, shape index: {}]   ;;  %s13596_s2 = inlined_call_operand.hbm [shape: f32[1,1024], index: 2, kind: input, shape index: {}]   ;;  %s13597_s3 = inlined_call_operand.vmem [shape: bf16[1024,512], index: 3, kind: input, shape index: {}]   ;;  %s13598_s4 = inlined_call_operand.hbm [shape: f32[1,512], index: 4, kind: input, shape index: {}]   ;;  %s13599_s5 = inlined_call_operand.vmem [shape: bf16[512,256], index: 5, kind: input, shape index: {}]   ;;  %s13600_s6 = inlined_call_operand.hbm [shape: f32[1,256], index: 6, kind: input, shape index: {}]   ;;  %s13601_s7 = inlined_call_operand.vmem [shape: bf16[256,10], index: 7, kind: input, shape index: {}]   ;;  %s13602_s8 = inlined_call_operand.hbm [shape: f32[1,10], index: 8, kind: input, shape index: {}]   ;;  %s13603_s9 = inlined_call_operand.hbm [shape: f32[2,10], index: 9, kind: output, shape index: {}]  }
   0x1   :  { %15 = vsyncpa [#allocation7], 0 }
   0x2   :  { %16 = vsyncpa [#allocation10], 0 }
   0x3   :  { %17 = vsyncpa [#allocation5], 0  ;;  %s12170_s30 = smov [#allocation6]   ;;  %s12171_s11 = smov [#allocation9]  }
   0x4   :  { %s38_s10 = sshll.u32 %s12170_s30, 4  ;;  %s62_s12 = sshll.u32 %s12171_s11, 4  ;;  %s39_s10 = int_to_ptr.vmem [resolvable:$true] %s38_s10  ;;  %s63_s12 = int_to_ptr.vmem [resolvable:$true] %s62_s12 }
   0x5   :  { %s12030_s15 = scalar_lea.hbm %s13596_s2, 128 }
   0x6   :  { %p12031_p0 = scmp.ne.s32.totalorder %s13596_s2, %s12030_s15  ;;  %p12034_p1 = scmp.lt.u32.totalorder %s12030_s15, %s13596_s2 }
   0x8   :  { %p12036_p2 = pnand %p12034_p1, %p12031_p0 }
   0xa   :  { %12039 = shalt.err (!%p12036_p2)
}
   0xb   :  { %s12040_s20 = scalar_lea.vmem %s39_s10, 128  ;;  %p12045_p4 = scmp.lt.s32.totalorder %s39_s10, %s39_s10 }
   0xc   :  { %p12041_p3 = scmp.ne.s32.totalorder %s39_s10, %s12040_s20  ;;  %p12046_p5 = scmp.lt.s32.totalorder %s12040_s20, %s12040_s20 }
   0xe   :  { %p12047_p6 = por %p12046_p5, %p12045_p4 }
  0x10   :  { %p12048_p7 = pnand %p12047_p6, %p12041_p3 }
  0x12   :  { %12051 = shalt.err (!%p12048_p7)
}
  0x13   :  { %41 = dma.hbm_to_vmem [thread:$0]  %s13596_s2, 128, %s39_s10, [#allocation7]  }
  0x14   :  { %s12052_s25 = scalar_lea.hbm %s13600_s6, 32 }
  0x15   :  { %p12053_p8 = scmp.ne.s32.totalorder %s13600_s6, %s12052_s25  ;;  %p12056_p9 = scmp.lt.u32.totalorder %s12052_s25, %s13600_s6 }
  0x17   :  { %p12058_p10 = pnand %p12056_p9, %p12053_p8 }
  0x19   :  { %12061 = shalt.err (!%p12058_p10)
}
  0x1a   :  { %s12062_s30 = scalar_lea.vmem %s63_s12, 32  ;;  %p12067_p12 = scmp.lt.s32.totalorder %s63_s12, %s63_s12 }
  0x1b   :  { %p12063_p11 = scmp.ne.s32.totalorder %s63_s12, %s12062_s30  ;;  %p12068_p13 = scmp.lt.s32.totalorder %s12062_s30, %s12062_s30 }
  0x1d   :  { %p12069_p0 = por %p12068_p13, %p12067_p12 }
  0x1f   :  { %p12070_p1 = pnand %p12069_p0, %p12063_p11 }
  0x21   :  { %12073 = shalt.err (!%p12070_p1)
}
  0x22   :  { %65 = dma.hbm_to_vmem [thread:$0]  %s13600_s6, 32, %s63_s12, [#allocation10]  }
  0x23   :  { %s12172_s11 = smov [#allocation3]   ;;  %s12074_s16 = scalar_lea.hbm %s13595_s1, 122880 }
  0x24   :  { %s25_s13 = sshll.u32 %s12172_s11, 4  ;;  %p12075_p2 = scmp.ne.s32.totalorder %s13595_s1, %s12074_s16  ;;  %s26_s13 = int_to_ptr.vmem [resolvable:$true] %s25_s13 }
  0x25   :  { %p12078_p3 = scmp.lt.u32.totalorder %s12074_s16, %s13595_s1 }
  0x27   :  { %p12080_p4 = pnand %p12078_p3, %p12075_p2 }
  0x29   :  { %12083 = shalt.err (!%p12080_p4)
}
  0x2a   :  { %s12084_s21 = scalar_lea.vmem %s26_s13, 122880  ;;  %p12089_p6 = scmp.lt.s32.totalorder %s26_s13, %s26_s13 }
  0x2b   :  { %p12085_p5 = scmp.ne.s32.totalorder %s26_s13, %s12084_s21  ;;  %p12090_p7 = scmp.lt.s32.totalorder %s12084_s21, %s12084_s21 }
  0x2d   :  { %p12091_p8 = por %p12090_p7, %p12089_p6 }
  0x2f   :  { %p12092_p9 = pnand %p12091_p8, %p12085_p5 }
  0x31   :  { %12095 = shalt.err (!%p12092_p9)
}
  0x32   :  { %s12173_s6 = smov 512   ;;  %s12174_s12 = smov 32  }
  0x33   :  { %31 = dma.hbm_to_vmem [thread:$0]  %s13595_s1, 122880, %s26_s13, [#allocation4], %s12173_s6, %s12173_s6, %s12174_s12  }
  0x34   :  { %s12175_s24 = smov [#allocation8]   ;;  %s12176_s26 = smov [#allocation11]  }
  0x35   :  { %s50_s25 = sshll.u32 %s12175_s24, 4  ;;  %s74_s27 = sshll.u32 %s12176_s26, 4  ;;  %s51_s25 = int_to_ptr.vmem [resolvable:$true] %s50_s25  ;;  %s75_s27 = int_to_ptr.vmem [resolvable:$true] %s74_s27 }
  0x36   :  { %s12096_s30 = scalar_lea.hbm %s13598_s4, 64 }
  0x37   :  { %p12097_p10 = scmp.ne.s32.totalorder %s13598_s4, %s12096_s30  ;;  %p12100_p11 = scmp.lt.u32.totalorder %s12096_s30, %s13598_s4 }
  0x39   :  { %p12102_p12 = pnand %p12100_p11, %p12097_p10 }
  0x3b   :  { %12105 = shalt.err (!%p12102_p12)
}
  0x3c   :  { %s12106_s1 = scalar_lea.vmem %s51_s25, 64  ;;  %p12111_p0 = scmp.lt.s32.totalorder %s51_s25, %s51_s25 }
  0x3d   :  { %p12107_p13 = scmp.ne.s32.totalorder %s51_s25, %s12106_s1  ;;  %p12112_p1 = scmp.lt.s32.totalorder %s12106_s1, %s12106_s1 }
  0x3f   :  { %p12113_p2 = por %p12112_p1, %p12111_p0 }
  0x41   :  { %p12114_p3 = pnand %p12113_p2, %p12107_p13 }
  0x43   :  { %12117 = shalt.err (!%p12114_p3)
}
  0x44   :  { %53 = dma.hbm_to_vmem [thread:$0]  %s13598_s4, 64, %s51_s25, [#allocation7]  }
  0x45   :  { %s12118_s18 = scalar_lea.hbm %s13602_s8, 16 }
  0x46   :  { %p12119_p4 = scmp.ne.s32.totalorder %s13602_s8, %s12118_s18  ;;  %p12122_p5 = scmp.lt.u32.totalorder %s12118_s18, %s13602_s8 }
  0x48   :  { %p12124_p6 = pnand %p12122_p5, %p12119_p4 }
  0x4a   :  { %12127 = shalt.err (!%p12124_p6)
}
  0x4b   :  { %s12128_s12 = scalar_lea.vmem %s75_s27, 16  ;;  %s12132_s22 = scalar_lea.vmem %s75_s27, 32 }
  0x4c   :  { %p12129_p7 = scmp.ne.s32.totalorder %s75_s27, %s12128_s12  ;;  %p12133_p8 = scmp.lt.s32.totalorder %s75_s27, %s75_s27 }
  0x4d   :  { %p12134_p9 = scmp.lt.s32.totalorder %s12132_s22, %s12128_s12 }
  0x4f   :  { %p12135_p10 = por %p12134_p9, %p12133_p8 }
  0x51   :  { %p12136_p11 = pnand %p12135_p10, %p12129_p7 }
  0x53   :  { %12139 = shalt.err (!%p12136_p11)
}
  0x54   :  { %77 = dma.hbm_to_vmem [thread:$0]  %s13602_s8, 16, %s75_s27, [#allocation10]  }
  0x55   :  { %12162 = dma.done.wait [#allocation4], 122880  }
  0x56   :  { %12163 = vsyncadd [#allocation4], 4294844416 }
  0x57   :  { %12164 = dma.done.wait [#allocation7], 192  }
  0x58   :  { %12165 = vsyncadd [#allocation7], 4294967104 }
  0x59   :  { %12166 = dma.done.wait [#allocation10], 48  }
  0x5a   :  { %12167 = vsyncadd [#allocation10], 4294967248  ;;  %v104_v0 = vld [vmem:[#allocation3] sm:$0xff]  ;;  %v12177_v32 = vmov 1966171168   ;;  %v1070_v34 = vlaneseq  ;;  %vm10020_vm0 = vcmask 74752  }
  0x5b   :  { %v108_v1 = vld [vmem:[#allocation3 + $0x20] sm:$0xff]  ;;  %v1068_v33 = vunpack.c.l.s4 %v12177_v32 }
  0x5c   :  { %v232_v2 = vld [vmem:[#allocation3 + $0x400] sm:$0xff]  ;;  %v10052_v3 = vcombine.high %v104_v0, %v108_v1  ;;  %v10051_v5 = vcombine.low %v104_v0, %v108_v1  ;;  %v12291_v44 = vshrl.u32 %v1070_v34, 7 }
  0x5d   :  { %v236_v4 = vld [vmem:[#allocation3 + $0x420] sm:$0xff]  ;;  %v1069_v43 = vunpack.c.0.s8 %v1068_v33 }
  0x5e   :  { %v112_v6 = vld [vmem:[#allocation3 + $0x40] sm:$0xff]  ;;  %v10180_v8 = vcombine.high %v232_v2, %v236_v4  ;;  %v10179_v9 = vcombine.low %v232_v2, %v236_v4  ;;  %5978 = vmatprep.subr.bf16.mxu1 %v10052_v3 }
  0x5f   :  { %v116_v7 = vld [vmem:[#allocation3 + $0x60] sm:$0xff]  ;;  %5979 = vmatpush1.bf16.msra.mxu1 %v10051_v5  ;;  %v12294_v53 = vsub.s32 %v1069_v43, %v12291_v44 }
  0x60   :  { %v10060_v10 = vcombine.high %v112_v6, %v116_v7  ;;  %v240_v11 = vld [vmem:[#allocation3 + $0x440] sm:$0xff]  ;;  %6019 = vmatprep.subr.bf16.mxu0 %v10180_v8  ;;  %v10059_v18 = vcombine.low %v112_v6, %v116_v7 }
  0x61   :  { %v244_v12 = vld [vmem:[#allocation3 + $0x460] sm:$0xff]  ;;  %6020 = vmatpush1.bf16.msra.mxu0 %v10179_v9 }
  0x62   :  { %v120_v13 = vld [vmem:[#allocation3 + $0x80] sm:$0xff]  ;;  %v10188_v14 = vcombine.high %v240_v11, %v244_v12  ;;  %5980 = vmatprep.subr.bf16.mxu1 %v10060_v10  ;;  %v10187_v19 = vcombine.low %v240_v11, %v244_v12 }
  0x63   :  { %v124_v15 = vld [vmem:[#allocation3 + $0xa0] sm:$0xff]  ;;  %5981 = vmatpush1.bf16.msra.mxu1 %v10059_v18 }
  0x64   :  { %v248_v16 = vld [vmem:[#allocation3 + $0x480] sm:$0xff]  ;;  %v10068_v20 = vcombine.high %v120_v13, %v124_v15  ;;  %6021 = vmatprep.subr.bf16.mxu0 %v10188_v14  ;;  %v10067_v26 = vcombine.low %v120_v13, %v124_v15 }
  0x65   :  { %v252_v17 = vld [vmem:[#allocation3 + $0x4a0] sm:$0xff]  ;;  %6022 = vmatpush1.bf16.msra.mxu0 %v10187_v19 }
  0x66   :  { %v10196_v21 = vcombine.high %v248_v16, %v252_v17  ;;  %v128_v22 = vld [vmem:[#allocation3 + $0xc0] sm:$0xff]  ;;  %5982 = vmatprep.subr.bf16.mxu1 %v10068_v20  ;;  %v10195_v27 = vcombine.low %v248_v16, %v252_v17 }
  0x67   :  { %v132_v23 = vld [vmem:[#allocation3 + $0xe0] sm:$0xff]  ;;  %5983 = vmatpush1.bf16.msra.mxu1 %v10067_v26 }
  0x68   :  { %v256_v24 = vld [vmem:[#allocation3 + $0x4c0] sm:$0xff]  ;;  %v10076_v28 = vcombine.high %v128_v22, %v132_v23  ;;  %6023 = vmatprep.subr.bf16.mxu0 %v10196_v21  ;;  %v10075_v37 = vcombine.low %v128_v22, %v132_v23 }
  0x69   :  { %v260_v25 = vld [vmem:[#allocation3 + $0x4e0] sm:$0xff]  ;;  %6024 = vmatpush1.bf16.msra.mxu0 %v10195_v27 }
  0x6a   :  { %v10204_v29 = vcombine.high %v256_v24, %v260_v25  ;;  %v136_v30 = vld [vmem:[#allocation3 + $0x100] sm:$0xff]  ;;  %5984 = vmatprep.subr.bf16.mxu1 %v10076_v28  ;;  %v10203_v38 = vcombine.low %v256_v24, %v260_v25 }
  0x6b   :  { %v140_v31 = vld [vmem:[#allocation3 + $0x120] sm:$0xff]  ;;  %5985 = vmatpush1.bf16.msra.mxu1 %v10075_v37 }
  0x6c   :  { %v264_v35 = vld [vmem:[#allocation3 + $0x500] sm:$0xff]  ;;  %v10084_v39 = vcombine.high %v136_v30, %v140_v31  ;;  %6025 = vmatprep.subr.bf16.mxu0 %v10204_v29  ;;  %v10083_v47 = vcombine.low %v136_v30, %v140_v31 }
  0x6d   :  { %v268_v36 = vld [vmem:[#allocation3 + $0x520] sm:$0xff]  ;;  %6026 = vmatpush1.bf16.msra.mxu0 %v10203_v38 }
  0x6e   :  { %v10212_v40 = vcombine.high %v264_v35, %v268_v36  ;;  %v144_v41 = vld [vmem:[#allocation3 + $0x140] sm:$0xff]  ;;  %5986 = vmatprep.subr.bf16.mxu1 %v10084_v39  ;;  %v10211_v48 = vcombine.low %v264_v35, %v268_v36 }
  0x6f   :  { %v148_v42 = vld [vmem:[#allocation3 + $0x160] sm:$0xff]  ;;  %5987 = vmatpush1.bf16.msra.mxu1 %v10083_v47 }
  0x70   :  { %v272_v45 = vld [vmem:[#allocation3 + $0x540] sm:$0xff]  ;;  %v10092_v49 = vcombine.high %v144_v41, %v148_v42  ;;  %6027 = vmatprep.subr.bf16.mxu0 %v10212_v40  ;;  %v10091_v56 = vcombine.low %v144_v41, %v148_v42 }
  0x71   :  { %v276_v46 = vld [vmem:[#allocation3 + $0x560] sm:$0xff]  ;;  %6028 = vmatpush1.bf16.msra.mxu0 %v10211_v48 }
  0x72   :  { %v10220_v50 = vcombine.high %v272_v45, %v276_v46  ;;  %v152_v51 = vld [vmem:[#allocation3 + $0x180] sm:$0xff]  ;;  %5988 = vmatprep.subr.bf16.mxu1 %v10092_v49  ;;  %v10219_v57 = vcombine.low %v272_v45, %v276_v46 }
  0x73   :  { %v156_v52 = vld [vmem:[#allocation3 + $0x1a0] sm:$0xff]  ;;  %5989 = vmatpush1.bf16.msra.mxu1 %v10091_v56 }
  0x74   :  { %v280_v54 = vld [vmem:[#allocation3 + $0x580] sm:$0xff]  ;;  %v10100_v58 = vcombine.high %v152_v51, %v156_v52  ;;  %6029 = vmatprep.subr.bf16.mxu0 %v10220_v50  ;;  %v10099_v2 = vcombine.low %v152_v51, %v156_v52 }
  0x75   :  { %v284_v55 = vld [vmem:[#allocation3 + $0x5a0] sm:$0xff]  ;;  %6030 = vmatpush1.bf16.msra.mxu0 %v10219_v57 }
  0x76   :  { %v12299_v59 = vld [vmem:[%s13594_s0] sm:$0xff]  ;;  %v10228_v60 = vcombine.high %v280_v54, %v284_v55  ;;  %5990 = vmatprep.subr.bf16.mxu1 %v10100_v58  ;;  %v10227_v4 = vcombine.low %v280_v54, %v284_v55 }
  0x77   :  { %v160_v61 = vld [vmem:[#allocation3 + $0x1c0] sm:$0xff]  ;;  %v12303_v63 = vrot.slane %v12299_v59, %v12294_v53  ;;  %5991 = vmatpush1.bf16.msra.mxu1 %v10099_v2 }
  0x78   :  { %v164_v62 = vld [vmem:[#allocation3 + $0x1e0] sm:$0xff]  ;;  %6031 = vmatprep.subr.bf16.mxu0 %v10228_v60 }
  0x79   :  { %v288_v0 = vld [vmem:[#allocation3 + $0x5c0] sm:$0xff]  ;;  %v1081_v3 = vcombine.high %v12303_v63, %v12303_v63  ;;  %v10108_v5 = vcombine.high %v160_v61, %v164_v62  ;;  %v10107_v12 = vcombine.low %v160_v61, %v164_v62  ;;  %6032 = vmatpush1.bf16.msra.mxu0 %v10227_v4 }
  0x7a   :  { %v292_v1 = vld [vmem:[#allocation3 + $0x5e0] sm:$0xff] }
  0x7b   :  { %v10236_v6 = vcombine.high %v288_v0, %v292_v1  ;;  %v168_v7 = vld [vmem:[#allocation3 + $0x200] sm:$0xff]  ;;  %v12308_v9 = vrot.slane %v1081_v3, %v12294_v53  ;;  %5992 = vmatprep.subr.bf16.mxu1 %v10108_v5  ;;  %v10235_v14 = vcombine.low %v288_v0, %v292_v1 }
  0x7c   :  { %v172_v8 = vld [vmem:[#allocation3 + $0x220] sm:$0xff]  ;;  %5993 = vmatpush1.bf16.msra.mxu1 %v10107_v12 }
  0x7d   :  { %v296_v10 = vld [vmem:[#allocation3 + $0x600] sm:$0xff]  ;;  %6010 = vmatprep.mubr.bf16.mxu1 %v12308_v9  ;;  %v12313_v13 = vcombine.high %v12308_v9, %v12308_v9  ;;  %v10116_v15 = vcombine.high %v168_v7, %v172_v8  ;;  %6033 = vmatprep.subr.bf16.mxu0 %v10236_v6  ;;  %v10115_v21 = vcombine.low %v168_v7, %v172_v8 }
  0x7e   :  { %v300_v11 = vld [vmem:[#allocation3 + $0x620] sm:$0xff]  ;;  %6034 = vmatpush1.bf16.msra.mxu0 %v10235_v14  ;;  %v1066_v7 = vcombine.high %v12299_v59, %v12299_v59  ;;  %v12323_v59 = vrot.slane %v12303_v63, %v12294_v53 }
  0x7f   :  { %v10244_v16 = vcombine.high %v296_v10, %v300_v11  ;;  %v176_v17 = vld [vmem:[#allocation3 + $0x240] sm:$0xff]  ;;  %6051 = vmatprep.mubr.bf16.mxu0 %v12313_v13  ;;  %5994 = vmatprep.subr.bf16.mxu1 %v10116_v15  ;;  %v10243_v22 = vcombine.low %v296_v10, %v300_v11 }
  0x80   :  { %v180_v18 = vld [vmem:[#allocation3 + $0x260] sm:$0xff]  ;;  %5995 = vmatpush1.bf16.msra.mxu1 %v10115_v21 }
  0x81   :  { %v304_v19 = vld [vmem:[#allocation3 + $0x640] sm:$0xff]  ;;  %v10124_v23 = vcombine.high %v176_v17, %v180_v18  ;;  %6035 = vmatprep.subr.bf16.mxu0 %v10244_v16  ;;  %v10123_v29 = vcombine.low %v176_v17, %v180_v18  ;;  %v105_v16 = vld [vmem:[#allocation3 + $0x8] sm:$0xff]  ;;  %v12319_v18 = vrot.slane %v1066_v7, %v12294_v53 }
  0x82   :  { %v308_v20 = vld [vmem:[#allocation3 + $0x660] sm:$0xff]  ;;  %6036 = vmatpush1.bf16.msra.mxu0 %v10243_v22  ;;  %v109_v17 = vld [vmem:[#allocation3 + $0x28] sm:$0xff] }
  0x83   :  { %v10252_v24 = vcombine.high %v304_v19, %v308_v20  ;;  %v184_v25 = vld [vmem:[#allocation3 + $0x280] sm:$0xff]  ;;  %5996 = vmatprep.subr.bf16.mxu1 %v10124_v23  ;;  %v10251_v30 = vcombine.low %v304_v19, %v308_v20  ;;  %v10054_v23 = vcombine.high %v105_v16, %v109_v17 }
  0x84   :  { %v188_v26 = vld [vmem:[#allocation3 + $0x2a0] sm:$0xff]  ;;  %5997 = vmatpush1.bf16.msra.mxu1 %v10123_v29 }
  0x85   :  { %v312_v27 = vld [vmem:[#allocation3 + $0x680] sm:$0xff]  ;;  %v10132_v31 = vcombine.high %v184_v25, %v188_v26  ;;  %6037 = vmatprep.subr.bf16.mxu0 %v10252_v24  ;;  %v10131_v37 = vcombine.low %v184_v25, %v188_v26  ;;  %v113_v25 = vld [vmem:[#allocation3 + $0x48] sm:$0xff] }
  0x86   :  { %v316_v28 = vld [vmem:[#allocation3 + $0x6a0] sm:$0xff]  ;;  %6038 = vmatpush1.bf16.msra.mxu0 %v10251_v30  ;;  %v117_v26 = vld [vmem:[#allocation3 + $0x68] sm:$0xff]  ;;  %v10053_v30 = vcombine.low %v105_v16, %v109_v17 }
  0x87   :  { %v10260_v32 = vcombine.high %v312_v27, %v316_v28  ;;  %v192_v33 = vld [vmem:[#allocation3 + $0x2c0] sm:$0xff]  ;;  %5998 = vmatprep.subr.bf16.mxu1 %v10132_v31  ;;  %v10259_v38 = vcombine.low %v312_v27, %v316_v28  ;;  %v1082_v27 = vcombine.high %v12319_v18, %v12319_v18  ;;  %v12329_v31 = vcombine.high %v12323_v59, %v12323_v59 }
  0x88   :  { %v196_v34 = vld [vmem:[#allocation3 + $0x2e0] sm:$0xff]  ;;  %5999 = vmatpush1.bf16.msra.mxu1 %v10131_v37  ;;  %v125_v37 = vld [vmem:[#allocation3 + $0xa8] sm:$0xff] }
  0x89   :  { %v320_v35 = vld [vmem:[#allocation3 + $0x6c0] sm:$0xff]  ;;  %v10140_v39 = vcombine.high %v192_v33, %v196_v34  ;;  %6039 = vmatprep.subr.bf16.mxu0 %v10260_v32  ;;  %v10139_v46 = vcombine.low %v192_v33, %v196_v34  ;;  %v10062_v32 = vcombine.high %v113_v25, %v117_v26 }
  0x8a   :  { %v324_v36 = vld [vmem:[#allocation3 + $0x6e0] sm:$0xff]  ;;  %6040 = vmatpush1.bf16.msra.mxu0 %v10259_v38  ;;  %v12332_v38 = vrot.slane %v1082_v27, %v12294_v53  ;;  %v169_v27 = vld [vmem:[#allocation3 + $0x208] sm:$0xff] }
  0x8b   :  { %v10268_v40 = vcombine.high %v320_v35, %v324_v36  ;;  %v200_v41 = vld [vmem:[#allocation3 + $0x300] sm:$0xff]  ;;  %6000 = vmatprep.subr.bf16.mxu1 %v10140_v39  ;;  %v10267_v47 = vcombine.low %v320_v35, %v324_v36  ;;  %v121_v35 = vld [vmem:[#allocation3 + $0x88] sm:$0xff]  ;;  %v10061_v39 = vcombine.low %v113_v25, %v117_v26 }
  0x8c   :  { %v204_v42 = vld [vmem:[#allocation3 + $0x320] sm:$0xff]  ;;  %6001 = vmatpush1.bf16.msra.mxu1 %v10139_v46 }
  0x8d   :  { %v328_v43 = vld [vmem:[#allocation3 + $0x700] sm:$0xff]  ;;  %v10148_v48 = vcombine.high %v200_v41, %v204_v42  ;;  %6041 = vmatprep.subr.bf16.mxu0 %v10268_v40  ;;  %v10147_v55 = vcombine.low %v200_v41, %v204_v42  ;;  %v10070_v41 = vcombine.high %v121_v35, %v125_v37 }
  0x8e   :  { %v332_v45 = vld [vmem:[#allocation3 + $0x720] sm:$0xff]  ;;  %6042 = vmatpush1.bf16.msra.mxu0 %v10267_v47  ;;  %v133_v47 = vld [vmem:[#allocation3 + $0xe8] sm:$0xff] }
  0x8f   :  { %v10276_v49 = vcombine.high %v328_v43, %v332_v45  ;;  %v208_v50 = vld [vmem:[#allocation3 + $0x340] sm:$0xff]  ;;  %6002 = vmatprep.subr.bf16.mxu1 %v10148_v48  ;;  %v10275_v56 = vcombine.low %v328_v43, %v332_v45  ;;  %v129_v45 = vld [vmem:[#allocation3 + $0xc8] sm:$0xff]  ;;  %v10069_v48 = vcombine.low %v121_v35, %v125_v37 }
  0x90   :  { %v212_v51 = vld [vmem:[#allocation3 + $0x360] sm:$0xff]  ;;  %6003 = vmatpush1.bf16.msra.mxu1 %v10147_v55  ;;  %v177_v35 = vld [vmem:[#allocation3 + $0x248] sm:$0xff] }
  0x91   :  { %v336_v52 = vld [vmem:[#allocation3 + $0x740] sm:$0xff]  ;;  %v10156_v57 = vcombine.high %v208_v50, %v212_v51  ;;  %6043 = vmatprep.subr.bf16.mxu0 %v10276_v49  ;;  %v10155_v1 = vcombine.low %v208_v50, %v212_v51  ;;  %v10078_v50 = vcombine.high %v129_v45, %v133_v47  ;;  %v181_v37 = vld [vmem:[#allocation3 + $0x268] sm:$0xff] }
  0x92   :  { %v340_v54 = vld [vmem:[#allocation3 + $0x760] sm:$0xff]  ;;  %6044 = vmatpush1.bf16.msra.mxu0 %v10275_v56  ;;  %v141_v56 = vld [vmem:[#allocation3 + $0x128] sm:$0xff] }
  0x93   :  { %v10284_v58 = vcombine.high %v336_v52, %v340_v54  ;;  %v216_v60 = vld [vmem:[#allocation3 + $0x380] sm:$0xff]  ;;  %6004 = vmatprep.subr.bf16.mxu1 %v10156_v57  ;;  %v10283_v2 = vcombine.low %v336_v52, %v340_v54  ;;  %v137_v54 = vld [vmem:[#allocation3 + $0x108] sm:$0xff]  ;;  %v10077_v57 = vcombine.low %v129_v45, %v133_v47 }
  0x94   :  { %v220_v61 = vld [vmem:[#allocation3 + $0x3a0] sm:$0xff]  ;;  %6005 = vmatpush1.bf16.msra.mxu1 %v10155_v1  ;;  %v185_v45 = vld [vmem:[#allocation3 + $0x288] sm:$0xff] }
  0x95   :  { %v344_v62 = vld [vmem:[#allocation3 + $0x780] sm:$0xff]  ;;  %v10164_v3 = vcombine.high %v216_v60, %v220_v61  ;;  %6045 = vmatprep.subr.bf16.mxu0 %v10284_v58  ;;  %v10163_v11 = vcombine.low %v216_v60, %v220_v61  ;;  %v10086_v60 = vcombine.high %v137_v54, %v141_v56  ;;  %v189_v47 = vld [vmem:[#allocation3 + $0x2a8] sm:$0xff] }
  0x96   :  { %v348_v0 = vld [vmem:[#allocation3 + $0x7a0] sm:$0xff]  ;;  %6046 = vmatpush1.bf16.msra.mxu0 %v10283_v2  ;;  %v149_v2 = vld [vmem:[#allocation3 + $0x168] sm:$0xff] }
  0x97   :  { %v10292_v4 = vcombine.high %v344_v62, %v348_v0  ;;  %v224_v5 = vld [vmem:[#allocation3 + $0x3c0] sm:$0xff]  ;;  %6006 = vmatprep.subr.bf16.mxu1 %v10164_v3  ;;  %v10291_v12 = vcombine.low %v344_v62, %v348_v0  ;;  %v145_v0 = vld [vmem:[#allocation3 + $0x148] sm:$0xff]  ;;  %v10085_v3 = vcombine.low %v137_v54, %v141_v56 }
  0x98   :  { %v228_v6 = vld [vmem:[#allocation3 + $0x3e0] sm:$0xff]  ;;  %6007 = vmatpush1.bf16.msra.mxu1 %v10163_v11  ;;  %v157_v11 = vld [vmem:[#allocation3 + $0x1a8] sm:$0xff] }
  0x99   :  { %v352_v8 = vld [vmem:[#allocation3 + $0x7c0] sm:$0xff]  ;;  %v10172_v14 = vcombine.high %v224_v5, %v228_v6  ;;  %6047 = vmatprep.subr.bf16.mxu0 %v10292_v4  ;;  %v10171_v21 = vcombine.low %v224_v5, %v228_v6  ;;  %v10094_v5 = vcombine.high %v145_v0, %v149_v2  ;;  %v193_v54 = vld [vmem:[#allocation3 + $0x2c8] sm:$0xff] }
  0x9a   :  { %v356_v10 = vld [vmem:[#allocation3 + $0x7e0] sm:$0xff]  ;;  %6048 = vmatpush1.bf16.msra.mxu0 %v10291_v12  ;;  %v10093_v12 = vcombine.low %v145_v0, %v149_v2  ;;  %v197_v56 = vld [vmem:[#allocation3 + $0x2e8] sm:$0xff] }
  0x9b   :  { %v10300_v15 = vcombine.high %v352_v8, %v356_v10  ;;  %v360_v19 = vld [vmem:[#allocation3 + $0x800] sm:$0xff]  ;;  %6008 = vmatprep.subr.bf16.mxu1 %v10172_v14  ;;  %v10299_v22 = vcombine.low %v352_v8, %v356_v10  ;;  %v153_v8 = vld [vmem:[#allocation3 + $0x188] sm:$0xff] }
  0x9c   :  { %v364_v20 = vld [vmem:[#allocation3 + $0x820] sm:$0xff]  ;;  %6009 = vmatpush1.bf16.msra.mxu1 %v10171_v21  ;;  %v165_v21 = vld [vmem:[#allocation3 + $0x1e8] sm:$0xff] }
  0x9d   :  { %6049 = vmatprep.subr.bf16.mxu0 %v10300_v15  ;;  %v10308_v24 = vcombine.high %v360_v19, %v364_v20  ;;  %v368_v28 = vld [vmem:[#allocation3 + $0x840] sm:$0xff]  ;;  %v10307_v63 = vcombine.low %v360_v19, %v364_v20  ;;  %6306 = vmatprep.subr.bf16.mxu1 %v10054_v23  ;;  %v10102_v15 = vcombine.high %v153_v8, %v157_v11  ;;  %v161_v19 = vld [vmem:[#allocation3 + $0x1c8] sm:$0xff] }
  0x9e   :  { %v372_v29 = vld [vmem:[#allocation3 + $0x860] sm:$0xff]  ;;  %6050 = vmatpush1.bf16.msra.mxu0 %v10299_v22  ;;  %v10101_v22 = vcombine.low %v153_v8, %v157_v11  ;;  %v201_v0 = vld [vmem:[#allocation3 + $0x308] sm:$0xff] }
  0x9f   :  { %v376_v33 = vld [vmem:[#allocation3 + $0x880] sm:$0xff]  ;;  %6060 = vmatprep.subr.bf16.mxu0 %v10308_v24  ;;  %v10316_v36 = vcombine.high %v368_v28, %v372_v29  ;;  %6011 = vmatmul.mubr.bf16.vlgmr.msra.gmra.mrb[0].mxu1 %v12323_v59  ;;  %v10315_v40 = vcombine.low %v368_v28, %v372_v29  ;;  %v10110_v24 = vcombine.high %v161_v19, %v165_v21  ;;  %v173_v29 = vld [vmem:[#allocation3 + $0x228] sm:$0xff] }
  0xa0   :  { %v380_v34 = vld [vmem:[#allocation3 + $0x8a0] sm:$0xff]  ;;  %6307 = vmatpush1.bf16.msra.mxu1 %v10053_v30  ;;  %6338 = vmatprep.mubr.bf16.mxu1 %v12308_v9  ;;  %v10109_v30 = vcombine.low %v161_v19, %v165_v21  ;;  %v205_v2 = vld [vmem:[#allocation3 + $0x328] sm:$0xff] }
  0xa1   :  { %6052 = vmatmul.mubr.bf16.vlgmr.msra.gmra.mrb[0].mxu0 %v12329_v31  ;;  %6308 = vmatprep.subr.bf16.mxu1 %v10062_v32  ;;  %v384_v42 = vld [vmem:[#allocation3 + $0x8c0] sm:$0xff]  ;;  %v10324_v46 = vcombine.high %v376_v33, %v380_v34  ;;  %v10323_v49 = vcombine.low %v376_v33, %v380_v34  ;;  %v10118_v32 = vcombine.high %v169_v27, %v173_v29  ;;  %v209_v8 = vld [vmem:[#allocation3 + $0x348] sm:$0xff] }
  0xa2   :  { %6061 = vmatpush1.bf16.msra.mxu0 %v10307_v63  ;;  %v388_v43 = vld [vmem:[#allocation3 + $0x8e0] sm:$0xff]  ;;  %6092 = vmatprep.mubr.bf16.mxu0 %v12332_v38  ;;  %v213_v11 = vld [vmem:[#allocation3 + $0x368] sm:$0xff] }
  0xa3   :  { %6062 = vmatprep.subr.bf16.mxu0 %v10316_v36  ;;  %v392_v51 = vld [vmem:[#allocation3 + $0x900] sm:$0xff]  ;;  %v10332_v55 = vcombine.high %v384_v42, %v388_v43  ;;  %v10331_v58 = vcombine.low %v384_v42, %v388_v43  ;;  %v217_v19 = vld [vmem:[#allocation3 + $0x388] sm:$0xff] }
  0xa4   :  { %6309 = vmatpush1.bf16.msra.mxu1 %v10061_v39  ;;  %v396_v52 = vld [vmem:[#allocation3 + $0x920] sm:$0xff]  ;;  %v10117_v39 = vcombine.low %v169_v27, %v173_v29  ;;  %v221_v21 = vld [vmem:[#allocation3 + $0x3a8] sm:$0xff] }
  0xa5   :  { %6310 = vmatprep.subr.bf16.mxu1 %v10070_v41  ;;  %v400_v61 = vld [vmem:[#allocation3 + $0x940] sm:$0xff]  ;;  %v10340_v1 = vcombine.high %v392_v51, %v396_v52  ;;  %v10339_v4 = vcombine.low %v392_v51, %v396_v52  ;;  %v10126_v41 = vcombine.high %v177_v35, %v181_v37  ;;  %v225_v27 = vld [vmem:[#allocation3 + $0x3c8] sm:$0xff] }
  0xa6   :  { %6063 = vmatpush1.bf16.msra.mxu0 %v10315_v40  ;;  %v404_v62 = vld [vmem:[#allocation3 + $0x960] sm:$0xff]  ;;  %v229_v29 = vld [vmem:[#allocation3 + $0x3e8] sm:$0xff] }
  0xa7   :  { %6064 = vmatprep.subr.bf16.mxu0 %v10324_v46  ;;  %v408_v6 = vld [vmem:[#allocation3 + $0x980] sm:$0xff]  ;;  %v10348_v10 = vcombine.high %v400_v61, %v404_v62  ;;  %v10347_v14 = vcombine.low %v400_v61, %v404_v62 }
  0xa8   :  { %6311 = vmatpush1.bf16.msra.mxu1 %v10069_v48  ;;  %v412_v7 = vld [vmem:[#allocation3 + $0x9a0] sm:$0xff]  ;;  %v10125_v48 = vcombine.low %v177_v35, %v181_v37  ;;  %v233_v35 = vld [vmem:[#allocation3 + $0x408] sm:$0xff] }
  0xa9   :  { %6312 = vmatprep.subr.bf16.mxu1 %v10078_v50  ;;  %v416_v16 = vld [vmem:[#allocation3 + $0x9c0] sm:$0xff]  ;;  %v10356_v20 = vcombine.high %v408_v6, %v412_v7  ;;  %v10355_v23 = vcombine.low %v408_v6, %v412_v7  ;;  %v10134_v50 = vcombine.high %v185_v45, %v189_v47  ;;  %v237_v37 = vld [vmem:[#allocation3 + $0x428] sm:$0xff] }
  0xaa   :  { %6065 = vmatpush1.bf16.msra.mxu0 %v10323_v49  ;;  %v420_v17 = vld [vmem:[#allocation3 + $0x9e0] sm:$0xff] }
  0xab   :  { %6066 = vmatprep.subr.bf16.mxu0 %v10332_v55  ;;  %v424_v25 = vld [vmem:[#allocation3 + $0xa00] sm:$0xff]  ;;  %v10364_v28 = vcombine.high %v416_v16, %v420_v17  ;;  %v10363_v63 = vcombine.low %v416_v16, %v420_v17 }
  0xac   :  { %6313 = vmatpush1.bf16.msra.mxu1 %v10077_v57  ;;  %v428_v26 = vld [vmem:[#allocation3 + $0xa20] sm:$0xff]  ;;  %v10133_v57 = vcombine.low %v185_v45, %v189_v47  ;;  %v245_v47 = vld [vmem:[#allocation3 + $0x468] sm:$0xff] }
  0xad   :  { %6314 = vmatprep.subr.bf16.mxu1 %v10086_v60  ;;  %v432_v33 = vld [vmem:[#allocation3 + $0xa40] sm:$0xff]  ;;  %v10372_v36 = vcombine.high %v424_v25, %v428_v26  ;;  %v10371_v40 = vcombine.low %v424_v25, %v428_v26  ;;  %v10142_v60 = vcombine.high %v193_v54, %v197_v56 }
  0xae   :  { %6067 = vmatpush1.bf16.msra.mxu0 %v10331_v58  ;;  %v436_v34 = vld [vmem:[#allocation3 + $0xa60] sm:$0xff] }
  0xaf   :  { %6068 = vmatprep.subr.bf16.mxu0 %v10340_v1  ;;  %v440_v42 = vld [vmem:[#allocation3 + $0xa80] sm:$0xff]  ;;  %v10380_v46 = vcombine.high %v432_v33, %v436_v34  ;;  %v10379_v49 = vcombine.low %v432_v33, %v436_v34 }
  0xb0   :  { %6315 = vmatpush1.bf16.msra.mxu1 %v10085_v3  ;;  %v444_v43 = vld [vmem:[#allocation3 + $0xaa0] sm:$0xff]  ;;  %v10141_v3 = vcombine.low %v193_v54, %v197_v56 }
  0xb1   :  { %6316 = vmatprep.subr.bf16.mxu1 %v10094_v5  ;;  %v448_v51 = vld [vmem:[#allocation3 + $0xac0] sm:$0xff]  ;;  %v10388_v55 = vcombine.high %v440_v42, %v444_v43  ;;  %v10387_v58 = vcombine.low %v440_v42, %v444_v43  ;;  %v10150_v5 = vcombine.high %v201_v0, %v205_v2 }
  0xb2   :  { %6069 = vmatpush1.bf16.msra.mxu0 %v10339_v4  ;;  %v452_v52 = vld [vmem:[#allocation3 + $0xae0] sm:$0xff] }
  0xb3   :  { %6070 = vmatprep.subr.bf16.mxu0 %v10348_v10  ;;  %v456_v61 = vld [vmem:[#allocation3 + $0xb00] sm:$0xff]  ;;  %v10396_v1 = vcombine.high %v448_v51, %v452_v52  ;;  %v10395_v4 = vcombine.low %v448_v51, %v452_v52 }
  0xb4   :  { %6317 = vmatpush1.bf16.msra.mxu1 %v10093_v12  ;;  %v460_v62 = vld [vmem:[#allocation3 + $0xb20] sm:$0xff]  ;;  %v10149_v12 = vcombine.low %v201_v0, %v205_v2 }
  0xb5   :  { %6318 = vmatprep.subr.bf16.mxu1 %v10102_v15  ;;  %v464_v6 = vld [vmem:[#allocation3 + $0xb40] sm:$0xff]  ;;  %v10404_v10 = vcombine.high %v456_v61, %v460_v62  ;;  %v10158_v15 = vcombine.high %v209_v8, %v213_v11 }
  0xb6   :  { %6071 = vmatpush1.bf16.msra.mxu0 %v10347_v14  ;;  %v468_v7 = vld [vmem:[#allocation3 + $0xb60] sm:$0xff]  ;;  %v10403_v14 = vcombine.low %v456_v61, %v460_v62 }
  0xb7   :  { %6072 = vmatprep.subr.bf16.mxu0 %v10356_v20  ;;  %v472_v16 = vld [vmem:[#allocation3 + $0xb80] sm:$0xff]  ;;  %v10412_v20 = vcombine.high %v464_v6, %v468_v7 }
  0xb8   :  { %6319 = vmatpush1.bf16.msra.mxu1 %v10101_v22  ;;  %v476_v17 = vld [vmem:[#allocation3 + $0xba0] sm:$0xff]  ;;  %v10157_v22 = vcombine.low %v209_v8, %v213_v11 }
  0xb9   :  { %6320 = vmatprep.subr.bf16.mxu1 %v10110_v24  ;;  %v10166_v24 = vcombine.high %v217_v19, %v221_v21  ;;  %v480_v25 = vld [vmem:[#allocation3 + $0xbc0] sm:$0xff] }
  0xba   :  { %6073 = vmatpush1.bf16.msra.mxu0 %v10355_v23  ;;  %v10411_v23 = vcombine.low %v464_v6, %v468_v7  ;;  %v484_v26 = vld [vmem:[#allocation3 + $0xbe0] sm:$0xff] }
  0xbb   :  { %6074 = vmatprep.subr.bf16.mxu0 %v10364_v28  ;;  %v10420_v28 = vcombine.high %v472_v16, %v476_v17  ;;  %v488_v33 = vld [vmem:[#allocation3 + $0xc00] sm:$0xff] }
  0xbc   :  { %6321 = vmatpush1.bf16.msra.mxu1 %v10109_v30  ;;  %v10165_v30 = vcombine.low %v217_v19, %v221_v21  ;;  %v492_v34 = vld [vmem:[#allocation3 + $0xc20] sm:$0xff] }
  0xbd   :  { %6322 = vmatprep.subr.bf16.mxu1 %v10118_v32  ;;  %v10174_v32 = vcombine.high %v225_v27, %v229_v29  ;;  %v496_v42 = vld [vmem:[#allocation3 + $0xc40] sm:$0xff]  ;;  %v10436_v45 = vcombine.high %v488_v33, %v492_v34 }
  0xbe   :  { %6075 = vmatpush1.bf16.msra.mxu0 %v10363_v63  ;;  %v10419_v63 = vcombine.low %v472_v16, %v476_v17  ;;  %v500_v43 = vld [vmem:[#allocation3 + $0xc60] sm:$0xff] }
  0xbf   :  { %6076 = vmatprep.subr.bf16.mxu0 %v10372_v36  ;;  %v10428_v36 = vcombine.high %v480_v25, %v484_v26  ;;  %v504_v52 = vld [vmem:[#allocation3 + $0xc80] sm:$0xff]  ;;  %v10444_v56 = vcombine.high %v496_v42, %v500_v43 }
  0xc0   :  { %6323 = vmatpush1.bf16.msra.mxu1 %v10117_v39  ;;  %v10173_v39 = vcombine.low %v225_v27, %v229_v29  ;;  %v508_v54 = vld [vmem:[#allocation3 + $0xca0] sm:$0xff] }
  0xc1   :  { %6324 = vmatprep.subr.bf16.mxu1 %v10126_v41  ;;  %v10182_v41 = vcombine.high %v233_v35, %v237_v37  ;;  %v512_v62 = vld [vmem:[#allocation3 + $0xcc0] sm:$0xff]  ;;  %v10452_v2 = vcombine.high %v504_v52, %v508_v54 }
  0xc2   :  { %6077 = vmatpush1.bf16.msra.mxu0 %v10371_v40  ;;  %v10427_v40 = vcombine.low %v480_v25, %v484_v26  ;;  %v516_v0 = vld [vmem:[#allocation3 + $0xce0] sm:$0xff] }
  0xc3   :  { %6078 = vmatprep.subr.bf16.mxu0 %v10380_v46  ;;  %v241_v46 = vld [vmem:[#allocation3 + $0x448] sm:$0xff]  ;;  %v520_v7 = vld [vmem:[#allocation3 + $0xd00] sm:$0xff]  ;;  %v10460_v11 = vcombine.high %v512_v62, %v516_v0 }
  0xc4   :  { %6325 = vmatpush1.bf16.msra.mxu1 %v10125_v48  ;;  %v10181_v48 = vcombine.low %v233_v35, %v237_v37  ;;  %v10190_v51 = vcombine.high %v241_v46, %v245_v47  ;;  %v524_v8 = vld [vmem:[#allocation3 + $0xd20] sm:$0xff] }
  0xc5   :  { %6326 = vmatprep.subr.bf16.mxu1 %v10134_v50  ;;  %v10435_v50 = vcombine.low %v488_v33, %v492_v34  ;;  %v528_v17 = vld [vmem:[#allocation3 + $0xd40] sm:$0xff]  ;;  %v10468_v21 = vcombine.high %v520_v7, %v524_v8 }
  0xc6   :  { %6079 = vmatpush1.bf16.msra.mxu0 %v10379_v49  ;;  %v12340_v49 = vrot.slane %v12319_v18, %v12294_v53  ;;  %v10189_v18 = vcombine.low %v241_v46, %v245_v47  ;;  %v532_v19 = vld [vmem:[#allocation3 + $0xd60] sm:$0xff]  ;;  %v297_v46 = vld [vmem:[#allocation3 + $0x608] sm:$0xff] }
  0xc7   :  { %6080 = vmatprep.subr.bf16.mxu0 %v10388_v55  ;;  %v249_v55 = vld [vmem:[#allocation3 + $0x488] sm:$0xff]  ;;  %v536_v26 = vld [vmem:[#allocation3 + $0xd80] sm:$0xff]  ;;  %v10476_v29 = vcombine.high %v528_v17, %v532_v19 }
  0xc8   :  { %6327 = vmatpush1.bf16.msra.mxu1 %v10133_v57  ;;  %v253_v57 = vld [vmem:[#allocation3 + $0x4a8] sm:$0xff]  ;;  %v540_v27 = vld [vmem:[#allocation3 + $0xda0] sm:$0xff] }
  0xc9   :  { %6328 = vmatprep.subr.bf16.mxu1 %v10142_v60  ;;  %v10443_v60 = vcombine.low %v496_v42, %v500_v43  ;;  %v10198_v61 = vcombine.high %v249_v55, %v253_v57  ;;  %v544_v34 = vld [vmem:[#allocation3 + $0xdc0] sm:$0xff]  ;;  %v10484_v37 = vcombine.high %v536_v26, %v540_v27 }
  0xca   :  { %6081 = vmatpush1.bf16.msra.mxu0 %v10387_v58  ;;  %v12344_v58 = vcombine.high %v12332_v38, %v12332_v38  ;;  %v548_v35 = vld [vmem:[#allocation3 + $0xde0] sm:$0xff] }
  0xcb   :  { %6082 = vmatprep.subr.bf16.mxu0 %v10396_v1  ;;  %v257_v1 = vld [vmem:[#allocation3 + $0x4c8] sm:$0xff]  ;;  %v552_v43 = vld [vmem:[#allocation3 + $0xe00] sm:$0xff]  ;;  %v10492_v47 = vcombine.high %v544_v34, %v548_v35 }
  0xcc   :  { %6329 = vmatpush1.bf16.msra.mxu1 %v10141_v3  ;;  %v261_v3 = vld [vmem:[#allocation3 + $0x4e8] sm:$0xff] }
  0xcd   :  { %6330 = vmatprep.subr.bf16.mxu1 %v10150_v5  ;;  %v10451_v5 = vcombine.low %v504_v52, %v508_v54  ;;  %v10206_v6 = vcombine.high %v257_v1, %v261_v3  ;;  %v560_v54 = vld [vmem:[#allocation3 + $0xe40] sm:$0xff] }
  0xce   :  { %6083 = vmatpush1.bf16.msra.mxu0 %v10395_v4  ;;  %v10197_v4 = vcombine.low %v249_v55, %v253_v57  ;;  %v564_v55 = vld [vmem:[#allocation3 + $0xe60] sm:$0xff] }
  0xcf   :  { %6084 = vmatprep.subr.bf16.mxu0 %v10404_v10  ;;  %v265_v10 = vld [vmem:[#allocation3 + $0x508] sm:$0xff] }
  0xd0   :  { %6331 = vmatpush1.bf16.msra.mxu1 %v10149_v12  ;;  %v269_v12 = vld [vmem:[#allocation3 + $0x528] sm:$0xff] }
  0xd1   :  { %6332 = vmatprep.subr.bf16.mxu1 %v10158_v15  ;;  %v10459_v15 = vcombine.low %v512_v62, %v516_v0  ;;  %v10214_v16 = vcombine.high %v265_v10, %v269_v12  ;;  %v568_v0 = vld [vmem:[#allocation3 + $0xe80] sm:$0xff] }
  0xd2   :  { %6085 = vmatpush1.bf16.msra.mxu0 %v10403_v14  ;;  %v10205_v14 = vcombine.low %v257_v1, %v261_v3  ;;  %v572_v1 = vld [vmem:[#allocation3 + $0xea0] sm:$0xff]  ;;  %v10508_v3 = vcombine.high %v560_v54, %v564_v55 }
  0xd3   :  { %6086 = vmatprep.subr.bf16.mxu0 %v10412_v20  ;;  %v273_v20 = vld [vmem:[#allocation3 + $0x548] sm:$0xff] }
  0xd4   :  { %6333 = vmatpush1.bf16.msra.mxu1 %v10157_v22  ;;  %v277_v22 = vld [vmem:[#allocation3 + $0x568] sm:$0xff] }
  0xd5   :  { %6334 = vmatprep.subr.bf16.mxu1 %v10166_v24  ;;  %v10467_v24 = vcombine.low %v520_v7, %v524_v8  ;;  %v10222_v25 = vcombine.high %v273_v20, %v277_v22  ;;  %v576_v8 = vld [vmem:[#allocation3 + $0xec0] sm:$0xff] }
  0xd6   :  { %6087 = vmatpush1.bf16.msra.mxu0 %v10411_v23  ;;  %v10213_v23 = vcombine.low %v265_v10, %v269_v12  ;;  %v580_v10 = vld [vmem:[#allocation3 + $0xee0] sm:$0xff]  ;;  %v10516_v12 = vcombine.high %v568_v0, %v572_v1 }
  0xd7   :  { %6088 = vmatprep.subr.bf16.mxu0 %v10420_v28  ;;  %v281_v28 = vld [vmem:[#allocation3 + $0x588] sm:$0xff] }
  0xd8   :  { %6335 = vmatpush1.bf16.msra.mxu1 %v10165_v30  ;;  %v285_v30 = vld [vmem:[#allocation3 + $0x5a8] sm:$0xff] }
  0xd9   :  { %6336 = vmatprep.subr.bf16.mxu1 %v10174_v32  ;;  %v10475_v32 = vcombine.low %v528_v17, %v532_v19  ;;  %v10230_v33 = vcombine.high %v281_v28, %v285_v30  ;;  %v584_v19 = vld [vmem:[#allocation3 + $0xf00] sm:$0xff] }
  0xda   :  { %6089 = vmatpush1.bf16.msra.mxu0 %v10419_v63  ;;  %v10221_v63 = vcombine.low %v273_v20, %v277_v22  ;;  %v588_v20 = vld [vmem:[#allocation3 + $0xf20] sm:$0xff]  ;;  %v10524_v22 = vcombine.high %v576_v8, %v580_v10 }
  0xdb   :  { %6090 = vmatprep.subr.bf16.mxu0 %v10428_v36  ;;  %v289_v36 = vld [vmem:[#allocation3 + $0x5c8] sm:$0xff] }
  0xdc   :  { %6337 = vmatpush1.bf16.msra.mxu1 %v10173_v39  ;;  %v293_v39 = vld [vmem:[#allocation3 + $0x5e8] sm:$0xff] }
  0xdd   :  { %6347 = vmatprep.subr.bf16.mxu1 %v10182_v41  ;;  %v10483_v41 = vcombine.low %v536_v26, %v540_v27  ;;  %v10238_v42 = vcombine.high %v289_v36, %v293_v39  ;;  %v592_v27 = vld [vmem:[#allocation3 + $0xf40] sm:$0xff] }
  0xde   :  { %6091 = vmatpush1.bf16.msra.mxu0 %v10427_v40  ;;  %v10229_v40 = vcombine.low %v281_v28, %v285_v30  ;;  %v596_v28 = vld [vmem:[#allocation3 + $0xf60] sm:$0xff]  ;;  %v10532_v30 = vcombine.high %v584_v19, %v588_v20 }
  0xdf   :  { %6101 = vmatprep.subr.bf16.mxu0 %v10436_v45  ;;  %6339 = vmatmul.mubr.bf16.vlgmr.msra.gmra.mrb[4].mxu1 %v12323_v59  ;;  %v556_v45 = vld [vmem:[#allocation3 + $0xe20] sm:$0xff] }
  0xe0   :  { %6348 = vmatpush1.bf16.msra.mxu1 %v10181_v48  ;;  %6379 = vmatprep.mubr.bf16.mxu1 %v12313_v13  ;;  %v301_v48 = vld [vmem:[#allocation3 + $0x628] sm:$0xff]  ;;  %v10500_v57 = vcombine.high %v552_v43, %v556_v45 }
  0xe1   :  { %6093 = vmatmul.mubr.bf16.vlgmr.msra.gmra.mrb[0].mxu0 %v12340_v49  ;;  %6349 = vmatprep.subr.bf16.mxu1 %v10190_v51  ;;  %v10491_v51 = vcombine.low %v544_v34, %v548_v35  ;;  %v10246_v52 = vcombine.high %v297_v46, %v301_v48  ;;  %v600_v35 = vld [vmem:[#allocation3 + $0xf80] sm:$0xff] }
  0xe2   :  { %6102 = vmatpush1.bf16.msra.mxu0 %v10435_v50  ;;  %6133 = vmatprep.mubr.bf16.mxu0 %v12344_v58  ;;  %v10237_v50 = vcombine.low %v289_v36, %v293_v39  ;;  %v604_v36 = vld [vmem:[#allocation3 + $0xfa0] sm:$0xff]  ;;  %v10540_v39 = vcombine.high %v592_v27, %v596_v28 }
  0xe3   :  { %6103 = vmatprep.subr.bf16.mxu0 %v10444_v56  ;;  %v305_v56 = vld [vmem:[#allocation3 + $0x648] sm:$0xff] }
  0xe4   :  { %6350 = vmatpush1.bf16.msra.mxu1 %v10189_v18  ;;  %v309_v18 = vld [vmem:[#allocation3 + $0x668] sm:$0xff] }
  0xe5   :  { %6351 = vmatprep.subr.bf16.mxu1 %v10198_v61  ;;  %v10499_v61 = vcombine.low %v552_v43, %v556_v45  ;;  %v10254_v62 = vcombine.high %v305_v56, %v309_v18  ;;  %v608_v45 = vld [vmem:[#allocation3 + $0xfc0] sm:$0xff] }
  0xe6   :  { %6104 = vmatpush1.bf16.msra.mxu0 %v10443_v60  ;;  %v10245_v60 = vcombine.low %v297_v46, %v301_v48  ;;  %v612_v46 = vld [vmem:[#allocation3 + $0xfe0] sm:$0xff]  ;;  %v357_v48 = vld [vmem:[#allocation3 + $0x7e8] sm:$0xff] }
  0xe7   :  { %6105 = vmatprep.subr.bf16.mxu0 %v10452_v2  ;;  %v313_v2 = vld [vmem:[#allocation3 + $0x688] sm:$0xff] }
  0xe8   :  { %6352 = vmatpush1.bf16.msra.mxu1 %v10197_v4  ;;  %v317_v4 = vld [vmem:[#allocation3 + $0x6a8] sm:$0xff] }
  0xe9   :  { %6353 = vmatprep.subr.bf16.mxu1 %v10206_v6  ;;  %v10507_v6 = vcombine.low %v560_v54, %v564_v55  ;;  %v10262_v7 = vcombine.high %v313_v2, %v317_v4  ;;  %v10547_v54 = vcombine.low %v600_v35, %v604_v36 }
  0xea   :  { %6106 = vmatpush1.bf16.msra.mxu0 %v10451_v5  ;;  %v10253_v5 = vcombine.low %v305_v56, %v309_v18  ;;  %v616_v56 = vld [vmem:[#allocation3 + $0x1000] sm:$0xff]  ;;  %v361_v18 = vld [vmem:[#allocation3 + $0x808] sm:$0xff] }
  0xeb   :  { %6107 = vmatprep.subr.bf16.mxu0 %v10460_v11  ;;  %v321_v11 = vld [vmem:[#allocation3 + $0x6c8] sm:$0xff] }
  0xec   :  { %6354 = vmatpush1.bf16.msra.mxu1 %v10205_v14  ;;  %v325_v14 = vld [vmem:[#allocation3 + $0x6e8] sm:$0xff] }
  0xed   :  { %6355 = vmatprep.subr.bf16.mxu1 %v10214_v16  ;;  %v10515_v16 = vcombine.low %v568_v0, %v572_v1  ;;  %v10270_v17 = vcombine.high %v321_v11, %v325_v14  ;;  %v10555_v0 = vcombine.low %v608_v45, %v612_v46 }
  0xee   :  { %6108 = vmatpush1.bf16.msra.mxu0 %v10459_v15  ;;  %v10261_v15 = vcombine.low %v313_v2, %v317_v4  ;;  %v624_v2 = vld [vmem:[#allocation3 + $0x1040] sm:$0xff]  ;;  %v369_v4 = vld [vmem:[#allocation3 + $0x848] sm:$0xff] }
  0xef   :  { %6109 = vmatprep.subr.bf16.mxu0 %v10468_v21  ;;  %v329_v21 = vld [vmem:[#allocation3 + $0x708] sm:$0xff] }
  0xf0   :  { %6356 = vmatpush1.bf16.msra.mxu1 %v10213_v23  ;;  %v333_v23 = vld [vmem:[#allocation3 + $0x728] sm:$0xff] }
  0xf1   :  { %6357 = vmatprep.subr.bf16.mxu1 %v10222_v25  ;;  %v10523_v25 = vcombine.low %v576_v8, %v580_v10  ;;  %v10278_v26 = vcombine.high %v329_v21, %v333_v23  ;;  %v12359_v10 = vcombine.high %v12340_v49, %v12340_v49 }
  0xf2   :  { %6110 = vmatpush1.bf16.msra.mxu0 %v10467_v24  ;;  %v10269_v24 = vcombine.low %v321_v11, %v325_v14  ;;  %v632_v14 = vld [vmem:[#allocation3 + $0x1080] sm:$0xff] }
  0xf3   :  { %6111 = vmatprep.subr.bf16.mxu0 %v10476_v29  ;;  %v337_v29 = vld [vmem:[#allocation3 + $0x748] sm:$0xff] }
  0xf4   :  { %6358 = vmatpush1.bf16.msra.mxu1 %v10221_v63  ;;  %v341_v63 = vld [vmem:[#allocation3 + $0x768] sm:$0xff] }
  0xf5   :  { %6359 = vmatprep.subr.bf16.mxu1 %v10230_v33  ;;  %v10531_v33 = vcombine.low %v584_v19, %v588_v20  ;;  %v10286_v34 = vcombine.high %v337_v29, %v341_v63  ;;  %v381_v19 = vld [vmem:[#allocation3 + $0x8a8] sm:$0xff] }
  0xf6   :  { %6112 = vmatpush1.bf16.msra.mxu0 %v10475_v32  ;;  %v10277_v32 = vcombine.low %v329_v21, %v333_v23 }
  0xf7   :  { %6113 = vmatprep.subr.bf16.mxu0 %v10484_v37  ;;  %v345_v37 = vld [vmem:[#allocation3 + $0x788] sm:$0xff] }
  0xf8   :  { %6360 = vmatpush1.bf16.msra.mxu1 %v10229_v40  ;;  %v349_v40 = vld [vmem:[#allocation3 + $0x7a8] sm:$0xff] }
  0xf9   :  { %6361 = vmatprep.subr.bf16.mxu1 %v10238_v42  ;;  %v10539_v42 = vcombine.low %v592_v27, %v596_v28  ;;  %v10294_v43 = vcombine.high %v345_v37, %v349_v40  ;;  %v389_v28 = vld [vmem:[#allocation3 + $0x8e8] sm:$0xff] }
  0xfa   :  { %6114 = vmatpush1.bf16.msra.mxu0 %v10483_v41  ;;  %v10285_v41 = vcombine.low %v337_v29, %v341_v63 }
  0xfb   :  { %6115 = vmatprep.subr.bf16.mxu0 %v10492_v47  ;;  %v353_v47 = vld [vmem:[#allocation3 + $0x7c8] sm:$0xff] }
  0xfc   :  { %6362 = vmatpush1.bf16.msra.mxu1 %v10237_v50  ;;  %v10548_v50 = vcombine.high %v600_v35, %v604_v36  ;;  %v10302_v55 = vcombine.high %v353_v47, %v357_v48  ;;  %v397_v36 = vld [vmem:[#allocation3 + $0x928] sm:$0xff] }
  0xfd   :  { %6363 = vmatprep.subr.bf16.mxu1 %v10246_v52  ;;  %v10293_v52 = vcombine.low %v345_v37, %v349_v40 }
  0xfe   :  { %6116 = vmatpush1.bf16.msra.mxu0 %v10491_v51  ;;  %v12353_v51 = vld.sshfl [vmem:[%s13594_s0 + $0x8] sm:$0x7f pattern:$0x75316420] }
  0xff   :  { %6117 = vmatprep.subr.bf16.mxu0 %v10500_v57  ;;  %v620_v57 = vld [vmem:[#allocation3 + $0x1020] sm:$0xff] }
 0x100   :  { %6364 = vmatpush1.bf16.msra.mxu1 %v10245_v60  ;;  %v10556_v60 = vcombine.high %v608_v45, %v612_v46  ;;  %v10563_v11 = vcombine.low %v616_v56, %v620_v57  ;;  %v405_v46 = vld [vmem:[#allocation3 + $0x968] sm:$0xff] }
 0x101   :  { %6365 = vmatprep.subr.bf16.mxu1 %v10254_v62  ;;  %v10301_v62 = vcombine.low %v353_v47, %v357_v48 }
 0x102   :  { %6118 = vmatpush1.bf16.msra.mxu0 %v10499_v61  ;;  %v365_v61 = vld [vmem:[#allocation3 + $0x828] sm:$0xff] }
 0x103   :  { %6119 = vmatprep.subr.bf16.mxu0 %v10508_v3  ;;  %v10310_v1 = vcombine.high %v361_v18, %v365_v61  ;;  %v628_v3 = vld [vmem:[#allocation3 + $0x1060] sm:$0xff]  ;;  %v10309_v8 = vcombine.low %v361_v18, %v365_v61 }
 0x104   :  { %6366 = vmatpush1.bf16.msra.mxu1 %v10253_v5  ;;  %v10564_v5 = vcombine.high %v616_v56, %v620_v57  ;;  %v413_v57 = vld [vmem:[#allocation3 + $0x9a8] sm:$0xff] }
 0x105   :  { %6367 = vmatprep.subr.bf16.mxu1 %v10262_v7  ;;  %v1130_v7 = vcombine.high %v12353_v51, %v12353_v51 }
 0x106   :  { %6120 = vmatpush1.bf16.msra.mxu0 %v10507_v6  ;;  %v373_v6 = vld [vmem:[#allocation3 + $0x868] sm:$0xff] }
 0x107   :  { %6121 = vmatprep.subr.bf16.mxu0 %v10516_v12  ;;  %v10318_v12 = vcombine.high %v369_v4, %v373_v6  ;;  %v12362_v20 = vrot.slane %v1130_v7, %v12294_v53  ;;  %v10317_v21 = vcombine.low %v369_v4, %v373_v6  ;;  %v680_v7 = vld [vmem:[#allocation3 + $0x1200] sm:$0xff] }
 0x108   :  { %6368 = vmatpush1.bf16.msra.mxu1 %v10261_v15  ;;  %v636_v15 = vld [vmem:[#allocation3 + $0x10a0] sm:$0xff] }
 0x109   :  { %6369 = vmatprep.subr.bf16.mxu1 %v10270_v17  ;;  %v10572_v17 = vcombine.high %v624_v2, %v628_v3  ;;  %v10580_v27 = vcombine.high %v632_v14, %v636_v15 }
 0x10a   :  { %6122 = vmatpush1.bf16.msra.mxu0 %v10515_v16  ;;  %v377_v16 = vld [vmem:[#allocation3 + $0x888] sm:$0xff] }
 0x10b   :  { %6123 = vmatprep.subr.bf16.mxu0 %v10524_v22  ;;  %v10571_v22 = vcombine.low %v624_v2, %v628_v3  ;;  %v10326_v23 = vcombine.high %v377_v16, %v381_v19  ;;  %v10325_v29 = vcombine.low %v377_v16, %v381_v19  ;;  %v421_v3 = vld [vmem:[#allocation3 + $0x9e8] sm:$0xff]  ;;  %v688_v19 = vld [vmem:[#allocation3 + $0x1240] sm:$0xff] }
 0x10c   :  { %6370 = vmatpush1.bf16.msra.mxu1 %v10269_v24  ;;  %v640_v24 = vld [vmem:[#allocation3 + $0x10c0] sm:$0xff] }
 0x10d   :  { %6371 = vmatprep.subr.bf16.mxu1 %v10278_v26  ;;  %v385_v26 = vld [vmem:[#allocation3 + $0x8c8] sm:$0xff] }
 0x10e   :  { %6124 = vmatpush1.bf16.msra.mxu0 %v10523_v25  ;;  %v644_v25 = vld [vmem:[#allocation3 + $0x10e0] sm:$0xff]  ;;  %v10334_v63 = vcombine.high %v385_v26, %v389_v28  ;;  %v10333_v37 = vcombine.low %v385_v26, %v389_v28 }
 0x10f   :  { %6125 = vmatprep.subr.bf16.mxu0 %v10532_v30  ;;  %v10579_v30 = vcombine.low %v632_v14, %v636_v15  ;;  %v10588_v35 = vcombine.high %v640_v24, %v644_v25  ;;  %v429_v14 = vld [vmem:[#allocation3 + $0xa28] sm:$0xff]  ;;  %v696_v28 = vld [vmem:[#allocation3 + $0x1280] sm:$0xff] }
 0x110   :  { %6372 = vmatpush1.bf16.msra.mxu1 %v10277_v32  ;;  %v648_v32 = vld [vmem:[#allocation3 + $0x1100] sm:$0xff] }
 0x111   :  { %6373 = vmatprep.subr.bf16.mxu1 %v10286_v34  ;;  %v393_v34 = vld [vmem:[#allocation3 + $0x908] sm:$0xff] }
 0x112   :  { %6126 = vmatpush1.bf16.msra.mxu0 %v10531_v33  ;;  %v652_v33 = vld [vmem:[#allocation3 + $0x1120] sm:$0xff]  ;;  %v10342_v40 = vcombine.high %v393_v34, %v397_v36  ;;  %v10341_v47 = vcombine.low %v393_v34, %v397_v36 }
 0x113   :  { %6127 = vmatprep.subr.bf16.mxu0 %v10540_v39  ;;  %v10587_v39 = vcombine.low %v640_v24, %v644_v25  ;;  %v10596_v45 = vcombine.high %v648_v32, %v652_v33  ;;  %v10595_v48 = vcombine.low %v648_v32, %v652_v33  ;;  %v437_v24 = vld [vmem:[#allocation3 + $0xa68] sm:$0xff]  ;;  %v704_v36 = vld [vmem:[#allocation3 + $0x12c0] sm:$0xff] }
 0x114   :  { %6374 = vmatpush1.bf16.msra.mxu1 %v10285_v41  ;;  %v656_v41 = vld [vmem:[#allocation3 + $0x1140] sm:$0xff]  ;;  %v445_v32 = vld [vmem:[#allocation3 + $0xaa8] sm:$0xff] }
 0x115   :  { %6375 = vmatprep.subr.bf16.mxu1 %v10294_v43  ;;  %v401_v43 = vld [vmem:[#allocation3 + $0x948] sm:$0xff] }
 0x116   :  { %6128 = vmatpush1.bf16.msra.mxu0 %v10539_v42  ;;  %v660_v42 = vld [vmem:[#allocation3 + $0x1160] sm:$0xff]  ;;  %v10349_v18 = vcombine.low %v401_v43, %v405_v46 }
 0x117   :  { %6129 = vmatprep.subr.bf16.mxu0 %v10548_v50  ;;  %v10350_v50 = vcombine.high %v401_v43, %v405_v46  ;;  %v10604_v56 = vcombine.high %v656_v41, %v660_v42  ;;  %v712_v46 = vld [vmem:[#allocation3 + $0x1300] sm:$0xff] }
 0x118   :  { %6376 = vmatpush1.bf16.msra.mxu1 %v10293_v52  ;;  %v664_v52 = vld [vmem:[#allocation3 + $0x1180] sm:$0xff] }
 0x119   :  { %6377 = vmatprep.subr.bf16.mxu1 %v10302_v55  ;;  %v409_v55 = vld [vmem:[#allocation3 + $0x988] sm:$0xff] }
 0x11a   :  { %6130 = vmatpush1.bf16.msra.mxu0 %v10547_v54  ;;  %v668_v54 = vld [vmem:[#allocation3 + $0x11a0] sm:$0xff]  ;;  %v10358_v61 = vcombine.high %v409_v55, %v413_v57  ;;  %v10357_v4 = vcombine.low %v409_v55, %v413_v57 }
 0x11b   :  { %6131 = vmatprep.subr.bf16.mxu0 %v10556_v60  ;;  %v10603_v60 = vcombine.low %v656_v41, %v660_v42  ;;  %v10612_v2 = vcombine.high %v664_v52, %v668_v54  ;;  %v453_v41 = vld [vmem:[#allocation3 + $0xae8] sm:$0xff]  ;;  %v720_v57 = vld [vmem:[#allocation3 + $0x1340] sm:$0xff] }
 0x11c   :  { %6378 = vmatpush1.bf16.msra.mxu1 %v10301_v62  ;;  %v672_v62 = vld [vmem:[#allocation3 + $0x11c0] sm:$0xff] }
 0x11d   :  { %6388 = vmatprep.subr.bf16.mxu1 %v10310_v1  ;;  %v417_v1 = vld [vmem:[#allocation3 + $0x9c8] sm:$0xff] }
 0x11e   :  { %6132 = vmatpush1.bf16.msra.mxu0 %v10555_v0  ;;  %v676_v0 = vld [vmem:[#allocation3 + $0x11e0] sm:$0xff]  ;;  %v10366_v6 = vcombine.high %v417_v1, %v421_v3  ;;  %v10365_v15 = vcombine.low %v417_v1, %v421_v3 }
 0x11f   :  { %6142 = vmatprep.subr.bf16.mxu0 %v10564_v5  ;;  %6380 = vmatmul.mubr.bf16.vlgmr.msra.gmra.mrb[4].mxu1 %v12329_v31  ;;  %v10611_v5 = vcombine.low %v664_v52, %v668_v54  ;;  %v10619_v16 = vcombine.low %v672_v62, %v676_v0  ;;  %v461_v52 = vld [vmem:[#allocation3 + $0xb28] sm:$0xff] }
 0x120   :  { %6389 = vmatpush1.bf16.msra.mxu1 %v10309_v8  ;;  %6420 = vmatprep.mubr.bf16.mxu1 %v12332_v38  ;;  %v684_v8 = vld [vmem:[#allocation3 + $0x1220] sm:$0xff] }
 0x121   :  { %6134 = vmatmul.mubr.bf16.vlgmr.msra.gmra.mrb[0].mxu0 %v12359_v10  ;;  %6390 = vmatprep.subr.bf16.mxu1 %v10318_v12  ;;  %v10620_v12 = vcombine.high %v672_v62, %v676_v0  ;;  %v10627_v26 = vcombine.low %v680_v7, %v684_v8  ;;  %v469_v62 = vld [vmem:[#allocation3 + $0xb68] sm:$0xff] }
 0x122   :  { %6143 = vmatpush1.bf16.msra.mxu0 %v10563_v11  ;;  %6174 = vmatprep.mubr.bf16.mxu0 %v12362_v20  ;;  %v425_v11 = vld [vmem:[#allocation3 + $0xa08] sm:$0xff] }
 0x123   :  { %6144 = vmatprep.subr.bf16.mxu0 %v10572_v17  ;;  %v10374_v17 = vcombine.high %v425_v11, %v429_v14  ;;  %v10373_v25 = vcombine.low %v425_v11, %v429_v14 }
 0x124   :  { %6391 = vmatpush1.bf16.msra.mxu1 %v10317_v21  ;;  %v692_v21 = vld [vmem:[#allocation3 + $0x1260] sm:$0xff] }
 0x125   :  { %6392 = vmatprep.subr.bf16.mxu1 %v10326_v23  ;;  %v10628_v23 = vcombine.high %v680_v7, %v684_v8  ;;  %v10635_v34 = vcombine.low %v688_v19, %v692_v21  ;;  %v732_v7 = vld [vmem:[#allocation3 + $0x13a0] sm:$0xff] }
 0x126   :  { %6145 = vmatpush1.bf16.msra.mxu0 %v10571_v22  ;;  %v433_v22 = vld [vmem:[#allocation3 + $0xa48] sm:$0xff] }
 0x127   :  { %6146 = vmatprep.subr.bf16.mxu0 %v10580_v27  ;;  %v10382_v27 = vcombine.high %v433_v22, %v437_v24  ;;  %v10381_v33 = vcombine.low %v433_v22, %v437_v24 }
 0x128   :  { %6393 = vmatpush1.bf16.msra.mxu1 %v10325_v29  ;;  %v700_v29 = vld [vmem:[#allocation3 + $0x12a0] sm:$0xff] }
 0x129   :  { %6394 = vmatprep.subr.bf16.mxu1 %v10334_v63  ;;  %v10636_v63 = vcombine.high %v688_v19, %v692_v21  ;;  %v10643_v43 = vcombine.low %v696_v28, %v700_v29  ;;  %v740_v19 = vld [vmem:[#allocation3 + $0x13e0] sm:$0xff] }
 0x12a   :  { %6147 = vmatpush1.bf16.msra.mxu0 %v10579_v30  ;;  %v441_v30 = vld [vmem:[#allocation3 + $0xa88] sm:$0xff] }
 0x12b   :  { %6148 = vmatprep.subr.bf16.mxu0 %v10588_v35  ;;  %v10390_v35 = vcombine.high %v441_v30, %v445_v32  ;;  %v10389_v42 = vcombine.low %v441_v30, %v445_v32 }
 0x12c   :  { %6395 = vmatpush1.bf16.msra.mxu1 %v10333_v37  ;;  %v708_v37 = vld [vmem:[#allocation3 + $0x12e0] sm:$0xff] }
 0x12d   :  { %6396 = vmatprep.subr.bf16.mxu1 %v10342_v40  ;;  %v10644_v40 = vcombine.high %v696_v28, %v700_v29  ;;  %v10651_v55 = vcombine.low %v704_v36, %v708_v37  ;;  %v748_v28 = vld [vmem:[#allocation3 + $0x1420] sm:$0xff] }
 0x12e   :  { %6149 = vmatpush1.bf16.msra.mxu0 %v10587_v39  ;;  %v449_v39 = vld [vmem:[#allocation3 + $0xac8] sm:$0xff] }
 0x12f   :  { %6150 = vmatprep.subr.bf16.mxu0 %v10596_v45  ;;  %v10398_v45 = vcombine.high %v449_v39, %v453_v41  ;;  %v10397_v54 = vcombine.low %v449_v39, %v453_v41  ;;  %v12370_v39 = vrot.slane %v12353_v51, %v12294_v53 }
 0x130   :  { %6397 = vmatpush1.bf16.msra.mxu1 %v10341_v47  ;;  %v716_v47 = vld [vmem:[#allocation3 + $0x1320] sm:$0xff] }
 0x131   :  { %6398 = vmatprep.subr.bf16.mxu1 %v10350_v50  ;;  %v10652_v50 = vcombine.high %v704_v36, %v708_v37  ;;  %v10659_v1 = vcombine.low %v712_v46, %v716_v47  ;;  %v756_v36 = vld [vmem:[#allocation3 + $0x1460] sm:$0xff] }
 0x132   :  { %6151 = vmatpush1.bf16.msra.mxu0 %v10595_v48  ;;  %v457_v48 = vld [vmem:[#allocation3 + $0xb08] sm:$0xff] }
 0x133   :  { %6152 = vmatprep.subr.bf16.mxu0 %v10604_v56  ;;  %v10406_v56 = vcombine.high %v457_v48, %v461_v52  ;;  %v10405_v0 = vcombine.low %v457_v48, %v461_v52  ;;  %v764_v48 = vld [vmem:[#allocation3 + $0x14a0] sm:$0xff] }
 0x134   :  { %6399 = vmatpush1.bf16.msra.mxu1 %v10349_v18  ;;  %v724_v18 = vld [vmem:[#allocation3 + $0x1360] sm:$0xff] }
 0x135   :  { %6400 = vmatprep.subr.bf16.mxu1 %v10358_v61  ;;  %v10660_v61 = vcombine.high %v712_v46, %v716_v47  ;;  %v10668_v3 = vcombine.high %v720_v57, %v724_v18  ;;  %v10667_v11 = vcombine.low %v720_v57, %v724_v18  ;;  %v12374_v46 = vcombine.high %v12362_v20, %v12362_v20  ;;  %v760_v47 = vld [vmem:[#allocation3 + $0x1480] sm:$0xff] }
 0x136   :  { %6153 = vmatpush1.bf16.msra.mxu0 %v10603_v60  ;;  %v465_v60 = vld [vmem:[#allocation3 + $0xb48] sm:$0xff]  ;;  %v768_v57 = vld [vmem:[#allocation3 + $0x14c0] sm:$0xff] }
 0x137   :  { %6154 = vmatprep.subr.bf16.mxu0 %v10612_v2  ;;  %v10414_v2 = vcombine.high %v465_v60, %v469_v62  ;;  %v10413_v8 = vcombine.low %v465_v60, %v469_v62  ;;  %v772_v18 = vld [vmem:[#allocation3 + $0x14e0] sm:$0xff] }
 0x138   :  { %6401 = vmatpush1.bf16.msra.mxu1 %v10357_v4  ;;  %v473_v4 = vld [vmem:[#allocation3 + $0xb88] sm:$0xff] }
 0x139   :  { %6402 = vmatprep.subr.bf16.mxu1 %v10366_v6  ;;  %v728_v6 = vld [vmem:[#allocation3 + $0x1380] sm:$0xff] }
 0x13a   :  { %6155 = vmatpush1.bf16.msra.mxu0 %v10611_v5  ;;  %v477_v5 = vld [vmem:[#allocation3 + $0xba8] sm:$0xff]  ;;  %v10676_v14 = vcombine.high %v728_v6, %v732_v7  ;;  %v10675_v22 = vcombine.low %v728_v6, %v732_v7  ;;  %v10715_v6 = vcombine.low %v768_v57, %v772_v18 }
 0x13b   :  { %6156 = vmatprep.subr.bf16.mxu0 %v10620_v12  ;;  %v10422_v12 = vcombine.high %v473_v4, %v477_v5  ;;  %v10421_v21 = vcombine.low %v473_v4, %v477_v5  ;;  %v780_v4 = vld [vmem:[#allocation3 + $0x1520] sm:$0xff] }
 0x13c   :  { %6403 = vmatpush1.bf16.msra.mxu1 %v10365_v15  ;;  %v481_v15 = vld [vmem:[#allocation3 + $0xbc8] sm:$0xff] }
 0x13d   :  { %6404 = vmatprep.subr.bf16.mxu1 %v10374_v17  ;;  %v736_v17 = vld [vmem:[#allocation3 + $0x13c0] sm:$0xff] }
 0x13e   :  { %6157 = vmatpush1.bf16.msra.mxu0 %v10619_v16  ;;  %v485_v16 = vld [vmem:[#allocation3 + $0xbe8] sm:$0xff]  ;;  %v10684_v24 = vcombine.high %v736_v17, %v740_v19  ;;  %v10683_v30 = vcombine.low %v736_v17, %v740_v19 }
 0x13f   :  { %6158 = vmatprep.subr.bf16.mxu0 %v10628_v23  ;;  %v10430_v23 = vcombine.high %v481_v15, %v485_v16  ;;  %v10429_v29 = vcombine.low %v481_v15, %v485_v16  ;;  %v788_v15 = vld [vmem:[#allocation3 + $0x1560] sm:$0xff] }
 0x140   :  { %6405 = vmatpush1.bf16.msra.mxu1 %v10373_v25  ;;  %v489_v25 = vld [vmem:[#allocation3 + $0xc08] sm:$0xff] }
 0x141   :  { %6406 = vmatprep.subr.bf16.mxu1 %v10382_v27  ;;  %v744_v27 = vld [vmem:[#allocation3 + $0x1400] sm:$0xff] }
 0x142   :  { %6159 = vmatpush1.bf16.msra.mxu0 %v10627_v26  ;;  %v493_v26 = vld [vmem:[#allocation3 + $0xc28] sm:$0xff]  ;;  %v10692_v32 = vcombine.high %v744_v27, %v748_v28 }
 0x143   :  { %6160 = vmatprep.subr.bf16.mxu0 %v10636_v63  ;;  %v10438_v63 = vcombine.high %v489_v25, %v493_v26  ;;  %v10437_v37 = vcombine.low %v489_v25, %v493_v26  ;;  %v796_v25 = vld [vmem:[#allocation3 + $0x15a0] sm:$0xff] }
 0x144   :  { %6407 = vmatpush1.bf16.msra.mxu1 %v10381_v33  ;;  %v497_v33 = vld [vmem:[#allocation3 + $0xc48] sm:$0xff] }
 0x145   :  { %6408 = vmatprep.subr.bf16.mxu1 %v10390_v35  ;;  %v752_v35 = vld [vmem:[#allocation3 + $0x1440] sm:$0xff] }
 0x146   :  { %6161 = vmatpush1.bf16.msra.mxu0 %v10635_v34  ;;  %v501_v34 = vld [vmem:[#allocation3 + $0xc68] sm:$0xff] }
 0x147   :  { %6162 = vmatprep.subr.bf16.mxu0 %v10644_v40  ;;  %v10691_v40 = vcombine.low %v744_v27, %v748_v28  ;;  %v10446_v41 = vcombine.high %v497_v33, %v501_v34  ;;  %v10445_v51 = vcombine.low %v497_v33, %v501_v34  ;;  %v800_v34 = vld [vmem:[#allocation3 + $0x15c0] sm:$0xff] }
 0x148   :  { %6409 = vmatpush1.bf16.msra.mxu1 %v10389_v42  ;;  %v10700_v42 = vcombine.high %v752_v35, %v756_v36 }
 0x149   :  { %6410 = vmatprep.subr.bf16.mxu1 %v10398_v45  ;;  %v509_v45 = vld [vmem:[#allocation3 + $0xca8] sm:$0xff] }
 0x14a   :  { %6163 = vmatpush1.bf16.msra.mxu0 %v10643_v43  ;;  %v505_v43 = vld [vmem:[#allocation3 + $0xc88] sm:$0xff] }
 0x14b   :  { %6164 = vmatprep.subr.bf16.mxu0 %v10652_v50  ;;  %v10699_v50 = vcombine.low %v752_v35, %v756_v36  ;;  %v10454_v52 = vcombine.high %v505_v43, %v509_v45  ;;  %v10453_v60 = vcombine.low %v505_v43, %v509_v45  ;;  %v804_v35 = vld [vmem:[#allocation3 + $0x15e0] sm:$0xff]  ;;  %v553_v45 = vld [vmem:[#allocation3 + $0xe08] sm:$0xff] }
 0x14c   :  { %6411 = vmatpush1.bf16.msra.mxu1 %v10397_v54  ;;  %v10708_v54 = vcombine.high %v760_v47, %v764_v48  ;;  %v10748_v43 = vcombine.high %v800_v34, %v804_v35 }
 0x14d   :  { %6412 = vmatprep.subr.bf16.mxu1 %v10406_v56  ;;  %v517_v56 = vld [vmem:[#allocation3 + $0xce8] sm:$0xff] }
 0x14e   :  { %6165 = vmatpush1.bf16.msra.mxu0 %v10651_v55  ;;  %v513_v55 = vld [vmem:[#allocation3 + $0xcc8] sm:$0xff] }
 0x14f   :  { %6166 = vmatprep.subr.bf16.mxu0 %v10660_v61  ;;  %v10707_v61 = vcombine.low %v760_v47, %v764_v48  ;;  %v10462_v62 = vcombine.high %v513_v55, %v517_v56  ;;  %v10461_v5 = vcombine.low %v513_v55, %v517_v56  ;;  %v557_v47 = vld [vmem:[#allocation3 + $0xe28] sm:$0xff]  ;;  %v808_v48 = vld [vmem:[#allocation3 + $0x1600] sm:$0xff] }
 0x150   :  { %6413 = vmatpush1.bf16.msra.mxu1 %v10405_v0  ;;  %v10716_v0 = vcombine.high %v768_v57, %v772_v18  ;;  %v561_v56 = vld [vmem:[#allocation3 + $0xe48] sm:$0xff]  ;;  %v816_v18 = vld [vmem:[#allocation3 + $0x1640] sm:$0xff] }
 0x151   :  { %6414 = vmatprep.subr.bf16.mxu1 %v10414_v2  ;;  %v525_v2 = vld [vmem:[#allocation3 + $0xd28] sm:$0xff] }
 0x152   :  { %6167 = vmatpush1.bf16.msra.mxu0 %v10659_v1  ;;  %v521_v1 = vld [vmem:[#allocation3 + $0xd08] sm:$0xff] }
 0x153   :  { %6168 = vmatprep.subr.bf16.mxu0 %v10668_v3  ;;  %v776_v3 = vld [vmem:[#allocation3 + $0x1500] sm:$0xff]  ;;  %v10470_v7 = vcombine.high %v521_v1, %v525_v2  ;;  %v10469_v16 = vcombine.low %v521_v1, %v525_v2  ;;  %v565_v57 = vld [vmem:[#allocation3 + $0xe68] sm:$0xff] }
 0x154   :  { %6415 = vmatpush1.bf16.msra.mxu1 %v10413_v8  ;;  %v10724_v8 = vcombine.high %v776_v3, %v780_v4  ;;  %v10723_v17 = vcombine.low %v776_v3, %v780_v4  ;;  %v569_v2 = vld [vmem:[#allocation3 + $0xe88] sm:$0xff]  ;;  %v824_v4 = vld [vmem:[#allocation3 + $0x1680] sm:$0xff] }
 0x155   :  { %6416 = vmatprep.subr.bf16.mxu1 %v10422_v12  ;;  %v533_v12 = vld [vmem:[#allocation3 + $0xd68] sm:$0xff] }
 0x156   :  { %6169 = vmatpush1.bf16.msra.mxu0 %v10667_v11  ;;  %v529_v11 = vld [vmem:[#allocation3 + $0xd48] sm:$0xff] }
 0x157   :  { %6170 = vmatprep.subr.bf16.mxu0 %v10676_v14  ;;  %v784_v14 = vld [vmem:[#allocation3 + $0x1540] sm:$0xff]  ;;  %v10478_v19 = vcombine.high %v529_v11, %v533_v12  ;;  %v10477_v26 = vcombine.low %v529_v11, %v533_v12  ;;  %v573_v3 = vld [vmem:[#allocation3 + $0xea8] sm:$0xff] }
 0x158   :  { %6417 = vmatpush1.bf16.msra.mxu1 %v10421_v21  ;;  %v10732_v21 = vcombine.high %v784_v14, %v788_v15  ;;  %v10731_v27 = vcombine.low %v784_v14, %v788_v15  ;;  %v577_v12 = vld [vmem:[#allocation3 + $0xec8] sm:$0xff]  ;;  %v832_v15 = vld [vmem:[#allocation3 + $0x16c0] sm:$0xff] }
 0x159   :  { %6418 = vmatprep.subr.bf16.mxu1 %v10430_v23  ;;  %v541_v23 = vld [vmem:[#allocation3 + $0xda8] sm:$0xff] }
 0x15a   :  { %6171 = vmatpush1.bf16.msra.mxu0 %v10675_v22  ;;  %v537_v22 = vld [vmem:[#allocation3 + $0xd88] sm:$0xff] }
 0x15b   :  { %6172 = vmatprep.subr.bf16.mxu0 %v10684_v24  ;;  %v792_v24 = vld [vmem:[#allocation3 + $0x1580] sm:$0xff]  ;;  %v10486_v28 = vcombine.high %v537_v22, %v541_v23  ;;  %v581_v14 = vld [vmem:[#allocation3 + $0xee8] sm:$0xff] }
 0x15c   :  { %6419 = vmatpush1.bf16.msra.mxu1 %v10429_v29 }
 0x15d   :  { %6429 = vmatprep.subr.bf16.mxu1 %v10438_v63  ;;  %v545_v63 = vld [vmem:[#allocation3 + $0xdc8] sm:$0xff] }
 0x15e   :  { %6173 = vmatpush1.bf16.msra.mxu0 %v10683_v30  ;;  %v10740_v30 = vcombine.high %v792_v24, %v796_v25 }
 0x15f   :  { %6183 = vmatprep.subr.bf16.mxu0 %v10692_v32  ;;  %6421 = vmatmul.mubr.bf16.vlgmr.msra.gmra.mrb[4].mxu1 %v12340_v49  ;;  %v549_v32 = vld [vmem:[#allocation3 + $0xde8] sm:$0xff] }
 0x160   :  { %6430 = vmatpush1.bf16.msra.mxu1 %v10437_v37  ;;  %6461 = vmatprep.mubr.bf16.mxu1 %v12344_v58  ;;  %v10485_v37 = vcombine.low %v537_v22, %v541_v23  ;;  %v585_v23 = vld [vmem:[#allocation3 + $0xf08] sm:$0xff] }
 0x161   :  { %6175 = vmatmul.mubr.bf16.vlgmr.msra.gmra.mrb[0].mxu0 %v12370_v39  ;;  %6431 = vmatprep.subr.bf16.mxu1 %v10446_v41  ;;  %v10739_v41 = vcombine.low %v792_v24, %v796_v25  ;;  %v589_v24 = vld [vmem:[#allocation3 + $0xf28] sm:$0xff]  ;;  %v840_v25 = vld [vmem:[#allocation3 + $0x1700] sm:$0xff] }
 0x162   :  { %6184 = vmatpush1.bf16.msra.mxu0 %v10691_v40  ;;  %6215 = vmatprep.mubr.bf16.mxu0 %v12374_v46 }
 0x163   :  { %6185 = vmatprep.subr.bf16.mxu0 %v10700_v42  ;;  %v10494_v42 = vcombine.high %v545_v63, %v549_v32 }
 0x164   :  { %6432 = vmatpush1.bf16.msra.mxu1 %v10445_v51  ;;  %v812_v51 = vld [vmem:[#allocation3 + $0x1620] sm:$0xff] }
 0x165   :  { %6433 = vmatprep.subr.bf16.mxu1 %v10454_v52  ;;  %v10747_v52 = vcombine.low %v800_v34, %v804_v35  ;;  %v10756_v55 = vcombine.high %v808_v48, %v812_v51  ;;  %v597_v34 = vld [vmem:[#allocation3 + $0xf68] sm:$0xff]  ;;  %v848_v35 = vld [vmem:[#allocation3 + $0x1740] sm:$0xff] }
 0x166   :  { %6186 = vmatpush1.bf16.msra.mxu0 %v10699_v50  ;;  %v10493_v50 = vcombine.low %v545_v63, %v549_v32  ;;  %v593_v32 = vld [vmem:[#allocation3 + $0xf48] sm:$0xff] }
 0x167   :  { %6187 = vmatprep.subr.bf16.mxu0 %v10708_v54  ;;  %v10502_v54 = vcombine.high %v553_v45, %v557_v47 }
 0x168   :  { %6434 = vmatpush1.bf16.msra.mxu1 %v10453_v60  ;;  %v820_v60 = vld [vmem:[#allocation3 + $0x1660] sm:$0xff] }
 0x169   :  { %6435 = vmatprep.subr.bf16.mxu1 %v10462_v62  ;;  %v10755_v62 = vcombine.low %v808_v48, %v812_v51  ;;  %v10764_v1 = vcombine.high %v816_v18, %v820_v60  ;;  %v860_v48 = vld [vmem:[#allocation3 + $0x17a0] sm:$0xff]  ;;  %v10541_v51 = vcombine.low %v593_v32, %v597_v34 }
 0x16a   :  { %6188 = vmatpush1.bf16.msra.mxu0 %v10707_v61  ;;  %v10501_v61 = vcombine.low %v553_v45, %v557_v47  ;;  %v605_v45 = vld [vmem:[#allocation3 + $0xfa8] sm:$0xff]  ;;  %v856_v47 = vld [vmem:[#allocation3 + $0x1780] sm:$0xff] }
 0x16b   :  { %6189 = vmatprep.subr.bf16.mxu0 %v10716_v0  ;;  %v10510_v0 = vcombine.high %v561_v56, %v565_v57 }
 0x16c   :  { %6436 = vmatpush1.bf16.msra.mxu1 %v10461_v5  ;;  %v828_v5 = vld [vmem:[#allocation3 + $0x16a0] sm:$0xff] }
 0x16d   :  { %6437 = vmatprep.subr.bf16.mxu1 %v10470_v7  ;;  %v10763_v7 = vcombine.low %v816_v18, %v820_v60  ;;  %v10772_v11 = vcombine.high %v824_v4, %v828_v5  ;;  %v864_v60 = vld [vmem:[#allocation3 + $0x17c0] sm:$0xff] }
 0x16e   :  { %6190 = vmatpush1.bf16.msra.mxu0 %v10715_v6  ;;  %v10509_v6 = vcombine.low %v561_v56, %v565_v57  ;;  %v613_v56 = vld [vmem:[#allocation3 + $0xfe8] sm:$0xff] }
 0x16f   :  { %6191 = vmatprep.subr.bf16.mxu0 %v10724_v8  ;;  %v10518_v8 = vcombine.high %v569_v2, %v573_v3  ;;  %v12027_v57 = vld [vmem:[%s13594_s0 + $0x8] sm:$0x7f] }
 0x170   :  { %6438 = vmatpush1.bf16.msra.mxu1 %v10469_v16  ;;  %v836_v16 = vld [vmem:[#allocation3 + $0x16e0] sm:$0xff]  ;;  %v1115_v18 = vcombine.high %v12027_v57, %v12027_v57 }
 0x171   :  { %6439 = vmatprep.subr.bf16.mxu1 %v10478_v19  ;;  %v10771_v19 = vcombine.low %v824_v4, %v828_v5  ;;  %v10780_v22 = vcombine.high %v832_v15, %v836_v16  ;;  %v621_v4 = vld [vmem:[#allocation3 + $0x1028] sm:$0xff] }
 0x172   :  { %6192 = vmatpush1.bf16.msra.mxu0 %v10723_v17  ;;  %v12380_v29 = vpop.f32.mrb[0].mxu1  ;;  %v10517_v17 = vcombine.low %v569_v2, %v573_v3  ;;  %v617_v3 = vld [vmem:[#allocation3 + $0x1008] sm:$0xff]  ;;  %v12388_v5 = vrot.slane %v1115_v18, %v12294_v53 }
 0x173   :  { %6193 = vmatprep.subr.bf16.mxu0 %v10732_v21  ;;  %v12382_v33 = vpop.f32.mrb[1].mxu1  ;;  %v10526_v21 = vcombine.high %v577_v12, %v581_v14 }
 0x174   :  { %v6016_v36 = vpop.f32.mrb[2].mxu1  ;;  %6440 = vmatpush1.bf16.msra.mxu1 %v10477_v26  ;;  %v844_v26 = vld [vmem:[#allocation3 + $0x1720] sm:$0xff] }
 0x175   :  { %v6017_v40 = vpop.f32.mrb[3].mxu1  ;;  %6441 = vmatprep.subr.bf16.mxu1 %v10486_v28  ;;  %v10779_v28 = vcombine.low %v832_v15, %v836_v16  ;;  %v10788_v63 = vcombine.high %v840_v25, %v844_v26  ;;  %v852_v36 = vld [vmem:[#allocation3 + $0x1760] sm:$0xff]  ;;  %v625_v15 = vld [vmem:[#allocation3 + $0x1048] sm:$0xff] }
 0x176   :  { %6194 = vmatpush1.bf16.msra.mxu0 %v10731_v27  ;;  %v10525_v27 = vcombine.low %v577_v12, %v581_v14  ;;  %v10787_v40 = vcombine.low %v840_v25, %v844_v26  ;;  %v10566_v12 = vcombine.high %v617_v3, %v621_v4  ;;  %v629_v16 = vld [vmem:[#allocation3 + $0x1068] sm:$0xff] }
 0x177   :  { %6195 = vmatprep.subr.bf16.mxu0 %v10740_v30  ;;  %v10534_v30 = vcombine.high %v585_v23, %v589_v24  ;;  %v10574_v25 = vcombine.high %v625_v15, %v629_v16 }
 0x178   :  { %6442 = vmatpush1.bf16.msra.mxu1 %v10485_v37  ;;  %v10533_v37 = vcombine.low %v585_v23, %v589_v24  ;;  %v12394_v23 = vcombine.high %v12370_v39, %v12370_v39 }
 0x179   :  { %6443 = vmatprep.subr.bf16.mxu1 %v10494_v42  ;;  %v10796_v42 = vcombine.high %v848_v35, %v852_v36 }
 0x17a   :  { %6196 = vmatpush1.bf16.msra.mxu0 %v10739_v41  ;;  %v10542_v41 = vcombine.high %v593_v32, %v597_v34  ;;  %v892_v32 = vld [vmem:[#allocation3 + $0x18a0] sm:$0xff]  ;;  %v10573_v34 = vcombine.low %v625_v15, %v629_v16 }
 0x17b   :  { %6197 = vmatprep.subr.bf16.mxu0 %v10748_v43  ;;  %v601_v43 = vld [vmem:[#allocation3 + $0xf88] sm:$0xff] }
 0x17c   :  { %6444 = vmatpush1.bf16.msra.mxu1 %v10493_v50  ;;  %v10795_v50 = vcombine.low %v848_v35, %v852_v36 }
 0x17d   :  { %6445 = vmatprep.subr.bf16.mxu1 %v10502_v54  ;;  %v10804_v54 = vcombine.high %v856_v47, %v860_v48 }
 0x17e   :  { %6198 = vmatpush1.bf16.msra.mxu0 %v10747_v52  ;;  %v10550_v52 = vcombine.high %v601_v43, %v605_v45 }
 0x17f   :  { %6199 = vmatprep.subr.bf16.mxu0 %v10756_v55  ;;  %v609_v55 = vld [vmem:[#allocation3 + $0xfc8] sm:$0xff] }
 0x180   :  { %6446 = vmatpush1.bf16.msra.mxu1 %v10501_v61  ;;  %v868_v61 = vld [vmem:[#allocation3 + $0x17e0] sm:$0xff] }
 0x181   :  { %6447 = vmatprep.subr.bf16.mxu1 %v10510_v0  ;;  %v10803_v0 = vcombine.low %v856_v47, %v860_v48  ;;  %v10812_v2 = vcombine.high %v864_v60, %v868_v61 }
 0x182   :  { %6200 = vmatpush1.bf16.msra.mxu0 %v10755_v62  ;;  %v10549_v62 = vcombine.low %v601_v43, %v605_v45  ;;  %v900_v43 = vld [vmem:[#allocation3 + $0x18e0] sm:$0xff] }
 0x183   :  { %6201 = vmatprep.subr.bf16.mxu0 %v10764_v1  ;;  %v10558_v1 = vcombine.high %v609_v55, %v613_v56 }
 0x184   :  { %6448 = vmatpush1.bf16.msra.mxu1 %v10509_v6  ;;  %v872_v6 = vld [vmem:[#allocation3 + $0x1800] sm:$0xff] }
 0x185   :  { %6449 = vmatprep.subr.bf16.mxu1 %v10518_v8  ;;  %v10557_v8 = vcombine.low %v609_v55, %v613_v56  ;;  %v908_v55 = vld [vmem:[#allocation3 + $0x1920] sm:$0xff] }
 0x186   :  { %6202 = vmatpush1.bf16.msra.mxu0 %v10763_v7  ;;  %v876_v7 = vld [vmem:[#allocation3 + $0x1820] sm:$0xff] }
 0x187   :  { %6203 = vmatprep.subr.bf16.mxu0 %v10772_v11  ;;  %v10811_v11 = vcombine.low %v864_v60, %v868_v61  ;;  %v10820_v14 = vcombine.high %v872_v6, %v876_v7  ;;  %v10819_v24 = vcombine.low %v872_v6, %v876_v7  ;;  %v657_v61 = vld [vmem:[#allocation3 + $0x1148] sm:$0xff] }
 0x188   :  { %6450 = vmatpush1.bf16.msra.mxu1 %v10517_v17  ;;  %v1131_v17 = vcombine.high %v12388_v5, %v12388_v5  ;;  %v665_v7 = vld [vmem:[#allocation3 + $0x1188] sm:$0xff] }
 0x189   :  { %6451 = vmatprep.subr.bf16.mxu1 %v10526_v21  ;;  %v884_v21 = vld [vmem:[#allocation3 + $0x1860] sm:$0xff] }
 0x18a   :  { %6204 = vmatpush1.bf16.msra.mxu0 %v10771_v19  ;;  %v880_v19 = vld [vmem:[#allocation3 + $0x1840] sm:$0xff] }
 0x18b   :  { %6205 = vmatprep.subr.bf16.mxu0 %v10780_v22  ;;  %v10565_v22 = vcombine.low %v617_v3, %v621_v4  ;;  %v10828_v26 = vcombine.high %v880_v19, %v884_v21  ;;  %v10827_v35 = vcombine.low %v880_v19, %v884_v21  ;;  %v673_v19 = vld [vmem:[#allocation3 + $0x11c8] sm:$0xff] }
 0x18c   :  { %6452 = vmatpush1.bf16.msra.mxu1 %v10525_v27  ;;  %v633_v27 = vld [vmem:[#allocation3 + $0x1088] sm:$0xff] }
 0x18d   :  { %6453 = vmatprep.subr.bf16.mxu1 %v10534_v30  ;;  %v12397_v30 = vrot.slane %v1131_v17, %v12294_v53  ;;  %v677_v21 = vld [vmem:[#allocation3 + $0x11e8] sm:$0xff] }
 0x18e   :  { %6206 = vmatpush1.bf16.msra.mxu0 %v10779_v28  ;;  %v637_v28 = vld [vmem:[#allocation3 + $0x10a8] sm:$0xff] }
 0x18f   :  { %6207 = vmatprep.subr.bf16.mxu0 %v10788_v63  ;;  %v888_v63 = vld [vmem:[#allocation3 + $0x1880] sm:$0xff]  ;;  %v10582_v36 = vcombine.high %v633_v27, %v637_v28  ;;  %v10581_v45 = vcombine.low %v633_v27, %v637_v28  ;;  %v10622_v27 = vcombine.high %v673_v19, %v677_v21 }
 0x190   :  { %6454 = vmatpush1.bf16.msra.mxu1 %v10533_v37  ;;  %v10836_v37 = vcombine.high %v888_v63, %v892_v32  ;;  %v10835_v47 = vcombine.low %v888_v63, %v892_v32  ;;  %v681_v63 = vld [vmem:[#allocation3 + $0x1208] sm:$0xff] }
 0x191   :  { %6455 = vmatprep.subr.bf16.mxu1 %v10542_v41  ;;  %v645_v41 = vld [vmem:[#allocation3 + $0x10e8] sm:$0xff] }
 0x192   :  { %6208 = vmatpush1.bf16.msra.mxu0 %v10787_v40  ;;  %v641_v40 = vld [vmem:[#allocation3 + $0x10c8] sm:$0xff] }
 0x193   :  { %6209 = vmatprep.subr.bf16.mxu0 %v10796_v42  ;;  %v896_v42 = vld [vmem:[#allocation3 + $0x18c0] sm:$0xff]  ;;  %v10590_v48 = vcombine.high %v641_v40, %v645_v41  ;;  %v10589_v56 = vcombine.low %v641_v40, %v645_v41  ;;  %v685_v32 = vld [vmem:[#allocation3 + $0x1228] sm:$0xff] }
 0x194   :  { %6456 = vmatpush1.bf16.msra.mxu1 %v10541_v51  ;;  %v10844_v51 = vcombine.high %v896_v42, %v900_v43  ;;  %v10843_v57 = vcombine.low %v896_v42, %v900_v43  ;;  %v10630_v40 = vcombine.high %v681_v63, %v685_v32  ;;  %v689_v42 = vld [vmem:[#allocation3 + $0x1248] sm:$0xff] }
 0x195   :  { %6457 = vmatprep.subr.bf16.mxu1 %v10550_v52  ;;  %v653_v52 = vld [vmem:[#allocation3 + $0x1128] sm:$0xff] }
 0x196   :  { %6210 = vmatpush1.bf16.msra.mxu0 %v10795_v50  ;;  %v649_v50 = vld [vmem:[#allocation3 + $0x1108] sm:$0xff] }
 0x197   :  { %6211 = vmatprep.subr.bf16.mxu0 %v10804_v54  ;;  %v904_v54 = vld [vmem:[#allocation3 + $0x1900] sm:$0xff]  ;;  %v10598_v18 = vcombine.high %v649_v50, %v653_v52  ;;  %v693_v43 = vld [vmem:[#allocation3 + $0x1268] sm:$0xff] }
 0x198   :  { %6458 = vmatpush1.bf16.msra.mxu1 %v10549_v62  ;;  %v10852_v60 = vcombine.high %v904_v54, %v908_v55  ;;  %v661_v62 = vld [vmem:[#allocation3 + $0x1168] sm:$0xff]  ;;  %v10851_v3 = vcombine.low %v904_v54, %v908_v55 }
 0x199   :  { %6459 = vmatprep.subr.bf16.mxu1 %v10558_v1  ;;  %v916_v1 = vld [vmem:[#allocation3 + $0x1960] sm:$0xff]  ;;  %v10606_v4 = vcombine.high %v657_v61, %v661_v62  ;;  %v697_v54 = vld [vmem:[#allocation3 + $0x1288] sm:$0xff] }
 0x19a   :  { %6212 = vmatpush1.bf16.msra.mxu0 %v10803_v0  ;;  %v912_v0 = vld [vmem:[#allocation3 + $0x1940] sm:$0xff]  ;;  %v701_v55 = vld [vmem:[#allocation3 + $0x12a8] sm:$0xff] }
 0x19b   :  { %6213 = vmatprep.subr.bf16.mxu0 %v10812_v2  ;;  %v10597_v2 = vcombine.low %v649_v50, %v653_v52  ;;  %v10860_v6 = vcombine.high %v912_v0, %v916_v1  ;;  %v10859_v15 = vcombine.low %v912_v0, %v916_v1  ;;  %v10638_v50 = vcombine.high %v689_v42, %v693_v43  ;;  %v705_v0 = vld [vmem:[#allocation3 + $0x12c8] sm:$0xff] }
 0x19c   :  { %6460 = vmatpush1.bf16.msra.mxu1 %v10557_v8  ;;  %v669_v8 = vld [vmem:[#allocation3 + $0x11a8] sm:$0xff] }
 0x19d   :  { %6470 = vmatprep.subr.bf16.mxu1 %v10566_v12  ;;  %v924_v12 = vld [vmem:[#allocation3 + $0x19a0] sm:$0xff]  ;;  %v10614_v16 = vcombine.high %v665_v7, %v669_v8  ;;  %v709_v1 = vld [vmem:[#allocation3 + $0x12e8] sm:$0xff] }
 0x19e   :  { %6214 = vmatpush1.bf16.msra.mxu0 %v10811_v11  ;;  %v920_v11 = vld [vmem:[#allocation3 + $0x1980] sm:$0xff] }
 0x19f   :  { %6224 = vmatprep.subr.bf16.mxu0 %v10820_v14  ;;  %6462 = vmatmul.mubr.bf16.vlgmr.msra.gmra.mrb[4].mxu1 %v12359_v10  ;;  %v10605_v14 = vcombine.low %v657_v61, %v661_v62  ;;  %v10868_v17 = vcombine.high %v920_v11, %v924_v12  ;;  %v10646_v61 = vcombine.high %v697_v54, %v701_v55 }
 0x1a0   :  { %6471 = vmatpush1.bf16.msra.mxu1 %v10565_v22  ;;  %6502 = vmatprep.mubr.bf16.mxu1 %v12362_v20  ;;  %v928_v22 = vld [vmem:[#allocation3 + $0x19c0] sm:$0xff] }
 0x1a1   :  { %6216 = vmatmul.mubr.bf16.vlgmr.msra.gmra.mrb[0].mxu0 %v12394_v23  ;;  %6472 = vmatprep.subr.bf16.mxu1 %v10574_v25  ;;  %v10613_v25 = vcombine.low %v665_v7, %v669_v8  ;;  %v10654_v7 = vcombine.high %v705_v0, %v709_v1 }
 0x1a2   :  { %6225 = vmatpush1.bf16.msra.mxu0 %v10819_v24  ;;  %6256 = vmatprep.mubr.bf16.mxu0 %v12397_v30  ;;  %v932_v24 = vld [vmem:[#allocation3 + $0x19e0] sm:$0xff] }
 0x1a3   :  { %6226 = vmatprep.subr.bf16.mxu0 %v10828_v26  ;;  %v10867_v26 = vcombine.low %v920_v11, %v924_v12  ;;  %v10876_v28 = vcombine.high %v928_v22, %v932_v24  ;;  %v713_v11 = vld [vmem:[#allocation3 + $0x1308] sm:$0xff] }
 0x1a4   :  { %6473 = vmatpush1.bf16.msra.mxu1 %v10573_v34  ;;  %v936_v34 = vld [vmem:[#allocation3 + $0x1a00] sm:$0xff]  ;;  %v717_v12 = vld [vmem:[#allocation3 + $0x1328] sm:$0xff] }
 0x1a5   :  { %6474 = vmatprep.subr.bf16.mxu1 %v10582_v36  ;;  %v10621_v36 = vcombine.low %v673_v19, %v677_v21  ;;  %v10662_v19 = vcombine.high %v713_v11, %v717_v12 }
 0x1a6   :  { %6227 = vmatpush1.bf16.msra.mxu0 %v10827_v35  ;;  %v940_v35 = vld [vmem:[#allocation3 + $0x1a20] sm:$0xff] }
 0x1a7   :  { %6228 = vmatprep.subr.bf16.mxu0 %v10836_v37  ;;  %v10875_v37 = vcombine.low %v928_v22, %v932_v24  ;;  %v10884_v41 = vcombine.high %v936_v34, %v940_v35  ;;  %v721_v22 = vld [vmem:[#allocation3 + $0x1348] sm:$0xff] }
 0x1a8   :  { %6475 = vmatpush1.bf16.msra.mxu1 %v10581_v45  ;;  %v944_v45 = vld [vmem:[#allocation3 + $0x1a40] sm:$0xff]  ;;  %v725_v24 = vld [vmem:[#allocation3 + $0x1368] sm:$0xff] }
 0x1a9   :  { %6476 = vmatprep.subr.bf16.mxu1 %v10590_v48  ;;  %v10629_v48 = vcombine.low %v681_v63, %v685_v32  ;;  %v10670_v63 = vcombine.high %v721_v22, %v725_v24 }
 0x1aa   :  { %6229 = vmatpush1.bf16.msra.mxu0 %v10835_v47  ;;  %v948_v47 = vld [vmem:[#allocation3 + $0x1a60] sm:$0xff] }
 0x1ab   :  { %6230 = vmatprep.subr.bf16.mxu0 %v10844_v51  ;;  %v10883_v51 = vcombine.low %v936_v34, %v940_v35  ;;  %v10892_v52 = vcombine.high %v944_v45, %v948_v47  ;;  %v729_v34 = vld [vmem:[#allocation3 + $0x1388] sm:$0xff] }
 0x1ac   :  { %6477 = vmatpush1.bf16.msra.mxu1 %v10589_v56  ;;  %v952_v56 = vld [vmem:[#allocation3 + $0x1a80] sm:$0xff]  ;;  %v733_v35 = vld [vmem:[#allocation3 + $0x13a8] sm:$0xff] }
 0x1ad   :  { %6478 = vmatprep.subr.bf16.mxu1 %v10598_v18  ;;  %v10637_v18 = vcombine.low %v689_v42, %v693_v43  ;;  %v10678_v42 = vcombine.high %v729_v34, %v733_v35 }
 0x1ae   :  { %6231 = vmatpush1.bf16.msra.mxu0 %v10843_v57  ;;  %v956_v57 = vld [vmem:[#allocation3 + $0x1aa0] sm:$0xff] }
 0x1af   :  { %6232 = vmatprep.subr.bf16.mxu0 %v10852_v60  ;;  %v10891_v60 = vcombine.low %v944_v45, %v948_v47  ;;  %v10900_v62 = vcombine.high %v952_v56, %v956_v57  ;;  %v737_v45 = vld [vmem:[#allocation3 + $0x13c8] sm:$0xff] }
 0x1b0   :  { %6479 = vmatpush1.bf16.msra.mxu1 %v10597_v2  ;;  %v960_v2 = vld [vmem:[#allocation3 + $0x1ac0] sm:$0xff]  ;;  %v741_v47 = vld [vmem:[#allocation3 + $0x13e8] sm:$0xff] }
 0x1b1   :  { %6480 = vmatprep.subr.bf16.mxu1 %v10606_v4  ;;  %v10645_v4 = vcombine.low %v697_v54, %v701_v55  ;;  %v10686_v54 = vcombine.high %v737_v45, %v741_v47 }
 0x1b2   :  { %6233 = vmatpush1.bf16.msra.mxu0 %v10851_v3  ;;  %v964_v3 = vld [vmem:[#allocation3 + $0x1ae0] sm:$0xff] }
 0x1b3   :  { %6234 = vmatprep.subr.bf16.mxu0 %v10860_v6  ;;  %v10899_v6 = vcombine.low %v952_v56, %v956_v57  ;;  %v10908_v8 = vcombine.high %v960_v2, %v964_v3  ;;  %v745_v56 = vld [vmem:[#allocation3 + $0x1408] sm:$0xff] }
 0x1b4   :  { %6481 = vmatpush1.bf16.msra.mxu1 %v10605_v14  ;;  %v968_v14 = vld [vmem:[#allocation3 + $0x1b00] sm:$0xff]  ;;  %v749_v57 = vld [vmem:[#allocation3 + $0x1428] sm:$0xff] }
 0x1b5   :  { %6482 = vmatprep.subr.bf16.mxu1 %v10614_v16  ;;  %v10653_v16 = vcombine.low %v705_v0, %v709_v1  ;;  %v10694_v0 = vcombine.high %v745_v56, %v749_v57 }
 0x1b6   :  { %6235 = vmatpush1.bf16.msra.mxu0 %v10859_v15  ;;  %v972_v15 = vld [vmem:[#allocation3 + $0x1b20] sm:$0xff] }
 0x1b7   :  { %6236 = vmatprep.subr.bf16.mxu0 %v10868_v17  ;;  %v10907_v17 = vcombine.low %v960_v2, %v964_v3  ;;  %v10916_v21 = vcombine.high %v968_v14, %v972_v15  ;;  %v753_v2 = vld [vmem:[#allocation3 + $0x1448] sm:$0xff] }
 0x1b8   :  { %6483 = vmatpush1.bf16.msra.mxu1 %v10613_v25  ;;  %v976_v25 = vld [vmem:[#allocation3 + $0x1b40] sm:$0xff]  ;;  %v757_v3 = vld [vmem:[#allocation3 + $0x1468] sm:$0xff] }
 0x1b9   :  { %6484 = vmatprep.subr.bf16.mxu1 %v10622_v27  ;;  %v10661_v27 = vcombine.low %v713_v11, %v717_v12  ;;  %v10702_v12 = vcombine.high %v753_v2, %v757_v3 }
 0x1ba   :  { %6237 = vmatpush1.bf16.msra.mxu0 %v10867_v26  ;;  %v980_v26 = vld [vmem:[#allocation3 + $0x1b60] sm:$0xff] }
 0x1bb   :  { %6238 = vmatprep.subr.bf16.mxu0 %v10876_v28  ;;  %v10915_v28 = vcombine.low %v968_v14, %v972_v15  ;;  %v10924_v32 = vcombine.high %v976_v25, %v980_v26  ;;  %v761_v15 = vld [vmem:[#allocation3 + $0x1488] sm:$0xff] }
 0x1bc   :  { %6485 = vmatpush1.bf16.msra.mxu1 %v10621_v36  ;;  %v984_v36 = vld [vmem:[#allocation3 + $0x1b80] sm:$0xff] }
 0x1bd   :  { %6486 = vmatprep.subr.bf16.mxu1 %v10630_v40  ;;  %v10669_v40 = vcombine.low %v721_v22, %v725_v24  ;;  %v769_v24 = vld [vmem:[#allocation3 + $0x14c8] sm:$0xff] }
 0x1be   :  { %6239 = vmatpush1.bf16.msra.mxu0 %v10875_v37  ;;  %v988_v37 = vld [vmem:[#allocation3 + $0x1ba0] sm:$0xff] }
 0x1bf   :  { %6240 = vmatprep.subr.bf16.mxu0 %v10884_v41  ;;  %v10923_v41 = vcombine.low %v976_v25, %v980_v26  ;;  %v10932_v43 = vcombine.high %v984_v36, %v988_v37  ;;  %v773_v25 = vld [vmem:[#allocation3 + $0x14e8] sm:$0xff]  ;;  %v12178_v26 = vmov 0  }
 0x1c0   :  { %6487 = vmatpush1.bf16.msra.mxu1 %v10629_v48  ;;  %v992_v48 = vld [vmem:[#allocation3 + $0x1bc0] sm:$0xff] }
 0x1c1   :  { %6488 = vmatprep.subr.bf16.mxu1 %v10638_v50  ;;  %v10677_v50 = vcombine.low %v729_v34, %v733_v35  ;;  %v10718_v34 = vcombine.high %v769_v24, %v773_v25 }
 0x1c2   :  { %6241 = vmatpush1.bf16.msra.mxu0 %v10883_v51  ;;  %v996_v51 = vld [vmem:[#allocation3 + $0x1be0] sm:$0xff] }
 0x1c3   :  { %6242 = vmatprep.subr.bf16.mxu0 %v10892_v52  ;;  %v10931_v52 = vcombine.low %v984_v36, %v988_v37  ;;  %v10940_v55 = vcombine.high %v992_v48, %v996_v51  ;;  %v777_v36 = vld [vmem:[#allocation3 + $0x1508] sm:$0xff] }
 0x1c4   :  { %6489 = vmatpush1.bf16.msra.mxu1 %v10637_v18  ;;  %v1000_v18 = vld [vmem:[#allocation3 + $0x1c00] sm:$0xff]  ;;  %v781_v37 = vld [vmem:[#allocation3 + $0x1528] sm:$0xff] }
 0x1c5   :  { %6490 = vmatprep.subr.bf16.mxu1 %v10646_v61  ;;  %v10685_v61 = vcombine.low %v737_v45, %v741_v47  ;;  %v10726_v45 = vcombine.high %v777_v36, %v781_v37 }
 0x1c6   :  { %6243 = vmatpush1.bf16.msra.mxu0 %v10891_v60  ;;  %v1004_v60 = vld [vmem:[#allocation3 + $0x1c20] sm:$0xff] }
 0x1c7   :  { %6244 = vmatprep.subr.bf16.mxu0 %v10900_v62  ;;  %v10939_v62 = vcombine.low %v992_v48, %v996_v51  ;;  %v10948_v1 = vcombine.high %v1000_v18, %v1004_v60  ;;  %v10947_v11 = vcombine.low %v1000_v18, %v1004_v60  ;;  %v785_v48 = vld [vmem:[#allocation3 + $0x1548] sm:$0xff] }
 0x1c8   :  { %6491 = vmatpush1.bf16.msra.mxu1 %v10645_v4  ;;  %v1008_v4 = vld [vmem:[#allocation3 + $0x1c40] sm:$0xff]  ;;  %v789_v51 = vld [vmem:[#allocation3 + $0x1568] sm:$0xff] }
 0x1c9   :  { %6492 = vmatprep.subr.bf16.mxu1 %v10654_v7  ;;  %v10693_v7 = vcombine.low %v745_v56, %v749_v57  ;;  %v10734_v56 = vcombine.high %v785_v48, %v789_v51  ;;  %v793_v18 = vld [vmem:[#allocation3 + $0x1588] sm:$0xff] }
 0x1ca   :  { %6245 = vmatpush1.bf16.msra.mxu0 %v10899_v6  ;;  %v1012_v6 = vld [vmem:[#allocation3 + $0x1c60] sm:$0xff]  ;;  %v797_v60 = vld [vmem:[#allocation3 + $0x15a8] sm:$0xff] }
 0x1cb   :  { %6246 = vmatprep.subr.bf16.mxu0 %v10908_v8  ;;  %v12405_v8 = vrot.slane %v12388_v5, %v12294_v53  ;;  %v10956_v14 = vcombine.high %v1008_v4, %v1012_v6  ;;  %v10955_v22 = vcombine.low %v1008_v4, %v1012_v6  ;;  %v801_v4 = vld [vmem:[#allocation3 + $0x15c8] sm:$0xff] }
 0x1cc   :  { %6493 = vmatpush1.bf16.msra.mxu1 %v10653_v16  ;;  %v765_v16 = vld [vmem:[#allocation3 + $0x14a8] sm:$0xff] }
 0x1cd   :  { %6494 = vmatprep.subr.bf16.mxu1 %v10662_v19  ;;  %v1020_v19 = vld [vmem:[#allocation3 + $0x1ca0] sm:$0xff]  ;;  %v10710_v53 = vcombine.high %v761_v15, %v765_v16  ;;  %v805_v6 = vld [vmem:[#allocation3 + $0x15e8] sm:$0xff] }
 0x1ce   :  { %6247 = vmatpush1.bf16.msra.mxu0 %v10907_v17  ;;  %v1016_v17 = vld [vmem:[#allocation3 + $0x1c80] sm:$0xff] }
 0x1cf   :  { %6248 = vmatprep.subr.bf16.mxu0 %v10916_v21  ;;  %v10701_v21 = vcombine.low %v753_v2, %v757_v3  ;;  %v10964_v5 = vcombine.high %v1016_v17, %v1020_v19  ;;  %v10742_v2 = vcombine.high %v793_v18, %v797_v60 }
 0x1d0   :  { %6495 = vmatpush1.bf16.msra.mxu1 %v10661_v27  ;;  %v1024_v27 = vld [vmem:[#allocation3 + $0x1cc0] sm:$0xff] }
 0x1d1   :  { %6496 = vmatprep.subr.bf16.mxu1 %v10670_v63  ;;  %v10709_v63 = vcombine.low %v761_v15, %v765_v16  ;;  %v10750_v15 = vcombine.high %v801_v4, %v805_v6 }
 0x1d2   :  { %6249 = vmatpush1.bf16.msra.mxu0 %v10915_v28  ;;  %v1028_v28 = vld [vmem:[#allocation3 + $0x1ce0] sm:$0xff] }
 0x1d3   :  { %6250 = vmatprep.subr.bf16.mxu0 %v10924_v32  ;;  %v10963_v32 = vcombine.low %v1016_v17, %v1020_v19  ;;  %v10972_v35 = vcombine.high %v1024_v27, %v1028_v28  ;;  %v809_v17 = vld [vmem:[#allocation3 + $0x1608] sm:$0xff] }
 0x1d4   :  { %6497 = vmatpush1.bf16.msra.mxu1 %v10669_v40  ;;  %v1032_v40 = vld [vmem:[#allocation3 + $0x1d00] sm:$0xff]  ;;  %v813_v19 = vld [vmem:[#allocation3 + $0x1628] sm:$0xff] }
 0x1d5   :  { %6498 = vmatprep.subr.bf16.mxu1 %v10678_v42  ;;  %v10717_v42 = vcombine.low %v769_v24, %v773_v25  ;;  %v10758_v24 = vcombine.high %v809_v17, %v813_v19 }
 0x1d6   :  { %6251 = vmatpush1.bf16.msra.mxu0 %v10923_v41  ;;  %v1036_v41 = vld [vmem:[#allocation3 + $0x1d20] sm:$0xff] }
 0x1d7   :  { %6252 = vmatprep.subr.bf16.mxu0 %v10932_v43  ;;  %v10971_v43 = vcombine.low %v1024_v27, %v1028_v28  ;;  %v10980_v47 = vcombine.high %v1032_v40, %v1036_v41  ;;  %v817_v27 = vld [vmem:[#allocation3 + $0x1648] sm:$0xff] }
 0x1d8   :  { %6499 = vmatpush1.bf16.msra.mxu1 %v10677_v50  ;;  %v1040_v50 = vld [vmem:[#allocation3 + $0x1d40] sm:$0xff]  ;;  %v821_v28 = vld [vmem:[#allocation3 + $0x1668] sm:$0xff] }
 0x1d9   :  { %6500 = vmatprep.subr.bf16.mxu1 %v10686_v54  ;;  %v10725_v54 = vcombine.low %v777_v36, %v781_v37  ;;  %v10766_v37 = vcombine.high %v817_v27, %v821_v28 }
 0x1da   :  { %6253 = vmatpush1.bf16.msra.mxu0 %v10931_v52  ;;  %v1044_v52 = vld [vmem:[#allocation3 + $0x1d60] sm:$0xff] }
 0x1db   :  { %6254 = vmatprep.subr.bf16.mxu0 %v10940_v55  ;;  %v10979_v55 = vcombine.low %v1032_v40, %v1036_v41  ;;  %v10988_v57 = vcombine.high %v1040_v50, %v1044_v52  ;;  %v825_v41 = vld [vmem:[#allocation3 + $0x1688] sm:$0xff] }
 0x1dc   :  { %6501 = vmatpush1.bf16.msra.mxu1 %v10685_v61  ;;  %v1048_v61 = vld [vmem:[#allocation3 + $0x1d80] sm:$0xff] }
 0x1dd   :  { %6511 = vmatprep.subr.bf16.mxu1 %v10694_v0  ;;  %v10733_v0 = vcombine.low %v785_v48, %v789_v51 }
 0x1de   :  { %6255 = vmatpush1.bf16.msra.mxu0 %v10939_v62  ;;  %v1052_v62 = vld [vmem:[#allocation3 + $0x1da0] sm:$0xff] }
 0x1df   :  { %6265 = vmatprep.subr.bf16.mxu0 %v10948_v1  ;;  %6503 = vmatmul.mubr.bf16.vlgmr.msra.gmra.mrb[4].mxu1 %v12370_v39  ;;  %v10987_v1 = vcombine.low %v1040_v50, %v1044_v52  ;;  %v10996_v3 = vcombine.high %v1048_v61, %v1052_v62  ;;  %v833_v52 = vld [vmem:[#allocation3 + $0x16c8] sm:$0xff] }
 0x1e0   :  { %6512 = vmatpush1.bf16.msra.mxu1 %v10693_v7  ;;  %6543 = vmatprep.mubr.bf16.mxu1 %v12374_v46  ;;  %v1056_v7 = vld [vmem:[#allocation3 + $0x1dc0] sm:$0xff] }
 0x1e1   :  { %6257 = vmatmul.mubr.bf16.vlgmr.msra.gmra.mrb[0].mxu0 %v12405_v8  ;;  %6513 = vmatprep.subr.bf16.mxu1 %v10702_v12  ;;  %v10741_v12 = vcombine.low %v793_v18, %v797_v60 }
 0x1e2   :  { %6266 = vmatpush1.bf16.msra.mxu0 %v10947_v11  ;;  %6297 = vmatprep.mubr.bf16.mxu0 %v12178_v26  ;;  %v1060_v11 = vld [vmem:[#allocation3 + $0x1de0] sm:$0xff] }
 0x1e3   :  { %6267 = vmatprep.subr.bf16.mxu0 %v10956_v14  ;;  %v10995_v14 = vcombine.low %v1048_v61, %v1052_v62  ;;  %v11004_v16 = vcombine.high %v1056_v7, %v1060_v11  ;;  %v841_v62 = vld [vmem:[#allocation3 + $0x1708] sm:$0xff] }
 0x1e4   :  { %6514 = vmatpush1.bf16.msra.mxu1 %v10701_v21  ;;  %v106_v21 = vld [vmem:[#allocation3 + $0x10] sm:$0xff] }
 0x1e5   :  { %6515 = vmatprep.subr.bf16.mxu1 %v10710_v53  ;;  %v10749_v53 = vcombine.low %v801_v4, %v805_v6 }
 0x1e6   :  { %6268 = vmatpush1.bf16.msra.mxu0 %v10955_v22  ;;  %v110_v22 = vld [vmem:[#allocation3 + $0x30] sm:$0xff] }
 0x1e7   :  { %6269 = vmatprep.subr.bf16.mxu0 %v10964_v5  ;;  %v11003_v5 = vcombine.low %v1056_v7, %v1060_v11  ;;  %v10056_v25 = vcombine.high %v106_v21, %v110_v22  ;;  %v10055_v36 = vcombine.low %v106_v21, %v110_v22  ;;  %v849_v11 = vld [vmem:[#allocation3 + $0x1748] sm:$0xff] }
 0x1e8   :  { %6516 = vmatpush1.bf16.msra.mxu1 %v10709_v63  ;;  %v114_v63 = vld [vmem:[#allocation3 + $0x50] sm:$0xff]  ;;  %v857_v22 = vld [vmem:[#allocation3 + $0x1788] sm:$0xff] }
 0x1e9   :  { %6517 = vmatprep.subr.bf16.mxu1 %v10718_v34  ;;  %v12413_v34 = vcombine.high %v12405_v8, %v12405_v8 }
 0x1ea   :  { %6270 = vmatpush1.bf16.msra.mxu0 %v10963_v32  ;;  %v118_v32 = vld [vmem:[#allocation3 + $0x70] sm:$0xff] }
 0x1eb   :  { %6271 = vmatprep.subr.bf16.mxu0 %v10972_v35  ;;  %v10757_v35 = vcombine.low %v809_v17, %v813_v19  ;;  %v10064_v40 = vcombine.high %v114_v63, %v118_v32  ;;  %v10063_v48 = vcombine.low %v114_v63, %v118_v32  ;;  %v865_v32 = vld [vmem:[#allocation3 + $0x17c8] sm:$0xff] }
 0x1ec   :  { %6518 = vmatpush1.bf16.msra.mxu1 %v10717_v42  ;;  %v829_v42 = vld [vmem:[#allocation3 + $0x16a8] sm:$0xff] }
 0x1ed   :  { %6519 = vmatprep.subr.bf16.mxu1 %v10726_v45  ;;  %v126_v45 = vld [vmem:[#allocation3 + $0xb0] sm:$0xff]  ;;  %v10774_v51 = vcombine.high %v825_v41, %v829_v42 }
 0x1ee   :  { %6272 = vmatpush1.bf16.msra.mxu0 %v10971_v43  ;;  %v122_v43 = vld [vmem:[#allocation3 + $0x90] sm:$0xff] }
 0x1ef   :  { %6273 = vmatprep.subr.bf16.mxu0 %v10980_v47  ;;  %v10765_v47 = vcombine.low %v817_v27, %v821_v28  ;;  %v10072_v50 = vcombine.high %v122_v43, %v126_v45  ;;  %v10071_v18 = vcombine.low %v122_v43, %v126_v45  ;;  %v873_v45 = vld [vmem:[#allocation3 + $0x1808] sm:$0xff] }
 0x1f0   :  { %6520 = vmatpush1.bf16.msra.mxu1 %v10725_v54  ;;  %v837_v54 = vld [vmem:[#allocation3 + $0x16e8] sm:$0xff] }
 0x1f1   :  { %6521 = vmatprep.subr.bf16.mxu1 %v10734_v56  ;;  %v134_v56 = vld [vmem:[#allocation3 + $0xf0] sm:$0xff]  ;;  %v10782_v60 = vcombine.high %v833_v52, %v837_v54 }
 0x1f2   :  { %6274 = vmatpush1.bf16.msra.mxu0 %v10979_v55  ;;  %v130_v55 = vld [vmem:[#allocation3 + $0xd0] sm:$0xff] }
 0x1f3   :  { %6275 = vmatprep.subr.bf16.mxu0 %v10988_v57  ;;  %v10773_v57 = vcombine.low %v825_v41, %v829_v42  ;;  %v10080_v61 = vcombine.high %v130_v55, %v134_v56  ;;  %v10079_v4 = vcombine.low %v130_v55, %v134_v56  ;;  %v881_v56 = vld [vmem:[#allocation3 + $0x1848] sm:$0xff] }
 0x1f4   :  { %6522 = vmatpush1.bf16.msra.mxu1 %v10733_v0  ;;  %v845_v0 = vld [vmem:[#allocation3 + $0x1728] sm:$0xff] }
 0x1f5   :  { %6523 = vmatprep.subr.bf16.mxu1 %v10742_v2  ;;  %v142_v2 = vld [vmem:[#allocation3 + $0x130] sm:$0xff]  ;;  %v10790_v6 = vcombine.high %v841_v62, %v845_v0 }
 0x1f6   :  { %6276 = vmatpush1.bf16.msra.mxu0 %v10987_v1  ;;  %v138_v1 = vld [vmem:[#allocation3 + $0x110] sm:$0xff] }
 0x1f7   :  { %6277 = vmatprep.subr.bf16.mxu0 %v10996_v3  ;;  %v10781_v3 = vcombine.low %v833_v52, %v837_v54  ;;  %v10088_v7 = vcombine.high %v138_v1, %v142_v2  ;;  %v10087_v17 = vcombine.low %v138_v1, %v142_v2  ;;  %v889_v2 = vld [vmem:[#allocation3 + $0x1888] sm:$0xff] }
 0x1f8   :  { %6524 = vmatpush1.bf16.msra.mxu1 %v10741_v12  ;;  %v853_v12 = vld [vmem:[#allocation3 + $0x1768] sm:$0xff] }
 0x1f9   :  { %6525 = vmatprep.subr.bf16.mxu1 %v10750_v15  ;;  %v150_v15 = vld [vmem:[#allocation3 + $0x170] sm:$0xff]  ;;  %v10798_v19 = vcombine.high %v849_v11, %v853_v12 }
 0x1fa   :  { %6278 = vmatpush1.bf16.msra.mxu0 %v10995_v14  ;;  %v146_v14 = vld [vmem:[#allocation3 + $0x150] sm:$0xff] }
 0x1fb   :  { %6279 = vmatprep.subr.bf16.mxu0 %v11004_v16  ;;  %v10789_v16 = vcombine.low %v841_v62, %v845_v0  ;;  %v10096_v21 = vcombine.high %v146_v14, %v150_v15  ;;  %v10095_v27 = vcombine.low %v146_v14, %v150_v15  ;;  %v897_v15 = vld [vmem:[#allocation3 + $0x18c8] sm:$0xff] }
 0x1fc   :  { %6526 = vmatpush1.bf16.msra.mxu1 %v10749_v53  ;;  %v861_v53 = vld [vmem:[#allocation3 + $0x17a8] sm:$0xff] }
 0x1fd   :  { %6527 = vmatprep.subr.bf16.mxu1 %v10758_v24  ;;  %v158_v24 = vld [vmem:[#allocation3 + $0x1b0] sm:$0xff]  ;;  %v10806_v28 = vcombine.high %v857_v22, %v861_v53 }
 0x1fe   :  { %6280 = vmatpush1.bf16.msra.mxu0 %v11003_v5  ;;  %v154_v5 = vld [vmem:[#allocation3 + $0x190] sm:$0xff] }
 0x1ff   :  { %6634 = vmatprep.subr.bf16.mxu0 %v10056_v25  ;;  %v10797_v25 = vcombine.low %v849_v11, %v853_v12  ;;  %v10104_v63 = vcombine.high %v154_v5, %v158_v24  ;;  %v10103_v41 = vcombine.low %v154_v5, %v158_v24  ;;  %v905_v24 = vld [vmem:[#allocation3 + $0x1908] sm:$0xff] }
 0x200   :  { %6528 = vmatpush1.bf16.msra.mxu1 %v10757_v35  ;;  %v869_v35 = vld [vmem:[#allocation3 + $0x17e8] sm:$0xff] }
 0x201   :  { %6298 = vmatmul.mubr.bf16.vlgmr.msra.gmra.mrb[0].mxu0 %v12413_v34  ;;  %6529 = vmatprep.subr.bf16.mxu1 %v10766_v37  ;;  %v166_v37 = vld [vmem:[#allocation3 + $0x1f0] sm:$0xff]  ;;  %v10814_v42 = vcombine.high %v865_v32, %v869_v35 }
 0x202   :  { %6635 = vmatpush1.bf16.msra.mxu0 %v10055_v36  ;;  %6666 = vmatprep.mubr.bf16.mxu0 %v12308_v9  ;;  %v162_v36 = vld [vmem:[#allocation3 + $0x1d0] sm:$0xff] }
 0x203   :  { %6636 = vmatprep.subr.bf16.mxu0 %v10064_v40  ;;  %v10805_v40 = vcombine.low %v857_v22, %v861_v53  ;;  %v10112_v43 = vcombine.high %v162_v36, %v166_v37  ;;  %v10111_v52 = vcombine.low %v162_v36, %v166_v37  ;;  %v913_v37 = vld [vmem:[#allocation3 + $0x1948] sm:$0xff] }
 0x204   :  { %6530 = vmatpush1.bf16.msra.mxu1 %v10765_v47  ;;  %v877_v47 = vld [vmem:[#allocation3 + $0x1828] sm:$0xff] }
 0x205   :  { %6531 = vmatprep.subr.bf16.mxu1 %v10774_v51  ;;  %v174_v51 = vld [vmem:[#allocation3 + $0x230] sm:$0xff]  ;;  %v10822_v54 = vcombine.high %v873_v45, %v877_v47 }
 0x206   :  { %6637 = vmatpush1.bf16.msra.mxu0 %v10063_v48  ;;  %v170_v48 = vld [vmem:[#allocation3 + $0x210] sm:$0xff] }
 0x207   :  { %6638 = vmatprep.subr.bf16.mxu0 %v10072_v50  ;;  %v10813_v50 = vcombine.low %v865_v32, %v869_v35  ;;  %v10120_v55 = vcombine.high %v170_v48, %v174_v51  ;;  %v10119_v62 = vcombine.low %v170_v48, %v174_v51  ;;  %v921_v51 = vld [vmem:[#allocation3 + $0x1988] sm:$0xff] }
 0x208   :  { %6532 = vmatpush1.bf16.msra.mxu1 %v10773_v57  ;;  %v885_v57 = vld [vmem:[#allocation3 + $0x1868] sm:$0xff] }
 0x209   :  { %6533 = vmatprep.subr.bf16.mxu1 %v10782_v60  ;;  %v182_v60 = vld [vmem:[#allocation3 + $0x270] sm:$0xff]  ;;  %v10830_v0 = vcombine.high %v881_v56, %v885_v57 }
 0x20a   :  { %6639 = vmatpush1.bf16.msra.mxu0 %v10071_v18  ;;  %v178_v18 = vld [vmem:[#allocation3 + $0x250] sm:$0xff] }
 0x20b   :  { %6640 = vmatprep.subr.bf16.mxu0 %v10080_v61  ;;  %v10821_v61 = vcombine.low %v873_v45, %v877_v47  ;;  %v10128_v1 = vcombine.high %v178_v18, %v182_v60  ;;  %v10127_v11 = vcombine.low %v178_v18, %v182_v60  ;;  %v929_v60 = vld [vmem:[#allocation3 + $0x19c8] sm:$0xff] }
 0x20c   :  { %6534 = vmatpush1.bf16.msra.mxu1 %v10781_v3  ;;  %v893_v3 = vld [vmem:[#allocation3 + $0x18a8] sm:$0xff] }
 0x20d   :  { %6535 = vmatprep.subr.bf16.mxu1 %v10790_v6  ;;  %v190_v6 = vld [vmem:[#allocation3 + $0x2b0] sm:$0xff]  ;;  %v10838_v12 = vcombine.high %v889_v2, %v893_v3 }
 0x20e   :  { %6641 = vmatpush1.bf16.msra.mxu0 %v10079_v4  ;;  %v186_v4 = vld [vmem:[#allocation3 + $0x290] sm:$0xff] }
 0x20f   :  { %6642 = vmatprep.subr.bf16.mxu0 %v10088_v7  ;;  %v10829_v7 = vcombine.low %v881_v56, %v885_v57  ;;  %v10136_v14 = vcombine.high %v186_v4, %v190_v6  ;;  %v10135_v22 = vcombine.low %v186_v4, %v190_v6  ;;  %v937_v6 = vld [vmem:[#allocation3 + $0x1a08] sm:$0xff] }
 0x210   :  { %6536 = vmatpush1.bf16.msra.mxu1 %v10789_v16  ;;  %v901_v16 = vld [vmem:[#allocation3 + $0x18e8] sm:$0xff] }
 0x211   :  { %6537 = vmatprep.subr.bf16.mxu1 %v10798_v19  ;;  %v198_v19 = vld [vmem:[#allocation3 + $0x2f0] sm:$0xff]  ;;  %v10846_v53 = vcombine.high %v897_v15, %v901_v16 }
 0x212   :  { %6643 = vmatpush1.bf16.msra.mxu0 %v10087_v17  ;;  %v194_v17 = vld [vmem:[#allocation3 + $0x2d0] sm:$0xff] }
 0x213   :  { %6644 = vmatprep.subr.bf16.mxu0 %v10096_v21  ;;  %v10837_v21 = vcombine.low %v889_v2, %v893_v3  ;;  %v10144_v5 = vcombine.high %v194_v17, %v198_v19  ;;  %v10143_v32 = vcombine.low %v194_v17, %v198_v19  ;;  %v945_v19 = vld [vmem:[#allocation3 + $0x1a48] sm:$0xff] }
 0x214   :  { %6538 = vmatpush1.bf16.msra.mxu1 %v10797_v25  ;;  %v909_v25 = vld [vmem:[#allocation3 + $0x1928] sm:$0xff] }
 0x215   :  { %6539 = vmatprep.subr.bf16.mxu1 %v10806_v28  ;;  %v206_v28 = vld [vmem:[#allocation3 + $0x330] sm:$0xff]  ;;  %v10854_v35 = vcombine.high %v905_v24, %v909_v25 }
 0x216   :  { %6645 = vmatpush1.bf16.msra.mxu0 %v10095_v27  ;;  %v202_v27 = vld [vmem:[#allocation3 + $0x310] sm:$0xff] }
 0x217   :  { %6646 = vmatprep.subr.bf16.mxu0 %v10104_v63  ;;  %v10845_v63 = vcombine.low %v897_v15, %v901_v16  ;;  %v10152_v36 = vcombine.high %v202_v27, %v206_v28  ;;  %v10151_v45 = vcombine.low %v202_v27, %v206_v28  ;;  %v953_v28 = vld [vmem:[#allocation3 + $0x1a88] sm:$0xff] }
 0x218   :  { %6540 = vmatpush1.bf16.msra.mxu1 %v10805_v40  ;;  %v917_v40 = vld [vmem:[#allocation3 + $0x1968] sm:$0xff] }
 0x219   :  { %6541 = vmatprep.subr.bf16.mxu1 %v10814_v42  ;;  %v214_v42 = vld [vmem:[#allocation3 + $0x370] sm:$0xff]  ;;  %v10862_v47 = vcombine.high %v913_v37, %v917_v40 }
 0x21a   :  { %6647 = vmatpush1.bf16.msra.mxu0 %v10103_v41  ;;  %v210_v41 = vld [vmem:[#allocation3 + $0x350] sm:$0xff] }
 0x21b   :  { %6648 = vmatprep.subr.bf16.mxu0 %v10112_v43  ;;  %v10853_v43 = vcombine.low %v905_v24, %v909_v25  ;;  %v10160_v48 = vcombine.high %v210_v41, %v214_v42  ;;  %v10159_v56 = vcombine.low %v210_v41, %v214_v42  ;;  %v961_v42 = vld [vmem:[#allocation3 + $0x1ac8] sm:$0xff] }
 0x21c   :  { %6542 = vmatpush1.bf16.msra.mxu1 %v10813_v50  ;;  %v925_v50 = vld [vmem:[#allocation3 + $0x19a8] sm:$0xff] }
 0x21d   :  { %6552 = vmatprep.subr.bf16.mxu1 %v10822_v54  ;;  %v222_v54 = vld [vmem:[#allocation3 + $0x3b0] sm:$0xff]  ;;  %v10870_v57 = vcombine.high %v921_v51, %v925_v50 }
 0x21e   :  { %6649 = vmatpush1.bf16.msra.mxu0 %v10111_v52  ;;  %v218_v52 = vld [vmem:[#allocation3 + $0x390] sm:$0xff] }
 0x21f   :  { %6650 = vmatprep.subr.bf16.mxu0 %v10120_v55  ;;  %6544 = vmatmul.mubr.bf16.vlgmr.msra.gmra.mrb[4].mxu1 %v12394_v23  ;;  %v10861_v55 = vcombine.low %v913_v37, %v917_v40  ;;  %v10168_v18 = vcombine.high %v218_v52, %v222_v54  ;;  %v10167_v2 = vcombine.low %v218_v52, %v222_v54  ;;  %v969_v54 = vld [vmem:[#allocation3 + $0x1b08] sm:$0xff] }
 0x220   :  { %6553 = vmatpush1.bf16.msra.mxu1 %v10821_v61  ;;  %6584 = vmatprep.mubr.bf16.mxu1 %v12397_v30  ;;  %v933_v61 = vld [vmem:[#allocation3 + $0x19e8] sm:$0xff] }
 0x221   :  { %6554 = vmatprep.subr.bf16.mxu1 %v10830_v0  ;;  %v230_v0 = vld [vmem:[#allocation3 + $0x3f0] sm:$0xff]  ;;  %v10878_v3 = vcombine.high %v929_v60, %v933_v61 }
 0x222   :  { %6651 = vmatpush1.bf16.msra.mxu0 %v10119_v62  ;;  %v226_v62 = vld [vmem:[#allocation3 + $0x3d0] sm:$0xff] }
 0x223   :  { %6652 = vmatprep.subr.bf16.mxu0 %v10128_v1  ;;  %v10869_v1 = vcombine.low %v921_v51, %v925_v50  ;;  %v10176_v4 = vcombine.high %v226_v62, %v230_v0  ;;  %v10175_v15 = vcombine.low %v226_v62, %v230_v0  ;;  %v977_v0 = vld [vmem:[#allocation3 + $0x1b48] sm:$0xff] }
 0x224   :  { %6555 = vmatpush1.bf16.msra.mxu1 %v10829_v7  ;;  %v941_v7 = vld [vmem:[#allocation3 + $0x1a28] sm:$0xff] }
 0x225   :  { %6556 = vmatprep.subr.bf16.mxu1 %v10838_v12  ;;  %v238_v12 = vld [vmem:[#allocation3 + $0x430] sm:$0xff]  ;;  %v10886_v16 = vcombine.high %v937_v6, %v941_v7 }
 0x226   :  { %6653 = vmatpush1.bf16.msra.mxu0 %v10127_v11  ;;  %v234_v11 = vld [vmem:[#allocation3 + $0x410] sm:$0xff] }
 0x227   :  { %6654 = vmatprep.subr.bf16.mxu0 %v10136_v14  ;;  %v10877_v14 = vcombine.low %v929_v60, %v933_v61  ;;  %v10184_v17 = vcombine.high %v234_v11, %v238_v12  ;;  %v10183_v24 = vcombine.low %v234_v11, %v238_v12  ;;  %v985_v12 = vld [vmem:[#allocation3 + $0x1b88] sm:$0xff] }
 0x228   :  { %6557 = vmatpush1.bf16.msra.mxu1 %v10837_v21  ;;  %v949_v21 = vld [vmem:[#allocation3 + $0x1a68] sm:$0xff] }
 0x229   :  { %6558 = vmatprep.subr.bf16.mxu1 %v10846_v53  ;;  %v246_v53 = vld [vmem:[#allocation3 + $0x470] sm:$0xff]  ;;  %v10894_v25 = vcombine.high %v945_v19, %v949_v21 }
 0x22a   :  { %6655 = vmatpush1.bf16.msra.mxu0 %v10135_v22  ;;  %v242_v22 = vld [vmem:[#allocation3 + $0x450] sm:$0xff] }
 0x22b   :  { %6656 = vmatprep.subr.bf16.mxu0 %v10144_v5  ;;  %v10885_v5 = vcombine.low %v937_v6, %v941_v7  ;;  %v10192_v27 = vcombine.high %v242_v22, %v246_v53  ;;  %v10191_v37 = vcombine.low %v242_v22, %v246_v53  ;;  %v993_v53 = vld [vmem:[#allocation3 + $0x1bc8] sm:$0xff] }
 0x22c   :  { %6559 = vmatpush1.bf16.msra.mxu1 %v10845_v63  ;;  %v957_v63 = vld [vmem:[#allocation3 + $0x1aa8] sm:$0xff] }
 0x22d   :  { %6560 = vmatprep.subr.bf16.mxu1 %v10854_v35  ;;  %v254_v35 = vld [vmem:[#allocation3 + $0x4b0] sm:$0xff]  ;;  %v10902_v40 = vcombine.high %v953_v28, %v957_v63 }
 0x22e   :  { %6657 = vmatpush1.bf16.msra.mxu0 %v10143_v32  ;;  %v250_v32 = vld [vmem:[#allocation3 + $0x490] sm:$0xff] }
 0x22f   :  { %6658 = vmatprep.subr.bf16.mxu0 %v10152_v36  ;;  %v10893_v36 = vcombine.low %v945_v19, %v949_v21  ;;  %v10200_v41 = vcombine.high %v250_v32, %v254_v35  ;;  %v10199_v51 = vcombine.low %v250_v32, %v254_v35  ;;  %v1001_v35 = vld [vmem:[#allocation3 + $0x1c08] sm:$0xff] }
 0x230   :  { %6561 = vmatpush1.bf16.msra.mxu1 %v10853_v43  ;;  %v965_v43 = vld [vmem:[#allocation3 + $0x1ae8] sm:$0xff] }
 0x231   :  { %6562 = vmatprep.subr.bf16.mxu1 %v10862_v47  ;;  %v262_v47 = vld [vmem:[#allocation3 + $0x4f0] sm:$0xff]  ;;  %v10910_v50 = vcombine.high %v961_v42, %v965_v43 }
 0x232   :  { %6659 = vmatpush1.bf16.msra.mxu0 %v10151_v45  ;;  %v258_v45 = vld [vmem:[#allocation3 + $0x4d0] sm:$0xff] }
 0x233   :  { %6660 = vmatprep.subr.bf16.mxu0 %v10160_v48  ;;  %v10901_v48 = vcombine.low %v953_v28, %v957_v63  ;;  %v10208_v52 = vcombine.high %v258_v45, %v262_v47  ;;  %v10207_v60 = vcombine.low %v258_v45, %v262_v47  ;;  %v1009_v47 = vld [vmem:[#allocation3 + $0x1c48] sm:$0xff] }
 0x234   :  { %6563 = vmatpush1.bf16.msra.mxu1 %v10861_v55  ;;  %v973_v55 = vld [vmem:[#allocation3 + $0x1b28] sm:$0xff] }
 0x235   :  { %6564 = vmatprep.subr.bf16.mxu1 %v10870_v57  ;;  %v270_v57 = vld [vmem:[#allocation3 + $0x530] sm:$0xff]  ;;  %v10918_v61 = vcombine.high %v969_v54, %v973_v55 }
 0x236   :  { %6661 = vmatpush1.bf16.msra.mxu0 %v10159_v56  ;;  %v266_v56 = vld [vmem:[#allocation3 + $0x510] sm:$0xff] }
 0x237   :  { %6662 = vmatprep.subr.bf16.mxu0 %v10168_v18  ;;  %v10909_v18 = vcombine.low %v961_v42, %v965_v43  ;;  %v10216_v62 = vcombine.high %v266_v56, %v270_v57  ;;  %v10215_v6 = vcombine.low %v266_v56, %v270_v57  ;;  %v1017_v57 = vld [vmem:[#allocation3 + $0x1c88] sm:$0xff] }
 0x238   :  { %6565 = vmatpush1.bf16.msra.mxu1 %v10869_v1  ;;  %v981_v1 = vld [vmem:[#allocation3 + $0x1b68] sm:$0xff] }
 0x239   :  { %6566 = vmatprep.subr.bf16.mxu1 %v10878_v3  ;;  %v278_v3 = vld [vmem:[#allocation3 + $0x570] sm:$0xff]  ;;  %v10926_v7 = vcombine.high %v977_v0, %v981_v1 }
 0x23a   :  { %6663 = vmatpush1.bf16.msra.mxu0 %v10167_v2  ;;  %v274_v2 = vld [vmem:[#allocation3 + $0x550] sm:$0xff] }
 0x23b   :  { %6664 = vmatprep.subr.bf16.mxu0 %v10176_v4  ;;  %v10917_v4 = vcombine.low %v969_v54, %v973_v55  ;;  %v10224_v11 = vcombine.high %v274_v2, %v278_v3  ;;  %v10223_v19 = vcombine.low %v274_v2, %v278_v3  ;;  %v1025_v3 = vld [vmem:[#allocation3 + $0x1cc8] sm:$0xff] }
 0x23c   :  { %6567 = vmatpush1.bf16.msra.mxu1 %v10877_v14  ;;  %v989_v14 = vld [vmem:[#allocation3 + $0x1ba8] sm:$0xff] }
 0x23d   :  { %6568 = vmatprep.subr.bf16.mxu1 %v10886_v16  ;;  %v286_v16 = vld [vmem:[#allocation3 + $0x5b0] sm:$0xff]  ;;  %v10934_v21 = vcombine.high %v985_v12, %v989_v14 }
 0x23e   :  { %6665 = vmatpush1.bf16.msra.mxu0 %v10175_v15  ;;  %v282_v15 = vld [vmem:[#allocation3 + $0x590] sm:$0xff] }
 0x23f   :  { %6675 = vmatprep.subr.bf16.mxu0 %v10184_v17  ;;  %v10925_v17 = vcombine.low %v977_v0, %v981_v1  ;;  %v10232_v22 = vcombine.high %v282_v15, %v286_v16  ;;  %v10231_v28 = vcombine.low %v282_v15, %v286_v16  ;;  %v1033_v16 = vld [vmem:[#allocation3 + $0x1d08] sm:$0xff] }
 0x240   :  { %6569 = vmatpush1.bf16.msra.mxu1 %v10885_v5  ;;  %v997_v5 = vld [vmem:[#allocation3 + $0x1be8] sm:$0xff] }
 0x241   :  { %6667 = vmatmul.mubr.bf16.vlgmr.msra.gmra.mrb[4].mxu0 %v12323_v59  ;;  %6570 = vmatprep.subr.bf16.mxu1 %v10894_v25  ;;  %v294_v25 = vld [vmem:[#allocation3 + $0x5f0] sm:$0xff]  ;;  %v10942_v63 = vcombine.high %v993_v53, %v997_v5 }
 0x242   :  { %6676 = vmatpush1.bf16.msra.mxu0 %v10183_v24  ;;  %6707 = vmatprep.mubr.bf16.mxu0 %v12313_v13  ;;  %v290_v24 = vld [vmem:[#allocation3 + $0x5d0] sm:$0xff] }
 0x243   :  { %6677 = vmatprep.subr.bf16.mxu0 %v10192_v27  ;;  %v10933_v27 = vcombine.low %v985_v12, %v989_v14  ;;  %v10240_v32 = vcombine.high %v290_v24, %v294_v25  ;;  %v10239_v42 = vcombine.low %v290_v24, %v294_v25  ;;  %v1041_v25 = vld [vmem:[#allocation3 + $0x1d48] sm:$0xff] }
 0x244   :  { %6571 = vmatpush1.bf16.msra.mxu1 %v10893_v36  ;;  %v1005_v36 = vld [vmem:[#allocation3 + $0x1c28] sm:$0xff] }
 0x245   :  { %6572 = vmatprep.subr.bf16.mxu1 %v10902_v40  ;;  %v302_v40 = vld [vmem:[#allocation3 + $0x630] sm:$0xff]  ;;  %v10950_v43 = vcombine.high %v1001_v35, %v1005_v36 }
 0x246   :  { %6678 = vmatpush1.bf16.msra.mxu0 %v10191_v37  ;;  %v298_v37 = vld [vmem:[#allocation3 + $0x610] sm:$0xff] }
 0x247   :  { %6679 = vmatprep.subr.bf16.mxu0 %v10200_v41  ;;  %v10941_v41 = vcombine.low %v993_v53, %v997_v5  ;;  %v10248_v45 = vcombine.high %v298_v37, %v302_v40  ;;  %v10247_v54 = vcombine.low %v298_v37, %v302_v40  ;;  %v1049_v40 = vld [vmem:[#allocation3 + $0x1d88] sm:$0xff] }
 0x248   :  { %6573 = vmatpush1.bf16.msra.mxu1 %v10901_v48  ;;  %v1013_v48 = vld [vmem:[#allocation3 + $0x1c68] sm:$0xff] }
 0x249   :  { %6574 = vmatprep.subr.bf16.mxu1 %v10910_v50  ;;  %v310_v50 = vld [vmem:[#allocation3 + $0x670] sm:$0xff]  ;;  %v10958_v55 = vcombine.high %v1009_v47, %v1013_v48 }
 0x24a   :  { %6680 = vmatpush1.bf16.msra.mxu0 %v10199_v51  ;;  %v306_v51 = vld [vmem:[#allocation3 + $0x650] sm:$0xff] }
 0x24b   :  { %6681 = vmatprep.subr.bf16.mxu0 %v10208_v52  ;;  %v10949_v52 = vcombine.low %v1001_v35, %v1005_v36  ;;  %v10256_v56 = vcombine.high %v306_v51, %v310_v50  ;;  %v10255_v0 = vcombine.low %v306_v51, %v310_v50  ;;  %v1057_v50 = vld [vmem:[#allocation3 + $0x1dc8] sm:$0xff] }
 0x24c   :  { %6575 = vmatpush1.bf16.msra.mxu1 %v10909_v18  ;;  %v1021_v18 = vld [vmem:[#allocation3 + $0x1ca8] sm:$0xff] }
 0x24d   :  { %6576 = vmatprep.subr.bf16.mxu1 %v10918_v61  ;;  %v318_v61 = vld [vmem:[#allocation3 + $0x6b0] sm:$0xff]  ;;  %v10966_v1 = vcombine.high %v1017_v57, %v1021_v18 }
 0x24e   :  { %6682 = vmatpush1.bf16.msra.mxu0 %v10207_v60  ;;  %v314_v60 = vld [vmem:[#allocation3 + $0x690] sm:$0xff] }
 0x24f   :  { %6683 = vmatprep.subr.bf16.mxu0 %v10216_v62  ;;  %v10957_v62 = vcombine.low %v1009_v47, %v1013_v48  ;;  %v10264_v2 = vcombine.high %v314_v60, %v318_v61  ;;  %v10263_v12 = vcombine.low %v314_v60, %v318_v61  ;;  %v107_v61 = vld [vmem:[#allocation3 + $0x18] sm:$0xff] }
 0x250   :  { %6577 = vmatpush1.bf16.msra.mxu1 %v10917_v4  ;;  %v1029_v4 = vld [vmem:[#allocation3 + $0x1ce8] sm:$0xff] }
 0x251   :  { %6578 = vmatprep.subr.bf16.mxu1 %v10926_v7  ;;  %v326_v7 = vld [vmem:[#allocation3 + $0x6f0] sm:$0xff]  ;;  %v10974_v14 = vcombine.high %v1025_v3, %v1029_v4 }
 0x252   :  { %6684 = vmatpush1.bf16.msra.mxu0 %v10215_v6  ;;  %v322_v6 = vld [vmem:[#allocation3 + $0x6d0] sm:$0xff] }
 0x253   :  { %6685 = vmatprep.subr.bf16.mxu0 %v10224_v11  ;;  %v10965_v11 = vcombine.low %v1017_v57, %v1021_v18  ;;  %v10272_v15 = vcombine.high %v322_v6, %v326_v7  ;;  %v10271_v53 = vcombine.low %v322_v6, %v326_v7  ;;  %v115_v7 = vld [vmem:[#allocation3 + $0x58] sm:$0xff] }
 0x254   :  { %6579 = vmatpush1.bf16.msra.mxu1 %v10925_v17  ;;  %v1037_v17 = vld [vmem:[#allocation3 + $0x1d28] sm:$0xff] }
 0x255   :  { %6580 = vmatprep.subr.bf16.mxu1 %v10934_v21  ;;  %v334_v21 = vld [vmem:[#allocation3 + $0x730] sm:$0xff]  ;;  %v10982_v5 = vcombine.high %v1033_v16, %v1037_v17 }
 0x256   :  { %6686 = vmatpush1.bf16.msra.mxu0 %v10223_v19  ;;  %v330_v19 = vld [vmem:[#allocation3 + $0x710] sm:$0xff] }
 0x257   :  { %6687 = vmatprep.subr.bf16.mxu0 %v10232_v22  ;;  %v10973_v22 = vcombine.low %v1025_v3, %v1029_v4  ;;  %v10280_v24 = vcombine.high %v330_v19, %v334_v21  ;;  %v10279_v35 = vcombine.low %v330_v19, %v334_v21  ;;  %v123_v21 = vld [vmem:[#allocation3 + $0x98] sm:$0xff] }
 0x258   :  { %6581 = vmatpush1.bf16.msra.mxu1 %v10933_v27  ;;  %v1045_v27 = vld [vmem:[#allocation3 + $0x1d68] sm:$0xff] }
 0x259   :  { %6582 = vmatprep.subr.bf16.mxu1 %v10942_v63  ;;  %v342_v63 = vld [vmem:[#allocation3 + $0x770] sm:$0xff]  ;;  %v10990_v36 = vcombine.high %v1041_v25, %v1045_v27 }
 0x25a   :  { %6688 = vmatpush1.bf16.msra.mxu0 %v10231_v28  ;;  %v338_v28 = vld [vmem:[#allocation3 + $0x750] sm:$0xff] }
 0x25b   :  { %6689 = vmatprep.subr.bf16.mxu0 %v10240_v32  ;;  %v10981_v32 = vcombine.low %v1033_v16, %v1037_v17  ;;  %v10288_v37 = vcombine.high %v338_v28, %v342_v63  ;;  %v10287_v47 = vcombine.low %v338_v28, %v342_v63  ;;  %v131_v63 = vld [vmem:[#allocation3 + $0xd8] sm:$0xff] }
 0x25c   :  { %6583 = vmatpush1.bf16.msra.mxu1 %v10941_v41  ;;  %v1053_v41 = vld [vmem:[#allocation3 + $0x1da8] sm:$0xff] }
 0x25d   :  { %6593 = vmatprep.subr.bf16.mxu1 %v10950_v43  ;;  %v350_v43 = vld [vmem:[#allocation3 + $0x7b0] sm:$0xff]  ;;  %v10998_v48 = vcombine.high %v1049_v40, %v1053_v41 }
 0x25e   :  { %6690 = vmatpush1.bf16.msra.mxu0 %v10239_v42  ;;  %v346_v42 = vld [vmem:[#allocation3 + $0x790] sm:$0xff] }
 0x25f   :  { %6691 = vmatprep.subr.bf16.mxu0 %v10248_v45  ;;  %6585 = vmatmul.mubr.bf16.vlgmr.msra.gmra.mrb[4].mxu1 %v12405_v8  ;;  %v10989_v45 = vcombine.low %v1041_v25, %v1045_v27  ;;  %v10296_v51 = vcombine.high %v346_v42, %v350_v43  ;;  %v10295_v57 = vcombine.low %v346_v42, %v350_v43  ;;  %v139_v43 = vld [vmem:[#allocation3 + $0x118] sm:$0xff] }
 0x260   :  { %6594 = vmatpush1.bf16.msra.mxu1 %v10949_v52  ;;  %6625 = vmatprep.mubr.bf16.mxu1 %v12178_v26  ;;  %v1061_v52 = vld [vmem:[#allocation3 + $0x1de8] sm:$0xff] }
 0x261   :  { %6595 = vmatprep.subr.bf16.mxu1 %v10958_v55  ;;  %v358_v55 = vld [vmem:[#allocation3 + $0x7f0] sm:$0xff]  ;;  %v11006_v18 = vcombine.high %v1057_v50, %v1061_v52 }
 0x262   :  { %6692 = vmatpush1.bf16.msra.mxu0 %v10247_v54  ;;  %v354_v54 = vld [vmem:[#allocation3 + $0x7d0] sm:$0xff] }
 0x263   :  { %6693 = vmatprep.subr.bf16.mxu0 %v10256_v56  ;;  %v10997_v56 = vcombine.low %v1049_v40, %v1053_v41  ;;  %v10304_v60 = vcombine.high %v354_v54, %v358_v55  ;;  %v10303_v3 = vcombine.low %v354_v54, %v358_v55  ;;  %v147_v54 = vld [vmem:[#allocation3 + $0x158] sm:$0xff] }
 0x264   :  { %6596 = vmatpush1.bf16.msra.mxu1 %v10957_v62  ;;  %v111_v62 = vld [vmem:[#allocation3 + $0x38] sm:$0xff] }
 0x265   :  { %6597 = vmatprep.subr.bf16.mxu1 %v10966_v1  ;;  %v366_v1 = vld [vmem:[#allocation3 + $0x830] sm:$0xff]  ;;  %v10058_v4 = vcombine.high %v107_v61, %v111_v62  ;;  %v151_v55 = vld [vmem:[#allocation3 + $0x178] sm:$0xff] }
 0x266   :  { %6694 = vmatpush1.bf16.msra.mxu0 %v10255_v0  ;;  %v362_v0 = vld [vmem:[#allocation3 + $0x810] sm:$0xff] }
 0x267   :  { %6695 = vmatprep.subr.bf16.mxu0 %v10264_v2  ;;  %v11005_v2 = vcombine.low %v1057_v50, %v1061_v52  ;;  %v10312_v6 = vcombine.high %v362_v0, %v366_v1  ;;  %v10311_v16 = vcombine.low %v362_v0, %v366_v1  ;;  %v155_v0 = vld [vmem:[#allocation3 + $0x198] sm:$0xff] }
 0x268   :  { %6598 = vmatpush1.bf16.msra.mxu1 %v10965_v11  ;;  %v119_v11 = vld [vmem:[#allocation3 + $0x78] sm:$0xff] }
 0x269   :  { %6599 = vmatprep.subr.bf16.mxu1 %v10974_v14  ;;  %v374_v14 = vld [vmem:[#allocation3 + $0x870] sm:$0xff]  ;;  %v10066_v17 = vcombine.high %v115_v7, %v119_v11  ;;  %v159_v1 = vld [vmem:[#allocation3 + $0x1b8] sm:$0xff] }
 0x26a   :  { %6696 = vmatpush1.bf16.msra.mxu0 %v10263_v12  ;;  %v370_v12 = vld [vmem:[#allocation3 + $0x850] sm:$0xff] }
 0x26b   :  { %6697 = vmatprep.subr.bf16.mxu0 %v10272_v15  ;;  %v10057_v15 = vcombine.low %v107_v61, %v111_v62  ;;  %v10320_v19 = vcombine.high %v370_v12, %v374_v14  ;;  %v10319_v25 = vcombine.low %v370_v12, %v374_v14  ;;  %v10098_v61 = vcombine.high %v147_v54, %v151_v55  ;;  %v163_v12 = vld [vmem:[#allocation3 + $0x1d8] sm:$0xff] }
 0x26c   :  { %6600 = vmatpush1.bf16.msra.mxu1 %v10973_v22  ;;  %v127_v22 = vld [vmem:[#allocation3 + $0xb8] sm:$0xff] }
 0x26d   :  { %6601 = vmatprep.subr.bf16.mxu1 %v10982_v5  ;;  %v382_v5 = vld [vmem:[#allocation3 + $0x8b0] sm:$0xff]  ;;  %v10074_v27 = vcombine.high %v123_v21, %v127_v22  ;;  %v167_v14 = vld [vmem:[#allocation3 + $0x1f8] sm:$0xff] }
 0x26e   :  { %6698 = vmatpush1.bf16.msra.mxu0 %v10271_v53  ;;  %v378_v53 = vld [vmem:[#allocation3 + $0x890] sm:$0xff] }
 0x26f   :  { %6699 = vmatprep.subr.bf16.mxu0 %v10280_v24  ;;  %v10065_v24 = vcombine.low %v115_v7, %v119_v11  ;;  %v10328_v28 = vcombine.high %v378_v53, %v382_v5  ;;  %v10327_v40 = vcombine.low %v378_v53, %v382_v5  ;;  %v10106_v7 = vcombine.high %v155_v0, %v159_v1  ;;  %v171_v53 = vld [vmem:[#allocation3 + $0x218] sm:$0xff] }
 0x270   :  { %6602 = vmatpush1.bf16.msra.mxu1 %v10981_v32  ;;  %v135_v32 = vld [vmem:[#allocation3 + $0xf8] sm:$0xff] }
 0x271   :  { %6603 = vmatprep.subr.bf16.mxu1 %v10990_v36  ;;  %v390_v36 = vld [vmem:[#allocation3 + $0x8f0] sm:$0xff]  ;;  %v10082_v41 = vcombine.high %v131_v63, %v135_v32  ;;  %v175_v5 = vld [vmem:[#allocation3 + $0x238] sm:$0xff] }
 0x272   :  { %6700 = vmatpush1.bf16.msra.mxu0 %v10279_v35  ;;  %v386_v35 = vld [vmem:[#allocation3 + $0x8d0] sm:$0xff] }
 0x273   :  { %6701 = vmatprep.subr.bf16.mxu0 %v10288_v37  ;;  %v10073_v37 = vcombine.low %v123_v21, %v127_v22  ;;  %v10336_v42 = vcombine.high %v386_v35, %v390_v36  ;;  %v10335_v50 = vcombine.low %v386_v35, %v390_v36  ;;  %v10114_v21 = vcombine.high %v163_v12, %v167_v14  ;;  %v179_v35 = vld [vmem:[#allocation3 + $0x258] sm:$0xff] }
 0x274   :  { %6604 = vmatpush1.bf16.msra.mxu1 %v10989_v45  ;;  %v143_v45 = vld [vmem:[#allocation3 + $0x138] sm:$0xff] }
 0x275   :  { %6605 = vmatprep.subr.bf16.mxu1 %v10998_v48  ;;  %v398_v48 = vld [vmem:[#allocation3 + $0x930] sm:$0xff]  ;;  %v10090_v52 = vcombine.high %v139_v43, %v143_v45  ;;  %v183_v36 = vld [vmem:[#allocation3 + $0x278] sm:$0xff] }
 0x276   :  { %6702 = vmatpush1.bf16.msra.mxu0 %v10287_v47  ;;  %v394_v47 = vld [vmem:[#allocation3 + $0x910] sm:$0xff] }
 0x277   :  { %6703 = vmatprep.subr.bf16.mxu0 %v10296_v51  ;;  %v10081_v51 = vcombine.low %v131_v63, %v135_v32  ;;  %v10122_v63 = vcombine.high %v171_v53, %v175_v5 }
 0x278   :  { %6606 = vmatpush1.bf16.msra.mxu1 %v10997_v56  ;;  %v402_v56 = vld [vmem:[#allocation3 + $0x950] sm:$0xff] }
 0x279   :  { %6607 = vmatprep.subr.bf16.mxu1 %v11006_v18  ;;  %v10089_v18 = vcombine.low %v139_v43, %v143_v45  ;;  %v10130_v43 = vcombine.high %v179_v35, %v183_v36 }
 0x27a   :  { %6704 = vmatpush1.bf16.msra.mxu0 %v10295_v57  ;;  %v406_v57 = vld [vmem:[#allocation3 + $0x970] sm:$0xff] }
 0x27b   :  { %6705 = vmatprep.subr.bf16.mxu0 %v10304_v60  ;;  %v10343_v60 = vcombine.low %v394_v47, %v398_v48  ;;  %v10352_v62 = vcombine.high %v402_v56, %v406_v57 }
 0x27c   :  { %6608 = vmatpush1.bf16.msra.mxu1 %v11005_v2  ;;  %v410_v2 = vld [vmem:[#allocation3 + $0x990] sm:$0xff] }
 0x27d   :  { %6962 = vmatprep.subr.bf16.mxu1 %v10058_v4  ;;  %v10097_v4 = vcombine.low %v147_v54, %v151_v55 }
 0x27e   :  { %6706 = vmatpush1.bf16.msra.mxu0 %v10303_v3  ;;  %v414_v3 = vld [vmem:[#allocation3 + $0x9b0] sm:$0xff] }
 0x27f   :  { %6716 = vmatprep.subr.bf16.mxu0 %v10312_v6  ;;  %6626 = vmatmul.mubr.bf16.vlgmr.msra.gmra.mrb[4].mxu1 %v12413_v34  ;;  %v10351_v6 = vcombine.low %v402_v56, %v406_v57  ;;  %v10360_v11 = vcombine.high %v410_v2, %v414_v3  ;;  %v195_v56 = vld [vmem:[#allocation3 + $0x2d8] sm:$0xff] }
 0x280   :  { %6963 = vmatpush1.bf16.msra.mxu1 %v10057_v15  ;;  %6994 = vmatprep.mubr.bf16.mxu1 %v12308_v9  ;;  %v10344_v9 = vcombine.high %v394_v47, %v398_v48  ;;  %v418_v15 = vld [vmem:[#allocation3 + $0x9d0] sm:$0xff]  ;;  %v187_v47 = vld [vmem:[#allocation3 + $0x298] sm:$0xff] }
 0x281   :  { %6708 = vmatmul.mubr.bf16.vlgmr.msra.gmra.mrb[4].mxu0 %v12329_v31  ;;  %6964 = vmatprep.subr.bf16.mxu1 %v10066_v17  ;;  %v10105_v17 = vcombine.low %v155_v0, %v159_v1  ;;  %v191_v48 = vld [vmem:[#allocation3 + $0x2b8] sm:$0xff] }
 0x282   :  { %6717 = vmatpush1.bf16.msra.mxu0 %v10311_v16  ;;  %6748 = vmatprep.mubr.bf16.mxu0 %v12332_v38  ;;  %v422_v16 = vld [vmem:[#allocation3 + $0x9f0] sm:$0xff]  ;;  %v10138_v54 = vcombine.high %v187_v47, %v191_v48  ;;  %v199_v57 = vld [vmem:[#allocation3 + $0x2f8] sm:$0xff] }
 0x283   :  { %6718 = vmatprep.subr.bf16.mxu0 %v10320_v19  ;;  %v10359_v19 = vcombine.low %v410_v2, %v414_v3  ;;  %v10368_v22 = vcombine.high %v418_v15, %v422_v16  ;;  %v10146_v0 = vcombine.high %v195_v56, %v199_v57  ;;  %v203_v2 = vld [vmem:[#allocation3 + $0x318] sm:$0xff] }
 0x284   :  { %6965 = vmatpush1.bf16.msra.mxu1 %v10065_v24  ;;  %v426_v24 = vld [vmem:[#allocation3 + $0xa10] sm:$0xff]  ;;  %v207_v3 = vld [vmem:[#allocation3 + $0x338] sm:$0xff] }
 0x285   :  { %6966 = vmatprep.subr.bf16.mxu1 %v10074_v27  ;;  %v10113_v27 = vcombine.low %v163_v12, %v167_v14  ;;  %v10154_v12 = vcombine.high %v203_v2, %v207_v3 }
 0x286   :  { %6719 = vmatpush1.bf16.msra.mxu0 %v10319_v25  ;;  %v430_v25 = vld [vmem:[#allocation3 + $0xa30] sm:$0xff] }
 0x287   :  { %6720 = vmatprep.subr.bf16.mxu0 %v10328_v28  ;;  %v10367_v28 = vcombine.low %v418_v15, %v422_v16  ;;  %v10376_v32 = vcombine.high %v426_v24, %v430_v25  ;;  %v211_v15 = vld [vmem:[#allocation3 + $0x358] sm:$0xff] }
 0x288   :  { %6967 = vmatpush1.bf16.msra.mxu1 %v10073_v37  ;;  %v434_v37 = vld [vmem:[#allocation3 + $0xa50] sm:$0xff]  ;;  %v215_v16 = vld [vmem:[#allocation3 + $0x378] sm:$0xff] }
 0x289   :  { %6968 = vmatprep.subr.bf16.mxu1 %v10082_v41  ;;  %v10121_v41 = vcombine.low %v171_v53, %v175_v5  ;;  %v10162_v53 = vcombine.high %v211_v15, %v215_v16 }
 0x28a   :  { %6721 = vmatpush1.bf16.msra.mxu0 %v10327_v40  ;;  %v438_v40 = vld [vmem:[#allocation3 + $0xa70] sm:$0xff] }
 0x28b   :  { %6722 = vmatprep.subr.bf16.mxu0 %v10336_v42  ;;  %v10375_v42 = vcombine.low %v426_v24, %v430_v25  ;;  %v10384_v45 = vcombine.high %v434_v37, %v438_v40  ;;  %v219_v24 = vld [vmem:[#allocation3 + $0x398] sm:$0xff] }
 0x28c   :  { %6969 = vmatpush1.bf16.msra.mxu1 %v10081_v51  ;;  %v442_v51 = vld [vmem:[#allocation3 + $0xa90] sm:$0xff]  ;;  %v223_v25 = vld [vmem:[#allocation3 + $0x3b8] sm:$0xff] }
 0x28d   :  { %6970 = vmatprep.subr.bf16.mxu1 %v10090_v52  ;;  %v10129_v52 = vcombine.low %v179_v35, %v183_v36  ;;  %v10170_v35 = vcombine.high %v219_v24, %v223_v25 }
 0x28e   :  { %6723 = vmatpush1.bf16.msra.mxu0 %v10335_v50  ;;  %v446_v50 = vld [vmem:[#allocation3 + $0xab0] sm:$0xff] }
 0x28f   :  { %6724 = vmatprep.subr.bf16.mxu0 %v10344_v9  ;;  %v10383_v9 = vcombine.low %v434_v37, %v438_v40  ;;  %v10392_v55 = vcombine.high %v442_v51, %v446_v50  ;;  %v227_v37 = vld [vmem:[#allocation3 + $0x3d8] sm:$0xff] }
 0x290   :  { %6971 = vmatpush1.bf16.msra.mxu1 %v10089_v18  ;;  %v450_v18 = vld [vmem:[#allocation3 + $0xad0] sm:$0xff]  ;;  %v231_v40 = vld [vmem:[#allocation3 + $0x3f8] sm:$0xff] }
 0x291   :  { %6972 = vmatprep.subr.bf16.mxu1 %v10098_v61  ;;  %v10137_v61 = vcombine.low %v187_v47, %v191_v48  ;;  %v10178_v47 = vcombine.high %v227_v37, %v231_v40 }
 0x292   :  { %6725 = vmatpush1.bf16.msra.mxu0 %v10343_v60  ;;  %v454_v60 = vld [vmem:[#allocation3 + $0xaf0] sm:$0xff] }
 0x293   :  { %6726 = vmatprep.subr.bf16.mxu0 %v10352_v62  ;;  %v10391_v62 = vcombine.low %v442_v51, %v446_v50  ;;  %v10400_v1 = vcombine.high %v450_v18, %v454_v60  ;;  %v235_v51 = vld [vmem:[#allocation3 + $0x418] sm:$0xff] }
 0x294   :  { %6973 = vmatpush1.bf16.msra.mxu1 %v10097_v4  ;;  %v458_v4 = vld [vmem:[#allocation3 + $0xb10] sm:$0xff]  ;;  %v239_v50 = vld [vmem:[#allocation3 + $0x438] sm:$0xff] }
 0x295   :  { %6974 = vmatprep.subr.bf16.mxu1 %v10106_v7  ;;  %v10145_v7 = vcombine.low %v195_v56, %v199_v57  ;;  %v10186_v56 = vcombine.high %v235_v51, %v239_v50 }
 0x296   :  { %6727 = vmatpush1.bf16.msra.mxu0 %v10351_v6  ;;  %v462_v6 = vld [vmem:[#allocation3 + $0xb30] sm:$0xff] }
 0x297   :  { %6728 = vmatprep.subr.bf16.mxu0 %v10360_v11  ;;  %v10399_v11 = vcombine.low %v450_v18, %v454_v60  ;;  %v10408_v14 = vcombine.high %v458_v4, %v462_v6  ;;  %v243_v18 = vld [vmem:[#allocation3 + $0x458] sm:$0xff] }
 0x298   :  { %6975 = vmatpush1.bf16.msra.mxu1 %v10105_v17  ;;  %v466_v17 = vld [vmem:[#allocation3 + $0xb50] sm:$0xff]  ;;  %v247_v60 = vld [vmem:[#allocation3 + $0x478] sm:$0xff] }
 0x299   :  { %6976 = vmatprep.subr.bf16.mxu1 %v10114_v21  ;;  %v10153_v21 = vcombine.low %v203_v2, %v207_v3  ;;  %v10194_v2 = vcombine.high %v243_v18, %v247_v60 }
 0x29a   :  { %6729 = vmatpush1.bf16.msra.mxu0 %v10359_v19  ;;  %v470_v19 = vld [vmem:[#allocation3 + $0xb70] sm:$0xff] }
 0x29b   :  { %6730 = vmatprep.subr.bf16.mxu0 %v10368_v22  ;;  %v10407_v22 = vcombine.low %v458_v4, %v462_v6  ;;  %v10416_v5 = vcombine.high %v466_v17, %v470_v19  ;;  %v251_v4 = vld [vmem:[#allocation3 + $0x498] sm:$0xff] }
 0x29c   :  { %6977 = vmatpush1.bf16.msra.mxu1 %v10113_v27  ;;  %v474_v27 = vld [vmem:[#allocation3 + $0xb90] sm:$0xff]  ;;  %v255_v6 = vld [vmem:[#allocation3 + $0x4b8] sm:$0xff] }
 0x29d   :  { %6978 = vmatprep.subr.bf16.mxu1 %v10122_v63  ;;  %v10161_v63 = vcombine.low %v211_v15, %v215_v16  ;;  %v10202_v15 = vcombine.high %v251_v4, %v255_v6 }
 0x29e   :  { %6731 = vmatpush1.bf16.msra.mxu0 %v10367_v28  ;;  %v478_v28 = vld [vmem:[#allocation3 + $0xbb0] sm:$0xff] }
 0x29f   :  { %6732 = vmatprep.subr.bf16.mxu0 %v10376_v32  ;;  %v10415_v32 = vcombine.low %v466_v17, %v470_v19  ;;  %v10424_v36 = vcombine.high %v474_v27, %v478_v28  ;;  %v259_v17 = vld [vmem:[#allocation3 + $0x4d8] sm:$0xff] }
 0x2a0   :  { %6979 = vmatpush1.bf16.msra.mxu1 %v10121_v41  ;;  %v482_v41 = vld [vmem:[#allocation3 + $0xbd0] sm:$0xff]  ;;  %v263_v19 = vld [vmem:[#allocation3 + $0x4f8] sm:$0xff] }
 0x2a1   :  { %6980 = vmatprep.subr.bf16.mxu1 %v10130_v43  ;;  %v10169_v43 = vcombine.low %v219_v24, %v223_v25  ;;  %v267_v25 = vld [vmem:[#allocation3 + $0x518] sm:$0xff] }
 0x2a2   :  { %6733 = vmatpush1.bf16.msra.mxu0 %v10375_v42  ;;  %v486_v42 = vld [vmem:[#allocation3 + $0xbf0] sm:$0xff] }
 0x2a3   :  { %6734 = vmatprep.subr.bf16.mxu0 %v10384_v45  ;;  %v10423_v45 = vcombine.low %v474_v27, %v478_v28  ;;  %v10432_v48 = vcombine.high %v482_v41, %v486_v42  ;;  %v271_v27 = vld [vmem:[#allocation3 + $0x538] sm:$0xff]  ;;  %v522_v28 = vld [vmem:[#allocation3 + $0xd10] sm:$0xff] }
 0x2a4   :  { %6981 = vmatpush1.bf16.msra.mxu1 %v10129_v52  ;;  %v490_v52 = vld [vmem:[#allocation3 + $0xc10] sm:$0xff] }
 0x2a5   :  { %6982 = vmatprep.subr.bf16.mxu1 %v10138_v54  ;;  %v10177_v54 = vcombine.low %v227_v37, %v231_v40  ;;  %v275_v37 = vld [vmem:[#allocation3 + $0x558] sm:$0xff] }
 0x2a6   :  { %6735 = vmatpush1.bf16.msra.mxu0 %v10383_v9  ;;  %v494_v9 = vld [vmem:[#allocation3 + $0xc30] sm:$0xff]  ;;  %v279_v40 = vld [vmem:[#allocation3 + $0x578] sm:$0xff] }
 0x2a7   :  { %6736 = vmatprep.subr.bf16.mxu0 %v10392_v55  ;;  %v10431_v55 = vcombine.low %v482_v41, %v486_v42  ;;  %v10440_v57 = vcombine.high %v490_v52, %v494_v9  ;;  %v530_v41 = vld [vmem:[#allocation3 + $0xd50] sm:$0xff] }
 0x2a8   :  { %6983 = vmatpush1.bf16.msra.mxu1 %v10137_v61  ;;  %v498_v61 = vld [vmem:[#allocation3 + $0xc50] sm:$0xff] }
 0x2a9   :  { %6984 = vmatprep.subr.bf16.mxu1 %v10146_v0  ;;  %v10185_v0 = vcombine.low %v235_v51, %v239_v50  ;;  %v534_v42 = vld [vmem:[#allocation3 + $0xd70] sm:$0xff]  ;;  %v283_v51 = vld [vmem:[#allocation3 + $0x598] sm:$0xff] }
 0x2aa   :  { %6737 = vmatpush1.bf16.msra.mxu0 %v10391_v62  ;;  %v502_v62 = vld [vmem:[#allocation3 + $0xc70] sm:$0xff]  ;;  %v287_v50 = vld [vmem:[#allocation3 + $0x5b8] sm:$0xff] }
 0x2ab   :  { %6738 = vmatprep.subr.bf16.mxu0 %v10400_v1  ;;  %v10439_v1 = vcombine.low %v490_v52, %v494_v9  ;;  %v10448_v3 = vcombine.high %v498_v61, %v502_v62  ;;  %v538_v52 = vld [vmem:[#allocation3 + $0xd90] sm:$0xff] }
 0x2ac   :  { %6985 = vmatpush1.bf16.msra.mxu1 %v10145_v7  ;;  %v506_v7 = vld [vmem:[#allocation3 + $0xc90] sm:$0xff] }
 0x2ad   :  { %6986 = vmatprep.subr.bf16.mxu1 %v10154_v12  ;;  %v10193_v12 = vcombine.low %v243_v18, %v247_v60  ;;  %v542_v9 = vld [vmem:[#allocation3 + $0xdb0] sm:$0xff]  ;;  %v291_v18 = vld [vmem:[#allocation3 + $0x5d8] sm:$0xff] }
 0x2ae   :  { %6739 = vmatpush1.bf16.msra.mxu0 %v10399_v11  ;;  %v510_v11 = vld [vmem:[#allocation3 + $0xcb0] sm:$0xff]  ;;  %v295_v60 = vld [vmem:[#allocation3 + $0x5f8] sm:$0xff] }
 0x2af   :  { %6740 = vmatprep.subr.bf16.mxu0 %v10408_v14  ;;  %v10447_v14 = vcombine.low %v498_v61, %v502_v62  ;;  %v10456_v16 = vcombine.high %v506_v7, %v510_v11  ;;  %v546_v62 = vld [vmem:[#allocation3 + $0xdd0] sm:$0xff] }
 0x2b0   :  { %6987 = vmatpush1.bf16.msra.mxu1 %v10153_v21  ;;  %v514_v21 = vld [vmem:[#allocation3 + $0xcd0] sm:$0xff] }
 0x2b1   :  { %6988 = vmatprep.subr.bf16.mxu1 %v10162_v53  ;;  %v10455_v53 = vcombine.low %v506_v7, %v510_v11  ;;  %v10487_v7 = vcombine.low %v538_v52, %v542_v9  ;;  %v10242_v11 = vcombine.high %v291_v18, %v295_v60 }
 0x2b2   :  { %6741 = vmatpush1.bf16.msra.mxu0 %v10407_v22  ;;  %v518_v22 = vld [vmem:[#allocation3 + $0xcf0] sm:$0xff] }
 0x2b3   :  { %6742 = vmatprep.subr.bf16.mxu0 %v10416_v5  ;;  %v10210_v5 = vcombine.high %v259_v17, %v263_v19  ;;  %v10464_v24 = vcombine.high %v514_v21, %v518_v22 }
 0x2b4   :  { %6989 = vmatpush1.bf16.msra.mxu1 %v10161_v63  ;;  %v526_v63 = vld [vmem:[#allocation3 + $0xd30] sm:$0xff] }
 0x2b5   :  { %6990 = vmatprep.subr.bf16.mxu1 %v10170_v35  ;;  %v10463_v35 = vcombine.low %v514_v21, %v518_v22  ;;  %v10241_v21 = vcombine.low %v291_v18, %v295_v60  ;;  %v590_v18 = vld [vmem:[#allocation3 + $0xf30] sm:$0xff] }
 0x2b6   :  { %6743 = vmatpush1.bf16.msra.mxu0 %v10415_v32  ;;  %v10209_v32 = vcombine.low %v259_v17, %v263_v19  ;;  %v554_v17 = vld [vmem:[#allocation3 + $0xe10] sm:$0xff] }
 0x2b7   :  { %6744 = vmatprep.subr.bf16.mxu0 %v10424_v36  ;;  %v10218_v36 = vcombine.high %v267_v25, %v271_v27  ;;  %v558_v19 = vld [vmem:[#allocation3 + $0xe30] sm:$0xff] }
 0x2b8   :  { %6991 = vmatpush1.bf16.msra.mxu1 %v10169_v43  ;;  %v10217_v43 = vcombine.low %v267_v25, %v271_v27  ;;  %v566_v25 = vld [vmem:[#allocation3 + $0xe70] sm:$0xff] }
 0x2b9   :  { %6992 = vmatprep.subr.bf16.mxu1 %v10178_v47  ;;  %v10226_v47 = vcombine.high %v275_v37, %v279_v40 }
 0x2ba   :  { %6745 = vmatpush1.bf16.msra.mxu0 %v10423_v45  ;;  %v10471_v45 = vcombine.low %v522_v28, %v526_v63 }
 0x2bb   :  { %6746 = vmatprep.subr.bf16.mxu0 %v10432_v48  ;;  %v10480_v48 = vcombine.high %v530_v41, %v534_v42 }
 0x2bc   :  { %6993 = vmatpush1.bf16.msra.mxu1 %v10177_v54  ;;  %v10225_v54 = vcombine.low %v275_v37, %v279_v40  ;;  %v574_v37 = vld [vmem:[#allocation3 + $0xeb0] sm:$0xff] }
 0x2bd   :  { %7003 = vmatprep.subr.bf16.mxu1 %v10186_v56  ;;  %v10234_v56 = vcombine.high %v283_v51, %v287_v50 }
 0x2be   :  { %6747 = vmatpush1.bf16.msra.mxu0 %v10431_v55  ;;  %v10479_v55 = vcombine.low %v530_v41, %v534_v42 }
 0x2bf   :  { %6757 = vmatprep.subr.bf16.mxu0 %v10440_v57  ;;  %6995 = vmatmul.mubr.bf16.vlgmr.msra.gmra.mrb[8].mxu1 %v12323_v59  ;;  %v10201_v59 = vcombine.low %v251_v4, %v255_v6  ;;  %v10488_v57 = vcombine.high %v538_v52, %v542_v9 }
 0x2c0   :  { %7004 = vmatpush1.bf16.msra.mxu1 %v10185_v0  ;;  %7035 = vmatprep.mubr.bf16.mxu1 %v12313_v13  ;;  %v10472_v13 = vcombine.high %v522_v28, %v526_v63  ;;  %v550_v0 = vld [vmem:[#allocation3 + $0xdf0] sm:$0xff]  ;;  %v10503_v28 = vcombine.low %v554_v17, %v558_v19 }
 0x2c1   :  { %6749 = vmatmul.mubr.bf16.vlgmr.msra.gmra.mrb[4].mxu0 %v12340_v49  ;;  %7005 = vmatprep.subr.bf16.mxu1 %v10194_v2 }
 0x2c2   :  { %6758 = vmatpush1.bf16.msra.mxu0 %v10439_v1  ;;  %6789 = vmatprep.mubr.bf16.mxu0 %v12344_v58 }
 0x2c3   :  { %6759 = vmatprep.subr.bf16.mxu0 %v10448_v3  ;;  %v10233_v3 = vcombine.low %v283_v51, %v287_v50  ;;  %v582_v51 = vld [vmem:[#allocation3 + $0xef0] sm:$0xff] }
 0x2c4   :  { %7006 = vmatpush1.bf16.msra.mxu1 %v10193_v12 }
 0x2c5   :  { %7007 = vmatprep.subr.bf16.mxu1 %v10202_v15  ;;  %v299_v15 = vld [vmem:[#allocation3 + $0x618] sm:$0xff] }
 0x2c6   :  { %6760 = vmatpush1.bf16.msra.mxu0 %v10447_v14  ;;  %v10496_v14 = vcombine.high %v546_v62, %v550_v0 }
 0x2c7   :  { %6761 = vmatprep.subr.bf16.mxu0 %v10456_v16  ;;  %v303_v16 = vld [vmem:[#allocation3 + $0x638] sm:$0xff] }
 0x2c8   :  { %7008 = vmatpush1.bf16.msra.mxu1 %v10201_v59  ;;  %v10250_v22 = vcombine.high %v299_v15, %v303_v16  ;;  %v10504_v59 = vcombine.high %v554_v17, %v558_v19  ;;  %v10249_v27 = vcombine.low %v299_v15, %v303_v16  ;;  %v347_v16 = vld [vmem:[#allocation3 + $0x798] sm:$0xff]  ;;  %v602_v19 = vld [vmem:[#allocation3 + $0xf90] sm:$0xff] }
 0x2c9   :  { %7009 = vmatprep.subr.bf16.mxu1 %v10210_v5  ;;  %v311_v5 = vld [vmem:[#allocation3 + $0x678] sm:$0xff] }
 0x2ca   :  { %6762 = vmatpush1.bf16.msra.mxu0 %v10455_v53  ;;  %v307_v53 = vld [vmem:[#allocation3 + $0x658] sm:$0xff] }
 0x2cb   :  { %6763 = vmatprep.subr.bf16.mxu0 %v10464_v24  ;;  %v562_v24 = vld [vmem:[#allocation3 + $0xe50] sm:$0xff]  ;;  %v10258_v63 = vcombine.high %v307_v53, %v311_v5  ;;  %v10257_v40 = vcombine.low %v307_v53, %v311_v5  ;;  %v351_v17 = vld [vmem:[#allocation3 + $0x7b8] sm:$0xff] }
 0x2cc   :  { %7010 = vmatpush1.bf16.msra.mxu1 %v10209_v32  ;;  %v10512_v32 = vcombine.high %v562_v24, %v566_v25  ;;  %v10511_v41 = vcombine.low %v562_v24, %v566_v25  ;;  %v355_v5 = vld [vmem:[#allocation3 + $0x7d8] sm:$0xff]  ;;  %v610_v25 = vld [vmem:[#allocation3 + $0xfd0] sm:$0xff] }
 0x2cd   :  { %7011 = vmatprep.subr.bf16.mxu1 %v10218_v36  ;;  %v319_v36 = vld [vmem:[#allocation3 + $0x6b8] sm:$0xff] }
 0x2ce   :  { %6764 = vmatpush1.bf16.msra.mxu0 %v10463_v35  ;;  %v315_v35 = vld [vmem:[#allocation3 + $0x698] sm:$0xff] }
 0x2cf   :  { %6765 = vmatprep.subr.bf16.mxu0 %v10472_v13  ;;  %v570_v13 = vld [vmem:[#allocation3 + $0xe90] sm:$0xff]  ;;  %v10266_v42 = vcombine.high %v315_v35, %v319_v36  ;;  %v10265_v50 = vcombine.low %v315_v35, %v319_v36  ;;  %v359_v24 = vld [vmem:[#allocation3 + $0x7f8] sm:$0xff] }
 0x2d0   :  { %7012 = vmatpush1.bf16.msra.mxu1 %v10217_v43  ;;  %v10520_v43 = vcombine.high %v570_v13, %v574_v37  ;;  %v10519_v52 = vcombine.low %v570_v13, %v574_v37  ;;  %v363_v36 = vld [vmem:[#allocation3 + $0x818] sm:$0xff]  ;;  %v618_v37 = vld [vmem:[#allocation3 + $0x1010] sm:$0xff] }
 0x2d1   :  { %7013 = vmatprep.subr.bf16.mxu1 %v10226_v47  ;;  %v327_v47 = vld [vmem:[#allocation3 + $0x6f8] sm:$0xff] }
 0x2d2   :  { %6766 = vmatpush1.bf16.msra.mxu0 %v10471_v45  ;;  %v323_v45 = vld [vmem:[#allocation3 + $0x6d8] sm:$0xff] }
 0x2d3   :  { %6767 = vmatprep.subr.bf16.mxu0 %v10480_v48  ;;  %v578_v48 = vld [vmem:[#allocation3 + $0xed0] sm:$0xff]  ;;  %v10274_v9 = vcombine.high %v323_v45, %v327_v47  ;;  %v10273_v60 = vcombine.low %v323_v45, %v327_v47  ;;  %v367_v13 = vld [vmem:[#allocation3 + $0x838] sm:$0xff] }
 0x2d4   :  { %v6299_v61 = vpop.f32.mrb[0].mxu0  ;;  %7014 = vmatpush1.bf16.msra.mxu1 %v10225_v54  ;;  %v10528_v54 = vcombine.high %v578_v48, %v582_v51  ;;  %v371_v47 = vld [vmem:[#allocation3 + $0x858] sm:$0xff] }
 0x2d5   :  { %v12432_v1 = vadd.f32 %v6299_v61, %v12380_v29  ;;  %v6301_v2 = vpop.f32.mrb[1].mxu0  ;;  %7015 = vmatprep.subr.bf16.mxu1 %v10234_v56  ;;  %v335_v56 = vld [vmem:[#allocation3 + $0x738] sm:$0xff]  ;;  %v10527_v61 = vcombine.low %v578_v48, %v582_v51  ;;  %v626_v51 = vld [vmem:[#allocation3 + $0x1050] sm:$0xff] }
 0x2d6   :  { %v12435_v4 = vadd.f32 %v6301_v2, %v12382_v33  ;;  %v6303_v6 = vpop.f32.mrb[2].mxu0  ;;  %6768 = vmatpush1.bf16.msra.mxu0 %v10479_v55  ;;  %v10495_v33 = vcombine.low %v546_v62, %v550_v0  ;;  %v331_v55 = vld [vmem:[#allocation3 + $0x718] sm:$0xff] }
 0x2d7   :  { %v6304_v12 = vpop.f32.mrb[3].mxu0  ;;  %6769 = vmatprep.subr.bf16.mxu0 %v10488_v57  ;;  %v586_v57 = vld [vmem:[#allocation3 + $0xf10] sm:$0xff]  ;;  %v10282_v62 = vcombine.high %v331_v55, %v335_v56  ;;  %v339_v2 = vld [vmem:[#allocation3 + $0x758] sm:$0xff] }
 0x2d8   :  { %v7298_v29 = vcombine.low %v12432_v1, %v12435_v4  ;;  %7016 = vmatpush1.bf16.msra.mxu1 %v10233_v3  ;;  %v10536_v0 = vcombine.high %v586_v57, %v590_v18  ;;  %v343_v3 = vld [vmem:[#allocation3 + $0x778] sm:$0xff]  ;;  %v594_v6 = vld [vmem:[#allocation3 + $0xf50] sm:$0xff]  ;;  %v10535_v12 = vcombine.low %v586_v57, %v590_v18 }
 0x2d9   :  { %7017 = vmatprep.subr.bf16.mxu1 %v10242_v11  ;;  %v10281_v11 = vcombine.low %v331_v55, %v335_v56  ;;  %v375_v48 = vld [vmem:[#allocation3 + $0x878] sm:$0xff]  ;;  %v634_v18 = vld [vmem:[#allocation3 + $0x1090] sm:$0xff] }
 0x2da   :  { %6770 = vmatpush1.bf16.msra.mxu0 %v10487_v7  ;;  %v598_v7 = vld [vmem:[#allocation3 + $0xf70] sm:$0xff]  ;;  %v379_v56 = vld [vmem:[#allocation3 + $0x898] sm:$0xff] }
 0x2db   :  { %6771 = vmatprep.subr.bf16.mxu0 %v10496_v14  ;;  %v10290_v14 = vcombine.high %v339_v2, %v343_v3  ;;  %v10544_v15 = vcombine.high %v594_v6, %v598_v7  ;;  %v383_v57 = vld [vmem:[#allocation3 + $0x8b8] sm:$0xff] }
 0x2dc   :  { %7018 = vmatpush1.bf16.msra.mxu1 %v10241_v21  ;;  %v606_v21 = vld [vmem:[#allocation3 + $0xfb0] sm:$0xff] }
 0x2dd   :  { %7019 = vmatprep.subr.bf16.mxu1 %v10250_v22  ;;  %v10543_v22 = vcombine.low %v594_v6, %v598_v7  ;;  %v10552_v53 = vcombine.high %v602_v19, %v606_v21  ;;  %v391_v6 = vld [vmem:[#allocation3 + $0x8f8] sm:$0xff]  ;;  %v642_v7 = vld [vmem:[#allocation3 + $0x10d0] sm:$0xff] }
 0x2de   :  { %6772 = vmatpush1.bf16.msra.mxu0 %v10495_v33  ;;  %v10289_v33 = vcombine.low %v339_v2, %v343_v3  ;;  %v387_v3 = vld [vmem:[#allocation3 + $0x8d8] sm:$0xff] }
 0x2df   :  { %6773 = vmatprep.subr.bf16.mxu0 %v10504_v59  ;;  %v10298_v59 = vcombine.high %v347_v16, %v351_v17 }
 0x2e0   :  { %7020 = vmatpush1.bf16.msra.mxu1 %v10249_v27  ;;  %v614_v27 = vld [vmem:[#allocation3 + $0xff0] sm:$0xff] }
 0x2e1   :  { %7021 = vmatprep.subr.bf16.mxu1 %v10258_v63  ;;  %v10551_v63 = vcombine.low %v602_v19, %v606_v21  ;;  %v10560_v35 = vcombine.high %v610_v25, %v614_v27  ;;  %v650_v19 = vld [vmem:[#allocation3 + $0x1110] sm:$0xff] }
 0x2e2   :  { %6774 = vmatpush1.bf16.msra.mxu0 %v10503_v28  ;;  %v10297_v28 = vcombine.low %v347_v16, %v351_v17  ;;  %v395_v16 = vld [vmem:[#allocation3 + $0x918] sm:$0xff]  ;;  %v654_v21 = vld [vmem:[#allocation3 + $0x1130] sm:$0xff] }
 0x2e3   :  { %6775 = vmatprep.subr.bf16.mxu0 %v10512_v32  ;;  %v10306_v32 = vcombine.high %v355_v5, %v359_v24  ;;  %v399_v17 = vld [vmem:[#allocation3 + $0x938] sm:$0xff] }
 0x2e4   :  { %7022 = vmatpush1.bf16.msra.mxu1 %v10257_v40  ;;  %v622_v40 = vld [vmem:[#allocation3 + $0x1030] sm:$0xff] }
 0x2e5   :  { %7023 = vmatprep.subr.bf16.mxu1 %v10266_v42  ;;  %v10559_v42 = vcombine.low %v610_v25, %v614_v27  ;;  %v10568_v45 = vcombine.high %v618_v37, %v622_v40  ;;  %v662_v25 = vld [vmem:[#allocation3 + $0x1170] sm:$0xff]  ;;  %v10345_v27 = vcombine.low %v395_v16, %v399_v17 }
 0x2e6   :  { %6776 = vmatpush1.bf16.msra.mxu0 %v10511_v41  ;;  %v10305_v41 = vcombine.low %v355_v5, %v359_v24  ;;  %v407_v5 = vld [vmem:[#allocation3 + $0x978] sm:$0xff]  ;;  %v658_v24 = vld [vmem:[#allocation3 + $0x1150] sm:$0xff] }
 0x2e7   :  { %6777 = vmatprep.subr.bf16.mxu0 %v10520_v43  ;;  %v10314_v43 = vcombine.high %v363_v36, %v367_v13 }
 0x2e8   :  { %7024 = vmatpush1.bf16.msra.mxu1 %v10265_v50  ;;  %v630_v50 = vld [vmem:[#allocation3 + $0x1070] sm:$0xff] }
 0x2e9   :  { %7025 = vmatprep.subr.bf16.mxu1 %v10274_v9  ;;  %v10567_v9 = vcombine.low %v618_v37, %v622_v40  ;;  %v10576_v55 = vcombine.high %v626_v51, %v630_v50  ;;  %v670_v37 = vld [vmem:[#allocation3 + $0x11b0] sm:$0xff] }
 0x2ea   :  { %6778 = vmatpush1.bf16.msra.mxu0 %v10519_v52  ;;  %v10313_v52 = vcombine.low %v363_v36, %v367_v13  ;;  %v415_v36 = vld [vmem:[#allocation3 + $0x9b8] sm:$0xff]  ;;  %v666_v13 = vld [vmem:[#allocation3 + $0x1190] sm:$0xff] }
 0x2eb   :  { %6779 = vmatprep.subr.bf16.mxu0 %v10528_v54  ;;  %v10322_v54 = vcombine.high %v371_v47, %v375_v48 }
 0x2ec   :  { %7026 = vmatpush1.bf16.msra.mxu1 %v10273_v60  ;;  %v638_v60 = vld [vmem:[#allocation3 + $0x10b0] sm:$0xff] }
 0x2ed   :  { %7027 = vmatprep.subr.bf16.mxu1 %v10282_v62  ;;  %v10575_v62 = vcombine.low %v626_v51, %v630_v50  ;;  %v10584_v2 = vcombine.high %v634_v18, %v638_v60  ;;  %v678_v51 = vld [vmem:[#allocation3 + $0x11f0] sm:$0xff] }
 0x2ee   :  { %6780 = vmatpush1.bf16.msra.mxu0 %v10527_v61  ;;  %v10321_v61 = vcombine.low %v371_v47, %v375_v48  ;;  %v423_v47 = vld [vmem:[#allocation3 + $0x9f8] sm:$0xff]  ;;  %v674_v48 = vld [vmem:[#allocation3 + $0x11d0] sm:$0xff] }
 0x2ef   :  { %6781 = vmatprep.subr.bf16.mxu0 %v10536_v0  ;;  %v10330_v0 = vcombine.high %v379_v56, %v383_v57 }
 0x2f0   :  { %7028 = vmatpush1.bf16.msra.mxu1 %v10281_v11  ;;  %v646_v11 = vld [vmem:[#allocation3 + $0x10f0] sm:$0xff] }
 0x2f1   :  { %7029 = vmatprep.subr.bf16.mxu1 %v10290_v14  ;;  %v10338_v14 = vcombine.high %v387_v3, %v391_v6 }
 0x2f2   :  { %6782 = vmatpush1.bf16.msra.mxu0 %v10535_v12  ;;  %v10583_v12 = vcombine.low %v634_v18, %v638_v60  ;;  %v686_v18 = vld [vmem:[#allocation3 + $0x1230] sm:$0xff] }
 0x2f3   :  { %6783 = vmatprep.subr.bf16.mxu0 %v10544_v15  ;;  %v10592_v15 = vcombine.high %v642_v7, %v646_v11 }
 0x2f4   :  { %7030 = vmatpush1.bf16.msra.mxu1 %v10289_v33  ;;  %v10337_v33 = vcombine.low %v387_v3, %v391_v6  ;;  %v439_v3 = vld [vmem:[#allocation3 + $0xa78] sm:$0xff]  ;;  %v690_v6 = vld [vmem:[#allocation3 + $0x1250] sm:$0xff] }
 0x2f5   :  { %7031 = vmatprep.subr.bf16.mxu1 %v10298_v59  ;;  %v10346_v59 = vcombine.high %v395_v16, %v399_v17  ;;  %v447_v16 = vld [vmem:[#allocation3 + $0xab8] sm:$0xff]  ;;  %v698_v17 = vld [vmem:[#allocation3 + $0x1290] sm:$0xff] }
 0x2f6   :  { %6784 = vmatpush1.bf16.msra.mxu0 %v10543_v22  ;;  %v10591_v22 = vcombine.low %v642_v7, %v646_v11  ;;  %v694_v7 = vld [vmem:[#allocation3 + $0x1270] sm:$0xff] }
 0x2f7   :  { %6785 = vmatprep.subr.bf16.mxu0 %v10552_v53  ;;  %v403_v53 = vld [vmem:[#allocation3 + $0x958] sm:$0xff] }
 0x2f8   :  { %7032 = vmatpush1.bf16.msra.mxu1 %v10297_v28  ;;  %v10599_v28 = vcombine.low %v650_v19, %v654_v21  ;;  %v10353_v40 = vcombine.low %v403_v53, %v407_v5 }
 0x2f9   :  { %7033 = vmatprep.subr.bf16.mxu1 %v10306_v32  ;;  %v10608_v32 = vcombine.high %v658_v24, %v662_v25 }
 0x2fa   :  { %6786 = vmatpush1.bf16.msra.mxu0 %v10551_v63  ;;  %v10354_v63 = vcombine.high %v403_v53, %v407_v5  ;;  %v455_v53 = vld [vmem:[#allocation3 + $0xaf8] sm:$0xff]  ;;  %v706_v5 = vld [vmem:[#allocation3 + $0x12d0] sm:$0xff] }
 0x2fb   :  { %6787 = vmatprep.subr.bf16.mxu0 %v10560_v35  ;;  %v411_v35 = vld [vmem:[#allocation3 + $0x998] sm:$0xff] }
 0x2fc   :  { %7034 = vmatpush1.bf16.msra.mxu1 %v10305_v41  ;;  %v10607_v41 = vcombine.low %v658_v24, %v662_v25  ;;  %v10361_v50 = vcombine.low %v411_v35, %v415_v36  ;;  %v710_v24 = vld [vmem:[#allocation3 + $0x12f0] sm:$0xff] }
 0x2fd   :  { %7044 = vmatprep.subr.bf16.mxu1 %v10314_v43  ;;  %v10616_v43 = vcombine.high %v666_v13, %v670_v37 }
 0x2fe   :  { %6788 = vmatpush1.bf16.msra.mxu0 %v10559_v42  ;;  %v10362_v42 = vcombine.high %v411_v35, %v415_v36  ;;  %v463_v35 = vld [vmem:[#allocation3 + $0xb38] sm:$0xff]  ;;  %v714_v36 = vld [vmem:[#allocation3 + $0x1310] sm:$0xff] }
 0x2ff   :  { %6798 = vmatprep.subr.bf16.mxu0 %v10568_v45  ;;  %7036 = vmatmul.mubr.bf16.vlgmr.msra.gmra.mrb[8].mxu1 %v12329_v31  ;;  %v10329_v31 = vcombine.low %v379_v56, %v383_v57  ;;  %v419_v45 = vld [vmem:[#allocation3 + $0x9d8] sm:$0xff]  ;;  %v682_v57 = vld [vmem:[#allocation3 + $0x1210] sm:$0xff] }
 0x300   :  { %7045 = vmatpush1.bf16.msra.mxu1 %v10313_v52  ;;  %7076 = vmatprep.mubr.bf16.mxu1 %v12332_v38  ;;  %v10600_v38 = vcombine.high %v650_v19, %v654_v21  ;;  %v10615_v52 = vcombine.low %v666_v13, %v670_v37  ;;  %v431_v56 = vld [vmem:[#allocation3 + $0xa38] sm:$0xff]  ;;  %v10369_v60 = vcombine.low %v419_v45, %v423_v47  ;;  %v702_v19 = vld [vmem:[#allocation3 + $0x12b0] sm:$0xff] }
 0x301   :  { %6790 = vmatmul.mubr.bf16.vlgmr.msra.gmra.mrb[4].mxu0 %v12359_v10  ;;  %7046 = vmatprep.subr.bf16.mxu1 %v10322_v54  ;;  %v10624_v54 = vcombine.high %v674_v48, %v678_v51  ;;  %v718_v13 = vld [vmem:[#allocation3 + $0x1330] sm:$0xff] }
 0x302   :  { %6799 = vmatpush1.bf16.msra.mxu0 %v10567_v9  ;;  %6830 = vmatprep.mubr.bf16.mxu0 %v12362_v20  ;;  %v10370_v9 = vcombine.high %v419_v45, %v423_v47  ;;  %v471_v45 = vld [vmem:[#allocation3 + $0xb78] sm:$0xff]  ;;  %v722_v47 = vld [vmem:[#allocation3 + $0x1350] sm:$0xff] }
 0x303   :  { %6800 = vmatprep.subr.bf16.mxu0 %v10576_v55  ;;  %v427_v55 = vld [vmem:[#allocation3 + $0xa18] sm:$0xff] }
 0x304   :  { %7047 = vmatpush1.bf16.msra.mxu1 %v10321_v61  ;;  %v10623_v61 = vcombine.low %v674_v48, %v678_v51  ;;  %v10377_v11 = vcombine.low %v427_v55, %v431_v56  ;;  %v726_v48 = vld [vmem:[#allocation3 + $0x1370] sm:$0xff] }
 0x305   :  { %7048 = vmatprep.subr.bf16.mxu1 %v10330_v0  ;;  %v10632_v0 = vcombine.high %v682_v57, %v686_v18 }
 0x306   :  { %6801 = vmatpush1.bf16.msra.mxu0 %v10575_v62  ;;  %v10378_v62 = vcombine.high %v427_v55, %v431_v56  ;;  %v479_v55 = vld [vmem:[#allocation3 + $0xbb8] sm:$0xff]  ;;  %v730_v56 = vld [vmem:[#allocation3 + $0x1390] sm:$0xff] }
 0x307   :  { %6802 = vmatprep.subr.bf16.mxu0 %v10584_v2  ;;  %v435_v2 = vld [vmem:[#allocation3 + $0xa58] sm:$0xff] }
 0x308   :  { %7049 = vmatpush1.bf16.msra.mxu1 %v10329_v31  ;;  %v10631_v31 = vcombine.low %v682_v57, %v686_v18  ;;  %v10385_v21 = vcombine.low %v435_v2, %v439_v3  ;;  %v734_v57 = vld [vmem:[#allocation3 + $0x13b0] sm:$0xff] }
 0x309   :  { %7050 = vmatprep.subr.bf16.mxu1 %v10338_v14  ;;  %v10640_v14 = vcombine.high %v690_v6, %v694_v7 }
 0x30a   :  { %6803 = vmatpush1.bf16.msra.mxu0 %v10583_v12  ;;  %v10386_v12 = vcombine.high %v435_v2, %v439_v3  ;;  %v487_v2 = vld [vmem:[#allocation3 + $0xbf8] sm:$0xff]  ;;  %v738_v3 = vld [vmem:[#allocation3 + $0x13d0] sm:$0xff] }
 0x30b   :  { %6804 = vmatprep.subr.bf16.mxu0 %v10592_v15  ;;  %v443_v15 = vld [vmem:[#allocation3 + $0xa98] sm:$0xff] }
 0x30c   :  { %7051 = vmatpush1.bf16.msra.mxu1 %v10337_v33  ;;  %v10639_v33 = vcombine.low %v690_v6, %v694_v7  ;;  %v10393_v25 = vcombine.low %v443_v15, %v447_v16  ;;  %v742_v6 = vld [vmem:[#allocation3 + $0x13f0] sm:$0xff] }
 0x30d   :  { %7052 = vmatprep.subr.bf16.mxu1 %v10346_v59  ;;  %v10648_v59 = vcombine.high %v698_v17, %v702_v19 }
 0x30e   :  { %6805 = vmatpush1.bf16.msra.mxu0 %v10591_v22  ;;  %v10394_v22 = vcombine.high %v443_v15, %v447_v16  ;;  %v495_v15 = vld [vmem:[#allocation3 + $0xc38] sm:$0xff]  ;;  %v746_v16 = vld [vmem:[#allocation3 + $0x1410] sm:$0xff] }
 0x30f   :  { %6806 = vmatprep.subr.bf16.mxu0 %v10600_v38  ;;  %v451_v38 = vld [vmem:[#allocation3 + $0xad8] sm:$0xff] }
 0x310   :  { %7053 = vmatpush1.bf16.msra.mxu1 %v10345_v27  ;;  %v10647_v27 = vcombine.low %v698_v17, %v702_v19  ;;  %v10401_v37 = vcombine.low %v451_v38, %v455_v53  ;;  %v750_v17 = vld [vmem:[#allocation3 + $0x1430] sm:$0xff] }
 0x311   :  { %7054 = vmatprep.subr.bf16.mxu1 %v10354_v63  ;;  %v10656_v63 = vcombine.high %v706_v5, %v710_v24 }
 0x312   :  { %6807 = vmatpush1.bf16.msra.mxu0 %v10599_v28  ;;  %v10402_v28 = vcombine.high %v451_v38, %v455_v53  ;;  %v503_v38 = vld [vmem:[#allocation3 + $0xc78] sm:$0xff]  ;;  %v754_v53 = vld [vmem:[#allocation3 + $0x1450] sm:$0xff] }
 0x313   :  { %6808 = vmatprep.subr.bf16.mxu0 %v10608_v32  ;;  %v459_v32 = vld [vmem:[#allocation3 + $0xb18] sm:$0xff] }
 0x314   :  { %7055 = vmatpush1.bf16.msra.mxu1 %v10353_v40  ;;  %v10655_v40 = vcombine.low %v706_v5, %v710_v24  ;;  %v10409_v51 = vcombine.low %v459_v32, %v463_v35  ;;  %v758_v5 = vld [vmem:[#allocation3 + $0x1470] sm:$0xff] }
 0x315   :  { %7056 = vmatprep.subr.bf16.mxu1 %v10362_v42  ;;  %v10664_v42 = vcombine.high %v714_v36, %v718_v13 }
 0x316   :  { %6809 = vmatpush1.bf16.msra.mxu0 %v10607_v41  ;;  %v10410_v41 = vcombine.high %v459_v32, %v463_v35  ;;  %v511_v32 = vld [vmem:[#allocation3 + $0xcb8] sm:$0xff]  ;;  %v762_v35 = vld [vmem:[#allocation3 + $0x1490] sm:$0xff] }
 0x317   :  { %6810 = vmatprep.subr.bf16.mxu0 %v10616_v43  ;;  %v467_v43 = vld [vmem:[#allocation3 + $0xb58] sm:$0xff] }
 0x318   :  { %7057 = vmatpush1.bf16.msra.mxu1 %v10361_v50  ;;  %v10663_v50 = vcombine.low %v714_v36, %v718_v13  ;;  %v10417_v18 = vcombine.low %v467_v43, %v471_v45  ;;  %v766_v36 = vld [vmem:[#allocation3 + $0x14b0] sm:$0xff] }
 0x319   :  { %7058 = vmatprep.subr.bf16.mxu1 %v10370_v9  ;;  %v10672_v9 = vcombine.high %v722_v47, %v726_v48 }
 0x31a   :  { %6811 = vmatpush1.bf16.msra.mxu0 %v10615_v52  ;;  %v10418_v52 = vcombine.high %v467_v43, %v471_v45  ;;  %v519_v43 = vld [vmem:[#allocation3 + $0xcf8] sm:$0xff]  ;;  %v770_v45 = vld [vmem:[#allocation3 + $0x14d0] sm:$0xff] }
 0x31b   :  { %6812 = vmatprep.subr.bf16.mxu0 %v10624_v54  ;;  %v475_v54 = vld [vmem:[#allocation3 + $0xb98] sm:$0xff] }
 0x31c   :  { %7059 = vmatpush1.bf16.msra.mxu1 %v10369_v60  ;;  %v10671_v60 = vcombine.low %v722_v47, %v726_v48  ;;  %v10425_v7 = vcombine.low %v475_v54, %v479_v55  ;;  %v774_v47 = vld [vmem:[#allocation3 + $0x14f0] sm:$0xff]  ;;  %v10711_v48 = vcombine.low %v762_v35, %v766_v36 }
 0x31d   :  { %7060 = vmatprep.subr.bf16.mxu1 %v10378_v62  ;;  %v10680_v62 = vcombine.high %v730_v56, %v734_v57 }
 0x31e   :  { %6813 = vmatpush1.bf16.msra.mxu0 %v10623_v61  ;;  %v10426_v61 = vcombine.high %v475_v54, %v479_v55  ;;  %v778_v54 = vld [vmem:[#allocation3 + $0x1510] sm:$0xff] }
 0x31f   :  { %6814 = vmatprep.subr.bf16.mxu0 %v10632_v0  ;;  %v483_v0 = vld [vmem:[#allocation3 + $0xbd8] sm:$0xff]  ;;  %v782_v55 = vld [vmem:[#allocation3 + $0x1530] sm:$0xff] }
 0x320   :  { %7061 = vmatpush1.bf16.msra.mxu1 %v10377_v11  ;;  %v10679_v11 = vcombine.low %v730_v56, %v734_v57  ;;  %v10433_v19 = vcombine.low %v483_v0, %v487_v2  ;;  %v10719_v57 = vcombine.low %v770_v45, %v774_v47 }
 0x321   :  { %7062 = vmatprep.subr.bf16.mxu1 %v10386_v12  ;;  %v10688_v12 = vcombine.high %v738_v3, %v742_v6 }
 0x322   :  { %6815 = vmatpush1.bf16.msra.mxu0 %v10631_v31  ;;  %v10434_v31 = vcombine.high %v483_v0, %v487_v2  ;;  %v535_v0 = vld [vmem:[#allocation3 + $0xd78] sm:$0xff]  ;;  %v786_v2 = vld [vmem:[#allocation3 + $0x1550] sm:$0xff] }
 0x323   :  { %6816 = vmatprep.subr.bf16.mxu0 %v10640_v14  ;;  %v491_v14 = vld [vmem:[#allocation3 + $0xc18] sm:$0xff] }
 0x324   :  { %7063 = vmatpush1.bf16.msra.mxu1 %v10385_v21  ;;  %v10687_v21 = vcombine.low %v738_v3, %v742_v6  ;;  %v10441_v24 = vcombine.low %v491_v14, %v495_v15  ;;  %v790_v3 = vld [vmem:[#allocation3 + $0x1570] sm:$0xff] }
 0x325   :  { %7064 = vmatprep.subr.bf16.mxu1 %v10394_v22  ;;  %v10696_v22 = vcombine.high %v746_v16, %v750_v17 }
 0x326   :  { %6817 = vmatpush1.bf16.msra.mxu0 %v10639_v33  ;;  %v10442_v33 = vcombine.high %v491_v14, %v495_v15  ;;  %v539_v14 = vld [vmem:[#allocation3 + $0xd98] sm:$0xff] }
 0x327   :  { %6818 = vmatprep.subr.bf16.mxu0 %v10648_v59  ;;  %v499_v59 = vld [vmem:[#allocation3 + $0xc58] sm:$0xff] }
 0x328   :  { %7065 = vmatpush1.bf16.msra.mxu1 %v10393_v25  ;;  %v10695_v25 = vcombine.low %v746_v16, %v750_v17  ;;  %v10449_v13 = vcombine.low %v499_v59, %v503_v38  ;;  %v543_v15 = vld [vmem:[#allocation3 + $0xdb8] sm:$0xff]  ;;  %v794_v16 = vld [vmem:[#allocation3 + $0x1590] sm:$0xff] }
 0x329   :  { %7066 = vmatprep.subr.bf16.mxu1 %v10402_v28  ;;  %v10704_v28 = vcombine.high %v754_v53, %v758_v5  ;;  %v798_v17 = vld [vmem:[#allocation3 + $0x15b0] sm:$0xff] }
 0x32a   :  { %6819 = vmatpush1.bf16.msra.mxu0 %v10647_v27  ;;  %v10450_v27 = vcombine.high %v499_v59, %v503_v38  ;;  %v10744_v38 = vcombine.high %v794_v16, %v798_v17 }
 0x32b   :  { %6820 = vmatprep.subr.bf16.mxu0 %v10656_v63  ;;  %v507_v63 = vld [vmem:[#allocation3 + $0xc98] sm:$0xff] }
 0x32c   :  { %7067 = vmatpush1.bf16.msra.mxu1 %v10401_v37  ;;  %v10703_v37 = vcombine.low %v754_v53, %v758_v5  ;;  %v547_v53 = vld [vmem:[#allocation3 + $0xdd8] sm:$0xff] }
 0x32d   :  { %7068 = vmatprep.subr.bf16.mxu1 %v10410_v41  ;;  %v10712_v41 = vcombine.high %v762_v35, %v766_v36  ;;  %v551_v5 = vld [vmem:[#allocation3 + $0xdf8] sm:$0xff]  ;;  %v10743_v36 = vcombine.low %v794_v16, %v798_v17 }
 0x32e   :  { %6821 = vmatpush1.bf16.msra.mxu0 %v10655_v40  ;;  %v10458_v40 = vcombine.high %v507_v63, %v511_v32  ;;  %v587_v17 = vld [vmem:[#allocation3 + $0xf18] sm:$0xff] }
 0x32f   :  { %6822 = vmatprep.subr.bf16.mxu0 %v10664_v42  ;;  %v515_v42 = vld [vmem:[#allocation3 + $0xcd8] sm:$0xff] }
 0x330   :  { %7069 = vmatpush1.bf16.msra.mxu1 %v10409_v51  ;;  %v10466_v51 = vcombine.high %v515_v42, %v519_v43  ;;  %v10465_v56 = vcombine.low %v515_v42, %v519_v43  ;;  %v555_v42 = vld [vmem:[#allocation3 + $0xe18] sm:$0xff] }
 0x331   :  { %7070 = vmatprep.subr.bf16.mxu1 %v10418_v52  ;;  %v523_v52 = vld [vmem:[#allocation3 + $0xd18] sm:$0xff] }
 0x332   :  { %6823 = vmatpush1.bf16.msra.mxu0 %v10663_v50  ;;  %v10720_v50 = vcombine.high %v770_v45, %v774_v47  ;;  %v559_v43 = vld [vmem:[#allocation3 + $0xe38] sm:$0xff]  ;;  %v810_v45 = vld [vmem:[#allocation3 + $0x1610] sm:$0xff] }
 0x333   :  { %6824 = vmatprep.subr.bf16.mxu0 %v10672_v9  ;;  %v527_v9 = vld [vmem:[#allocation3 + $0xd38] sm:$0xff]  ;;  %v814_v47 = vld [vmem:[#allocation3 + $0x1630] sm:$0xff]  ;;  %v10506_v1 = vcombine.high %v555_v42, %v559_v43 }
 0x334   :  { %7071 = vmatpush1.bf16.msra.mxu1 %v10417_v18  ;;  %v10474_v18 = vcombine.high %v523_v52, %v527_v9  ;;  %v10473_v6 = vcombine.low %v523_v52, %v527_v9  ;;  %v10760_v4 = vcombine.high %v810_v45, %v814_v47  ;;  %v818_v52 = vld [vmem:[#allocation3 + $0x1650] sm:$0xff] }
 0x335   :  { %7072 = vmatprep.subr.bf16.mxu1 %v10426_v61  ;;  %v10728_v61 = vcombine.high %v778_v54, %v782_v55  ;;  %v822_v9 = vld [vmem:[#allocation3 + $0x1670] sm:$0xff] }
 0x336   :  { %6825 = vmatpush1.bf16.msra.mxu0 %v10671_v60  ;;  %v12179_v60 = vmov 1983009808  }
 0x337   :  { %6826 = vmatprep.subr.bf16.mxu0 %v10680_v62  ;;  %v531_v62 = vld [vmem:[#allocation3 + $0xd58] sm:$0xff] }
 0x338   :  { %7073 = vmatpush1.bf16.msra.mxu1 %v10425_v7  ;;  %v10727_v7 = vcombine.low %v778_v54, %v782_v55  ;;  %v10505_v54 = vcombine.low %v555_v42, %v559_v43  ;;  %v10759_v55 = vcombine.low %v810_v45, %v814_v47  ;;  %v858_v42 = vld [vmem:[#allocation3 + $0x1790] sm:$0xff] }
 0x339   :  { %7074 = vmatprep.subr.bf16.mxu1 %v10434_v31  ;;  %v862_v43 = vld [vmem:[#allocation3 + $0x17b0] sm:$0xff] }
 0x33a   :  { %6827 = vmatpush1.bf16.msra.mxu0 %v10679_v11  ;;  %v10482_v11 = vcombine.high %v531_v62, %v535_v0 }
 0x33b   :  { %6828 = vmatprep.subr.bf16.mxu0 %v10688_v12  ;;  %v10736_v12 = vcombine.high %v786_v2, %v790_v3 }
 0x33c   :  { %7075 = vmatpush1.bf16.msra.mxu1 %v10433_v19  ;;  %v10481_v19 = vcombine.low %v531_v62, %v535_v0  ;;  %v10767_v0 = vcombine.low %v818_v52, %v822_v9 }
 0x33d   :  { %7085 = vmatprep.subr.bf16.mxu1 %v10442_v33  ;;  %v10490_v33 = vcombine.high %v539_v14, %v543_v15 }
 0x33e   :  { %6829 = vmatpush1.bf16.msra.mxu0 %v10687_v21  ;;  %v10735_v21 = vcombine.low %v786_v2, %v790_v3 }
 0x33f   :  { %6839 = vmatprep.subr.bf16.mxu0 %v10696_v22  ;;  %7077 = vmatmul.mubr.bf16.vlgmr.msra.gmra.mrb[8].mxu1 %v12340_v49  ;;  %v10457_v49 = vcombine.low %v507_v63, %v511_v32  ;;  %v10489_v32 = vcombine.low %v539_v14, %v543_v15 }
 0x340   :  { %7086 = vmatpush1.bf16.msra.mxu1 %v10441_v24  ;;  %7117 = vmatprep.mubr.bf16.mxu1 %v12344_v58  ;;  %v7301_v58 = vunpack.c.l.s4 %v12179_v60  ;;  %v575_v60 = vld [vmem:[#allocation3 + $0xeb8] sm:$0xff] }
 0x341   :  { %6831 = vmatmul.mubr.bf16.vlgmr.msra.gmra.mrb[4].mxu0 %v12370_v39  ;;  %7087 = vmatprep.subr.bf16.mxu1 %v10450_v27  ;;  %v806_v27 = vld [vmem:[#allocation3 + $0x15f0] sm:$0xff] }
 0x342   :  { %6840 = vmatpush1.bf16.msra.mxu0 %v10695_v25  ;;  %6871 = vmatprep.mubr.bf16.mxu0 %v12374_v46  ;;  %v7302_v31 = vunpack.c.0.s8 %v7301_v58  ;;  %v802_v25 = vld [vmem:[#allocation3 + $0x15d0] sm:$0xff] }
 0x343   :  { %6841 = vmatprep.subr.bf16.mxu0 %v10704_v28  ;;  %v826_v58 = vld [vmem:[#allocation3 + $0x1690] sm:$0xff] }
 0x344   :  { %7088 = vmatpush1.bf16.msra.mxu1 %v10449_v13  ;;  %v12448_v22 = vsub.s32 %v7302_v31, %v12291_v44  ;;  %v10498_v13 = vcombine.high %v547_v53, %v551_v5  ;;  %v838_v31 = vld [vmem:[#allocation3 + $0x16f0] sm:$0xff] }
 0x345   :  { %7089 = vmatprep.subr.bf16.mxu1 %v10458_v40 }
 0x346   :  { %6842 = vmatpush1.bf16.msra.mxu0 %v10703_v37  ;;  %v12454_v37 = vrot.slane %v7298_v29, %v12448_v22  ;;  %v563_v29 = vld [vmem:[#allocation3 + $0xe58] sm:$0xff] }
 0x347   :  { %6843 = vmatprep.subr.bf16.mxu0 %v10712_v41  ;;  %v10752_v41 = vcombine.high %v802_v25, %v806_v27 }
 0x348   :  { %7090 = vmatpush1.bf16.msra.mxu1 %v10457_v49 }
 0x349   :  { %7091 = vmatprep.subr.bf16.mxu1 %v10466_v51  ;;  %v10751_v51 = vcombine.low %v802_v25, %v806_v27  ;;  %v599_v25 = vld [vmem:[#allocation3 + $0xf78] sm:$0xff]  ;;  %v850_v27 = vld [vmem:[#allocation3 + $0x1750] sm:$0xff] }
 0x34a   :  { %6844 = vmatpush1.bf16.msra.mxu0 %v10711_v48  ;;  %v10497_v48 = vcombine.low %v547_v53, %v551_v5 }
 0x34b   :  { %6845 = vmatprep.subr.bf16.mxu0 %v10720_v50  ;;  %v567_v50 = vld [vmem:[#allocation3 + $0xe78] sm:$0xff] }
 0x34c   :  { %7092 = vmatpush1.bf16.msra.mxu1 %v10465_v56  ;;  %v10514_v56 = vcombine.high %v563_v29, %v567_v50  ;;  %v10513_v62 = vcombine.low %v563_v29, %v567_v50  ;;  %v866_v29 = vld [vmem:[#allocation3 + $0x17d0] sm:$0xff] }
 0x34d   :  { %7093 = vmatprep.subr.bf16.mxu1 %v10474_v18  ;;  %v571_v18 = vld [vmem:[#allocation3 + $0xe98] sm:$0xff]  ;;  %v870_v50 = vld [vmem:[#allocation3 + $0x17f0] sm:$0xff] }
 0x34e   :  { %6846 = vmatpush1.bf16.msra.mxu0 %v10719_v57  ;;  %v10768_v57 = vcombine.high %v818_v52, %v822_v9  ;;  %v10522_v2 = vcombine.high %v571_v18, %v575_v60  ;;  %v10807_v9 = vcombine.low %v858_v42, %v862_v43 }
 0x34f   :  { %6847 = vmatprep.subr.bf16.mxu0 %v10728_v61  ;;  %v830_v61 = vld [vmem:[#allocation3 + $0x16b0] sm:$0xff] }
 0x350   :  { %7094 = vmatpush1.bf16.msra.mxu1 %v10473_v6  ;;  %v10776_v3 = vcombine.high %v826_v58, %v830_v61  ;;  %v579_v6 = vld [vmem:[#allocation3 + $0xed8] sm:$0xff]  ;;  %v10775_v14 = vcombine.low %v826_v58, %v830_v61  ;;  %v10815_v61 = vcombine.low %v866_v29, %v870_v50 }
 0x351   :  { %7095 = vmatprep.subr.bf16.mxu1 %v10482_v11  ;;  %v834_v11 = vld [vmem:[#allocation3 + $0x16d0] sm:$0xff] }
 0x352   :  { %6848 = vmatpush1.bf16.msra.mxu0 %v10727_v7  ;;  %v6627_v59 = vpop.f32.mrb[4].mxu1  ;;  %v583_v7 = vld [vmem:[#allocation3 + $0xef8] sm:$0xff]  ;;  %v10784_v16 = vcombine.high %v834_v11, %v838_v31 }
 0x353   :  { %6849 = vmatprep.subr.bf16.mxu0 %v10736_v12  ;;  %v6629_v24 = vpop.f32.mrb[5].mxu1  ;;  %v10521_v12 = vcombine.low %v571_v18, %v575_v60  ;;  %v10530_v15 = vcombine.high %v579_v6, %v583_v7  ;;  %v874_v18 = vld [vmem:[#allocation3 + $0x1810] sm:$0xff] }
 0x354   :  { %v7299_v28 = vcombine.low %v6627_v59, %v6629_v24  ;;  %v6631_v63 = vpop.f32.mrb[6].mxu1  ;;  %7096 = vmatpush1.bf16.msra.mxu1 %v10481_v19  ;;  %v591_v19 = vld [vmem:[#allocation3 + $0xf38] sm:$0xff]  ;;  %v10529_v59 = vcombine.low %v579_v6, %v583_v7  ;;  %v878_v60 = vld [vmem:[#allocation3 + $0x1830] sm:$0xff] }
 0x355   :  { %v6632_v35 = vpop.f32.mrb[7].mxu1  ;;  %7097 = vmatprep.subr.bf16.mxu1 %v10490_v33  ;;  %v846_v33 = vld [vmem:[#allocation3 + $0x1730] sm:$0xff]  ;;  %v10538_v53 = vcombine.high %v587_v17, %v591_v19  ;;  %v595_v24 = vld [vmem:[#allocation3 + $0xf58] sm:$0xff]  ;;  %v10537_v63 = vcombine.low %v587_v17, %v591_v19 }
 0x356   :  { %6850 = vmatpush1.bf16.msra.mxu0 %v10735_v21  ;;  %v12457_v40 = vrot.slane %v7299_v28, %v12448_v22  ;;  %v842_v21 = vld [vmem:[#allocation3 + $0x1710] sm:$0xff]  ;;  %v10546_v35 = vcombine.high %v595_v24, %v599_v25  ;;  %v10545_v45 = vcombine.low %v595_v24, %v599_v25 }
 0x357   :  { %6851 = vmatprep.subr.bf16.mxu0 %v10744_v38  ;;  %v10783_v38 = vcombine.low %v834_v11, %v838_v31  ;;  %v10792_v5 = vcombine.high %v842_v21, %v846_v33  ;;  %v854_v28 = vld [vmem:[#allocation3 + $0x1770] sm:$0xff]  ;;  %v10823_v31 = vcombine.low %v874_v18, %v878_v60 }
 0x358   :  { %v7314_v49 = vcombine.low %v12454_v37, %v12457_v40  ;;  %7098 = vmatpush1.bf16.msra.mxu1 %v10489_v32  ;;  %v10791_v32 = vcombine.low %v842_v21, %v846_v33  ;;  %v10799_v47 = vcombine.low %v850_v27, %v854_v28  ;;  %v882_v6 = vld [vmem:[#allocation3 + $0x1850] sm:$0xff] }
 0x359   :  { %7099 = vmatprep.subr.bf16.mxu1 %v10498_v13  ;;  %v603_v13 = vld [vmem:[#allocation3 + $0xf98] sm:$0xff]  ;;  %v886_v7 = vld [vmem:[#allocation3 + $0x1870] sm:$0xff] }
 0x35a   :  { %6852 = vmatpush1.bf16.msra.mxu0 %v10743_v36  ;;  %v10800_v36 = vcombine.high %v850_v27, %v854_v28  ;;  %v890_v17 = vld [vmem:[#allocation3 + $0x1890] sm:$0xff]  ;;  %v10831_v33 = vcombine.low %v882_v6, %v886_v7 }
 0x35b   :  { %6853 = vmatprep.subr.bf16.mxu0 %v10752_v41  ;;  %v607_v41 = vld [vmem:[#allocation3 + $0xfb8] sm:$0xff]  ;;  %v894_v19 = vld [vmem:[#allocation3 + $0x18b0] sm:$0xff] }
 0x35c   :  { %7100 = vmatpush1.bf16.msra.mxu1 %v10497_v48  ;;  %v10554_v48 = vcombine.high %v603_v13, %v607_v41  ;;  %v10553_v52 = vcombine.low %v603_v13, %v607_v41  ;;  %v898_v24 = vld [vmem:[#allocation3 + $0x18d0] sm:$0xff]  ;;  %v10839_v27 = vcombine.low %v890_v17, %v894_v19 }
 0x35d   :  { %7101 = vmatprep.subr.bf16.mxu1 %v10506_v1  ;;  %v611_v1 = vld [vmem:[#allocation3 + $0xfd8] sm:$0xff]  ;;  %v902_v25 = vld [vmem:[#allocation3 + $0x18f0] sm:$0xff] }
 0x35e   :  { %6854 = vmatpush1.bf16.msra.mxu0 %v10751_v51  ;;  %v10808_v51 = vcombine.high %v858_v42, %v862_v43  ;;  %v910_v13 = vld [vmem:[#allocation3 + $0x1930] sm:$0xff]  ;;  %v10847_v42 = vcombine.low %v898_v24, %v902_v25 }
 0x35f   :  { %6855 = vmatprep.subr.bf16.mxu0 %v10760_v4  ;;  %v615_v4 = vld [vmem:[#allocation3 + $0xff8] sm:$0xff] }
 0x360   :  { %7102 = vmatpush1.bf16.msra.mxu1 %v10505_v54  ;;  %v10562_v54 = vcombine.high %v611_v1, %v615_v4  ;;  %v10561_v58 = vcombine.low %v611_v1, %v615_v4 }
 0x361   :  { %7103 = vmatprep.subr.bf16.mxu1 %v10514_v56  ;;  %v619_v56 = vld [vmem:[#allocation3 + $0x1018] sm:$0xff] }
 0x362   :  { %6856 = vmatpush1.bf16.msra.mxu0 %v10759_v55  ;;  %v10816_v55 = vcombine.high %v866_v29, %v870_v50 }
 0x363   :  { %6857 = vmatprep.subr.bf16.mxu0 %v10768_v57  ;;  %v623_v57 = vld [vmem:[#allocation3 + $0x1038] sm:$0xff] }
 0x364   :  { %7104 = vmatpush1.bf16.msra.mxu1 %v10513_v62  ;;  %v10570_v62 = vcombine.high %v619_v56, %v623_v57  ;;  %v10569_v11 = vcombine.low %v619_v56, %v623_v57 }
 0x365   :  { %7105 = vmatprep.subr.bf16.mxu1 %v10522_v2  ;;  %v627_v2 = vld [vmem:[#allocation3 + $0x1058] sm:$0xff] }
 0x366   :  { %6858 = vmatpush1.bf16.msra.mxu0 %v10767_v0  ;;  %v10824_v0 = vcombine.high %v874_v18, %v878_v60 }
 0x367   :  { %6859 = vmatprep.subr.bf16.mxu0 %v10776_v3  ;;  %v631_v3 = vld [vmem:[#allocation3 + $0x1078] sm:$0xff] }
 0x368   :  { %7106 = vmatpush1.bf16.msra.mxu1 %v10521_v12  ;;  %v10578_v12 = vcombine.high %v627_v2, %v631_v3  ;;  %v10577_v21 = vcombine.low %v627_v2, %v631_v3 }
 0x369   :  { %7107 = vmatprep.subr.bf16.mxu1 %v10530_v15  ;;  %v635_v15 = vld [vmem:[#allocation3 + $0x1098] sm:$0xff] }
 0x36a   :  { %6860 = vmatpush1.bf16.msra.mxu0 %v10775_v14  ;;  %v10832_v14 = vcombine.high %v882_v6, %v886_v7 }
 0x36b   :  { %6861 = vmatprep.subr.bf16.mxu0 %v10784_v16  ;;  %v639_v16 = vld [vmem:[#allocation3 + $0x10b8] sm:$0xff] }
 0x36c   :  { %7108 = vmatpush1.bf16.msra.mxu1 %v10529_v59  ;;  %v10586_v59 = vcombine.high %v635_v15, %v639_v16 }
 0x36d   :  { %7109 = vmatprep.subr.bf16.mxu1 %v10538_v53  ;;  %v643_v53 = vld [vmem:[#allocation3 + $0x10d8] sm:$0xff] }
 0x36e   :  { %6862 = vmatpush1.bf16.msra.mxu0 %v10783_v38  ;;  %v10840_v38 = vcombine.high %v890_v17, %v894_v19 }
 0x36f   :  { %6863 = vmatprep.subr.bf16.mxu0 %v10792_v5  ;;  %v647_v5 = vld [vmem:[#allocation3 + $0x10f8] sm:$0xff] }
 0x370   :  { %7110 = vmatpush1.bf16.msra.mxu1 %v10537_v63  ;;  %v10594_v28 = vcombine.high %v643_v53, %v647_v5  ;;  %v10848_v63 = vcombine.high %v898_v24, %v902_v25  ;;  %v10593_v41 = vcombine.low %v643_v53, %v647_v5 }
 0x371   :  { %7111 = vmatprep.subr.bf16.mxu1 %v10546_v35  ;;  %v655_v35 = vld [vmem:[#allocation3 + $0x1138] sm:$0xff] }
 0x372   :  { %6864 = vmatpush1.bf16.msra.mxu0 %v10791_v32  ;;  %v651_v32 = vld [vmem:[#allocation3 + $0x1118] sm:$0xff] }
 0x373   :  { %6865 = vmatprep.subr.bf16.mxu0 %v10800_v36  ;;  %v906_v36 = vld [vmem:[#allocation3 + $0x1910] sm:$0xff]  ;;  %v10602_v43 = vcombine.high %v651_v32, %v655_v35  ;;  %v10601_v1 = vcombine.low %v651_v32, %v655_v35 }
 0x374   :  { %7112 = vmatpush1.bf16.msra.mxu1 %v10545_v45  ;;  %v659_v45 = vld [vmem:[#allocation3 + $0x1158] sm:$0xff]  ;;  %v10855_v4 = vcombine.low %v906_v36, %v910_v13 }
 0x375   :  { %7113 = vmatprep.subr.bf16.mxu1 %v10554_v48  ;;  %v914_v48 = vld [vmem:[#allocation3 + $0x1950] sm:$0xff] }
 0x376   :  { %6866 = vmatpush1.bf16.msra.mxu0 %v10799_v47  ;;  %v663_v47 = vld [vmem:[#allocation3 + $0x1178] sm:$0xff] }
 0x377   :  { %6867 = vmatprep.subr.bf16.mxu0 %v10808_v51  ;;  %v918_v51 = vld [vmem:[#allocation3 + $0x1970] sm:$0xff]  ;;  %v10610_v29 = vcombine.high %v659_v45, %v663_v47  ;;  %v10609_v56 = vcombine.low %v659_v45, %v663_v47 }
 0x378   :  { %7114 = vmatpush1.bf16.msra.mxu1 %v10553_v52  ;;  %v10864_v50 = vcombine.high %v914_v48, %v918_v51  ;;  %v667_v52 = vld [vmem:[#allocation3 + $0x1198] sm:$0xff]  ;;  %v10863_v57 = vcombine.low %v914_v48, %v918_v51 }
 0x379   :  { %7115 = vmatprep.subr.bf16.mxu1 %v10562_v54  ;;  %v922_v54 = vld [vmem:[#allocation3 + $0x1990] sm:$0xff] }
 0x37a   :  { %6868 = vmatpush1.bf16.msra.mxu0 %v10807_v9  ;;  %v671_v9 = vld [vmem:[#allocation3 + $0x11b8] sm:$0xff] }
 0x37b   :  { %6869 = vmatprep.subr.bf16.mxu0 %v10816_v55  ;;  %v926_v55 = vld [vmem:[#allocation3 + $0x19b0] sm:$0xff]  ;;  %v10618_v18 = vcombine.high %v667_v52, %v671_v9  ;;  %v10617_v2 = vcombine.low %v667_v52, %v671_v9 }
 0x37c   :  { %7116 = vmatpush1.bf16.msra.mxu1 %v10561_v58  ;;  %v10872_v60 = vcombine.high %v922_v54, %v926_v55  ;;  %v675_v58 = vld [vmem:[#allocation3 + $0x11d8] sm:$0xff]  ;;  %v10871_v3 = vcombine.low %v922_v54, %v926_v55 }
 0x37d   :  { %7126 = vmatprep.subr.bf16.mxu1 %v10570_v62  ;;  %v930_v62 = vld [vmem:[#allocation3 + $0x19d0] sm:$0xff] }
 0x37e   :  { %6870 = vmatpush1.bf16.msra.mxu0 %v10815_v61  ;;  %v679_v61 = vld [vmem:[#allocation3 + $0x11f8] sm:$0xff] }
 0x37f   :  { %6880 = vmatprep.subr.bf16.mxu0 %v10824_v0  ;;  %7118 = vmatmul.mubr.bf16.vlgmr.msra.gmra.mrb[8].mxu1 %v12359_v10  ;;  %v10585_v10 = vcombine.low %v635_v15, %v639_v16  ;;  %v934_v0 = vld [vmem:[#allocation3 + $0x19f0] sm:$0xff]  ;;  %v10626_v6 = vcombine.high %v675_v58, %v679_v61  ;;  %v10625_v15 = vcombine.low %v675_v58, %v679_v61 }
 0x380   :  { %7127 = vmatpush1.bf16.msra.mxu1 %v10569_v11  ;;  %7158 = vmatprep.mubr.bf16.mxu1 %v12362_v20  ;;  %v10856_v20 = vcombine.high %v906_v36, %v910_v13  ;;  %v10880_v7 = vcombine.high %v930_v62, %v934_v0  ;;  %v683_v11 = vld [vmem:[#allocation3 + $0x1218] sm:$0xff]  ;;  %v10879_v16 = vcombine.low %v930_v62, %v934_v0 }
 0x381   :  { %6872 = vmatmul.mubr.bf16.vlgmr.msra.gmra.mrb[4].mxu0 %v12394_v23  ;;  %7128 = vmatprep.subr.bf16.mxu1 %v10578_v12  ;;  %v938_v12 = vld [vmem:[#allocation3 + $0x1a10] sm:$0xff] }
 0x382   :  { %6881 = vmatpush1.bf16.msra.mxu0 %v10823_v31  ;;  %6912 = vmatprep.mubr.bf16.mxu0 %v12397_v30  ;;  %v687_v31 = vld [vmem:[#allocation3 + $0x1238] sm:$0xff] }
 0x383   :  { %6882 = vmatprep.subr.bf16.mxu0 %v10832_v14  ;;  %v942_v14 = vld [vmem:[#allocation3 + $0x1a30] sm:$0xff]  ;;  %v10634_v17 = vcombine.high %v683_v11, %v687_v31  ;;  %v10633_v53 = vcombine.low %v683_v11, %v687_v31 }
 0x384   :  { %7129 = vmatpush1.bf16.msra.mxu1 %v10577_v21  ;;  %v10888_v19 = vcombine.high %v938_v12, %v942_v14  ;;  %v691_v21 = vld [vmem:[#allocation3 + $0x1258] sm:$0xff]  ;;  %v10887_v5 = vcombine.low %v938_v12, %v942_v14 }
 0x385   :  { %7130 = vmatprep.subr.bf16.mxu1 %v10586_v59  ;;  %v946_v59 = vld [vmem:[#allocation3 + $0x1a50] sm:$0xff] }
 0x386   :  { %6883 = vmatpush1.bf16.msra.mxu0 %v10831_v33  ;;  %v695_v33 = vld [vmem:[#allocation3 + $0x1278] sm:$0xff] }
 0x387   :  { %6884 = vmatprep.subr.bf16.mxu0 %v10840_v38  ;;  %v950_v38 = vld [vmem:[#allocation3 + $0x1a70] sm:$0xff]  ;;  %v10642_v24 = vcombine.high %v691_v21, %v695_v33  ;;  %v10641_v32 = vcombine.low %v691_v21, %v695_v33 }
 0x388   :  { %7131 = vmatpush1.bf16.msra.mxu1 %v10585_v10  ;;  %v10896_v25 = vcombine.high %v946_v59, %v950_v38  ;;  %v699_v10 = vld [vmem:[#allocation3 + $0x1298] sm:$0xff]  ;;  %v10895_v35 = vcombine.low %v946_v59, %v950_v38 }
 0x389   :  { %7132 = vmatprep.subr.bf16.mxu1 %v10594_v28  ;;  %v954_v28 = vld [vmem:[#allocation3 + $0x1a90] sm:$0xff] }
 0x38a   :  { %6885 = vmatpush1.bf16.msra.mxu0 %v10839_v27  ;;  %v703_v27 = vld [vmem:[#allocation3 + $0x12b8] sm:$0xff] }
 0x38b   :  { %6886 = vmatprep.subr.bf16.mxu0 %v10848_v63  ;;  %v958_v63 = vld [vmem:[#allocation3 + $0x1ab0] sm:$0xff]  ;;  %v10650_v36 = vcombine.high %v699_v10, %v703_v27  ;;  %v10649_v45 = vcombine.low %v699_v10, %v703_v27 }
 0x38c   :  { %7133 = vmatpush1.bf16.msra.mxu1 %v10593_v41  ;;  %v10904_v13 = vcombine.high %v954_v28, %v958_v63  ;;  %v707_v41 = vld [vmem:[#allocation3 + $0x12d8] sm:$0xff]  ;;  %v10903_v47 = vcombine.low %v954_v28, %v958_v63 }
 0x38d   :  { %7134 = vmatprep.subr.bf16.mxu1 %v10602_v43  ;;  %v962_v43 = vld [vmem:[#allocation3 + $0x1ad0] sm:$0xff] }
 0x38e   :  { %6887 = vmatpush1.bf16.msra.mxu0 %v10847_v42  ;;  %v711_v42 = vld [vmem:[#allocation3 + $0x12f8] sm:$0xff] }
 0x38f   :  { %6888 = vmatprep.subr.bf16.mxu0 %v10856_v20  ;;  %v966_v20 = vld [vmem:[#allocation3 + $0x1af0] sm:$0xff]  ;;  %v10658_v48 = vcombine.high %v707_v41, %v711_v42  ;;  %v10657_v52 = vcombine.low %v707_v41, %v711_v42  ;;  %v7355_v41 = vsub.s32 2, %v12291_v44  ;;  %v7359_v42 = vsub.s32 3, %v12291_v44 }
 0x390   :  { %7135 = vmatpush1.bf16.msra.mxu1 %v10601_v1  ;;  %v10912_v51 = vcombine.high %v962_v43, %v966_v20  ;;  %v715_v1 = vld [vmem:[#allocation3 + $0x1318] sm:$0xff]  ;;  %v10911_v9 = vcombine.low %v962_v43, %v966_v20  ;;  %v1010_v43 = vld [vmem:[#allocation3 + $0x1c50] sm:$0xff] }
 0x391   :  { %7136 = vmatprep.subr.bf16.mxu1 %v10610_v29  ;;  %v970_v29 = vld [vmem:[#allocation3 + $0x1b10] sm:$0xff] }
 0x392   :  { %6889 = vmatpush1.bf16.msra.mxu0 %v10855_v4  ;;  %v719_v4 = vld [vmem:[#allocation3 + $0x1338] sm:$0xff]  ;;  %v1014_v20 = vld [vmem:[#allocation3 + $0x1c70] sm:$0xff] }
 0x393   :  { %6890 = vmatprep.subr.bf16.mxu0 %v10864_v50  ;;  %v974_v50 = vld [vmem:[#allocation3 + $0x1b30] sm:$0xff]  ;;  %v10666_v54 = vcombine.high %v715_v1, %v719_v4  ;;  %v10665_v58 = vcombine.low %v715_v1, %v719_v4  ;;  %v10960_v1 = vcombine.high %v1010_v43, %v1014_v20  ;;  %v763_v4 = vld [vmem:[#allocation3 + $0x1498] sm:$0xff] }
 0x394   :  { %7137 = vmatpush1.bf16.msra.mxu1 %v10609_v56  ;;  %v10920_v55 = vcombine.high %v970_v29, %v974_v50  ;;  %v723_v56 = vld [vmem:[#allocation3 + $0x1358] sm:$0xff]  ;;  %v10919_v61 = vcombine.low %v970_v29, %v974_v50 }
 0x395   :  { %7138 = vmatprep.subr.bf16.mxu1 %v10618_v18  ;;  %v978_v18 = vld [vmem:[#allocation3 + $0x1b50] sm:$0xff]  ;;  %v767_v29 = vld [vmem:[#allocation3 + $0x14b8] sm:$0xff] }
 0x396   :  { %6891 = vmatpush1.bf16.msra.mxu0 %v10863_v57  ;;  %v727_v57 = vld [vmem:[#allocation3 + $0x1378] sm:$0xff] }
 0x397   :  { %6892 = vmatprep.subr.bf16.mxu0 %v10872_v60  ;;  %v982_v60 = vld [vmem:[#allocation3 + $0x1b70] sm:$0xff]  ;;  %v10674_v62 = vcombine.high %v723_v56, %v727_v57  ;;  %v10673_v11 = vcombine.low %v723_v56, %v727_v57 }
 0x398   :  { %7139 = vmatpush1.bf16.msra.mxu1 %v10617_v2  ;;  %v10928_v0 = vcombine.high %v978_v18, %v982_v60  ;;  %v731_v2 = vld [vmem:[#allocation3 + $0x1398] sm:$0xff]  ;;  %v10927_v31 = vcombine.low %v978_v18, %v982_v60  ;;  %v1022_v56 = vld [vmem:[#allocation3 + $0x1cb0] sm:$0xff]  ;;  %v10959_v18 = vcombine.low %v1010_v43, %v1014_v20  ;;  %v10714_v60 = vcombine.high %v763_v4, %v767_v29 }
 0x399   :  { %7140 = vmatprep.subr.bf16.mxu1 %v10626_v6  ;;  %v986_v6 = vld [vmem:[#allocation3 + $0x1b90] sm:$0xff] }
 0x39a   :  { %6893 = vmatpush1.bf16.msra.mxu0 %v10871_v3  ;;  %v735_v3 = vld [vmem:[#allocation3 + $0x13b8] sm:$0xff]  ;;  %v1050_v20 = vld [vmem:[#allocation3 + $0x1d90] sm:$0xff] }
 0x39b   :  { %6894 = vmatprep.subr.bf16.mxu0 %v10880_v7  ;;  %v990_v7 = vld [vmem:[#allocation3 + $0x1bb0] sm:$0xff]  ;;  %v10682_v12 = vcombine.high %v731_v2, %v735_v3  ;;  %v10681_v21 = vcombine.low %v731_v2, %v735_v3 }
 0x39c   :  { %7141 = vmatpush1.bf16.msra.mxu1 %v10625_v15  ;;  %v10936_v14 = vcombine.high %v986_v6, %v990_v7  ;;  %v739_v15 = vld [vmem:[#allocation3 + $0x13d8] sm:$0xff]  ;;  %v10935_v33 = vcombine.low %v986_v6, %v990_v7  ;;  %v1026_v3 = vld [vmem:[#allocation3 + $0x1cd0] sm:$0xff]  ;;  %v10713_v6 = vcombine.low %v763_v4, %v767_v29 }
 0x39d   :  { %7142 = vmatprep.subr.bf16.mxu1 %v10634_v17  ;;  %v994_v17 = vld [vmem:[#allocation3 + $0x1bd0] sm:$0xff]  ;;  %v803_v4 = vld [vmem:[#allocation3 + $0x15d8] sm:$0xff] }
 0x39e   :  { %6895 = vmatpush1.bf16.msra.mxu0 %v10879_v16  ;;  %v743_v16 = vld [vmem:[#allocation3 + $0x13f8] sm:$0xff] }
 0x39f   :  { %6896 = vmatprep.subr.bf16.mxu0 %v10888_v19  ;;  %v998_v19 = vld [vmem:[#allocation3 + $0x1bf0] sm:$0xff]  ;;  %v10690_v59 = vcombine.high %v739_v15, %v743_v16  ;;  %v10689_v10 = vcombine.low %v739_v15, %v743_v16  ;;  %v807_v29 = vld [vmem:[#allocation3 + $0x15f8] sm:$0xff] }
 0x3a0   :  { %7143 = vmatpush1.bf16.msra.mxu1 %v10633_v53  ;;  %v10944_v38 = vcombine.high %v994_v17, %v998_v19  ;;  %v747_v53 = vld [vmem:[#allocation3 + $0x1418] sm:$0xff]  ;;  %v10943_v27 = vcombine.low %v994_v17, %v998_v19  ;;  %v1034_v17 = vld [vmem:[#allocation3 + $0x1d10] sm:$0xff]  ;;  %v10754_v40 = vcombine.high %v803_v4, %v807_v29 }
 0x3a1   :  { %7144 = vmatprep.subr.bf16.mxu1 %v10642_v24  ;;  %v1002_v24 = vld [vmem:[#allocation3 + $0x1c10] sm:$0xff] }
 0x3a2   :  { %6897 = vmatpush1.bf16.msra.mxu0 %v10887_v5  ;;  %v751_v5 = vld [vmem:[#allocation3 + $0x1438] sm:$0xff]  ;;  %v1038_v19 = vld [vmem:[#allocation3 + $0x1d30] sm:$0xff] }
 0x3a3   :  { %6898 = vmatprep.subr.bf16.mxu0 %v10896_v25  ;;  %v1006_v25 = vld [vmem:[#allocation3 + $0x1c30] sm:$0xff]  ;;  %v10698_v28 = vcombine.high %v747_v53, %v751_v5 }
 0x3a4   :  { %7145 = vmatpush1.bf16.msra.mxu1 %v10641_v32  ;;  %v10952_v63 = vcombine.high %v1002_v24, %v1006_v25  ;;  %v755_v32 = vld [vmem:[#allocation3 + $0x1458] sm:$0xff] }
 0x3a5   :  { %7146 = vmatprep.subr.bf16.mxu1 %v10650_v36  ;;  %v12466_v36 = vsub.s32 0, %v12291_v44 }
 0x3a6   :  { %6899 = vmatpush1.bf16.msra.mxu0 %v10895_v35  ;;  %v759_v35 = vld [vmem:[#allocation3 + $0x1478] sm:$0xff] }
 0x3a7   :  { %6900 = vmatprep.subr.bf16.mxu0 %v10904_v13  ;;  %v12469_v13 = vsub.s32 1, %v12291_v44  ;;  %v10705_v57 = vcombine.low %v755_v32, %v759_v35 }
 0x3a8   :  { %7147 = vmatpush1.bf16.msra.mxu1 %v10649_v45  ;;  %v7343_v45 = vld [vmem:[#allocation6] sm:$0xff] }
 0x3a9   :  { %7148 = vmatprep.subr.bf16.mxu1 %v10658_v48  ;;  %v10951_v48 = vcombine.low %v1002_v24, %v1006_v25  ;;  %v7348_v50 = vrot.slane %v7343_v45, %v12466_v36  ;;  %v1042_v24 = vld [vmem:[#allocation3 + $0x1d50] sm:$0xff] }
 0x3aa   :  { %6901 = vmatpush1.bf16.msra.mxu0 %v10903_v47  ;;  %v10697_v47 = vcombine.low %v747_v53, %v751_v5  ;;  %v791_v53 = vld [vmem:[#allocation3 + $0x1578] sm:$0xff]  ;;  %v1046_v25 = vld [vmem:[#allocation3 + $0x1d70] sm:$0xff] }
 0x3ab   :  { %6902 = vmatprep.subr.bf16.mxu0 %v10912_v51  ;;  %v10706_v51 = vcombine.high %v755_v32, %v759_v35  ;;  %v795_v32 = vld [vmem:[#allocation3 + $0x1598] sm:$0xff] }
 0x3ac   :  { %7149 = vmatpush1.bf16.msra.mxu1 %v10657_v52  ;;  %v7352_v52 = vrot.slane %v7343_v45, %v12469_v13  ;;  %v799_v35 = vld [vmem:[#allocation3 + $0x15b8] sm:$0xff] }
 0x3ad   :  { %7150 = vmatprep.subr.bf16.mxu1 %v10666_v54  ;;  %v7360_v54 = vrot.slane %v7343_v45, %v7359_v42 }
 0x3ae   :  { %6903 = vmatpush1.bf16.msra.mxu0 %v10911_v9  ;;  %v7356_v9 = vrot.slane %v7343_v45, %v7355_v41  ;;  %v1054_v45 = vld [vmem:[#allocation3 + $0x1db0] sm:$0xff] }
 0x3af   :  { %6904 = vmatprep.subr.bf16.mxu0 %v10920_v55  ;;  %v1018_v55 = vld [vmem:[#allocation3 + $0x1c90] sm:$0xff]  ;;  %v10999_v37 = vcombine.low %v1050_v20, %v1054_v45 }
 0x3b0   :  { %7151 = vmatpush1.bf16.msra.mxu1 %v10665_v58  ;;  %v10968_v58 = vcombine.high %v1018_v55, %v1022_v56  ;;  %v7378_v2 = vcombine.low %v7356_v9, %v7360_v54  ;;  %v10967_v7 = vcombine.low %v1018_v55, %v1022_v56  ;;  %v1062_v9 = vld [vmem:[#allocation3 + $0x1df0] sm:$0xff]  ;;  %v10745_v54 = vcombine.low %v795_v32, %v799_v35  ;;  %v811_v55 = vld [vmem:[#allocation3 + $0x1618] sm:$0xff] }
 0x3b1   :  { %7152 = vmatprep.subr.bf16.mxu1 %v10674_v62  ;;  %v775_v62 = vld [vmem:[#allocation3 + $0x14f8] sm:$0xff] }
 0x3b2   :  { %6905 = vmatpush1.bf16.msra.mxu0 %v10919_v61  ;;  %v771_v61 = vld [vmem:[#allocation3 + $0x14d8] sm:$0xff]  ;;  %v7392_v16 = vrot.slane %v7378_v2, %v12448_v22 }
 0x3b3   :  { %6906 = vmatprep.subr.bf16.mxu0 %v10928_v0  ;;  %v7377_v0 = vcombine.low %v7348_v50, %v7352_v52  ;;  %v1058_v52 = vld [vmem:[#allocation3 + $0x1dd0] sm:$0xff]  ;;  %v815_v56 = vld [vmem:[#allocation3 + $0x1638] sm:$0xff] }
 0x3b4   :  { %7153 = vmatpush1.bf16.msra.mxu1 %v10673_v11  ;;  %v10722_v11 = vcombine.high %v771_v61, %v775_v62  ;;  %v823_v2 = vld [vmem:[#allocation3 + $0x1678] sm:$0xff] }
 0x3b5   :  { %7154 = vmatprep.subr.bf16.mxu1 %v10682_v12  ;;  %v779_v12 = vld [vmem:[#allocation3 + $0x1518] sm:$0xff]  ;;  %v7385_v15 = vrot.slane %v7377_v0, %v12448_v22 }
 0x3b6   :  { %6907 = vmatpush1.bf16.msra.mxu0 %v10927_v31  ;;  %v819_v0 = vld [vmem:[#allocation3 + $0x1658] sm:$0xff] }
 0x3b7   :  { %6908 = vmatprep.subr.bf16.mxu0 %v10936_v14  ;;  %v783_v14 = vld [vmem:[#allocation3 + $0x1538] sm:$0xff]  ;;  %v7393_v5 = vcombine.low %v7385_v15, %v7392_v16  ;;  %v11530_v15 = vld [vmem:[%s13597_s3 + $0x20] ss:$16 sps:$4 sm:$0xff]  }
 0x3b8   :  { %7155 = vmatpush1.bf16.msra.mxu1 %v10681_v21  ;;  %v10721_v21 = vcombine.low %v771_v61, %v775_v62  ;;  %v11529_v61 = vld [vmem:[%s13597_s3 + $0x4] ss:$16 sps:$4 sm:$0xff]  }
 0x3b9   :  { %7156 = vmatprep.subr.bf16.mxu1 %v10690_v59  ;;  %v10984_v59 = vcombine.high %v1034_v17, %v1038_v19  ;;  %v7413_v43 = vadd.f32 %v7393_v5, %v7314_v49  ;;  %v11008_v49 = vcombine.high %v1058_v52, %v1062_v9  ;;  %v847_v5 = vld [vmem:[#allocation3 + $0x1738] sm:$0xff] }
 0x3ba   :  { %6909 = vmatpush1.bf16.msra.mxu0 %v10935_v33  ;;  %v10730_v33 = vcombine.high %v779_v12, %v783_v14 }
 0x3bb   :  { %6910 = vmatprep.subr.bf16.mxu0 %v10944_v38  ;;  %v787_v38 = vld [vmem:[#allocation3 + $0x1558] sm:$0xff]  ;;  %v12488_v50 = vmax.f32 %v7413_v43, 0.0 }
 0x3bc   :  { %7157 = vmatpush1.bf16.msra.mxu1 %v10689_v10  ;;  %v10729_v10 = vcombine.low %v779_v12, %v783_v14  ;;  %v10769_v14 = vcombine.low %v819_v0, %v823_v2 }
 0x3bd   :  { %7167 = vmatprep.subr.bf16.mxu1 %v10698_v28  ;;  %v10738_v28 = vcombine.high %v787_v38, %v791_v53 }
 0x3be   :  { %6911 = vmatpush1.bf16.msra.mxu0 %v10943_v27  ;;  %v10983_v27 = vcombine.low %v1034_v17, %v1038_v19  ;;  %v11535_v17 = vld [vmem:[%s13597_s3 + $0x44] ss:$16 sps:$4 sm:$0xff]   ;;  %v835_v19 = vld [vmem:[#allocation3 + $0x16d8] sm:$0xff] }
 0x3bf   :  { %6921 = vmatprep.subr.bf16.mxu0 %v10952_v63  ;;  %7159 = vmatmul.mubr.bf16.vlgmr.msra.gmra.mrb[8].mxu1 %v12370_v39  ;;  %v1030_v39 = vld [vmem:[#allocation3 + $0x1cf0] sm:$0xff]  ;;  %v10992_v63 = vcombine.high %v1042_v24, %v1046_v25 }
 0x3c0   :  { %7168 = vmatpush1.bf16.msra.mxu1 %v10697_v47  ;;  %7199 = vmatprep.mubr.bf16.mxu1 %v12374_v46  ;;  %v10976_v31 = vcombine.high %v1026_v3, %v1030_v39  ;;  %v10975_v46 = vcombine.low %v1026_v3, %v1030_v39  ;;  %v10737_v47 = vcombine.low %v787_v38, %v791_v53  ;;  %v11527_v39 = vld [vmem:[%s13597_s3] ss:$16 sps:$4 sm:$0xff]   ;;  %v11538_v38 = vld [vmem:[%s13597_s3 + $0x64] ss:$16 sps:$4 sm:$0xff]   ;;  %v843_v53 = vld [vmem:[#allocation3 + $0x1718] sm:$0xff] }
 0x3c1   :  { %6913 = vmatmul.mubr.bf16.vlgmr.msra.gmra.mrb[4].mxu0 %v12405_v8  ;;  %7169 = vmatprep.subr.bf16.mxu1 %v10706_v51  ;;  %v10746_v51 = vcombine.high %v795_v32, %v799_v35  ;;  %v10761_v3 = vcombine.low %v811_v55, %v815_v56  ;;  %v10793_v32 = vcombine.low %v843_v53, %v847_v5  ;;  %v11539_v35 = vld [vmem:[%s13597_s3 + $0x80] ss:$16 sps:$4 sm:$0xff]  }
 0x3c2   :  { %6922 = vmatpush1.bf16.msra.mxu0 %v10951_v48  ;;  %6953 = vmatprep.mubr.bf16.mxu0 %v12178_v26  ;;  %v10991_v48 = vcombine.low %v1042_v24, %v1046_v25  ;;  %v11536_v25 = vld [vmem:[%s13597_s3 + $0x60] ss:$16 sps:$4 sm:$0xff]  }
 0x3c3   :  { %6923 = vmatprep.subr.bf16.mxu0 %v10960_v1  ;;  %v11000_v1 = vcombine.high %v1050_v20, %v1054_v45  ;;  %v11544_v20 = vld [vmem:[%s13597_s3 + $0xa4] ss:$16 sps:$4 sm:$0xff]   ;;  %v859_v45 = vld [vmem:[#allocation3 + $0x1798] sm:$0xff] }
 0x3c4   :  { %7170 = vmatpush1.bf16.msra.mxu1 %v10705_v57  ;;  %v12492_v57 = vrot.slane %v12488_v50, %v12448_v22 }
 0x3c5   :  { %7171 = vmatprep.subr.bf16.mxu1 %v10714_v60  ;;  %v11007_v60 = vcombine.low %v1058_v52, %v1062_v9  ;;  %v871_v52 = vld [vmem:[#allocation3 + $0x17f8] sm:$0xff] }
 0x3c6   :  { %6924 = vmatpush1.bf16.msra.mxu0 %v10959_v18  ;;  %v10753_v18 = vcombine.low %v803_v4, %v807_v29  ;;  %v7434_v62 = vcombine.high %v12492_v57, %v12492_v57  ;;  %v11547_v4 = vld [vmem:[%s13597_s3 + $0xc4] ss:$16 sps:$4 sm:$0xff]   ;;  %v867_v29 = vld [vmem:[#allocation3 + $0x17d8] sm:$0xff] }
 0x3c7   :  { %6925 = vmatprep.subr.bf16.mxu0 %v10968_v58  ;;  %v10762_v58 = vcombine.high %v811_v55, %v815_v56  ;;  %v879_v55 = vld [vmem:[#allocation3 + $0x1838] sm:$0xff]  ;;  %v10817_v56 = vcombine.low %v867_v29, %v871_v52 }
 0x3c8   :  { %7172 = vmatpush1.bf16.msra.mxu1 %v10713_v6  ;;  %v10770_v6 = vcombine.high %v819_v0, %v823_v2  ;;  %v12505_v12 = vpack.c.bf16 %v7434_v62, %v7434_v62  ;;  %v887_v62 = vld [vmem:[#allocation3 + $0x1878] sm:$0xff]  ;;  %v11551_v2 = vld [vmem:[%s13597_s3 + $0x100] ss:$16 sps:$4 sm:$0xff]  }
 0x3c9   :  { %7173 = vmatprep.subr.bf16.mxu1 %v10722_v11  ;;  %v827_v11 = vld [vmem:[#allocation3 + $0x1698] sm:$0xff] }
 0x3ca   :  { %6926 = vmatpush1.bf16.msra.mxu0 %v10967_v7  ;;  %v11532_v7 = vld [vmem:[%s13597_s3 + $0x24] ss:$16 sps:$4 sm:$0xff]  }
 0x3cb   :  { %6927 = vmatprep.subr.bf16.mxu0 %v10976_v31  ;;  %v831_v31 = vld [vmem:[#allocation3 + $0x16b8] sm:$0xff] }
 0x3cc   :  { %7174 = vmatpush1.bf16.msra.mxu1 %v10721_v21  ;;  %v10778_v16 = vcombine.high %v827_v11, %v831_v31  ;;  %v839_v21 = vld [vmem:[#allocation3 + $0x16f8] sm:$0xff] }
 0x3cd   :  { %7175 = vmatprep.subr.bf16.mxu1 %v10730_v33  ;;  %v11533_v33 = vld [vmem:[%s13597_s3 + $0x40] ss:$16 sps:$4 sm:$0xff]   ;;  %v10785_v24 = vcombine.low %v835_v19, %v839_v21 }
 0x3ce   :  { %6928 = vmatpush1.bf16.msra.mxu0 %v10975_v46  ;;  %v10777_v46 = vcombine.low %v827_v11, %v831_v31  ;;  %v11554_v31 = vld [vmem:[%s13597_s3 + $0x120] ss:$16 sps:$4 sm:$0xff]  }
 0x3cf   :  { %6929 = vmatprep.subr.bf16.mxu0 %v10984_v59  ;;  %v10786_v59 = vcombine.high %v835_v19, %v839_v21  ;;  %v11562_v21 = vld [vmem:[%s13597_s3 + $0x164] ss:$16 sps:$4 sm:$0xff]  }
 0x3d0   :  { %7176 = vmatpush1.bf16.msra.mxu1 %v10729_v10  ;;  %v10794_v10 = vcombine.high %v843_v53, %v847_v5  ;;  %v11565_v5 = vld [vmem:[%s13597_s3 + $0x184] ss:$16 sps:$4 sm:$0xff]  }
 0x3d1   :  { %7177 = vmatprep.subr.bf16.mxu1 %v10738_v28  ;;  %v851_v28 = vld [vmem:[#allocation3 + $0x1758] sm:$0xff] }
 0x3d2   :  { %6930 = vmatpush1.bf16.msra.mxu0 %v10983_v27  ;;  %v11541_v27 = vld [vmem:[%s13597_s3 + $0x84] ss:$16 sps:$4 sm:$0xff]  }
 0x3d3   :  { %6931 = vmatprep.subr.bf16.mxu0 %v10992_v63  ;;  %v855_v63 = vld [vmem:[#allocation3 + $0x1778] sm:$0xff] }
 0x3d4   :  { %7178 = vmatpush1.bf16.msra.mxu1 %v10737_v47  ;;  %v10802_v43 = vcombine.high %v851_v28, %v855_v63  ;;  %v863_v47 = vld [vmem:[#allocation3 + $0x17b8] sm:$0xff] }
 0x3d5   :  { %7179 = vmatprep.subr.bf16.mxu1 %v10746_v51  ;;  %v11542_v51 = vld [vmem:[%s13597_s3 + $0xa0] ss:$16 sps:$4 sm:$0xff]   ;;  %v10809_v9 = vcombine.low %v859_v45, %v863_v47 }
 0x3d6   :  { %6932 = vmatpush1.bf16.msra.mxu0 %v10991_v48  ;;  %v10801_v48 = vcombine.low %v851_v28, %v855_v63  ;;  %v11568_v63 = vld [vmem:[%s13597_s3 + $0x1a4] ss:$16 sps:$4 sm:$0xff]  }
 0x3d7   :  { %6933 = vmatprep.subr.bf16.mxu0 %v11000_v1  ;;  %v10810_v1 = vcombine.high %v859_v45, %v863_v47  ;;  %v11571_v47 = vld [vmem:[%s13597_s3 + $0x1c4] ss:$16 sps:$4 sm:$0xff]  }
 0x3d8   :  { %7180 = vmatpush1.bf16.msra.mxu1 %v10745_v54  ;;  %v11545_v54 = vld [vmem:[%s13597_s3 + $0xc0] ss:$16 sps:$4 sm:$0xff]  }
 0x3d9   :  { %7181 = vmatprep.subr.bf16.mxu1 %v10754_v40  ;;  %v11550_v40 = vld [vmem:[%s13597_s3 + $0xe4] ss:$16 sps:$4 sm:$0xff]  }
 0x3da   :  { %6934 = vmatpush1.bf16.msra.mxu0 %v10999_v37  ;;  %v10818_v37 = vcombine.high %v867_v29, %v871_v52  ;;  %v11569_v29 = vld [vmem:[%s13597_s3 + $0x1c0] ss:$16 sps:$4 sm:$0xff]  }
 0x3db   :  { %6935 = vmatprep.subr.bf16.mxu0 %v11008_v49  ;;  %v875_v49 = vld [vmem:[#allocation3 + $0x1818] sm:$0xff] }
 0x3dc   :  { %7182 = vmatpush1.bf16.msra.mxu1 %v10753_v18  ;;  %v11548_v18 = vld [vmem:[%s13597_s3 + $0xe0] ss:$16 sps:$4 sm:$0xff]   ;;  %v10825_v0 = vcombine.low %v875_v49, %v879_v55 }
 0x3dd   :  { %7183 = vmatprep.subr.bf16.mxu1 %v10762_v58  ;;  %v11553_v58 = vld [vmem:[%s13597_s3 + $0x104] ss:$16 sps:$4 sm:$0xff]  }
 0x3de   :  { %6936 = vmatpush1.bf16.msra.mxu0 %v11007_v60  ;;  %v10826_v60 = vcombine.high %v875_v49, %v879_v55  ;;  %v11572_v49 = vld [vmem:[%s13597_s3 + $0x1e0] ss:$16 sps:$4 sm:$0xff]  }
 0x3df   :  { %9027 = vmatprep.subr.bf16.mxu0 %v11529_v61  ;;  %v883_v61 = vld [vmem:[#allocation3 + $0x1858] sm:$0xff] }
 0x3e0   :  { %7184 = vmatpush1.bf16.msra.mxu1 %v10761_v3  ;;  %v10834_v3 = vcombine.high %v883_v61, %v887_v62  ;;  %v10833_v11 = vcombine.low %v883_v61, %v887_v62  ;;  %v11575_v62 = vld [vmem:[%s13597_s3 + $0x200] ss:$16 sps:$4 sm:$0xff]  }
 0x3e1   :  { %6954 = vmatmul.mubr.bf16.vlgmr.msra.gmra.mrb[4].mxu0 %v12413_v34  ;;  %7185 = vmatprep.subr.bf16.mxu1 %v10770_v6  ;;  %v891_v6 = vld [vmem:[#allocation3 + $0x1898] sm:$0xff] }
 0x3e2   :  { %9028 = vmatpush1.bf16.msra.mxu0 %v11527_v39  ;;  %9059 = vmatprep.mubr.bf16.mxu0 %v12505_v12  ;;  %v11556_v39 = vld [vmem:[%s13597_s3 + $0x124] ss:$16 sps:$4 sm:$0xff]  }
 0x3e3   :  { %9029 = vmatprep.subr.bf16.mxu0 %v11532_v7  ;;  %v895_v7 = vld [vmem:[#allocation3 + $0x18b8] sm:$0xff] }
 0x3e4   :  { %7186 = vmatpush1.bf16.msra.mxu1 %v10769_v14  ;;  %v10842_v14 = vcombine.high %v891_v6, %v895_v7 }
 0x3e5   :  { %7187 = vmatprep.subr.bf16.mxu1 %v10778_v16  ;;  %v899_v16 = vld [vmem:[#allocation3 + $0x18d8] sm:$0xff] }
 0x3e6   :  { %9030 = vmatpush1.bf16.msra.mxu0 %v11530_v15  ;;  %v11559_v15 = vld [vmem:[%s13597_s3 + $0x144] ss:$16 sps:$4 sm:$0xff]  }
 0x3e7   :  { %9031 = vmatprep.subr.bf16.mxu0 %v11535_v17  ;;  %v903_v17 = vld [vmem:[#allocation3 + $0x18f8] sm:$0xff] }
 0x3e8   :  { %7188 = vmatpush1.bf16.msra.mxu1 %v10777_v46  ;;  %v10850_v19 = vcombine.high %v899_v16, %v903_v17  ;;  %v907_v46 = vld [vmem:[#allocation3 + $0x1918] sm:$0xff] }
 0x3e9   :  { %7189 = vmatprep.subr.bf16.mxu1 %v10786_v59  ;;  %v10849_v59 = vcombine.low %v899_v16, %v903_v17  ;;  %v967_v16 = vld [vmem:[#allocation3 + $0x1af8] sm:$0xff] }
 0x3ea   :  { %9032 = vmatpush1.bf16.msra.mxu0 %v11533_v33  ;;  %v911_v33 = vld [vmem:[#allocation3 + $0x1938] sm:$0xff] }
 0x3eb   :  { %9033 = vmatprep.subr.bf16.mxu0 %v11538_v38  ;;  %v11560_v38 = vld [vmem:[%s13597_s3 + $0x160] ss:$16 sps:$4 sm:$0xff]   ;;  %v10858_v53 = vcombine.high %v907_v46, %v911_v33 }
 0x3ec   :  { %7190 = vmatpush1.bf16.msra.mxu1 %v10785_v24  ;;  %v915_v24 = vld [vmem:[#allocation3 + $0x1958] sm:$0xff] }
 0x3ed   :  { %7191 = vmatprep.subr.bf16.mxu1 %v10794_v10  ;;  %v10857_v10 = vcombine.low %v907_v46, %v911_v33  ;;  %v975_v46 = vld [vmem:[#allocation3 + $0x1b38] sm:$0xff] }
 0x3ee   :  { %9034 = vmatpush1.bf16.msra.mxu0 %v11536_v25  ;;  %v919_v25 = vld [vmem:[#allocation3 + $0x1978] sm:$0xff] }
 0x3ef   :  { %9035 = vmatprep.subr.bf16.mxu0 %v11541_v27  ;;  %v11563_v27 = vld [vmem:[%s13597_s3 + $0x180] ss:$16 sps:$4 sm:$0xff]   ;;  %v10866_v28 = vcombine.high %v915_v24, %v919_v25 }
 0x3f0   :  { %7192 = vmatpush1.bf16.msra.mxu1 %v10793_v32  ;;  %v923_v32 = vld [vmem:[#allocation3 + $0x1998] sm:$0xff] }
 0x3f1   :  { %7193 = vmatprep.subr.bf16.mxu1 %v10802_v43  ;;  %v10865_v43 = vcombine.low %v915_v24, %v919_v25  ;;  %v983_v24 = vld [vmem:[#allocation3 + $0x1b78] sm:$0xff] }
 0x3f2   :  { %9036 = vmatpush1.bf16.msra.mxu0 %v11539_v35  ;;  %v927_v35 = vld [vmem:[#allocation3 + $0x19b8] sm:$0xff] }
 0x3f3   :  { %9037 = vmatprep.subr.bf16.mxu0 %v11544_v20  ;;  %v11566_v20 = vld [vmem:[%s13597_s3 + $0x1a0] ss:$16 sps:$4 sm:$0xff]   ;;  %v10874_v45 = vcombine.high %v923_v32, %v927_v35 }
 0x3f4   :  { %7194 = vmatpush1.bf16.msra.mxu1 %v10801_v48  ;;  %v931_v48 = vld [vmem:[#allocation3 + $0x19d8] sm:$0xff] }
 0x3f5   :  { %7195 = vmatprep.subr.bf16.mxu1 %v10810_v1  ;;  %v7419_v1 = vcombine.high %v12488_v50, %v12488_v50 }
 0x3f6   :  { %9038 = vmatpush1.bf16.msra.mxu0 %v11542_v51  ;;  %v935_v51 = vld [vmem:[#allocation3 + $0x19f8] sm:$0xff] }
 0x3f7   :  { %9039 = vmatprep.subr.bf16.mxu0 %v11547_v4  ;;  %v10873_v4 = vcombine.low %v923_v32, %v927_v35  ;;  %v10882_v52 = vcombine.high %v931_v48, %v935_v51  ;;  %v10881_v50 = vcombine.low %v931_v48, %v935_v51  ;;  %v991_v32 = vld [vmem:[#allocation3 + $0x1bb8] sm:$0xff] }
 0x3f8   :  { %7196 = vmatpush1.bf16.msra.mxu1 %v10809_v9  ;;  %v11574_v9 = vld [vmem:[%s13597_s3 + $0x1e4] ss:$16 sps:$4 sm:$0xff]   ;;  %v999_v48 = vld [vmem:[#allocation3 + $0x1bf8] sm:$0xff] }
 0x3f9   :  { %7197 = vmatprep.subr.bf16.mxu1 %v10818_v37  ;;  %v943_v37 = vld [vmem:[#allocation3 + $0x1a38] sm:$0xff] }
 0x3fa   :  { %9040 = vmatpush1.bf16.msra.mxu0 %v11545_v54  ;;  %v939_v54 = vld [vmem:[#allocation3 + $0x1a18] sm:$0xff] }
 0x3fb   :  { %9041 = vmatprep.subr.bf16.mxu0 %v11550_v40  ;;  %v12598_v40 = vrot.slane %v7419_v1, %v12448_v22  ;;  %v10890_v55 = vcombine.high %v939_v54, %v943_v37  ;;  %v10889_v61 = vcombine.low %v939_v54, %v943_v37  ;;  %v11593_v1 = vld [vmem:[%s13597_s3 + $0x2c0] ss:$16 sps:$4 sm:$0xff]  }
 0x3fc   :  { %7198 = vmatpush1.bf16.msra.mxu1 %v10817_v56  ;;  %v11577_v56 = vld [vmem:[%s13597_s3 + $0x204] ss:$16 sps:$4 sm:$0xff]   ;;  %v11596_v37 = vld [vmem:[%s13597_s3 + $0x2e0] ss:$16 sps:$4 sm:$0xff]  }
 0x3fd   :  { %7208 = vmatprep.subr.bf16.mxu1 %v10826_v60  ;;  %v947_v60 = vld [vmem:[#allocation3 + $0x1a58] sm:$0xff] }
 0x3fe   :  { %9042 = vmatpush1.bf16.msra.mxu0 %v11548_v18  ;;  %v7435_v18 = vcombine.high %v12598_v40, %v12598_v40 }
 0x3ff   :  { %9043 = vmatprep.subr.bf16.mxu0 %v11553_v58  ;;  %7200 = vmatmul.mubr.bf16.vlgmr.msra.gmra.mrb[8].mxu1 %v12394_v23  ;;  %v10841_v23 = vcombine.low %v891_v6, %v895_v7  ;;  %v951_v58 = vld [vmem:[#allocation3 + $0x1a78] sm:$0xff] }
 0x400   :  { %7209 = vmatpush1.bf16.msra.mxu1 %v10825_v0  ;;  %7240 = vmatprep.mubr.bf16.mxu1 %v12397_v30  ;;  %v11557_v30 = vld [vmem:[%s13597_s3 + $0x140] ss:$16 sps:$4 sm:$0xff]   ;;  %v12613_v0 = vpack.c.bf16 %v12492_v57, %v12492_v57  ;;  %v959_v6 = vld [vmem:[#allocation3 + $0x1ab8] sm:$0xff]  ;;  %v12618_v7 = vpack.c.bf16 %v7435_v18, %v7435_v18 }
 0x401   :  { %7210 = vmatprep.subr.bf16.mxu1 %v10834_v3  ;;  %v11580_v3 = vld [vmem:[%s13597_s3 + $0x224] ss:$16 sps:$4 sm:$0xff]   ;;  %v11578_v57 = vld [vmem:[%s13597_s3 + $0x220] ss:$16 sps:$4 sm:$0xff]  }
 0x402   :  { %9044 = vmatpush1.bf16.msra.mxu0 %v11551_v2  ;;  %v10898_v2 = vcombine.high %v947_v60, %v951_v58 }
 0x403   :  { %9045 = vmatprep.subr.bf16.mxu0 %v11556_v39  ;;  %v955_v39 = vld [vmem:[#allocation3 + $0x1a98] sm:$0xff] }
 0x404   :  { %7211 = vmatpush1.bf16.msra.mxu1 %v10833_v11  ;;  %v10897_v11 = vcombine.low %v947_v60, %v951_v58  ;;  %v10905_v17 = vcombine.low %v955_v39, %v959_v6  ;;  %v11599_v60 = vld [vmem:[%s13597_s3 + $0x300] ss:$16 sps:$4 sm:$0xff]  }
 0x405   :  { %7212 = vmatprep.subr.bf16.mxu1 %v10842_v14  ;;  %v11583_v14 = vld [vmem:[%s13597_s3 + $0x244] ss:$16 sps:$4 sm:$0xff]  }
 0x406   :  { %9046 = vmatpush1.bf16.msra.mxu0 %v11554_v31  ;;  %v10906_v31 = vcombine.high %v955_v39, %v959_v6  ;;  %v11602_v39 = vld [vmem:[%s13597_s3 + $0x320] ss:$16 sps:$4 sm:$0xff]  }
 0x407   :  { %9047 = vmatprep.subr.bf16.mxu0 %v11559_v15  ;;  %v963_v15 = vld [vmem:[#allocation3 + $0x1ad8] sm:$0xff] }
 0x408   :  { %7213 = vmatpush1.bf16.msra.mxu1 %v10841_v23  ;;  %v11581_v23 = vld [vmem:[%s13597_s3 + $0x240] ss:$16 sps:$4 sm:$0xff]   ;;  %v10913_v33 = vcombine.low %v963_v15, %v967_v16 }
 0x409   :  { %7214 = vmatprep.subr.bf16.mxu1 %v10850_v19  ;;  %v11586_v19 = vld [vmem:[%s13597_s3 + $0x264] ss:$16 sps:$4 sm:$0xff]  }
 0x40a   :  { %9048 = vmatpush1.bf16.msra.mxu0 %v11557_v30  ;;  %v10914_v30 = vcombine.high %v963_v15, %v967_v16  ;;  %v11610_v15 = vld [vmem:[%s13597_s3 + $0x364] ss:$16 sps:$4 sm:$0xff]   ;;  %v1035_v16 = vld [vmem:[#allocation3 + $0x1d18] sm:$0xff] }
 0x40b   :  { %9049 = vmatprep.subr.bf16.mxu0 %v11562_v21  ;;  %v971_v21 = vld [vmem:[#allocation3 + $0x1b18] sm:$0xff] }
 0x40c   :  { %7215 = vmatpush1.bf16.msra.mxu1 %v10849_v59  ;;  %v11584_v59 = vld [vmem:[%s13597_s3 + $0x260] ss:$16 sps:$4 sm:$0xff]   ;;  %v10921_v25 = vcombine.low %v971_v21, %v975_v46 }
 0x40d   :  { %7216 = vmatprep.subr.bf16.mxu1 %v10858_v53  ;;  %v11589_v53 = vld [vmem:[%s13597_s3 + $0x284] ss:$16 sps:$4 sm:$0xff]  }
 0x40e   :  { %9050 = vmatpush1.bf16.msra.mxu0 %v11560_v38  ;;  %v10922_v38 = vcombine.high %v971_v21, %v975_v46  ;;  %v11613_v21 = vld [vmem:[%s13597_s3 + $0x384] ss:$16 sps:$4 sm:$0xff]   ;;  %v1043_v46 = vld [vmem:[#allocation3 + $0x1d58] sm:$0xff] }
 0x40f   :  { %9051 = vmatprep.subr.bf16.mxu0 %v11565_v5  ;;  %v979_v5 = vld [vmem:[#allocation3 + $0x1b58] sm:$0xff] }
 0x410   :  { %7217 = vmatpush1.bf16.msra.mxu1 %v10857_v10  ;;  %v11587_v10 = vld [vmem:[%s13597_s3 + $0x280] ss:$16 sps:$4 sm:$0xff]   ;;  %v10929_v35 = vcombine.low %v979_v5, %v983_v24 }
 0x411   :  { %7218 = vmatprep.subr.bf16.mxu1 %v10866_v28  ;;  %v11592_v28 = vld [vmem:[%s13597_s3 + $0x2a4] ss:$16 sps:$4 sm:$0xff]  }
 0x412   :  { %9052 = vmatpush1.bf16.msra.mxu0 %v11563_v27  ;;  %v10930_v27 = vcombine.high %v979_v5, %v983_v24  ;;  %v11616_v5 = vld [vmem:[%s13597_s3 + $0x3a4] ss:$16 sps:$4 sm:$0xff]   ;;  %v1051_v24 = vld [vmem:[#allocation3 + $0x1d98] sm:$0xff] }
 0x413   :  { %9053 = vmatprep.subr.bf16.mxu0 %v11568_v63  ;;  %v987_v63 = vld [vmem:[#allocation3 + $0x1b98] sm:$0xff] }
 0x414   :  { %7219 = vmatpush1.bf16.msra.mxu1 %v10865_v43  ;;  %v11590_v43 = vld [vmem:[%s13597_s3 + $0x2a0] ss:$16 sps:$4 sm:$0xff]   ;;  %v10937_v51 = vcombine.low %v987_v63, %v991_v32 }
 0x415   :  { %7220 = vmatprep.subr.bf16.mxu1 %v10874_v45  ;;  %v11595_v45 = vld [vmem:[%s13597_s3 + $0x2c4] ss:$16 sps:$4 sm:$0xff]  }
 0x416   :  { %9054 = vmatpush1.bf16.msra.mxu0 %v11566_v20  ;;  %v10938_v20 = vcombine.high %v987_v63, %v991_v32  ;;  %v11619_v63 = vld [vmem:[%s13597_s3 + $0x3c4] ss:$16 sps:$4 sm:$0xff]   ;;  %v1059_v32 = vld [vmem:[#allocation3 + $0x1dd8] sm:$0xff] }
 0x417   :  { %9055 = vmatprep.subr.bf16.mxu0 %v11571_v47  ;;  %v995_v47 = vld [vmem:[#allocation3 + $0x1bd8] sm:$0xff] }
 0x418   :  { %7221 = vmatpush1.bf16.msra.mxu1 %v10873_v4  ;;  %v10946_v4 = vcombine.high %v995_v47, %v999_v48  ;;  %v10945_v54 = vcombine.low %v995_v47, %v999_v48  ;;  %v11622_v47 = vld [vmem:[%s13597_s3 + $0x3e4] ss:$16 sps:$4 sm:$0xff]  }
 0x419   :  { %7222 = vmatprep.subr.bf16.mxu1 %v10882_v52  ;;  %v1003_v52 = vld [vmem:[#allocation3 + $0x1c18] sm:$0xff] }
 0x41a   :  { %9056 = vmatpush1.bf16.msra.mxu0 %v11569_v29  ;;  %v11598_v29 = vld [vmem:[%s13597_s3 + $0x2e4] ss:$16 sps:$4 sm:$0xff]  }
 0x41b   :  { %9057 = vmatprep.subr.bf16.mxu0 %v11574_v9  ;;  %v1007_v9 = vld [vmem:[#allocation3 + $0x1c38] sm:$0xff] }
 0x41c   :  { %7223 = vmatpush1.bf16.msra.mxu1 %v10881_v50  ;;  %v10954_v50 = vcombine.high %v1003_v52, %v1007_v9  ;;  %v10953_v18 = vcombine.low %v1003_v52, %v1007_v9  ;;  %v12722_v52 = vpack.c.bf16 %v12598_v40, %v12598_v40  ;;  %v11719_v9 = vld [vmem:[%s13597_s3 + $0x400] ss:$16 sps:$4 sm:$0xff]   ;;  %v11727_v40 = vld [vmem:[%s13597_s3 + $0x424] ss:$16 sps:$4 sm:$0xff]  }
 0x41d   :  { %7224 = vmatprep.subr.bf16.mxu1 %v10890_v55  ;;  %v1011_v55 = vld [vmem:[#allocation3 + $0x1c58] sm:$0xff] }
 0x41e   :  { %9058 = vmatpush1.bf16.msra.mxu0 %v11572_v49  ;;  %v11601_v49 = vld [vmem:[%s13597_s3 + $0x304] ss:$16 sps:$4 sm:$0xff]  }
 0x41f   :  { %9068 = vmatprep.subr.bf16.mxu0 %v11577_v56  ;;  %v1015_v56 = vld [vmem:[#allocation3 + $0x1c78] sm:$0xff] }
 0x420   :  { %7225 = vmatpush1.bf16.msra.mxu1 %v10889_v61  ;;  %v10962_v58 = vcombine.high %v1011_v55, %v1015_v56  ;;  %v11604_v61 = vld [vmem:[%s13597_s3 + $0x324] ss:$16 sps:$4 sm:$0xff]  }
 0x421   :  { %9060 = vmatmul.mubr.bf16.vlgmr.msra.gmra.mrb[8].mxu0 %v12613_v0  ;;  %7226 = vmatprep.subr.bf16.mxu1 %v10898_v2  ;;  %v1023_v2 = vld [vmem:[#allocation3 + $0x1cb8] sm:$0xff] }
 0x422   :  { %9069 = vmatpush1.bf16.msra.mxu0 %v11575_v62  ;;  %9100 = vmatprep.mubr.bf16.mxu0 %v12618_v7  ;;  %v1019_v62 = vld [vmem:[#allocation3 + $0x1c98] sm:$0xff] }
 0x423   :  { %9070 = vmatprep.subr.bf16.mxu0 %v11580_v3  ;;  %v10961_v3 = vcombine.low %v1011_v55, %v1015_v56  ;;  %v10970_v6 = vcombine.high %v1019_v62, %v1023_v2  ;;  %v11634_v55 = vld [vmem:[%s13597_s3 + $0x6c] ss:$16 sps:$4 sm:$0xff]   ;;  %v11731_v56 = vld [vmem:[%s13597_s3 + $0x440] ss:$16 sps:$4 sm:$0xff]  }
 0x424   :  { %7227 = vmatpush1.bf16.msra.mxu1 %v10897_v11  ;;  %v11607_v11 = vld [vmem:[%s13597_s3 + $0x344] ss:$16 sps:$4 sm:$0xff]  }
 0x425   :  { %7228 = vmatprep.subr.bf16.mxu1 %v10906_v31  ;;  %v1031_v31 = vld [vmem:[#allocation3 + $0x1cf8] sm:$0xff] }
 0x426   :  { %9071 = vmatpush1.bf16.msra.mxu0 %v11578_v57  ;;  %v1027_v57 = vld [vmem:[#allocation3 + $0x1cd8] sm:$0xff] }
 0x427   :  { %9072 = vmatprep.subr.bf16.mxu0 %v11583_v14  ;;  %v10978_v14 = vcombine.high %v1027_v57, %v1031_v31 }
 0x428   :  { %7229 = vmatpush1.bf16.msra.mxu1 %v10905_v17  ;;  %v1039_v17 = vld [vmem:[#allocation3 + $0x1d38] sm:$0xff] }
 0x429   :  { %7230 = vmatprep.subr.bf16.mxu1 %v10914_v30  ;;  %v11608_v30 = vld [vmem:[%s13597_s3 + $0x360] ss:$16 sps:$4 sm:$0xff]  }
 0x42a   :  { %9073 = vmatpush1.bf16.msra.mxu0 %v11581_v23  ;;  %v10977_v23 = vcombine.low %v1027_v57, %v1031_v31  ;;  %v11643_v57 = vld [vmem:[%s13597_s3 + $0xcc] ss:$16 sps:$4 sm:$0xff]   ;;  %v11749_v31 = vld [vmem:[%s13597_s3 + $0x4a0] ss:$16 sps:$4 sm:$0xff]  }
 0x42b   :  { %9074 = vmatprep.subr.bf16.mxu0 %v11586_v19  ;;  %v10986_v19 = vcombine.high %v1035_v16, %v1039_v17 }
 0x42c   :  { %7231 = vmatpush1.bf16.msra.mxu1 %v10913_v33  ;;  %v1047_v33 = vld [vmem:[#allocation3 + $0x1d78] sm:$0xff] }
 0x42d   :  { %7232 = vmatprep.subr.bf16.mxu1 %v10922_v38  ;;  %v11611_v38 = vld [vmem:[%s13597_s3 + $0x380] ss:$16 sps:$4 sm:$0xff]  }
 0x42e   :  { %9075 = vmatpush1.bf16.msra.mxu0 %v11584_v59  ;;  %v10985_v59 = vcombine.low %v1035_v16, %v1039_v17  ;;  %v11644_v16 = vld [vmem:[%s13597_s3 + $0xe8] ss:$16 sps:$4 sm:$0xff]   ;;  %v11763_v17 = vld [vmem:[%s13597_s3 + $0x4e4] ss:$16 sps:$4 sm:$0xff]  }
 0x42f   :  { %9076 = vmatprep.subr.bf16.mxu0 %v11589_v53  ;;  %v10994_v53 = vcombine.high %v1043_v46, %v1047_v33 }
 0x430   :  { %7233 = vmatpush1.bf16.msra.mxu1 %v10921_v25  ;;  %v1055_v25 = vld [vmem:[#allocation3 + $0x1db8] sm:$0xff] }
 0x431   :  { %7234 = vmatprep.subr.bf16.mxu1 %v10930_v27  ;;  %v11614_v27 = vld [vmem:[%s13597_s3 + $0x3a0] ss:$16 sps:$4 sm:$0xff]  }
 0x432   :  { %9077 = vmatpush1.bf16.msra.mxu0 %v11587_v10  ;;  %v10993_v10 = vcombine.low %v1043_v46, %v1047_v33  ;;  %v11652_v46 = vld [vmem:[%s13597_s3 + $0x12c] ss:$16 sps:$4 sm:$0xff]   ;;  %v11767_v33 = vld [vmem:[%s13597_s3 + $0x500] ss:$16 sps:$4 sm:$0xff]  }
 0x433   :  { %9078 = vmatprep.subr.bf16.mxu0 %v11592_v28  ;;  %v11002_v28 = vcombine.high %v1051_v24, %v1055_v25 }
 0x434   :  { %7235 = vmatpush1.bf16.msra.mxu1 %v10929_v35  ;;  %v1063_v35 = vld [vmem:[#allocation3 + $0x1df8] sm:$0xff] }
 0x435   :  { %7236 = vmatprep.subr.bf16.mxu1 %v10938_v20  ;;  %v11617_v20 = vld [vmem:[%s13597_s3 + $0x3c0] ss:$16 sps:$4 sm:$0xff]   ;;  %v11009_v48 = vcombine.low %v1059_v32, %v1063_v35 }
 0x436   :  { %9079 = vmatpush1.bf16.msra.mxu0 %v11590_v43  ;;  %v11001_v43 = vcombine.low %v1051_v24, %v1055_v25  ;;  %v11653_v24 = vld [vmem:[%s13597_s3 + $0x148] ss:$16 sps:$4 sm:$0xff]   ;;  %v11781_v25 = vld [vmem:[%s13597_s3 + $0x544] ss:$16 sps:$4 sm:$0xff]  }
 0x437   :  { %9080 = vmatprep.subr.bf16.mxu0 %v11595_v45  ;;  %v11010_v45 = vcombine.high %v1059_v32, %v1063_v35  ;;  %v11661_v32 = vld [vmem:[%s13597_s3 + $0x18c] ss:$16 sps:$4 sm:$0xff]   ;;  %v11785_v35 = vld [vmem:[%s13597_s3 + $0x560] ss:$16 sps:$4 sm:$0xff]  }
 0x438   :  { %7237 = vmatpush1.bf16.msra.mxu1 %v10937_v51  ;;  %v11620_v51 = vld [vmem:[%s13597_s3 + $0x3e0] ss:$16 sps:$4 sm:$0xff]  }
 0x439   :  { %7238 = vmatprep.subr.bf16.mxu1 %v10946_v4  ;;  %v11623_v4 = vld [vmem:[%s13597_s3 + $0x8] ss:$16 sps:$4 sm:$0xff]  }
 0x43a   :  { %9081 = vmatpush1.bf16.msra.mxu0 %v11593_v1  ;;  %v11625_v1 = vld [vmem:[%s13597_s3 + $0xc] ss:$16 sps:$4 sm:$0xff]  }
 0x43b   :  { %9082 = vmatprep.subr.bf16.mxu0 %v11598_v29  ;;  %v11628_v29 = vld [vmem:[%s13597_s3 + $0x2c] ss:$16 sps:$4 sm:$0xff]  }
 0x43c   :  { %7239 = vmatpush1.bf16.msra.mxu1 %v10945_v54  ;;  %v11721_v54 = vld [vmem:[%s13597_s3 + $0x404] ss:$16 sps:$4 sm:$0xff]  }
 0x43d   :  { %7249 = vmatprep.subr.bf16.mxu1 %v10954_v50  ;;  %v11725_v50 = vld [vmem:[%s13597_s3 + $0x420] ss:$16 sps:$4 sm:$0xff]  }
 0x43e   :  { %9083 = vmatpush1.bf16.msra.mxu0 %v11596_v37  ;;  %v11626_v37 = vld [vmem:[%s13597_s3 + $0x28] ss:$16 sps:$4 sm:$0xff]  }
 0x43f   :  { %9084 = vmatprep.subr.bf16.mxu0 %v11601_v49  ;;  %7241 = vmatmul.mubr.bf16.vlgmr.msra.gmra.mrb[8].mxu1 %v12405_v8  ;;  %v10969_v8 = vcombine.low %v1019_v62, %v1023_v2  ;;  %v11629_v49 = vld [vmem:[%s13597_s3 + $0x48] ss:$16 sps:$4 sm:$0xff]   ;;  %v11745_v2 = vld [vmem:[%s13597_s3 + $0x484] ss:$16 sps:$4 sm:$0xff]  }
 0x440   :  { %7250 = vmatpush1.bf16.msra.mxu1 %v10953_v18  ;;  %7281 = vmatprep.mubr.bf16.mxu1 %v12178_v26  ;;  %v11605_v26 = vld [vmem:[%s13597_s3 + $0x340] ss:$16 sps:$4 sm:$0xff]   ;;  %v11632_v18 = vld [vmem:[%s13597_s3 + $0x68] ss:$16 sps:$4 sm:$0xff]  }
 0x441   :  { %7251 = vmatprep.subr.bf16.mxu1 %v10962_v58  ;;  %v11637_v58 = vld [vmem:[%s13597_s3 + $0x8c] ss:$16 sps:$4 sm:$0xff]   ;;  %v11635_v62 = vld [vmem:[%s13597_s3 + $0x88] ss:$16 sps:$4 sm:$0xff]  }
 0x442   :  { %9085 = vmatpush1.bf16.msra.mxu0 %v11599_v60  ;;  %v11739_v60 = vld [vmem:[%s13597_s3 + $0x464] ss:$16 sps:$4 sm:$0xff]  }
 0x443   :  { %9086 = vmatprep.subr.bf16.mxu0 %v11604_v61  ;;  %v11737_v61 = vld [vmem:[%s13597_s3 + $0x460] ss:$16 sps:$4 sm:$0xff]  }
 0x444   :  { %7252 = vmatpush1.bf16.msra.mxu1 %v10961_v3  ;;  %v11640_v3 = vld [vmem:[%s13597_s3 + $0xac] ss:$16 sps:$4 sm:$0xff]  }
 0x445   :  { %7253 = vmatprep.subr.bf16.mxu1 %v10970_v6  ;;  %v11638_v6 = vld [vmem:[%s13597_s3 + $0xa8] ss:$16 sps:$4 sm:$0xff]  }
 0x446   :  { %9087 = vmatpush1.bf16.msra.mxu0 %v11602_v39  ;;  %v11743_v39 = vld [vmem:[%s13597_s3 + $0x480] ss:$16 sps:$4 sm:$0xff]  }
 0x447   :  { %9088 = vmatprep.subr.bf16.mxu0 %v11607_v11  ;;  %v11751_v11 = vld [vmem:[%s13597_s3 + $0x4a4] ss:$16 sps:$4 sm:$0xff]  }
 0x448   :  { %7254 = vmatpush1.bf16.msra.mxu1 %v10969_v8  ;;  %v11641_v8 = vld [vmem:[%s13597_s3 + $0xc8] ss:$16 sps:$4 sm:$0xff]  }
 0x449   :  { %7255 = vmatprep.subr.bf16.mxu1 %v10978_v14  ;;  %v11646_v14 = vld [vmem:[%s13597_s3 + $0xec] ss:$16 sps:$4 sm:$0xff]  }
 0x44a   :  { %9089 = vmatpush1.bf16.msra.mxu0 %v11605_v26  ;;  %v11757_v26 = vld [vmem:[%s13597_s3 + $0x4c4] ss:$16 sps:$4 sm:$0xff]  }
 0x44b   :  { %9090 = vmatprep.subr.bf16.mxu0 %v11610_v15  ;;  %v11755_v15 = vld [vmem:[%s13597_s3 + $0x4c0] ss:$16 sps:$4 sm:$0xff]  }
 0x44c   :  { %7256 = vmatpush1.bf16.msra.mxu1 %v10977_v23  ;;  %v11649_v23 = vld [vmem:[%s13597_s3 + $0x10c] ss:$16 sps:$4 sm:$0xff]  }
 0x44d   :  { %7257 = vmatprep.subr.bf16.mxu1 %v10986_v19  ;;  %v11647_v19 = vld [vmem:[%s13597_s3 + $0x108] ss:$16 sps:$4 sm:$0xff]  }
 0x44e   :  { %9091 = vmatpush1.bf16.msra.mxu0 %v11608_v30  ;;  %v11761_v30 = vld [vmem:[%s13597_s3 + $0x4e0] ss:$16 sps:$4 sm:$0xff]  }
 0x44f   :  { %9092 = vmatprep.subr.bf16.mxu0 %v11613_v21  ;;  %v11769_v21 = vld [vmem:[%s13597_s3 + $0x504] ss:$16 sps:$4 sm:$0xff]  }
 0x450   :  { %7258 = vmatpush1.bf16.msra.mxu1 %v10985_v59  ;;  %v11650_v59 = vld [vmem:[%s13597_s3 + $0x128] ss:$16 sps:$4 sm:$0xff]  }
 0x451   :  { %7259 = vmatprep.subr.bf16.mxu1 %v10994_v53  ;;  %v11655_v53 = vld [vmem:[%s13597_s3 + $0x14c] ss:$16 sps:$4 sm:$0xff]  }
 0x452   :  { %9093 = vmatpush1.bf16.msra.mxu0 %v11611_v38  ;;  %v11775_v38 = vld [vmem:[%s13597_s3 + $0x524] ss:$16 sps:$4 sm:$0xff]  }
 0x453   :  { %9094 = vmatprep.subr.bf16.mxu0 %v11616_v5  ;;  %v11773_v5 = vld [vmem:[%s13597_s3 + $0x520] ss:$16 sps:$4 sm:$0xff]  }
 0x454   :  { %7260 = vmatpush1.bf16.msra.mxu1 %v10993_v10  ;;  %v11658_v10 = vld [vmem:[%s13597_s3 + $0x16c] ss:$16 sps:$4 sm:$0xff]  }
 0x455   :  { %7261 = vmatprep.subr.bf16.mxu1 %v11002_v28  ;;  %v11656_v28 = vld [vmem:[%s13597_s3 + $0x168] ss:$16 sps:$4 sm:$0xff]  }
 0x456   :  { %9095 = vmatpush1.bf16.msra.mxu0 %v11614_v27  ;;  %v11779_v27 = vld [vmem:[%s13597_s3 + $0x540] ss:$16 sps:$4 sm:$0xff]  }
 0x457   :  { %9096 = vmatprep.subr.bf16.mxu0 %v11619_v63  ;;  %v11787_v63 = vld [vmem:[%s13597_s3 + $0x564] ss:$16 sps:$4 sm:$0xff]  }
 0x458   :  { %7262 = vmatpush1.bf16.msra.mxu1 %v11001_v43  ;;  %v11659_v43 = vld [vmem:[%s13597_s3 + $0x188] ss:$16 sps:$4 sm:$0xff]  }
 0x459   :  { %7263 = vmatprep.subr.bf16.mxu1 %v11010_v45  ;;  %v11662_v45 = vld [vmem:[%s13597_s3 + $0x1a8] ss:$16 sps:$4 sm:$0xff]  }
 0x45a   :  { %9097 = vmatpush1.bf16.msra.mxu0 %v11617_v20  ;;  %v11664_v20 = vld [vmem:[%s13597_s3 + $0x1ac] ss:$16 sps:$4 sm:$0xff]  }
 0x45b   :  { %9098 = vmatprep.subr.bf16.mxu0 %v11622_v47  ;;  %v11667_v47 = vld [vmem:[%s13597_s3 + $0x1cc] ss:$16 sps:$4 sm:$0xff]  }
 0x45c   :  { %7264 = vmatpush1.bf16.msra.mxu1 %v11009_v48  ;;  %v11665_v48 = vld [vmem:[%s13597_s3 + $0x1c8] ss:$16 sps:$4 sm:$0xff]  }
 0x45d   :  { %9191 = vmatprep.subr.bf16.mxu1 %v11625_v1  ;;  %v11668_v1 = vld [vmem:[%s13597_s3 + $0x1e8] ss:$16 sps:$4 sm:$0xff]  }
 0x45e   :  { %9099 = vmatpush1.bf16.msra.mxu0 %v11620_v51  ;;  %v11670_v51 = vld [vmem:[%s13597_s3 + $0x1ec] ss:$16 sps:$4 sm:$0xff]  }
 0x45f   :  { %7282 = vmatmul.mubr.bf16.vlgmr.msra.gmra.mrb[8].mxu1 %v12413_v34  ;;  %v11631_v34 = vld [vmem:[%s13597_s3 + $0x4c] ss:$16 sps:$4 sm:$0xff]   ;;  %9109 = vmatprep.subr.bf16.mxu0 %v11721_v54  ;;  %v11674_v54 = vld [vmem:[%s13597_s3 + $0x228] ss:$16 sps:$4 sm:$0xff]  }
 0x460   :  { %9192 = vmatpush1.bf16.msra.mxu1 %v11623_v4  ;;  %9223 = vmatprep.mubr.bf16.mxu1 %v12505_v12  ;;  %v11733_v12 = vld [vmem:[%s13597_s3 + $0x444] ss:$16 sps:$4 sm:$0xff]   ;;  %v11673_v4 = vld [vmem:[%s13597_s3 + $0x20c] ss:$16 sps:$4 sm:$0xff]  }
 0x461   :  { %9101 = vmatmul.mubr.bf16.vlgmr.msra.gmra.mrb[8].mxu0 %v12722_v52  ;;  %9193 = vmatprep.subr.bf16.mxu1 %v11628_v29  ;;  %v11671_v29 = vld [vmem:[%s13597_s3 + $0x208] ss:$16 sps:$4 sm:$0xff]  }
 0x462   :  { %9110 = vmatpush1.bf16.msra.mxu0 %v11719_v9  ;;  %v11676_v9 = vld [vmem:[%s13597_s3 + $0x22c] ss:$16 sps:$4 sm:$0xff]  }
 0x463   :  { %9111 = vmatprep.subr.bf16.mxu0 %v11727_v40  ;;  %v11677_v40 = vld [vmem:[%s13597_s3 + $0x248] ss:$16 sps:$4 sm:$0xff]  }
 0x464   :  { %9194 = vmatpush1.bf16.msra.mxu1 %v11626_v37  ;;  %v11679_v37 = vld [vmem:[%s13597_s3 + $0x24c] ss:$16 sps:$4 sm:$0xff]  }
 0x465   :  { %9195 = vmatprep.subr.bf16.mxu1 %v11631_v34  ;;  %v11685_v34 = vld [vmem:[%s13597_s3 + $0x28c] ss:$16 sps:$4 sm:$0xff]  }
 0x466   :  { %9112 = vmatpush1.bf16.msra.mxu0 %v11725_v50  ;;  %v11683_v50 = vld [vmem:[%s13597_s3 + $0x288] ss:$16 sps:$4 sm:$0xff]  }
 0x467   :  { %9113 = vmatprep.subr.bf16.mxu0 %v11733_v12  ;;  %v11686_v12 = vld [vmem:[%s13597_s3 + $0x2a8] ss:$16 sps:$4 sm:$0xff]  }
 0x468   :  { %9196 = vmatpush1.bf16.msra.mxu1 %v11629_v49  ;;  %v11688_v49 = vld [vmem:[%s13597_s3 + $0x2ac] ss:$16 sps:$4 sm:$0xff]  }
 0x469   :  { %9197 = vmatprep.subr.bf16.mxu1 %v11634_v55  ;;  %v11691_v55 = vld [vmem:[%s13597_s3 + $0x2cc] ss:$16 sps:$4 sm:$0xff]  }
 0x46a   :  { %9114 = vmatpush1.bf16.msra.mxu0 %v11731_v56 }
 0x46b   :  { %9115 = vmatprep.subr.bf16.mxu0 %v11739_v60 }
 0x46c   :  { %9198 = vmatpush1.bf16.msra.mxu1 %v11632_v18  ;;  %v11793_v18 = vld [vmem:[%s13597_s3 + $0x584] ss:$16 sps:$4 sm:$0xff]  }
 0x46d   :  { %9199 = vmatprep.subr.bf16.mxu1 %v11637_v58  ;;  %v11689_v58 = vld [vmem:[%s13597_s3 + $0x2c8] ss:$16 sps:$4 sm:$0xff]  }
 0x46e   :  { %9116 = vmatpush1.bf16.msra.mxu0 %v11737_v61  ;;  %v11791_v61 = vld [vmem:[%s13597_s3 + $0x580] ss:$16 sps:$4 sm:$0xff]  }
 0x46f   :  { %9117 = vmatprep.subr.bf16.mxu0 %v11745_v2 }
 0x470   :  { %9200 = vmatpush1.bf16.msra.mxu1 %v11635_v62 }
 0x471   :  { %9201 = vmatprep.subr.bf16.mxu1 %v11640_v3  ;;  %v11694_v3 = vld [vmem:[%s13597_s3 + $0x2ec] ss:$16 sps:$4 sm:$0xff]  }
 0x472   :  { %9118 = vmatpush1.bf16.msra.mxu0 %v11743_v39 }
 0x473   :  { %9119 = vmatprep.subr.bf16.mxu0 %v11751_v11  ;;  %v11692_v11 = vld [vmem:[%s13597_s3 + $0x2e8] ss:$16 sps:$4 sm:$0xff]  }
 0x474   :  { %9202 = vmatpush1.bf16.msra.mxu1 %v11638_v6  ;;  %v11799_v6 = vld [vmem:[%s13597_s3 + $0x5a4] ss:$16 sps:$4 sm:$0xff]  }
 0x475   :  { %9203 = vmatprep.subr.bf16.mxu1 %v11643_v57  ;;  %v11797_v57 = vld [vmem:[%s13597_s3 + $0x5a0] ss:$16 sps:$4 sm:$0xff]  }
 0x476   :  { %9120 = vmatpush1.bf16.msra.mxu0 %v11749_v31  ;;  %v11697_v31 = vld [vmem:[%s13597_s3 + $0x30c] ss:$16 sps:$4 sm:$0xff]  }
 0x477   :  { %9121 = vmatprep.subr.bf16.mxu0 %v11757_v26  ;;  %v11695_v26 = vld [vmem:[%s13597_s3 + $0x308] ss:$16 sps:$4 sm:$0xff]  }
 0x478   :  { %9204 = vmatpush1.bf16.msra.mxu1 %v11641_v8  ;;  %v11805_v8 = vld [vmem:[%s13597_s3 + $0x5c4] ss:$16 sps:$4 sm:$0xff]  }
 0x479   :  { %9205 = vmatprep.subr.bf16.mxu1 %v11646_v14  ;;  %v11803_v14 = vld [vmem:[%s13597_s3 + $0x5c0] ss:$16 sps:$4 sm:$0xff]  }
 0x47a   :  { %9122 = vmatpush1.bf16.msra.mxu0 %v11755_v15  ;;  %v11700_v15 = vld [vmem:[%s13597_s3 + $0x32c] ss:$16 sps:$4 sm:$0xff]  }
 0x47b   :  { %9123 = vmatprep.subr.bf16.mxu0 %v11763_v17  ;;  %v11809_v17 = vld [vmem:[%s13597_s3 + $0x5e0] ss:$16 sps:$4 sm:$0xff]  }
 0x47c   :  { %9206 = vmatpush1.bf16.msra.mxu1 %v11644_v16  ;;  %v11811_v16 = vld [vmem:[%s13597_s3 + $0x5e4] ss:$16 sps:$4 sm:$0xff]  }
 0x47d   :  { %9207 = vmatprep.subr.bf16.mxu1 %v11649_v23  ;;  %v11698_v23 = vld [vmem:[%s13597_s3 + $0x328] ss:$16 sps:$4 sm:$0xff]  }
 0x47e   :  { %9124 = vmatpush1.bf16.msra.mxu0 %v11761_v30  ;;  %v11703_v30 = vld [vmem:[%s13597_s3 + $0x34c] ss:$16 sps:$4 sm:$0xff]  }
 0x47f   :  { %9125 = vmatprep.subr.bf16.mxu0 %v11769_v21  ;;  %v11701_v21 = vld [vmem:[%s13597_s3 + $0x348] ss:$16 sps:$4 sm:$0xff]  }
 0x480   :  { %9208 = vmatpush1.bf16.msra.mxu1 %v11647_v19  ;;  %v11817_v19 = vld [vmem:[%s13597_s3 + $0x604] ss:$16 sps:$4 sm:$0xff]  }
 0x481   :  { %9209 = vmatprep.subr.bf16.mxu1 %v11652_v46  ;;  %v11706_v46 = vld [vmem:[%s13597_s3 + $0x36c] ss:$16 sps:$4 sm:$0xff]  }
 0x482   :  { %9126 = vmatpush1.bf16.msra.mxu0 %v11767_v33  ;;  %v11704_v33 = vld [vmem:[%s13597_s3 + $0x368] ss:$16 sps:$4 sm:$0xff]  }
 0x483   :  { %9127 = vmatprep.subr.bf16.mxu0 %v11775_v38  ;;  %v11707_v38 = vld [vmem:[%s13597_s3 + $0x388] ss:$16 sps:$4 sm:$0xff]  }
 0x484   :  { %9210 = vmatpush1.bf16.msra.mxu1 %v11650_v59  ;;  %v11709_v59 = vld [vmem:[%s13597_s3 + $0x38c] ss:$16 sps:$4 sm:$0xff]  }
 0x485   :  { %9211 = vmatprep.subr.bf16.mxu1 %v11655_v53  ;;  %v11712_v53 = vld [vmem:[%s13597_s3 + $0x3ac] ss:$16 sps:$4 sm:$0xff]  }
 0x486   :  { %9128 = vmatpush1.bf16.msra.mxu0 %v11773_v5  ;;  %v11710_v5 = vld [vmem:[%s13597_s3 + $0x3a8] ss:$16 sps:$4 sm:$0xff]  }
 0x487   :  { %9129 = vmatprep.subr.bf16.mxu0 %v11781_v25  ;;  %v11713_v25 = vld [vmem:[%s13597_s3 + $0x3c8] ss:$16 sps:$4 sm:$0xff]  }
 0x488   :  { %9212 = vmatpush1.bf16.msra.mxu1 %v11653_v24  ;;  %v11715_v24 = vld [vmem:[%s13597_s3 + $0x3cc] ss:$16 sps:$4 sm:$0xff]  }
 0x489   :  { %9213 = vmatprep.subr.bf16.mxu1 %v11658_v10  ;;  %v11718_v10 = vld [vmem:[%s13597_s3 + $0x3ec] ss:$16 sps:$4 sm:$0xff]  }
 0x48a   :  { %9130 = vmatpush1.bf16.msra.mxu0 %v11779_v27  ;;  %v11716_v27 = vld [vmem:[%s13597_s3 + $0x3e8] ss:$16 sps:$4 sm:$0xff]  }
 0x48b   :  { %9131 = vmatprep.subr.bf16.mxu0 %v11787_v63  ;;  %v11722_v63 = vld [vmem:[%s13597_s3 + $0x408] ss:$16 sps:$4 sm:$0xff]  }
 0x48c   :  { %9214 = vmatpush1.bf16.msra.mxu1 %v11656_v28  ;;  %v11724_v28 = vld [vmem:[%s13597_s3 + $0x40c] ss:$16 sps:$4 sm:$0xff]  }
 0x48d   :  { %9215 = vmatprep.subr.bf16.mxu1 %v11661_v32  ;;  %v11730_v32 = vld [vmem:[%s13597_s3 + $0x42c] ss:$16 sps:$4 sm:$0xff]  }
 0x48e   :  { %9132 = vmatpush1.bf16.msra.mxu0 %v11785_v35  ;;  %v11728_v35 = vld [vmem:[%s13597_s3 + $0x428] ss:$16 sps:$4 sm:$0xff]  }
 0x48f   :  { %9133 = vmatprep.subr.bf16.mxu0 %v11793_v18  ;;  %v11794_v18 = vld [vmem:[%s13597_s3 + $0x588] ss:$16 sps:$4 sm:$0xff]  }
 0x490   :  { %9216 = vmatpush1.bf16.msra.mxu1 %v11659_v43  ;;  %v11736_v43 = vld [vmem:[%s13597_s3 + $0x44c] ss:$16 sps:$4 sm:$0xff]  }
 0x491   :  { %9217 = vmatprep.subr.bf16.mxu1 %v11664_v20  ;;  %v11734_v20 = vld [vmem:[%s13597_s3 + $0x448] ss:$16 sps:$4 sm:$0xff]  }
 0x492   :  { %9134 = vmatpush1.bf16.msra.mxu0 %v11791_v61  ;;  %v11800_v61 = vld [vmem:[%s13597_s3 + $0x5a8] ss:$16 sps:$4 sm:$0xff]  }
 0x493   :  { %9135 = vmatprep.subr.bf16.mxu0 %v11799_v6  ;;  %v11812_v6 = vld [vmem:[%s13597_s3 + $0x5e8] ss:$16 sps:$4 sm:$0xff]  }
 0x494   :  { %9218 = vmatpush1.bf16.msra.mxu1 %v11662_v45  ;;  %v11740_v45 = vld [vmem:[%s13597_s3 + $0x468] ss:$16 sps:$4 sm:$0xff]  }
 0x495   :  { %9219 = vmatprep.subr.bf16.mxu1 %v11667_v47  ;;  %v11748_v47 = vld [vmem:[%s13597_s3 + $0x48c] ss:$16 sps:$4 sm:$0xff]  }
 0x496   :  { %9136 = vmatpush1.bf16.msra.mxu0 %v11797_v57  ;;  %v7363_v57 = vsub.s32 4, %v12291_v44 }
 0x497   :  { %9137 = vmatprep.subr.bf16.mxu0 %v11805_v8  ;;  %v7371_v8 = vsub.s32 6, %v12291_v44 }
 0x498   :  { %9220 = vmatpush1.bf16.msra.mxu1 %v11665_v48  ;;  %v11746_v48 = vld [vmem:[%s13597_s3 + $0x488] ss:$16 sps:$4 sm:$0xff]  }
 0x499   :  { %9221 = vmatprep.subr.bf16.mxu1 %v11670_v51  ;;  %v11754_v51 = vld [vmem:[%s13597_s3 + $0x4ac] ss:$16 sps:$4 sm:$0xff]  }
 0x49a   :  { %9138 = vmatpush1.bf16.msra.mxu0 %v11803_v14  ;;  %v12028_v14 = vld [vmem:[#allocation6] sm:$0xff] }
 0x49b   :  { %9139 = vmatprep.subr.bf16.mxu0 %v11811_v16 }
 0x49c   :  { %9222 = vmatpush1.bf16.msra.mxu1 %v11668_v1  ;;  %v11752_v1 = vld [vmem:[%s13597_s3 + $0x4a8] ss:$16 sps:$4 sm:$0xff]  }
 0x49d   :  { %9232 = vmatprep.subr.bf16.mxu1 %v11673_v4  ;;  %v11760_v4 = vld [vmem:[%s13597_s3 + $0x4cc] ss:$16 sps:$4 sm:$0xff]  }
 0x49e   :  { %9140 = vmatpush1.bf16.msra.mxu0 %v11809_v17  ;;  %v7372_v17 = vrot.slane %v12028_v14, %v7371_v8  ;;  %v11860_v8 = vld [vmem:[%s13597_s3 + $0x6e8] ss:$16 sps:$4 sm:$0xff]  }
 0x49f   :  { %9224 = vmatmul.mubr.bf16.vlgmr.msra.gmra.mrb[12].mxu1 %v12613_v0  ;;  %v11682_v0 = vld [vmem:[%s13597_s3 + $0x26c] ss:$16 sps:$4 sm:$0xff]   ;;  %9150 = vmatprep.subr.bf16.mxu0 %v11817_v19 }
 0x4a0   :  { %9233 = vmatpush1.bf16.msra.mxu1 %v11671_v29  ;;  %9264 = vmatprep.mubr.bf16.mxu1 %v12618_v7  ;;  %v11680_v7 = vld [vmem:[%s13597_s3 + $0x268] ss:$16 sps:$4 sm:$0xff]  }
 0x4a1   :  { %9234 = vmatprep.subr.bf16.mxu1 %v11676_v9  ;;  %v11758_v29 = vld [vmem:[%s13597_s3 + $0x4c8] ss:$16 sps:$4 sm:$0xff]   ;;  %v11766_v9 = vld [vmem:[%s13597_s3 + $0x4ec] ss:$16 sps:$4 sm:$0xff]  }
 0x4a4   :  { %9235 = vmatpush1.bf16.msra.mxu1 %v11674_v54  ;;  %v11764_v54 = vld [vmem:[%s13597_s3 + $0x4e8] ss:$16 sps:$4 sm:$0xff]  }
 0x4a5   :  { %9236 = vmatprep.subr.bf16.mxu1 %v11679_v37  ;;  %v11772_v37 = vld [vmem:[%s13597_s3 + $0x50c] ss:$16 sps:$4 sm:$0xff]  }
 0x4a8   :  { %9237 = vmatpush1.bf16.msra.mxu1 %v11677_v40  ;;  %v11770_v40 = vld [vmem:[%s13597_s3 + $0x508] ss:$16 sps:$4 sm:$0xff]  }
 0x4a9   :  { %9238 = vmatprep.subr.bf16.mxu1 %v11682_v0  ;;  %v11778_v0 = vld [vmem:[%s13597_s3 + $0x52c] ss:$16 sps:$4 sm:$0xff]  }
 0x4ac   :  { %9239 = vmatpush1.bf16.msra.mxu1 %v11680_v7  ;;  %v11776_v7 = vld [vmem:[%s13597_s3 + $0x528] ss:$16 sps:$4 sm:$0xff]  }
 0x4ad   :  { %9240 = vmatprep.subr.bf16.mxu1 %v11685_v34  ;;  %v11784_v34 = vld [vmem:[%s13597_s3 + $0x54c] ss:$16 sps:$4 sm:$0xff]  }
 0x4b0   :  { %9241 = vmatpush1.bf16.msra.mxu1 %v11683_v50  ;;  %v11782_v50 = vld [vmem:[%s13597_s3 + $0x548] ss:$16 sps:$4 sm:$0xff]  }
 0x4b1   :  { %9242 = vmatprep.subr.bf16.mxu1 %v11688_v49  ;;  %v11790_v49 = vld [vmem:[%s13597_s3 + $0x56c] ss:$16 sps:$4 sm:$0xff]  }
 0x4b4   :  { %v12927_v56 = vpop.f32.mrb[4].mxu0  ;;  %9243 = vmatpush1.bf16.msra.mxu1 %v11686_v12  ;;  %v11788_v12 = vld [vmem:[%s13597_s3 + $0x568] ss:$16 sps:$4 sm:$0xff]  }
 0x4b5   :  { %v12932_v60 = vpop.f32.mrb[5].mxu0  ;;  %9244 = vmatprep.subr.bf16.mxu1 %v11691_v55  ;;  %v11796_v55 = vld [vmem:[%s13597_s3 + $0x58c] ss:$16 sps:$4 sm:$0xff]  }
 0x4b6   :  { %v7315_v62 = vcombine.low %v12927_v56, %v12932_v60  ;;  %v6959_v2 = vpop.f32.mrb[6].mxu0  ;;  %v11818_v56 = vld [vmem:[%s13597_s3 + $0x608] ss:$16 sps:$4 sm:$0xff]  }
 0x4b7   :  { %v6960_v39 = vpop.f32.mrb[7].mxu0  ;;  %v11808_v2 = vld [vmem:[%s13597_s3 + $0x5cc] ss:$16 sps:$4 sm:$0xff]  }
 0x4b8   :  { %9245 = vmatpush1.bf16.msra.mxu1 %v11689_v58  ;;  %v11802_v58 = vld [vmem:[%s13597_s3 + $0x5ac] ss:$16 sps:$4 sm:$0xff]  }
 0x4b9   :  { %9246 = vmatprep.subr.bf16.mxu1 %v11694_v3  ;;  %v11806_v3 = vld [vmem:[%s13597_s3 + $0x5c8] ss:$16 sps:$4 sm:$0xff]   ;;  %v11814_v39 = vld [vmem:[%s13597_s3 + $0x5ec] ss:$16 sps:$4 sm:$0xff]  }
 0x4bc   :  { %9247 = vmatpush1.bf16.msra.mxu1 %v11692_v11  ;;  %v11820_v11 = vld [vmem:[%s13597_s3 + $0x60c] ss:$16 sps:$4 sm:$0xff]  }
 0x4bd   :  { %9248 = vmatprep.subr.bf16.mxu1 %v11697_v31  ;;  %v7367_v31 = vsub.s32 5, %v12291_v44 }
 0x4bf   :  { %v7368_v16 = vrot.slane %v12028_v14, %v7367_v31  ;;  %v11857_v31 = vld [vmem:[%s13597_s3 + $0x6e0] ss:$16 sps:$4 sm:$0xff]  }
 0x4c0   :  { %9249 = vmatpush1.bf16.msra.mxu1 %v11695_v26  ;;  %v7375_v26 = vsub.s32 7, %v12291_v44  ;;  %v12004_v44 = vld [vmem:[%s13599_s5 + $0x1f0] ss:$8 sps:$4 sm:$0xff]  }
 0x4c1   :  { %9250 = vmatprep.subr.bf16.mxu1 %v11700_v15  ;;  %v7364_v15 = vrot.slane %v12028_v14, %v7363_v57  ;;  %v11862_v57 = vld [vmem:[%s13597_s3 + $0x6ec] ss:$16 sps:$4 sm:$0xff]  }
 0x4c4   :  { %9251 = vmatpush1.bf16.msra.mxu1 %v11698_v23  ;;  %v7376_v23 = vrot.slane %v12028_v14, %v7375_v26  ;;  %v11865_v26 = vld [vmem:[%s13597_s3 + $0x704] ss:$16 sps:$4 sm:$0xff]   ;;  %v11868_v14 = vld [vmem:[%s13597_s3 + $0x70c] ss:$16 sps:$4 sm:$0xff]  }
 0x4c5   :  { %9252 = vmatprep.subr.bf16.mxu1 %v11703_v30  ;;  %v7394_v30 = vcombine.low %v7364_v15, %v7368_v16  ;;  %v11863_v15 = vld [vmem:[%s13597_s3 + $0x700] ss:$16 sps:$4 sm:$0xff]   ;;  %v11866_v16 = vld [vmem:[%s13597_s3 + $0x708] ss:$16 sps:$4 sm:$0xff]  }
 0x4c6   :  { %v7395_v19 = vcombine.low %v7372_v17, %v7376_v23  ;;  %v11871_v17 = vld [vmem:[%s13597_s3 + $0x724] ss:$16 sps:$4 sm:$0xff]   ;;  %v11874_v23 = vld [vmem:[%s13597_s3 + $0x72c] ss:$16 sps:$4 sm:$0xff]  }
 0x4c8   :  { %9253 = vmatpush1.bf16.msra.mxu1 %v11701_v21 }
 0x4c9   :  { %9254 = vmatprep.subr.bf16.mxu1 %v11706_v46  ;;  %v7402_v46 = vrot.slane %v7394_v30, %v12448_v22  ;;  %v11869_v30 = vld [vmem:[%s13597_s3 + $0x720] ss:$16 sps:$4 sm:$0xff]  }
 0x4cc   :  { %9255 = vmatpush1.bf16.msra.mxu1 %v11704_v33  ;;  %v7409_v33 = vrot.slane %v7395_v19, %v12448_v22  ;;  %v11872_v19 = vld [vmem:[%s13597_s3 + $0x728] ss:$16 sps:$4 sm:$0xff]  }
 0x4cd   :  { %9256 = vmatprep.subr.bf16.mxu1 %v11709_v59 }
 0x4d0   :  { %9257 = vmatpush1.bf16.msra.mxu1 %v11707_v38 }
 0x4d1   :  { %9258 = vmatprep.subr.bf16.mxu1 %v11712_v53 }
 0x4d4   :  { %9259 = vmatpush1.bf16.msra.mxu1 %v11710_v5 }
 0x4d5   :  { %9260 = vmatprep.subr.bf16.mxu1 %v11715_v24  ;;  %v7323_v24 = vrot.slane %v7315_v62, %v12448_v22 }
 0x4d8   :  { %9261 = vmatpush1.bf16.msra.mxu1 %v11713_v25 }
 0x4d9   :  { %9262 = vmatprep.subr.bf16.mxu1 %v11718_v10  ;;  %v7410_v10 = vcombine.low %v7402_v46, %v7409_v33  ;;  %v11880_v46 = vld [vmem:[%s13597_s3 + $0x74c] ss:$16 sps:$4 sm:$0xff]   ;;  %v11875_v33 = vld [vmem:[%s13597_s3 + $0x740] ss:$16 sps:$4 sm:$0xff]  }
 0x4dc   :  { %9263 = vmatpush1.bf16.msra.mxu1 %v11716_v27 }
 0x4dd   :  { %9273 = vmatprep.subr.bf16.mxu1 %v11724_v28 }
 0x4df   :  { %9265 = vmatmul.mubr.bf16.vlgmr.msra.gmra.mrb[12].mxu1 %v12722_v52  ;;  %v11742_v52 = vld [vmem:[%s13597_s3 + $0x46c] ss:$16 sps:$4 sm:$0xff]  }
 0x4e0   :  { %9274 = vmatpush1.bf16.msra.mxu1 %v11722_v63 }
 0x4e1   :  { %9275 = vmatprep.subr.bf16.mxu1 %v11730_v32 }
 0x4e4   :  { %9276 = vmatpush1.bf16.msra.mxu1 %v11728_v35 }
 0x4e5   :  { %9277 = vmatprep.subr.bf16.mxu1 %v11736_v43 }
 0x4e8   :  { %9278 = vmatpush1.bf16.msra.mxu1 %v11734_v20 }
 0x4e9   :  { %9279 = vmatprep.subr.bf16.mxu1 %v11742_v52 }
 0x4ec   :  { %9280 = vmatpush1.bf16.msra.mxu1 %v11740_v45  ;;  %v11815_v45 = vld [vmem:[%s13597_s3 + $0x600] ss:$16 sps:$4 sm:$0xff]  }
 0x4ed   :  { %9281 = vmatprep.subr.bf16.mxu1 %v11748_v47 }
 0x4f0   :  { %9282 = vmatpush1.bf16.msra.mxu1 %v11746_v48  ;;  %v11826_v48 = vld [vmem:[%s13597_s3 + $0x62c] ss:$16 sps:$4 sm:$0xff]  }
 0x4f1   :  { %9283 = vmatprep.subr.bf16.mxu1 %v11754_v51  ;;  %v11821_v51 = vld [vmem:[%s13597_s3 + $0x620] ss:$16 sps:$4 sm:$0xff]  }
 0x4f4   :  { %9284 = vmatpush1.bf16.msra.mxu1 %v11752_v1  ;;  %v11824_v1 = vld [vmem:[%s13597_s3 + $0x628] ss:$16 sps:$4 sm:$0xff]  }
 0x4f5   :  { %9285 = vmatprep.subr.bf16.mxu1 %v11760_v4  ;;  %v11829_v4 = vld [vmem:[%s13597_s3 + $0x644] ss:$16 sps:$4 sm:$0xff]  }
 0x4f8   :  { %9286 = vmatpush1.bf16.msra.mxu1 %v11758_v29  ;;  %v11832_v29 = vld [vmem:[%s13597_s3 + $0x64c] ss:$16 sps:$4 sm:$0xff]  }
 0x4f9   :  { %9287 = vmatprep.subr.bf16.mxu1 %v11766_v9  ;;  %v11827_v9 = vld [vmem:[%s13597_s3 + $0x640] ss:$16 sps:$4 sm:$0xff]  }
 0x4fc   :  { %9288 = vmatpush1.bf16.msra.mxu1 %v11764_v54  ;;  %v11830_v54 = vld [vmem:[%s13597_s3 + $0x648] ss:$16 sps:$4 sm:$0xff]  }
 0x4fd   :  { %9289 = vmatprep.subr.bf16.mxu1 %v11772_v37  ;;  %v11835_v37 = vld [vmem:[%s13597_s3 + $0x664] ss:$16 sps:$4 sm:$0xff]  }
 0x500   :  { %9290 = vmatpush1.bf16.msra.mxu1 %v11770_v40  ;;  %v11838_v40 = vld [vmem:[%s13597_s3 + $0x66c] ss:$16 sps:$4 sm:$0xff]  }
 0x501   :  { %9291 = vmatprep.subr.bf16.mxu1 %v11778_v0  ;;  %v11833_v0 = vld [vmem:[%s13597_s3 + $0x660] ss:$16 sps:$4 sm:$0xff]  }
 0x504   :  { %9292 = vmatpush1.bf16.msra.mxu1 %v11776_v7  ;;  %v11836_v7 = vld [vmem:[%s13597_s3 + $0x668] ss:$16 sps:$4 sm:$0xff]  }
 0x505   :  { %9293 = vmatprep.subr.bf16.mxu1 %v11784_v34  ;;  %v11841_v34 = vld [vmem:[%s13597_s3 + $0x684] ss:$16 sps:$4 sm:$0xff]  }
 0x508   :  { %9294 = vmatpush1.bf16.msra.mxu1 %v11782_v50  ;;  %v11844_v50 = vld [vmem:[%s13597_s3 + $0x68c] ss:$16 sps:$4 sm:$0xff]  }
 0x509   :  { %9295 = vmatprep.subr.bf16.mxu1 %v11790_v49  ;;  %v11839_v49 = vld [vmem:[%s13597_s3 + $0x680] ss:$16 sps:$4 sm:$0xff]  }
 0x50c   :  { %9296 = vmatpush1.bf16.msra.mxu1 %v11788_v12  ;;  %v11842_v12 = vld [vmem:[%s13597_s3 + $0x688] ss:$16 sps:$4 sm:$0xff]  }
 0x50d   :  { %9297 = vmatprep.subr.bf16.mxu1 %v11796_v55  ;;  %v11847_v55 = vld [vmem:[%s13597_s3 + $0x6a4] ss:$16 sps:$4 sm:$0xff]  }
 0x510   :  { %9298 = vmatpush1.bf16.msra.mxu1 %v11794_v18  ;;  %v11850_v18 = vld [vmem:[%s13597_s3 + $0x6ac] ss:$16 sps:$4 sm:$0xff]  }
 0x511   :  { %9299 = vmatprep.subr.bf16.mxu1 %v11802_v58  ;;  %v11845_v58 = vld [vmem:[%s13597_s3 + $0x6a0] ss:$16 sps:$4 sm:$0xff]  }
 0x514   :  { %9300 = vmatpush1.bf16.msra.mxu1 %v11800_v61  ;;  %v11848_v61 = vld [vmem:[%s13597_s3 + $0x6a8] ss:$16 sps:$4 sm:$0xff]  }
 0x515   :  { %9301 = vmatprep.subr.bf16.mxu1 %v11808_v2  ;;  %v11853_v2 = vld [vmem:[%s13597_s3 + $0x6c4] ss:$16 sps:$4 sm:$0xff]  }
 0x518   :  { %9302 = vmatpush1.bf16.msra.mxu1 %v11806_v3  ;;  %v11856_v3 = vld [vmem:[%s13597_s3 + $0x6cc] ss:$16 sps:$4 sm:$0xff]  }
 0x519   :  { %9303 = vmatprep.subr.bf16.mxu1 %v11814_v39  ;;  %v11851_v39 = vld [vmem:[%s13597_s3 + $0x6c0] ss:$16 sps:$4 sm:$0xff]  }
 0x51c   :  { %9304 = vmatpush1.bf16.msra.mxu1 %v11812_v6  ;;  %v11854_v6 = vld [vmem:[%s13597_s3 + $0x6c8] ss:$16 sps:$4 sm:$0xff]  }
 0x51d   :  { %9314 = vmatprep.subr.bf16.mxu1 %v11820_v11  ;;  %v11859_v11 = vld [vmem:[%s13597_s3 + $0x6e4] ss:$16 sps:$4 sm:$0xff]  }
 0x532   :  { %v7283_v21 = vpop.f32.mrb[8].mxu1 }
 0x533   :  { %v7285_v59 = vpop.f32.mrb[9].mxu1 }
 0x534   :  { %v7316_v38 = vcombine.low %v7283_v21, %v7285_v59  ;;  %v7287_v53 = vpop.f32.mrb[10].mxu1  ;;  %v11877_v21 = vld [vmem:[%s13597_s3 + $0x744] ss:$16 sps:$4 sm:$0xff]   ;;  %v11878_v59 = vld [vmem:[%s13597_s3 + $0x748] ss:$16 sps:$4 sm:$0xff]  }
 0x535   :  { %v7288_v5 = vpop.f32.mrb[11].mxu1  ;;  %v11886_v53 = vld [vmem:[%s13597_s3 + $0x76c] ss:$16 sps:$4 sm:$0xff]  }
 0x536   :  { %v7330_v25 = vrot.slane %v7316_v38, %v12448_v22  ;;  %v11883_v38 = vld [vmem:[%s13597_s3 + $0x764] ss:$16 sps:$4 sm:$0xff]   ;;  %v11881_v5 = vld [vmem:[%s13597_s3 + $0x760] ss:$16 sps:$4 sm:$0xff]  }
 0x538   :  { %v7331_v27 = vcombine.low %v7323_v24, %v7330_v25  ;;  %v11884_v24 = vld [vmem:[%s13597_s3 + $0x768] ss:$16 sps:$4 sm:$0xff]   ;;  %v11889_v25 = vld [vmem:[%s13597_s3 + $0x784] ss:$16 sps:$4 sm:$0xff]  }
 0x53a   :  { %v7414_v28 = vadd.f32 %v7410_v10, %v7331_v27  ;;  %v11892_v10 = vld [vmem:[%s13597_s3 + $0x78c] ss:$16 sps:$4 sm:$0xff]   ;;  %v11887_v27 = vld [vmem:[%s13597_s3 + $0x780] ss:$16 sps:$4 sm:$0xff]  }
 0x53c   :  { %v7416_v63 = vmax.f32 %v7414_v28, 0.0  ;;  %v11890_v28 = vld [vmem:[%s13597_s3 + $0x788] ss:$16 sps:$4 sm:$0xff]  }
 0x53e   :  { %v7443_v32 = vrot.slane %v7416_v63, %v12448_v22  ;;  %v7436_v35 = vcombine.high %v7416_v63, %v7416_v63  ;;  %v11895_v63 = vld [vmem:[%s13597_s3 + $0x7a4] ss:$16 sps:$4 sm:$0xff]  }
 0x540   :  { %v7451_v43 = vcombine.high %v7443_v32, %v7443_v32  ;;  %v13130_v20 = vrot.slane %v7436_v35, %v12448_v22  ;;  %v7465_v62 = vpack.c.bf16 %v7443_v32, %v7443_v32  ;;  %v11823_v22 = vld [vmem:[%s13597_s3 + $0x624] ss:$16 sps:$4 sm:$0xff]   ;;  %v11898_v32 = vld [vmem:[%s13597_s3 + $0x7ac] ss:$16 sps:$4 sm:$0xff]   ;;  %v11893_v35 = vld [vmem:[%s13597_s3 + $0x7a0] ss:$16 sps:$4 sm:$0xff]  }
 0x542   :  { %v7466_v52 = vpack.c.bf16 %v7451_v43, %v7451_v43  ;;  %v7452_v60 = vcombine.high %v13130_v20, %v13130_v20  ;;  %v11896_v43 = vld [vmem:[%s13597_s3 + $0x7a8] ss:$16 sps:$4 sm:$0xff]  }
 0x544   :  { %9141 = vmatprep.mubr.bf16.mxu0 %v7466_v52  ;;  %9305 = vmatprep.mubr.bf16.mxu1 %v7466_v52  ;;  %v7468_v47 = vpack.c.bf16 %v7452_v60, %v7452_v60  ;;  %v11901_v52 = vld [vmem:[%s13597_s3 + $0x7c4] ss:$16 sps:$4 sm:$0xff]   ;;  %v11902_v60 = vld [vmem:[%s13597_s3 + $0x7c8] ss:$16 sps:$4 sm:$0xff]  }
 0x545   :  { %9142 = vmatmul.mubr.bf16.vlgmr.msra.gmra.mrb[8].mxu0 %v7465_v62  ;;  %9306 = vmatmul.mubr.bf16.vlgmr.msra.gmra.mrb[12].mxu1 %v7465_v62  ;;  %v11907_v62 = vld [vmem:[%s13597_s3 + $0x7e4] ss:$16 sps:$4 sm:$0xff]  }
 0x546   :  { %9151 = vmatpush1.bf16.msra.mxu0 %v11815_v45  ;;  %9315 = vmatpush1.bf16.msra.mxu1 %v11818_v56  ;;  %v11904_v45 = vld [vmem:[%s13597_s3 + $0x7cc] ss:$16 sps:$4 sm:$0xff]   ;;  %v11899_v56 = vld [vmem:[%s13597_s3 + $0x7c0] ss:$16 sps:$4 sm:$0xff]  }
 0x547   :  { %9182 = vmatprep.mubr.bf16.mxu0 %v7468_v47  ;;  %9346 = vmatprep.mubr.bf16.mxu1 %v7468_v47  ;;  %v11910_v47 = vld [vmem:[%s13597_s3 + $0x7ec] ss:$16 sps:$4 sm:$0xff]  }
 0x548   :  { %9152 = vmatprep.subr.bf16.mxu0 %v11823_v22  ;;  %9316 = vmatprep.subr.bf16.mxu1 %v11826_v48  ;;  %v11905_v22 = vld [vmem:[%s13597_s3 + $0x7e0] ss:$16 sps:$4 sm:$0xff]   ;;  %v11908_v48 = vld [vmem:[%s13597_s3 + $0x7e8] ss:$16 sps:$4 sm:$0xff]  }
 0x54a   :  { %9153 = vmatpush1.bf16.msra.mxu0 %v11821_v51  ;;  %9317 = vmatpush1.bf16.msra.mxu1 %v11824_v1  ;;  %v11913_v51 = vld [vmem:[%s13599_s5 + $0x4] ss:$8 sps:$4 sm:$0xff]   ;;  %v11911_v1 = vld [vmem:[%s13599_s5] ss:$8 sps:$4 sm:$0xff]  }
 0x54b   :  { %9154 = vmatprep.subr.bf16.mxu0 %v11829_v4  ;;  %9318 = vmatprep.subr.bf16.mxu1 %v11832_v29  ;;  %v7467_v4 = vpack.c.bf16 %v13130_v20, %v13130_v20  ;;  %v11916_v29 = vld [vmem:[%s13599_s5 + $0x14] ss:$8 sps:$4 sm:$0xff]   ;;  %v11917_v20 = vld [vmem:[%s13599_s5 + $0x20] ss:$8 sps:$4 sm:$0xff]  }
 0x54e   :  { %9155 = vmatpush1.bf16.msra.mxu0 %v11827_v9  ;;  %9319 = vmatpush1.bf16.msra.mxu1 %v11830_v54  ;;  %v11914_v9 = vld [vmem:[%s13599_s5 + $0x10] ss:$8 sps:$4 sm:$0xff]   ;;  %v11919_v54 = vld [vmem:[%s13599_s5 + $0x24] ss:$8 sps:$4 sm:$0xff]  }
 0x54f   :  { %9156 = vmatprep.subr.bf16.mxu0 %v11835_v37  ;;  %9320 = vmatprep.subr.bf16.mxu1 %v11838_v40  ;;  %v11922_v37 = vld [vmem:[%s13599_s5 + $0x34] ss:$8 sps:$4 sm:$0xff]   ;;  %v11920_v40 = vld [vmem:[%s13599_s5 + $0x30] ss:$8 sps:$4 sm:$0xff]  }
 0x552   :  { %9157 = vmatpush1.bf16.msra.mxu0 %v11833_v0  ;;  %9321 = vmatpush1.bf16.msra.mxu1 %v11836_v7  ;;  %v11925_v0 = vld [vmem:[%s13599_s5 + $0x44] ss:$8 sps:$4 sm:$0xff]   ;;  %v11923_v7 = vld [vmem:[%s13599_s5 + $0x40] ss:$8 sps:$4 sm:$0xff]  }
 0x553   :  { %9158 = vmatprep.subr.bf16.mxu0 %v11841_v34  ;;  %9322 = vmatprep.subr.bf16.mxu1 %v11844_v50  ;;  %v11928_v34 = vld [vmem:[%s13599_s5 + $0x54] ss:$8 sps:$4 sm:$0xff]   ;;  %v11926_v50 = vld [vmem:[%s13599_s5 + $0x50] ss:$8 sps:$4 sm:$0xff]  }
 0x556   :  { %9159 = vmatpush1.bf16.msra.mxu0 %v11839_v49  ;;  %9323 = vmatpush1.bf16.msra.mxu1 %v11842_v12  ;;  %v11931_v49 = vld [vmem:[%s13599_s5 + $0x64] ss:$8 sps:$4 sm:$0xff]   ;;  %v11929_v12 = vld [vmem:[%s13599_s5 + $0x60] ss:$8 sps:$4 sm:$0xff]  }
 0x557   :  { %9160 = vmatprep.subr.bf16.mxu0 %v11847_v55  ;;  %9324 = vmatprep.subr.bf16.mxu1 %v11850_v18  ;;  %v11934_v55 = vld [vmem:[%s13599_s5 + $0x74] ss:$8 sps:$4 sm:$0xff]   ;;  %v11932_v18 = vld [vmem:[%s13599_s5 + $0x70] ss:$8 sps:$4 sm:$0xff]  }
 0x55a   :  { %9161 = vmatpush1.bf16.msra.mxu0 %v11845_v58  ;;  %9325 = vmatpush1.bf16.msra.mxu1 %v11848_v61  ;;  %v11937_v58 = vld [vmem:[%s13599_s5 + $0x84] ss:$8 sps:$4 sm:$0xff]   ;;  %v11935_v61 = vld [vmem:[%s13599_s5 + $0x80] ss:$8 sps:$4 sm:$0xff]  }
 0x55b   :  { %9162 = vmatprep.subr.bf16.mxu0 %v11853_v2  ;;  %9326 = vmatprep.subr.bf16.mxu1 %v11856_v3  ;;  %v11940_v2 = vld [vmem:[%s13599_s5 + $0x94] ss:$8 sps:$4 sm:$0xff]   ;;  %v11938_v3 = vld [vmem:[%s13599_s5 + $0x90] ss:$8 sps:$4 sm:$0xff]  }
 0x55e   :  { %9163 = vmatpush1.bf16.msra.mxu0 %v11851_v39  ;;  %9327 = vmatpush1.bf16.msra.mxu1 %v11854_v6  ;;  %v11943_v39 = vld [vmem:[%s13599_s5 + $0xa4] ss:$8 sps:$4 sm:$0xff]   ;;  %v11941_v6 = vld [vmem:[%s13599_s5 + $0xa0] ss:$8 sps:$4 sm:$0xff]  }
 0x55f   :  { %9164 = vmatprep.subr.bf16.mxu0 %v11859_v11  ;;  %9328 = vmatprep.subr.bf16.mxu1 %v11862_v57  ;;  %v11946_v11 = vld [vmem:[%s13599_s5 + $0xb4] ss:$8 sps:$4 sm:$0xff]   ;;  %v11944_v57 = vld [vmem:[%s13599_s5 + $0xb0] ss:$8 sps:$4 sm:$0xff]  }
 0x562   :  { %9165 = vmatpush1.bf16.msra.mxu0 %v11857_v31  ;;  %9329 = vmatpush1.bf16.msra.mxu1 %v11860_v8  ;;  %v11949_v31 = vld [vmem:[%s13599_s5 + $0xc4] ss:$8 sps:$4 sm:$0xff]   ;;  %v11947_v8 = vld [vmem:[%s13599_s5 + $0xc0] ss:$8 sps:$4 sm:$0xff]  }
 0x563   :  { %9166 = vmatprep.subr.bf16.mxu0 %v11865_v26  ;;  %9330 = vmatprep.subr.bf16.mxu1 %v11868_v14  ;;  %v11952_v26 = vld [vmem:[%s13599_s5 + $0xd4] ss:$8 sps:$4 sm:$0xff]   ;;  %v11950_v14 = vld [vmem:[%s13599_s5 + $0xd0] ss:$8 sps:$4 sm:$0xff]  }
 0x566   :  { %9167 = vmatpush1.bf16.msra.mxu0 %v11863_v15  ;;  %9331 = vmatpush1.bf16.msra.mxu1 %v11866_v16  ;;  %v11955_v15 = vld [vmem:[%s13599_s5 + $0xe4] ss:$8 sps:$4 sm:$0xff]   ;;  %v11953_v16 = vld [vmem:[%s13599_s5 + $0xe0] ss:$8 sps:$4 sm:$0xff]  }
 0x567   :  { %9168 = vmatprep.subr.bf16.mxu0 %v11871_v17  ;;  %9332 = vmatprep.subr.bf16.mxu1 %v11874_v23  ;;  %v11958_v17 = vld [vmem:[%s13599_s5 + $0xf4] ss:$8 sps:$4 sm:$0xff]   ;;  %v11956_v23 = vld [vmem:[%s13599_s5 + $0xf0] ss:$8 sps:$4 sm:$0xff]  }
 0x56a   :  { %9169 = vmatpush1.bf16.msra.mxu0 %v11869_v30  ;;  %9333 = vmatpush1.bf16.msra.mxu1 %v11872_v19  ;;  %v11961_v30 = vld [vmem:[%s13599_s5 + $0x104] ss:$8 sps:$4 sm:$0xff]  }
 0x56b   :  { %9170 = vmatprep.subr.bf16.mxu0 %v11877_v21  ;;  %9334 = vmatprep.subr.bf16.mxu1 %v11880_v46  ;;  %v12007_v19 = vld [vmem:[%s13601_s7 + $0x40] sm:$0xff]   ;;  %v12009_v46 = vld [vmem:[%s13601_s7 + $0x48] sm:$0xff]  }
 0x56c   :  { %v12008_v21 = vld [vmem:[%s13601_s7] sm:$0xff]  }
 0x56e   :  { %9171 = vmatpush1.bf16.msra.mxu0 %v11875_v33  ;;  %9335 = vmatpush1.bf16.msra.mxu1 %v11878_v59  ;;  %v12010_v33 = vld [vmem:[%s13601_s7 + $0x8] sm:$0xff]   ;;  %v12011_v59 = vld [vmem:[%s13601_s7 + $0x50] sm:$0xff]  }
 0x56f   :  { %9172 = vmatprep.subr.bf16.mxu0 %v11883_v38  ;;  %9336 = vmatprep.subr.bf16.mxu1 %v11886_v53  ;;  %v12012_v38 = vld [vmem:[%s13601_s7 + $0x10] sm:$0xff]   ;;  %v12013_v53 = vld [vmem:[%s13601_s7 + $0x58] sm:$0xff]  }
 0x572   :  { %9173 = vmatpush1.bf16.msra.mxu0 %v11881_v5  ;;  %9337 = vmatpush1.bf16.msra.mxu1 %v11884_v24  ;;  %v12014_v5 = vld [vmem:[%s13601_s7 + $0x18] sm:$0xff]   ;;  %v12015_v24 = vld [vmem:[%s13601_s7 + $0x60] sm:$0xff]  }
 0x573   :  { %9174 = vmatprep.subr.bf16.mxu0 %v11889_v25  ;;  %9338 = vmatprep.subr.bf16.mxu1 %v11892_v10  ;;  %v12016_v25 = vld [vmem:[%s13601_s7 + $0x20] sm:$0xff]   ;;  %v12017_v10 = vld [vmem:[%s13601_s7 + $0x68] sm:$0xff]  }
 0x576   :  { %9175 = vmatpush1.bf16.msra.mxu0 %v11887_v27  ;;  %9339 = vmatpush1.bf16.msra.mxu1 %v11890_v28  ;;  %v12018_v27 = vld [vmem:[%s13601_s7 + $0x28] sm:$0xff]  }
 0x577   :  { %9176 = vmatprep.subr.bf16.mxu0 %v11895_v63  ;;  %9340 = vmatprep.subr.bf16.mxu1 %v11898_v32  ;;  %v13457_v28 = vld [vmem:[#allocation8] sm:$0xf] }
 0x578   :  { %v7730_v63 = vrot.slane %v13457_v28, %v12466_v36  ;;  %v7734_v32 = vrot.slane %v13457_v28, %v12469_v13 }
 0x57a   :  { %9177 = vmatpush1.bf16.msra.mxu0 %v11893_v35  ;;  %9341 = vmatpush1.bf16.msra.mxu1 %v11896_v43  ;;  %v7742_v35 = vrot.slane %v13457_v28, %v7359_v42  ;;  %v11959_v42 = vld [vmem:[%s13599_s5 + $0x100] ss:$8 sps:$4 sm:$0xff]  }
 0x57b   :  { %9178 = vmatprep.subr.bf16.mxu0 %v11901_v52  ;;  %9342 = vmatprep.subr.bf16.mxu1 %v11904_v45 }
 0x57e   :  { %9179 = vmatpush1.bf16.msra.mxu0 %v11899_v56  ;;  %9343 = vmatpush1.bf16.msra.mxu1 %v11902_v60 }
 0x57f   :  { %9180 = vmatprep.subr.bf16.mxu0 %v11907_v62  ;;  %9344 = vmatprep.subr.bf16.mxu1 %v11910_v47 }
 0x582   :  { %9181 = vmatpush1.bf16.msra.mxu0 %v11905_v22  ;;  %9345 = vmatpush1.bf16.msra.mxu1 %v11908_v48 }
 0x583   :  { %9759 = vmatprep.subr.bf16.mxu0 %v11913_v51  ;;  %11348 = vmatprep.subr.bf16.mxu1 %v12007_v19  ;;  %v7738_v19 = vrot.slane %v13457_v28, %v7355_v41 }
 0x585   :  { %9183 = vmatmul.mubr.bf16.vlgmr.msra.gmra.mrb[8].mxu0 %v7467_v4  ;;  %9347 = vmatmul.mubr.bf16.vlgmr.msra.gmra.mrb[12].mxu1 %v7467_v4 }
 0x586   :  { %9760 = vmatpush1.bf16.msra.mxu0 %v11911_v1  ;;  %11349 = vmatpush3.bf16.msra.mxu1 %v12008_v21  ;;  %v12003_v21 = vld [vmem:[%s13599_s5 + $0x1e4] ss:$8 sps:$4 sm:$0xff]  }
 0x587   :  { %9761 = vmatprep.subr.bf16.mxu0 %v11916_v29  ;;  %11350 = vmatprep.subr.bf16.mxu1 %v12009_v46  ;;  %v12001_v46 = vld [vmem:[%s13599_s5 + $0x1e0] ss:$8 sps:$4 sm:$0xff]  }
 0x58a   :  { %9762 = vmatpush1.bf16.msra.mxu0 %v11914_v9  ;;  %11351 = vmatpush3.bf16.msra.mxu1 %v12010_v33 }
 0x58b   :  { %9763 = vmatprep.subr.bf16.mxu0 %v11919_v54  ;;  %11352 = vmatprep.subr.bf16.mxu1 %v12011_v59  ;;  %v12006_v59 = vld [vmem:[%s13599_s5 + $0x1f4] ss:$8 sps:$4 sm:$0xff]  }
 0x58e   :  { %9764 = vmatpush1.bf16.msra.mxu0 %v11917_v20  ;;  %11353 = vmatpush3.bf16.msra.mxu1 %v12012_v38 }
 0x58f   :  { %9765 = vmatprep.subr.bf16.mxu0 %v11922_v37  ;;  %11354 = vmatprep.subr.bf16.mxu1 %v12013_v53  ;;  %v11964_v37 = vld [vmem:[%s13599_s5 + $0x114] ss:$8 sps:$4 sm:$0xff]  }
 0x590   :  { %v12019_v53 = vld [vmem:[%s13601_s7 + $0x70] sm:$0xff]  }
 0x592   :  { %9766 = vmatpush1.bf16.msra.mxu0 %v11920_v40  ;;  %11355 = vmatpush3.bf16.msra.mxu1 %v12014_v5  ;;  %v12020_v5 = vld [vmem:[%s13601_s7 + $0x30] sm:$0xff]  }
 0x593   :  { %9767 = vmatprep.subr.bf16.mxu0 %v11925_v0  ;;  %11356 = vmatprep.subr.bf16.mxu1 %v12015_v24  ;;  %v11962_v0 = vld [vmem:[%s13599_s5 + $0x110] ss:$8 sps:$4 sm:$0xff]  }
 0x594   :  { %v12021_v24 = vld [vmem:[%s13601_s7 + $0x78] sm:$0xff]  }
 0x596   :  { %9768 = vmatpush1.bf16.msra.mxu0 %v11923_v7  ;;  %11357 = vmatpush3.bf16.msra.mxu1 %v12016_v25  ;;  %v11967_v7 = vld [vmem:[%s13599_s5 + $0x124] ss:$8 sps:$4 sm:$0xff]   ;;  %v12022_v25 = vld [vmem:[%s13601_s7 + $0x38] sm:$0xff]   ;;  %s12180_s7 = smov [#allocation12]  }
 0x597   :  { %9769 = vmatprep.subr.bf16.mxu0 %v11928_v34  ;;  %11358 = vmatprep.subr.bf16.mxu1 %v12017_v10  ;;  %v11965_v34 = vld [vmem:[%s13599_s5 + $0x120] ss:$8 sps:$4 sm:$0xff]   ;;  %v9427_v10 = vld [vmem:[#allocation9] sm:$0x3]  ;;  %s10040_s12 = sshll.u32 %s12180_s7, 4  ;;  %s10041_s12 = int_to_ptr.vmem [resolvable:$true] %s10040_s12 }
 0x598   :  { %v9436_v28 = vrot.slane %v9427_v10, %v12469_v13  ;;  %s12140_s22 = scalar_lea.vmem %s10041_s12, 32  ;;  %p12145_p13 = scmp.lt.s32.totalorder %s10041_s12, %s10041_s12 }
 0x599   :  { %p12141_p12 = scmp.ne.s32.totalorder %s10041_s12, %s12140_s22  ;;  %p12146_p0 = scmp.lt.s32.totalorder %s12140_s22, %s12140_s22 }
 0x59a   :  { %9770 = vmatpush1.bf16.msra.mxu0 %v11926_v50  ;;  %11359 = vmatpush3.bf16.msra.mxu1 %v12018_v27  ;;  %v11970_v50 = vld [vmem:[%s13599_s5 + $0x134] ss:$8 sps:$4 sm:$0xff]   ;;  %v9432_v27 = vrot.slane %v9427_v10, %v12466_v36 }
 0x59b   :  { %9771 = vmatprep.subr.bf16.mxu0 %v11931_v49  ;;  %v11968_v49 = vld [vmem:[%s13599_s5 + $0x130] ss:$8 sps:$4 sm:$0xff]   ;;  %11360 = vmatprep.subr.bf16.mxu1 %v12019_v53  ;;  %p12147_p1 = por %p12146_p0, %p12145_p13 }
 0x59d   :  { %p12148_p2 = pnand %p12147_p1, %p12141_p12 }
 0x59e   :  { %9772 = vmatpush1.bf16.msra.mxu0 %v11929_v12  ;;  %v11973_v12 = vld [vmem:[%s13599_s5 + $0x144] ss:$8 sps:$4 sm:$0xff]   ;;  %11361 = vmatpush3.bf16.msra.mxu1 %v12020_v5 }
 0x59f   :  { %9773 = vmatprep.subr.bf16.mxu0 %v11934_v55  ;;  %v11971_v55 = vld [vmem:[%s13599_s5 + $0x140] ss:$8 sps:$4 sm:$0xff]   ;;  %11362 = vmatprep.subr.bf16.mxu1 %v12021_v24 }
 0x5a2   :  { %9774 = vmatpush1.bf16.msra.mxu0 %v11932_v18  ;;  %v11976_v18 = vld [vmem:[%s13599_s5 + $0x154] ss:$8 sps:$4 sm:$0xff]   ;;  %11363 = vmatpush3.bf16.msra.mxu1 %v12022_v25 }
 0x5a3   :  { %9775 = vmatprep.subr.bf16.mxu0 %v11937_v58  ;;  %v11974_v58 = vld [vmem:[%s13599_s5 + $0x150] ss:$8 sps:$4 sm:$0xff]  }
 0x5a6   :  { %9776 = vmatpush1.bf16.msra.mxu0 %v11935_v61  ;;  %v11979_v61 = vld [vmem:[%s13599_s5 + $0x164] ss:$8 sps:$4 sm:$0xff]  }
 0x5a7   :  { %9777 = vmatprep.subr.bf16.mxu0 %v11940_v2  ;;  %v11977_v2 = vld [vmem:[%s13599_s5 + $0x160] ss:$8 sps:$4 sm:$0xff]  }
 0x5aa   :  { %9778 = vmatpush1.bf16.msra.mxu0 %v11938_v3  ;;  %v11982_v3 = vld [vmem:[%s13599_s5 + $0x174] ss:$8 sps:$4 sm:$0xff]  }
 0x5ab   :  { %9779 = vmatprep.subr.bf16.mxu0 %v11943_v39  ;;  %v11980_v39 = vld [vmem:[%s13599_s5 + $0x170] ss:$8 sps:$4 sm:$0xff]  }
 0x5ae   :  { %9780 = vmatpush1.bf16.msra.mxu0 %v11941_v6  ;;  %v11985_v6 = vld [vmem:[%s13599_s5 + $0x184] ss:$8 sps:$4 sm:$0xff]  }
 0x5af   :  { %9781 = vmatprep.subr.bf16.mxu0 %v11946_v11  ;;  %v11983_v11 = vld [vmem:[%s13599_s5 + $0x180] ss:$8 sps:$4 sm:$0xff]  }
 0x5b2   :  { %9782 = vmatpush1.bf16.msra.mxu0 %v11944_v57  ;;  %v11988_v57 = vld [vmem:[%s13599_s5 + $0x194] ss:$8 sps:$4 sm:$0xff]  }
 0x5b3   :  { %9783 = vmatprep.subr.bf16.mxu0 %v11949_v31  ;;  %v11986_v31 = vld [vmem:[%s13599_s5 + $0x190] ss:$8 sps:$4 sm:$0xff]  }
 0x5b6   :  { %9784 = vmatpush1.bf16.msra.mxu0 %v11947_v8  ;;  %v11991_v8 = vld [vmem:[%s13599_s5 + $0x1a4] ss:$8 sps:$4 sm:$0xff]  }
 0x5b7   :  { %9785 = vmatprep.subr.bf16.mxu0 %v11952_v26  ;;  %v11989_v26 = vld [vmem:[%s13599_s5 + $0x1a0] ss:$8 sps:$4 sm:$0xff]  }
 0x5ba   :  { %9786 = vmatpush1.bf16.msra.mxu0 %v11950_v14  ;;  %v11994_v14 = vld [vmem:[%s13599_s5 + $0x1b4] ss:$8 sps:$4 sm:$0xff]  }
 0x5bb   :  { %9787 = vmatprep.subr.bf16.mxu0 %v11955_v15  ;;  %v11992_v15 = vld [vmem:[%s13599_s5 + $0x1b0] ss:$8 sps:$4 sm:$0xff]  }
 0x5be   :  { %9788 = vmatpush1.bf16.msra.mxu0 %v11953_v16  ;;  %v11997_v16 = vld [vmem:[%s13599_s5 + $0x1c4] ss:$8 sps:$4 sm:$0xff]  }
 0x5bf   :  { %9789 = vmatprep.subr.bf16.mxu0 %v11958_v17  ;;  %v11995_v17 = vld [vmem:[%s13599_s5 + $0x1c0] ss:$8 sps:$4 sm:$0xff]  }
 0x5c2   :  { %9790 = vmatpush1.bf16.msra.mxu0 %v11956_v23  ;;  %v12000_v23 = vld [vmem:[%s13599_s5 + $0x1d4] ss:$8 sps:$4 sm:$0xff]  }
 0x5c3   :  { %9800 = vmatprep.subr.bf16.mxu0 %v11961_v30  ;;  %v11998_v30 = vld [vmem:[%s13599_s5 + $0x1d0] ss:$8 sps:$4 sm:$0xff]  }
 0x658   :  { %v9184_v43 = vpop.f32.mrb[8].mxu0  ;;  %v13466_v52 = vpop.f32.mrb[12].mxu1 }
 0x659   :  { %v11372_v45 = vadd.f32 %v9184_v43, %v7730_v63  ;;  %v9186_v56 = vpop.f32.mrb[9].mxu0  ;;  %v9350_v60 = vpop.f32.mrb[13].mxu1  ;;  %v11374_v33 = vadd.f32 %v13466_v52, %v7738_v19 }
 0x65a   :  { %v11373_v62 = vadd.f32 %v9186_v56, %v7734_v32  ;;  %v11375_v47 = vadd.f32 %v9350_v60, %v7742_v35  ;;  %v9188_v22 = vpop.f32.mrb[10].mxu0  ;;  %v9352_v48 = vpop.f32.mrb[14].mxu1 }
 0x65b   :  { %v9355_v51 = vmax.f32 %v11372_v45, 0.0  ;;  %v9189_v1 = vpop.f32.mrb[11].mxu0  ;;  %v9353_v4 = vpop.f32.mrb[15].mxu1  ;;  %v9357_v41 = vmax.f32 %v11374_v33, 0.0 }
 0x65c   :  { %v9356_v29 = vmax.f32 %v11373_v62, 0.0  ;;  %v9358_v9 = vmax.f32 %v11375_v47, 0.0 }
 0x65d   :  { %v9359_v20 = vpack.c.bf16 %v9355_v51, %v9355_v51  ;;  %v9361_v38 = vpack.c.bf16 %v9357_v41, %v9357_v41  ;;  %v11331_v51 = vld [vmem:[#allocation11] ss:$0 sm:$0xff] }
 0x65e   :  { %v9360_v54 = vpack.c.bf16 %v9356_v29, %v9356_v29  ;;  %v9362_v40 = vpack.c.bf16 %v9358_v9, %v9358_v9 }
 0x660   :  { %9791 = vmatprep.mubr.bf16.mxu0 %v9360_v54 }
 0x661   :  { %9792 = vmatmul.mubr.bf16.vlgmr.msra.gmra.mrb[12].mxu0 %v9359_v20 }
 0x662   :  { %9801 = vmatpush1.bf16.msra.mxu0 %v11959_v42  ;;  %9832 = vmatprep.mubr.bf16.mxu0 %v9362_v40 }
 0x663   :  { %9802 = vmatprep.subr.bf16.mxu0 %v11964_v37 }
 0x666   :  { %9803 = vmatpush1.bf16.msra.mxu0 %v11962_v0 }
 0x667   :  { %9804 = vmatprep.subr.bf16.mxu0 %v11967_v7 }
 0x66a   :  { %9805 = vmatpush1.bf16.msra.mxu0 %v11965_v34 }
 0x66b   :  { %9806 = vmatprep.subr.bf16.mxu0 %v11970_v50 }
 0x66e   :  { %9807 = vmatpush1.bf16.msra.mxu0 %v11968_v49 }
 0x66f   :  { %9808 = vmatprep.subr.bf16.mxu0 %v11973_v12 }
 0x672   :  { %9809 = vmatpush1.bf16.msra.mxu0 %v11971_v55 }
 0x673   :  { %9810 = vmatprep.subr.bf16.mxu0 %v11976_v18 }
 0x676   :  { %9811 = vmatpush1.bf16.msra.mxu0 %v11974_v58 }
 0x677   :  { %9812 = vmatprep.subr.bf16.mxu0 %v11979_v61 }
 0x67a   :  { %9813 = vmatpush1.bf16.msra.mxu0 %v11977_v2 }
 0x67b   :  { %9814 = vmatprep.subr.bf16.mxu0 %v11982_v3 }
 0x67e   :  { %9815 = vmatpush1.bf16.msra.mxu0 %v11980_v39 }
 0x67f   :  { %9816 = vmatprep.subr.bf16.mxu0 %v11985_v6 }
 0x682   :  { %9817 = vmatpush1.bf16.msra.mxu0 %v11983_v11 }
 0x683   :  { %9818 = vmatprep.subr.bf16.mxu0 %v11988_v57 }
 0x686   :  { %9819 = vmatpush1.bf16.msra.mxu0 %v11986_v31 }
 0x687   :  { %9820 = vmatprep.subr.bf16.mxu0 %v11991_v8 }
 0x68a   :  { %9821 = vmatpush1.bf16.msra.mxu0 %v11989_v26 }
 0x68b   :  { %9822 = vmatprep.subr.bf16.mxu0 %v11994_v14 }
 0x68e   :  { %9823 = vmatpush1.bf16.msra.mxu0 %v11992_v15 }
 0x68f   :  { %9824 = vmatprep.subr.bf16.mxu0 %v11997_v16 }
 0x692   :  { %9825 = vmatpush1.bf16.msra.mxu0 %v11995_v17 }
 0x693   :  { %9826 = vmatprep.subr.bf16.mxu0 %v12000_v23 }
 0x696   :  { %9827 = vmatpush1.bf16.msra.mxu0 %v11998_v30 }
 0x697   :  { %9828 = vmatprep.subr.bf16.mxu0 %v12003_v21 }
 0x69a   :  { %9829 = vmatpush1.bf16.msra.mxu0 %v12001_v46 }
 0x69b   :  { %9830 = vmatprep.subr.bf16.mxu0 %v12006_v59 }
 0x69e   :  { %9831 = vmatpush1.bf16.msra.mxu0 %v12004_v44 }
 0x6a1   :  { %9833 = vmatmul.mubr.bf16.vlgmr.msra.gmra.mrb[12].mxu0 %v9361_v38 }
 0x774   :  { %v9834_v63 = vpop.f32.mrb[12].mxu0 }
 0x775   :  { %v11376_v32 = vadd.f32 %v9834_v63, %v9432_v27  ;;  %v9836_v35 = vpop.f32.mrb[13].mxu0 }
 0x776   :  { %v11377_v43 = vadd.f32 %v9836_v35, %v9436_v28  ;;  %v9838_v52 = vpop.f32.mrb[14].mxu0 }
 0x777   :  { %v9841_v45 = vmax.f32 %v11376_v32, 0.0  ;;  %v9839_v56 = vpop.f32.mrb[15].mxu0 }
 0x778   :  { %v9842_v60 = vmax.f32 %v11377_v43, 0.0 }
 0x779   :  { %v9843_v47 = vpack.c.bf16 %v9841_v45, %v9841_v45 }
 0x77a   :  { %v9844_v62 = vpack.c.bf16 %v9842_v60, %v9842_v60 }
 0x77c   :  { %10012 = vmatprep.mubr.bf16.mxu1 %v9844_v62 }
 0x77d   :  { %10013 = vmatmul.mubr.bf16.vlgmr.msra.gmra.mrb[16].mxu1 %v9843_v47 }
 0x850   :  { %v11364_v22 = vpop.f32.mrb[16].mxu1 }
 0x851   :  { %v11365_v48 = vpop.f32.mrb[17].mxu1 }
 0x852   :  { %v11366_v1 = vadd.f32 %v11365_v48, %v11364_v22  ;;  %v11367_v4 = vpop.f32.mrb[18].mxu1 }
 0x853   :  { %v11368_v36 = vpop.f32.mrb[19].mxu1 }
 0x854   :  { %v10015_v13 = vadd.f32 %v11366_v1, %v11331_v51 }
 0x856   :  { %v10021_v29 = vsel %vm10020_vm0, %v10015_v13, -inf }
 0x857   :  { %10022 = vmax.xlane.f32.xlu0 %v10021_v29 }
 0x8e4   :  { %v10023_v9 = vpop.xlane.xlu0 %10022 }
 0x8e5   :  { %v10024_v54 = vsub.f32 %v10015_v13, %v10023_v9 }
 0x8e7   :  { %v10025_v42 = vmul.f32 1.442695, %v10024_v54 }
 0x8e9   :  { %12023 = vpow2.f32 %v10025_v42 }
 0x8f3   :  { %v12024_v20 = vpop.eup %12023 }
 0x8f4   :  { %v10027_v37 = vsel %vm10020_vm0, %v12024_v20, 0.0 }
 0x8f5   :  { %10028 = vadd.xlane.f32.xlu0 %v10027_v37 }
 0x982   :  { %v10029_v40 = vpop.xlane.xlu0 %10028 }
 0x983   :  { %12025 = vlog2.f32 %v10029_v40 }
 0x98d   :  { %v12026_v0 = vpop.eup %12025 }
 0x98e   :  { %v10031_v7 = vmul.f32 0.6931472, %v12026_v0 }
 0x990   :  { %v10032_v34 = vsub.f32 %v10024_v54, %v10031_v7 }
 0x992   :  { %10033 = vst.msk [vmem:[#allocation12] sm:$0x3] %vm10020_vm0, %v10032_v34 }
 0x993   :  { %12151 = shalt.err (!%p12148_p2)
}
 0x994   :  { %s12152_s8 = scalar_lea.hbm %s13603_s9, 32 }
 0x995   :  { %p12153_p3 = scmp.ne.s32.totalorder %s13603_s9, %s12152_s8  ;;  %p12156_p4 = scmp.lt.u32.totalorder %s12152_s8, %s13603_s9 }
 0x997   :  { %p12158_p5 = pnand %p12156_p4, %p12153_p3 }
 0x999   :  { %12161 = shalt.err (!%p12158_p5)
}
 0x99a   :  { %10043 = dma.vmem_to_hbm [thread:$0]  %s10041_s12, 32, %s13603_s9, [#allocation5]  }
 0x99b   :  { %12168 = dma.done.wait [#allocation5], 32  }
 0x99c   :  { %12169 = vsyncadd [#allocation5], 4294967264 }
 0x99d   :  { %10047 = vsyncpa [#allocation4], 1 }
 0x99e   :  { %10048 = vsyncpa [#allocation7], 1 }
 0x99f   :  { %10049 = vsyncpa [#allocation10], 1 }
 0x9a0   :  { %10050 = vsyncpa [#allocation5], 1 }

</bundles_post_ra>
